<compile_context>
chip_gen: v7x
topology: tpu7x:2x2x1
jax: 0.10.0
libtpu: 0.0.40
codegen_flags: <defaults>
</compile_context>

<pallas_src>
import functools

import jax
import jax.numpy as jnp
import numpy as np
from jax.experimental import pallas as pl
from jax.experimental.pallas import tpu as pltpu

CONV_COUT = (6, 16, 32, 64)
KSIZE = 4
STRIDE = 2


def _full_spec(shape):
    zeros = (0,) * len(shape)
    return pl.BlockSpec(shape, lambda i: zeros)


# ----------------------------- Pallas kernels -----------------------------

def _gemm_bias_relu_kernel(x_ref, w_ref, b_ref, o_ref):
    """(M, K)bf16 @ (K, N)bf16 + bias(f32), ReLU -> bf16 (unpadded K and N)."""
    y = jnp.dot(x_ref[...], w_ref[...], preferred_element_type=jnp.float32)
    o_ref[...] = jnp.maximum(y + b_ref[...], 0.0).astype(o_ref.dtype)


def conv_gemm_bias_relu(p, w, b):
    """Single-block GEMM+bias+ReLU (whole problem fits VMEM comfortably)."""
    M, K = p.shape
    N = w.shape[1]
    return pl.pallas_call(
        _gemm_bias_relu_kernel,
        out_shape=jax.ShapeDtypeStruct((M, N), jnp.bfloat16),
        grid=(1,),
        in_specs=[_full_spec((M, K)), _full_spec((K, N)), _full_spec((1, N))],
        out_specs=_full_spec((M, N)),
        compiler_params=pltpu.CompilerParams(
            dimension_semantics=("arbitrary",)),
    )(p, w, b)


def _tail_kernel(p2_ref, w2_ref, b2_ref, g_ref, w3_ref, b3_ref,
                 w1_ref, b1_ref, w2f_ref, b2f_ref, w3f_ref, b3f_ref,
                 o_ref, *, batch, n_spatial):
    """Fused conv2 + conv3 (in-kernel im2col via selection matmul) + MLP head."""
    # conv2: (B*100, 256) @ (256, 32) + bias, ReLU.
    y2 = jnp.dot(p2_ref[...], w2_ref[...], preferred_element_type=jnp.float32)
    y2 = jnp.maximum(y2 + b2_ref[...], 0.0).astype(jnp.bfloat16)

    # conv3 im2col: one matmul against a constant 0/1 matrix gathers all 16
    # (kh, kw) taps, stacked along rows in blocks of (spatial, batch) order.
    # (Selection by 1.0 in bf16 is exact, so no extra rounding is introduced.)
    q = jnp.dot(g_ref[...], y2, preferred_element_type=jnp.float32)
    q = q.astype(jnp.bfloat16)                        # (16*blk, 32)

    blk = n_spatial * batch                           # rows per tap (=32)
    y3 = jnp.zeros((blk, 64), jnp.float32)
    for t in range(KSIZE * KSIZE):                    # 16 aligned 32-row blocks
        y3 = y3 + jnp.dot(q[t * blk:(t + 1) * blk, :], w3_ref[t],
                          preferred_element_type=jnp.float32)
    y3 = jnp.maximum(y3 + b3_ref[...], 0.0)           # (32, 64) f32, rows (s, b)

    # fc1: PyTorch's NCHW flatten is folded into w1_ref (per spatial position s).
    h1 = jnp.zeros((batch, 64), jnp.float32)
    for s in range(n_spatial):
        h1 = h1 + jnp.dot(y3[s * batch:(s + 1) * batch, :], w1_ref[s],
                          preferred_element_type=jnp.float32)
    h1 = jnp.maximum(h1 + b1_ref[...], 0.0)           # (B, 64) f32

    h2 = jnp.dot(h1, w2f_ref[...], preferred_element_type=jnp.float32)
    h2 = jnp.maximum(h2 + b2f_ref[...], 0.0)          # (B, 32) f32

    # fc3 has a single output unit: elementwise + lane-reduce avoids an N=1 MXU op.
    v = jnp.sum(h2 * w3f_ref[...], axis=-1, keepdims=True) + b3f_ref[...]
    o_ref[...] = v


def conv2_conv3_head(p2, wp, *, batch):
    n_spatial = 16                                    # conv3 output is 4x4
    kern = functools.partial(_tail_kernel, batch=batch, n_spatial=n_spatial)
    args = (p2, wp["conv2_w"], wp["conv2_b"], wp["g3"],
            wp["conv3_w"], wp["conv3_b"],
            wp["fc1_w"], wp["fc1_b"], wp["fc2_w"], wp["fc2_b"],
            wp["fc3_w"], wp["fc3_b"])
    return pl.pallas_call(
        kern,
        out_shape=jax.ShapeDtypeStruct((batch, 1), jnp.float32),
        grid=(1,),
        in_specs=[_full_spec(a.shape) for a in args],
        out_specs=_full_spec((batch, 1)),
        compiler_params=pltpu.CompilerParams(
            dimension_semantics=("arbitrary",)),
    )(*args)


# ------------------------------ glue (JAX) ---------------------------------

def _im2col(x, k=KSIZE, s=STRIDE):
    """x: (B, H, W, C) -> (B, Ho, Wo, k*k*C); patch feature order (kh, kw, ci)."""
    B, H, W, _ = x.shape
    Ho = (H - k) // s + 1
    Wo = (W - k) // s + 1
    cols = [x[:, kh:kh + s * Ho:s, kw:kw + s * Wo:s, :]
            for kh in range(k) for kw in range(k)]
    return jnp.concatenate(cols, axis=-1), Ho, Wo


def critic_forward(wp, obs_nchw):
    """Matches PyTorch Critic.forward: returns shape (B,)."""
    B = obs_nchw.shape[0]
    # Cin == 1, so NCHW -> NHWC is a pure (free) reshape, no transpose.
    x = obs_nchw.reshape(B, obs_nchw.shape[2], obs_nchw.shape[3], 1)
    for i in range(2):                                  # conv0, conv1
        p, Ho, Wo = _im2col(x)
        p = p.reshape(B * Ho * Wo, p.shape[-1]).astype(jnp.bfloat16)
        y = conv_gemm_bias_relu(p, wp[f"conv{i}_w"], wp[f"conv{i}_b"])
        x = y.reshape(B, Ho, Wo, CONV_COUT[i])
    # conv2 + conv3 + flatten + MLP head: one fused kernel.
    p2, Ho, Wo = _im2col(x)                             # (B, 10, 10, 256)
    p2 = p2.reshape(B * Ho * Wo, p2.shape[-1]).astype(jnp.bfloat16)
    v = conv2_conv3_head(p2, wp, batch=B)               # (B, 1) f32
    return v[:, 0]


# --------------------------- weight preparation ------------------------------

def _conv3_selection(batch, h2=10, w2=10, ho=4, wo=4, k=KSIZE, s=STRIDE):
    """0/1 matrix implementing conv3's stride-2 im2col as a matmul.

    Row index  = t*blk + (h3*wo + w3)*batch + b   with t = kh*k + kw, blk = ho*wo*batch.
    Col index  = b*h2*w2 + (s*h3 + kh)*w2 + (s*w3 + kw)   (rows of conv2's output).
    """
    blk = ho * wo * batch
    g = np.zeros((k * k * blk, batch * h2 * w2), np.float32)
    for kh in range(k):
        for kw in range(k):
            t = kh * k + kw
            for h3 in range(ho):
                for w3 in range(wo):
                    for b in range(batch):
                        row = t * blk + (h3 * wo + w3) * batch + b
                        col = b * h2 * w2 + (s * h3 + kh) * w2 + (s * w3 + kw)
                        g[row, col] = 1.0
    return g


def prepare_params(params, batch):
    """One-time prep (outside jit): PyTorch layouts -> GEMM weights, no padding.
    NOTE: the conv3 selection matrix `g3` is built for a fixed batch size."""
    wp = {}
    cin = 1
    for i, cout in enumerate(CONV_COUT[:3]):            # conv0..conv2 GEMM weights
        w = params[f"conv{i}_w"]                        # (Cout, Cin, 4, 4)
        wm = jnp.transpose(w, (2, 3, 1, 0)).reshape(16 * cin, cout)  # rows (kh,kw,ci)
        wp[f"conv{i}_w"] = wm.astype(jnp.bfloat16)
        wp[f"conv{i}_b"] = params[f"conv{i}_b"].reshape(1, cout).astype(jnp.float32)
        cin = cout
    # conv3: per-tap (Cin, Cout) weights stacked along a leading tap axis.
    w3 = jnp.transpose(params["conv3_w"], (2, 3, 1, 0)).reshape(16, 32, 64)
    wp["conv3_w"] = w3.astype(jnp.bfloat16)
    wp["conv3_b"] = params["conv3_b"].reshape(1, 64).astype(jnp.float32)
    wp["g3"] = jnp.asarray(_conv3_selection(batch), jnp.bfloat16)
    # fc1: fold the PyTorch NCHW flatten (idx = c*16 + h*4 + w) into the weights,
    # reorganized per spatial position s = h*4 + w: fc1_w[s, c, o].
    w1 = params["fc1_w"].reshape(64, 64, 4, 4)          # (o, c, h, w)
    wp["fc1_w"] = jnp.transpose(w1, (2, 3, 1, 0)).reshape(16, 64, 64).astype(jnp.float32)
    wp["fc1_b"] = params["fc1_b"].reshape(1, 64).astype(jnp.float32)
    wp["fc2_w"] = params["fc2_w"].T.astype(jnp.float32)              # (64, 32)
    wp["fc2_b"] = params["fc2_b"].reshape(1, 32).astype(jnp.float32)
    wp["fc3_w"] = params["fc3_w"].astype(jnp.float32)                # (1, 32) row vector
    wp["fc3_b"] = params["fc3_b"].reshape(1, 1).astype(jnp.float32)
    return wp


# ----------------------- reference (pure JAX, NCHW) -------------------------

def critic_reference(params, obs_nchw):
    x = obs_nchw
    for i in range(4):
        x = jax.lax.conv_general_dilated(
            x, params[f"conv{i}_w"], window_strides=(2, 2), padding="VALID",
            dimension_numbers=("NCHW", "OIHW", "NCHW"))
        x = jnp.maximum(x + params[f"conv{i}_b"][None, :, None, None], 0.0)
    x = x.reshape(x.shape[0], -1)
    h = jnp.maximum(x @ params["fc1_w"].T + params["fc1_b"], 0.0)
    h = jnp.maximum(h @ params["fc2_w"].T + params["fc2_b"], 0.0)
    v = h @ params["fc3_w"].T + params["fc3_b"]
    return jnp.squeeze(v, -1)


# ------------------------------ parameters ----------------------------------

def init_params(key):
    """Deterministic init; PyTorch-style layouts (conv OIHW, linear (out, in))."""
    conv_shapes = [(6, 1, 4, 4), (16, 6, 4, 4), (32, 16, 4, 4), (64, 32, 4, 4)]
    fc_shapes = [(64, 1024), (32, 64), (1, 32)]
    params = {}
    keys = jax.random.split(key, len(conv_shapes) + len(fc_shapes))
    for i, shp in enumerate(conv_shapes):
        fan_in = shp[1] * shp[2] * shp[3]
        bound = 1.0 / np.sqrt(fan_in)
        params[f"conv{i}_w"] = jax.random.uniform(keys[i], shp, jnp.float32,
                                                  -bound, bound)
        params[f"conv{i}_b"] = jnp.zeros((shp[0],), jnp.float32)
    for j, shp in enumerate(fc_shapes):
        bound = 1.0 / np.sqrt(shp[1])
        params[f"fc{j+1}_w"] = jax.random.uniform(keys[len(conv_shapes) + j], shp,
                                                  jnp.float32, -bound, bound)
        params[f"fc{j+1}_b"] = jnp.zeros((shp[0],), jnp.float32)
    return params


# --------------------------------- main --------------------------------------

if __name__ == "__main__":
    key = jax.random.PRNGKey(0)
    pkey, xkey = jax.random.split(key)
    params = init_params(pkey)

    B = 2
    wp = prepare_params(params, batch=B)   # one-time weight prep, outside the jit

    # 96x96 input is forced by Linear(1024, 64) == 64ch * 4 * 4 after the convs.
    obs = jax.random.uniform(xkey, (B, 1, 96, 96), jnp.float32)   # NCHW, like PyTorch

    fwd = jax.jit(critic_forward)
    out = jax.block_until_ready(fwd(wp, obs))
    assert out.shape == (B,), out.shape

    ref = jax.block_until_ready(critic_reference(params, obs))
    # bf16 MXU conv path (f32 head) -> slightly looser tolerance than pure f32.
    np.testing.assert_allclose(np.asarray(out), np.asarray(ref), rtol=2e-2, atol=2e-2)

    print("KERNEL_OK")
</pallas_src>

<mosaic_0001>
module attributes {stable_mosaic.version = 11 : i64} {
  func.func @_gemm_bias_relu_kernel(%arg0: i32, %arg1: memref<4418x16xbf16, #tpu.memory_space<vmem>>, %arg2: memref<16x6xbf16, #tpu.memory_space<vmem>>, %arg3: memref<1x6xf32, #tpu.memory_space<vmem>>, %arg4: memref<4418x6xbf16, #tpu.memory_space<vmem>>) attributes {dimension_semantics = [#tpu.dimension_semantics<arbitrary>], iteration_bounds = array<i64: 1>, scalar_prefetch = 0 : i64, scratch_operands = 0 : i64, tpu.core_type = #tpu.core_type<tc>, window_params = [{pipeline_mode = #tpu.pipeline_mode<synchronous>, transform_indices = @transform_0, window_bounds = array<i64: 4418, 16>}, {pipeline_mode = #tpu.pipeline_mode<synchronous>, transform_indices = @transform_1, window_bounds = array<i64: 16, 6>}, {pipeline_mode = #tpu.pipeline_mode<synchronous>, transform_indices = @transform_2, window_bounds = array<i64: 1, 6>}, {pipeline_mode = #tpu.pipeline_mode<synchronous>, transform_indices = @transform_3, window_bounds = array<i64: 4418, 6>}]} {
    %c0 = arith.constant 0 : index
    %c0_0 = arith.constant 0 : index
    %0 = vector.load %arg1[%c0, %c0_0] : memref<4418x16xbf16, #tpu.memory_space<vmem>>, vector<4418x16xbf16>
    %c0_1 = arith.constant 0 : index
    %c0_2 = arith.constant 0 : index
    %1 = vector.load %arg2[%c0_1, %c0_2] : memref<16x6xbf16, #tpu.memory_space<vmem>>, vector<16x6xbf16>
    %cst = arith.constant dense<0.000000e+00> : vector<4418x6xf32>
    %2 = tpu.matmul %0, %1, %cst {dimension_numbers = #tpu.dot_dimension_numbers<[1], [0], [0], [1], [0, 0, 1, 1], [], []>} : vector<4418x16xbf16>, vector<16x6xbf16>, vector<4418x6xf32> -> vector<4418x6xf32>
    %c0_3 = arith.constant 0 : index
    %c0_4 = arith.constant 0 : index
    %3 = vector.load %arg3[%c0_3, %c0_4] : memref<1x6xf32, #tpu.memory_space<vmem>>, vector<1x6xf32>
    %4 = vector.broadcast %3 : vector<1x6xf32> to vector<4418x6xf32>
    %5 = arith.addf %2, %4 : vector<4418x6xf32>
    %cst_5 = arith.constant 0.000000e+00 : f32
    %6 = vector.broadcast %cst_5 : f32 to vector<4418x6xf32>
    %7 = arith.maximumf %5, %6 : vector<4418x6xf32>
    %8 = arith.truncf %7 : vector<4418x6xf32> to vector<4418x6xbf16>
    %c0_6 = arith.constant 0 : index
    %c0_7 = arith.constant 0 : index
    %9 = vector.load %arg4[%c0_6, %c0_7] : memref<4418x6xbf16, #tpu.memory_space<vmem>>, vector<4418x6xbf16>
    tpu.vector_store %arg4[%c0_6, %c0_7], %8 {strides = array<i32>} : memref<4418x6xbf16, #tpu.memory_space<vmem>>, vector<4418x6xbf16>,
    return
  }
  func.func @transform_0(%arg0: i32) -> (i32, i32) {
    %c0_i32 = arith.constant 0 : i32
    %c0_i32_0 = arith.constant 0 : i32
    %c0_i32_1 = arith.constant 0 : i32
    return %c0_i32, %c0_i32_0 : i32, i32
  }
  func.func @transform_1(%arg0: i32) -> (i32, i32) {
    %c0_i32 = arith.constant 0 : i32
    %c0_i32_0 = arith.constant 0 : i32
    %c0_i32_1 = arith.constant 0 : i32
    return %c0_i32, %c0_i32_0 : i32, i32
  }
  func.func @transform_2(%arg0: i32) -> (i32, i32) {
    %c0_i32 = arith.constant 0 : i32
    %c0_i32_0 = arith.constant 0 : i32
    %c0_i32_1 = arith.constant 0 : i32
    return %c0_i32, %c0_i32_0 : i32, i32
  }
  func.func @transform_3(%arg0: i32) -> (i32, i32) {
    %c0_i32 = arith.constant 0 : i32
    %c0_i32_0 = arith.constant 0 : i32
    %c0_i32_1 = arith.constant 0 : i32
    return %c0_i32, %c0_i32_0 : i32, i32
  }
}

module attributes {stable_mosaic.version = 11 : i64} {
  func.func @_gemm_bias_relu_kernel(%arg0: i32, %arg1: memref<968x96xbf16, #tpu.memory_space<vmem>>, %arg2: memref<96x16xbf16, #tpu.memory_space<vmem>>, %arg3: memref<1x16xf32, #tpu.memory_space<vmem>>, %arg4: memref<968x16xbf16, #tpu.memory_space<vmem>>) attributes {dimension_semantics = [#tpu.dimension_semantics<arbitrary>], iteration_bounds = array<i64: 1>, scalar_prefetch = 0 : i64, scratch_operands = 0 : i64, tpu.core_type = #tpu.core_type<tc>, window_params = [{pipeline_mode = #tpu.pipeline_mode<synchronous>, transform_indices = @transform_0, window_bounds = array<i64: 968, 96>}, {pipeline_mode = #tpu.pipeline_mode<synchronous>, transform_indices = @transform_1, window_bounds = array<i64: 96, 16>}, {pipeline_mode = #tpu.pipeline_mode<synchronous>, transform_indices = @transform_2, window_bounds = array<i64: 1, 16>}, {pipeline_mode = #tpu.pipeline_mode<synchronous>, transform_indices = @transform_3, window_bounds = array<i64: 968, 16>}]} {
    %c0 = arith.constant 0 : index
    %c0_0 = arith.constant 0 : index
    %0 = vector.load %arg1[%c0, %c0_0] : memref<968x96xbf16, #tpu.memory_space<vmem>>, vector<968x96xbf16>
    %c0_1 = arith.constant 0 : index
    %c0_2 = arith.constant 0 : index
    %1 = vector.load %arg2[%c0_1, %c0_2] : memref<96x16xbf16, #tpu.memory_space<vmem>>, vector<96x16xbf16>
    %cst = arith.constant dense<0.000000e+00> : vector<968x16xf32>
    %2 = tpu.matmul %0, %1, %cst {dimension_numbers = #tpu.dot_dimension_numbers<[1], [0], [0], [1], [0, 0, 1, 1], [], []>} : vector<968x96xbf16>, vector<96x16xbf16>, vector<968x16xf32> -> vector<968x16xf32>
    %c0_3 = arith.constant 0 : index
    %c0_4 = arith.constant 0 : index
    %3 = vector.load %arg3[%c0_3, %c0_4] : memref<1x16xf32, #tpu.memory_space<vmem>>, vector<1x16xf32>
    %4 = vector.broadcast %3 : vector<1x16xf32> to vector<968x16xf32>
    %5 = arith.addf %2, %4 : vector<968x16xf32>
    %cst_5 = arith.constant 0.000000e+00 : f32
    %6 = vector.broadcast %cst_5 : f32 to vector<968x16xf32>
    %7 = arith.maximumf %5, %6 : vector<968x16xf32>
    %8 = arith.truncf %7 : vector<968x16xf32> to vector<968x16xbf16>
    %c0_6 = arith.constant 0 : index
    %c0_7 = arith.constant 0 : index
    %9 = vector.load %arg4[%c0_6, %c0_7] : memref<968x16xbf16, #tpu.memory_space<vmem>>, vector<968x16xbf16>
    tpu.vector_store %arg4[%c0_6, %c0_7], %8 {strides = array<i32>} : memref<968x16xbf16, #tpu.memory_space<vmem>>, vector<968x16xbf16>,
    return
  }
  func.func @transform_0(%arg0: i32) -> (i32, i32) {
    %c0_i32 = arith.constant 0 : i32
    %c0_i32_0 = arith.constant 0 : i32
    %c0_i32_1 = arith.constant 0 : i32
    return %c0_i32, %c0_i32_0 : i32, i32
  }
  func.func @transform_1(%arg0: i32) -> (i32, i32) {
    %c0_i32 = arith.constant 0 : i32
    %c0_i32_0 = arith.constant 0 : i32
    %c0_i32_1 = arith.constant 0 : i32
    return %c0_i32, %c0_i32_0 : i32, i32
  }
  func.func @transform_2(%arg0: i32) -> (i32, i32) {
    %c0_i32 = arith.constant 0 : i32
    %c0_i32_0 = arith.constant 0 : i32
    %c0_i32_1 = arith.constant 0 : i32
    return %c0_i32, %c0_i32_0 : i32, i32
  }
  func.func @transform_3(%arg0: i32) -> (i32, i32) {
    %c0_i32 = arith.constant 0 : i32
    %c0_i32_0 = arith.constant 0 : i32
    %c0_i32_1 = arith.constant 0 : i32
    return %c0_i32, %c0_i32_0 : i32, i32
  }
}

module attributes {stable_mosaic.version = 11 : i64} {
  func.func @_tail_kernel(%arg0: i32, %arg1: memref<200x256xbf16, #tpu.memory_space<vmem>>, %arg2: memref<256x32xbf16, #tpu.memory_space<vmem>>, %arg3: memref<1x32xf32, #tpu.memory_space<vmem>>, %arg4: memref<512x200xbf16, #tpu.memory_space<vmem>>, %arg5: memref<16x32x64xbf16, #tpu.memory_space<vmem>>, %arg6: memref<1x64xf32, #tpu.memory_space<vmem>>, %arg7: memref<16x64x64xf32, #tpu.memory_space<vmem>>, %arg8: memref<1x64xf32, #tpu.memory_space<vmem>>, %arg9: memref<64x32xf32, #tpu.memory_space<vmem>>, %arg10: memref<1x32xf32, #tpu.memory_space<vmem>>, %arg11: memref<1x32xf32, #tpu.memory_space<vmem>>, %arg12: memref<1x1xf32, #tpu.memory_space<vmem>>, %arg13: memref<2x1xf32, #tpu.memory_space<vmem>>) attributes {dimension_semantics = [#tpu.dimension_semantics<arbitrary>], iteration_bounds = array<i64: 1>, scalar_prefetch = 0 : i64, scratch_operands = 0 : i64, tpu.core_type = #tpu.core_type<tc>, window_params = [{pipeline_mode = #tpu.pipeline_mode<synchronous>, transform_indices = @transform_0, window_bounds = array<i64: 200, 256>}, {pipeline_mode = #tpu.pipeline_mode<synchronous>, transform_indices = @transform_1, window_bounds = array<i64: 256, 32>}, {pipeline_mode = #tpu.pipeline_mode<synchronous>, transform_indices = @transform_2, window_bounds = array<i64: 1, 32>}, {pipeline_mode = #tpu.pipeline_mode<synchronous>, transform_indices = @transform_3, window_bounds = array<i64: 512, 200>}, {pipeline_mode = #tpu.pipeline_mode<synchronous>, transform_indices = @transform_4, window_bounds = array<i64: 16, 32, 64>}, {pipeline_mode = #tpu.pipeline_mode<synchronous>, transform_indices = @transform_5, window_bounds = array<i64: 1, 64>}, {pipeline_mode = #tpu.pipeline_mode<synchronous>, transform_indices = @transform_6, window_bounds = array<i64: 16, 64, 64>}, {pipeline_mode = #tpu.pipeline_mode<synchronous>, transform_indices = @transform_7, window_bounds = array<i64: 1, 64>}, {pipeline_mode = #tpu.pipeline_mode<synchronous>, transform_indices = @transform_8, window_bounds = array<i64: 64, 32>}, {pipeline_mode = #tpu.pipeline_mode<synchronous>, transform_indices = @transform_9, window_bounds = array<i64: 1, 32>}, {pipeline_mode = #tpu.pipeline_mode<synchronous>, transform_indices = @transform_10, window_bounds = array<i64: 1, 32>}, {pipeline_mode = #tpu.pipeline_mode<synchronous>, transform_indices = @transform_11, window_bounds = array<i64: 1, 1>}, {pipeline_mode = #tpu.pipeline_mode<synchronous>, transform_indices = @transform_12, window_bounds = array<i64: 2, 1>}]} {
    %c0 = arith.constant 0 : index
    %c0_0 = arith.constant 0 : index
    %0 = vector.load %arg1[%c0, %c0_0] : memref<200x256xbf16, #tpu.memory_space<vmem>>, vector<200x256xbf16>
    %c0_1 = arith.constant 0 : index
    %c0_2 = arith.constant 0 : index
    %1 = vector.load %arg2[%c0_1, %c0_2] : memref<256x32xbf16, #tpu.memory_space<vmem>>, vector<256x32xbf16>
    %cst = arith.constant dense<0.000000e+00> : vector<200x32xf32>
    %2 = tpu.matmul %0, %1, %cst {dimension_numbers = #tpu.dot_dimension_numbers<[1], [0], [0], [1], [0, 0, 1, 1], [], []>} : vector<200x256xbf16>, vector<256x32xbf16>, vector<200x32xf32> -> vector<200x32xf32>
    %c0_3 = arith.constant 0 : index
    %c0_4 = arith.constant 0 : index
    %3 = vector.load %arg3[%c0_3, %c0_4] : memref<1x32xf32, #tpu.memory_space<vmem>>, vector<1x32xf32>
    %4 = vector.broadcast %3 : vector<1x32xf32> to vector<200x32xf32>
    %5 = arith.addf %2, %4 : vector<200x32xf32>
    %cst_5 = arith.constant 0.000000e+00 : f32
    %6 = vector.broadcast %cst_5 : f32 to vector<200x32xf32>
    %7 = arith.maximumf %5, %6 : vector<200x32xf32>
    %8 = arith.truncf %7 : vector<200x32xf32> to vector<200x32xbf16>
    %c0_6 = arith.constant 0 : index
    %c0_7 = arith.constant 0 : index
    %9 = vector.load %arg4[%c0_6, %c0_7] : memref<512x200xbf16, #tpu.memory_space<vmem>>, vector<512x200xbf16>
    %cst_8 = arith.constant dense<0.000000e+00> : vector<512x32xf32>
    %10 = tpu.matmul %9, %8, %cst_8 {dimension_numbers = #tpu.dot_dimension_numbers<[1], [0], [0], [1], [0, 0, 1, 1], [], []>} : vector<512x200xbf16>, vector<200x32xbf16>, vector<512x32xf32> -> vector<512x32xf32>
    %11 = arith.truncf %10 : vector<512x32xf32> to vector<512x32xbf16>
    %cst_9 = arith.constant 0.000000e+00 : f32
    %12 = vector.broadcast %cst_9 : f32 to vector<32x64xf32>
    %13 = vector.extract_strided_slice %11 {offsets = [0, 0], sizes = [32, 32], strides = [1, 1]} : vector<512x32xbf16> to vector<32x32xbf16>
    %c0_10 = arith.constant 0 : index
    %c0_11 = arith.constant 0 : index
    %c0_12 = arith.constant 0 : index
    %14 = vector.load %arg5[%c0_10, %c0_11, %c0_12] : memref<16x32x64xbf16, #tpu.memory_space<vmem>>, vector<1x32x64xbf16>
    %15 = vector.shape_cast %14 : vector<1x32x64xbf16> to vector<32x64xbf16>
    %cst_13 = arith.constant dense<0.000000e+00> : vector<32x64xf32>
    %16 = tpu.matmul %13, %15, %cst_13 {dimension_numbers = #tpu.dot_dimension_numbers<[1], [0], [0], [1], [0, 0, 1, 1], [], []>} : vector<32x32xbf16>, vector<32x64xbf16>, vector<32x64xf32> -> vector<32x64xf32>
    %17 = arith.addf %12, %16 : vector<32x64xf32>
    %18 = vector.extract_strided_slice %11 {offsets = [32, 0], sizes = [32, 32], strides = [1, 1]} : vector<512x32xbf16> to vector<32x32xbf16>
    %c1 = arith.constant 1 : index
    %c0_14 = arith.constant 0 : index
    %c0_15 = arith.constant 0 : index
    %19 = vector.load %arg5[%c1, %c0_14, %c0_15] : memref<16x32x64xbf16, #tpu.memory_space<vmem>>, vector<1x32x64xbf16>
    %20 = vector.shape_cast %19 : vector<1x32x64xbf16> to vector<32x64xbf16>
    %cst_16 = arith.constant dense<0.000000e+00> : vector<32x64xf32>
    %21 = tpu.matmul %18, %20, %cst_16 {dimension_numbers = #tpu.dot_dimension_numbers<[1], [0], [0], [1], [0, 0, 1, 1], [], []>} : vector<32x32xbf16>, vector<32x64xbf16>, vector<32x64xf32> -> vector<32x64xf32>
    %22 = arith.addf %17, %21 : vector<32x64xf32>
    %23 = vector.extract_strided_slice %11 {offsets = [64, 0], sizes = [32, 32], strides = [1, 1]} : vector<512x32xbf16> to vector<32x32xbf16>
    %c2 = arith.constant 2 : index
    %c0_17 = arith.constant 0 : index
    %c0_18 = arith.constant 0 : index
    %24 = vector.load %arg5[%c2, %c0_17, %c0_18] : memref<16x32x64xbf16, #tpu.memory_space<vmem>>, vector<1x32x64xbf16>
    %25 = vector.shape_cast %24 : vector<1x32x64xbf16> to vector<32x64xbf16>
    %cst_19 = arith.constant dense<0.000000e+00> : vector<32x64xf32>
    %26 = tpu.matmul %23, %25, %cst_19 {dimension_numbers = #tpu.dot_dimension_numbers<[1], [0], [0], [1], [0, 0, 1, 1], [], []>} : vector<32x32xbf16>, vector<32x64xbf16>, vector<32x64xf32> -> vector<32x64xf32>
    %27 = arith.addf %22, %26 : vector<32x64xf32>
    %28 = vector.extract_strided_slice %11 {offsets = [96, 0], sizes = [32, 32], strides = [1, 1]} : vector<512x32xbf16> to vector<32x32xbf16>
    %c3 = arith.constant 3 : index
    %c0_20 = arith.constant 0 : index
    %c0_21 = arith.constant 0 : index
    %29 = vector.load %arg5[%c3, %c0_20, %c0_21] : memref<16x32x64xbf16, #tpu.memory_space<vmem>>, vector<1x32x64xbf16>
    %30 = vector.shape_cast %29 : vector<1x32x64xbf16> to vector<32x64xbf16>
    %cst_22 = arith.constant dense<0.000000e+00> : vector<32x64xf32>
    %31 = tpu.matmul %28, %30, %cst_22 {dimension_numbers = #tpu.dot_dimension_numbers<[1], [0], [0], [1], [0, 0, 1, 1], [], []>} : vector<32x32xbf16>, vector<32x64xbf16>, vector<32x64xf32> -> vector<32x64xf32>
    %32 = arith.addf %27, %31 : vector<32x64xf32>
    %33 = vector.extract_strided_slice %11 {offsets = [128, 0], sizes = [32, 32], strides = [1, 1]} : vector<512x32xbf16> to vector<32x32xbf16>
    %c4 = arith.constant 4 : index
    %c0_23 = arith.constant 0 : index
    %c0_24 = arith.constant 0 : index
    %34 = vector.load %arg5[%c4, %c0_23, %c0_24] : memref<16x32x64xbf16, #tpu.memory_space<vmem>>, vector<1x32x64xbf16>
    %35 = vector.shape_cast %34 : vector<1x32x64xbf16> to vector<32x64xbf16>
    %cst_25 = arith.constant dense<0.000000e+00> : vector<32x64xf32>
    %36 = tpu.matmul %33, %35, %cst_25 {dimension_numbers = #tpu.dot_dimension_numbers<[1], [0], [0], [1], [0, 0, 1, 1], [], []>} : vector<32x32xbf16>, vector<32x64xbf16>, vector<32x64xf32> -> vector<32x64xf32>
    %37 = arith.addf %32, %36 : vector<32x64xf32>
    %38 = vector.extract_strided_slice %11 {offsets = [160, 0], sizes = [32, 32], strides = [1, 1]} : vector<512x32xbf16> to vector<32x32xbf16>
    %c5 = arith.constant 5 : index
    %c0_26 = arith.constant 0 : index
    %c0_27 = arith.constant 0 : index
    %39 = vector.load %arg5[%c5, %c0_26, %c0_27] : memref<16x32x64xbf16, #tpu.memory_space<vmem>>, vector<1x32x64xbf16>
    %40 = vector.shape_cast %39 : vector<1x32x64xbf16> to vector<32x64xbf16>
    %cst_28 = arith.constant dense<0.000000e+00> : vector<32x64xf32>
    %41 = tpu.matmul %38, %40, %cst_28 {dimension_numbers = #tpu.dot_dimension_numbers<[1], [0], [0], [1], [0, 0, 1, 1], [], []>} : vector<32x32xbf16>, vector<32x64xbf16>, vector<32x64xf32> -> vector<32x64xf32>
    %42 = arith.addf %37, %41 : vector<32x64xf32>
    %43 = vector.extract_strided_slice %11 {offsets = [192, 0], sizes = [32, 32], strides = [1, 1]} : vector<512x32xbf16> to vector<32x32xbf16>
    %c6 = arith.constant 6 : index
    %c0_29 = arith.constant 0 : index
    %c0_30 = arith.constant 0 : index
    %44 = vector.load %arg5[%c6, %c0_29, %c0_30] : memref<16x32x64xbf16, #tpu.memory_space<vmem>>, vector<1x32x64xbf16>
    %45 = vector.shape_cast %44 : vector<1x32x64xbf16> to vector<32x64xbf16>
    %cst_31 = arith.constant dense<0.000000e+00> : vector<32x64xf32>
    %46 = tpu.matmul %43, %45, %cst_31 {dimension_numbers = #tpu.dot_dimension_numbers<[1], [0], [0], [1], [0, 0, 1, 1], [], []>} : vector<32x32xbf16>, vector<32x64xbf16>, vector<32x64xf32> -> vector<32x64xf32>
    %47 = arith.addf %42, %46 : vector<32x64xf32>
    %48 = vector.extract_strided_slice %11 {offsets = [224, 0], sizes = [32, 32], strides = [1, 1]} : vector<512x32xbf16> to vector<32x32xbf16>
    %c7 = arith.constant 7 : index
    %c0_32 = arith.constant 0 : index
    %c0_33 = arith.constant 0 : index
    %49 = vector.load %arg5[%c7, %c0_32, %c0_33] : memref<16x32x64xbf16, #tpu.memory_space<vmem>>, vector<1x32x64xbf16>
    %50 = vector.shape_cast %49 : vector<1x32x64xbf16> to vector<32x64xbf16>
    %cst_34 = arith.constant dense<0.000000e+00> : vector<32x64xf32>
    %51 = tpu.matmul %48, %50, %cst_34 {dimension_numbers = #tpu.dot_dimension_numbers<[1], [0], [0], [1], [0, 0, 1, 1], [], []>} : vector<32x32xbf16>, vector<32x64xbf16>, vector<32x64xf32> -> vector<32x64xf32>
    %52 = arith.addf %47, %51 : vector<32x64xf32>
    %53 = vector.extract_strided_slice %11 {offsets = [256, 0], sizes = [32, 32], strides = [1, 1]} : vector<512x32xbf16> to vector<32x32xbf16>
    %c8 = arith.constant 8 : index
    %c0_35 = arith.constant 0 : index
    %c0_36 = arith.constant 0 : index
    %54 = vector.load %arg5[%c8, %c0_35, %c0_36] : memref<16x32x64xbf16, #tpu.memory_space<vmem>>, vector<1x32x64xbf16>
    %55 = vector.shape_cast %54 : vector<1x32x64xbf16> to vector<32x64xbf16>
    %cst_37 = arith.constant dense<0.000000e+00> : vector<32x64xf32>
    %56 = tpu.matmul %53, %55, %cst_37 {dimension_numbers = #tpu.dot_dimension_numbers<[1], [0], [0], [1], [0, 0, 1, 1], [], []>} : vector<32x32xbf16>, vector<32x64xbf16>, vector<32x64xf32> -> vector<32x64xf32>
    %57 = arith.addf %52, %56 : vector<32x64xf32>
    %58 = vector.extract_strided_slice %11 {offsets = [288, 0], sizes = [32, 32], strides = [1, 1]} : vector<512x32xbf16> to vector<32x32xbf16>
    %c9 = arith.constant 9 : index
    %c0_38 = arith.constant 0 : index
    %c0_39 = arith.constant 0 : index
    %59 = vector.load %arg5[%c9, %c0_38, %c0_39] : memref<16x32x64xbf16, #tpu.memory_space<vmem>>, vector<1x32x64xbf16>
    %60 = vector.shape_cast %59 : vector<1x32x64xbf16> to vector<32x64xbf16>
    %cst_40 = arith.constant dense<0.000000e+00> : vector<32x64xf32>
    %61 = tpu.matmul %58, %60, %cst_40 {dimension_numbers = #tpu.dot_dimension_numbers<[1], [0], [0], [1], [0, 0, 1, 1], [], []>} : vector<32x32xbf16>, vector<32x64xbf16>, vector<32x64xf32> -> vector<32x64xf32>
    %62 = arith.addf %57, %61 : vector<32x64xf32>
    %63 = vector.extract_strided_slice %11 {offsets = [320, 0], sizes = [32, 32], strides = [1, 1]} : vector<512x32xbf16> to vector<32x32xbf16>
    %c10 = arith.constant 10 : index
    %c0_41 = arith.constant 0 : index
    %c0_42 = arith.constant 0 : index
    %64 = vector.load %arg5[%c10, %c0_41, %c0_42] : memref<16x32x64xbf16, #tpu.memory_space<vmem>>, vector<1x32x64xbf16>
    %65 = vector.shape_cast %64 : vector<1x32x64xbf16> to vector<32x64xbf16>
    %cst_43 = arith.constant dense<0.000000e+00> : vector<32x64xf32>
    %66 = tpu.matmul %63, %65, %cst_43 {dimension_numbers = #tpu.dot_dimension_numbers<[1], [0], [0], [1], [0, 0, 1, 1], [], []>} : vector<32x32xbf16>, vector<32x64xbf16>, vector<32x64xf32> -> vector<32x64xf32>
    %67 = arith.addf %62, %66 : vector<32x64xf32>
    %68 = vector.extract_strided_slice %11 {offsets = [352, 0], sizes = [32, 32], strides = [1, 1]} : vector<512x32xbf16> to vector<32x32xbf16>
    %c11 = arith.constant 11 : index
    %c0_44 = arith.constant 0 : index
    %c0_45 = arith.constant 0 : index
    %69 = vector.load %arg5[%c11, %c0_44, %c0_45] : memref<16x32x64xbf16, #tpu.memory_space<vmem>>, vector<1x32x64xbf16>
    %70 = vector.shape_cast %69 : vector<1x32x64xbf16> to vector<32x64xbf16>
    %cst_46 = arith.constant dense<0.000000e+00> : vector<32x64xf32>
    %71 = tpu.matmul %68, %70, %cst_46 {dimension_numbers = #tpu.dot_dimension_numbers<[1], [0], [0], [1], [0, 0, 1, 1], [], []>} : vector<32x32xbf16>, vector<32x64xbf16>, vector<32x64xf32> -> vector<32x64xf32>
    %72 = arith.addf %67, %71 : vector<32x64xf32>
    %73 = vector.extract_strided_slice %11 {offsets = [384, 0], sizes = [32, 32], strides = [1, 1]} : vector<512x32xbf16> to vector<32x32xbf16>
    %c12 = arith.constant 12 : index
    %c0_47 = arith.constant 0 : index
    %c0_48 = arith.constant 0 : index
    %74 = vector.load %arg5[%c12, %c0_47, %c0_48] : memref<16x32x64xbf16, #tpu.memory_space<vmem>>, vector<1x32x64xbf16>
    %75 = vector.shape_cast %74 : vector<1x32x64xbf16> to vector<32x64xbf16>
    %cst_49 = arith.constant dense<0.000000e+00> : vector<32x64xf32>
    %76 = tpu.matmul %73, %75, %cst_49 {dimension_numbers = #tpu.dot_dimension_numbers<[1], [0], [0], [1], [0, 0, 1, 1], [], []>} : vector<32x32xbf16>, vector<32x64xbf16>, vector<32x64xf32> -> vector<32x64xf32>
    %77 = arith.addf %72, %76 : vector<32x64xf32>
    %78 = vector.extract_strided_slice %11 {offsets = [416, 0], sizes = [32, 32], strides = [1, 1]} : vector<512x32xbf16> to vector<32x32xbf16>
    %c13 = arith.constant 13 : index
    %c0_50 = arith.constant 0 : index
    %c0_51 = arith.constant 0 : index
    %79 = vector.load %arg5[%c13, %c0_50, %c0_51] : memref<16x32x64xbf16, #tpu.memory_space<vmem>>, vector<1x32x64xbf16>
    %80 = vector.shape_cast %79 : vector<1x32x64xbf16> to vector<32x64xbf16>
    %cst_52 = arith.constant dense<0.000000e+00> : vector<32x64xf32>
    %81 = tpu.matmul %78, %80, %cst_52 {dimension_numbers = #tpu.dot_dimension_numbers<[1], [0], [0], [1], [0, 0, 1, 1], [], []>} : vector<32x32xbf16>, vector<32x64xbf16>, vector<32x64xf32> -> vector<32x64xf32>
    %82 = arith.addf %77, %81 : vector<32x64xf32>
    %83 = vector.extract_strided_slice %11 {offsets = [448, 0], sizes = [32, 32], strides = [1, 1]} : vector<512x32xbf16> to vector<32x32xbf16>
    %c14 = arith.constant 14 : index
    %c0_53 = arith.constant 0 : index
    %c0_54 = arith.constant 0 : index
    %84 = vector.load %arg5[%c14, %c0_53, %c0_54] : memref<16x32x64xbf16, #tpu.memory_space<vmem>>, vector<1x32x64xbf16>
    %85 = vector.shape_cast %84 : vector<1x32x64xbf16> to vector<32x64xbf16>
    %cst_55 = arith.constant dense<0.000000e+00> : vector<32x64xf32>
    %86 = tpu.matmul %83, %85, %cst_55 {dimension_numbers = #tpu.dot_dimension_numbers<[1], [0], [0], [1], [0, 0, 1, 1], [], []>} : vector<32x32xbf16>, vector<32x64xbf16>, vector<32x64xf32> -> vector<32x64xf32>
    %87 = arith.addf %82, %86 : vector<32x64xf32>
    %88 = vector.extract_strided_slice %11 {offsets = [480, 0], sizes = [32, 32], strides = [1, 1]} : vector<512x32xbf16> to vector<32x32xbf16>
    %c15 = arith.constant 15 : index
    %c0_56 = arith.constant 0 : index
    %c0_57 = arith.constant 0 : index
    %89 = vector.load %arg5[%c15, %c0_56, %c0_57] : memref<16x32x64xbf16, #tpu.memory_space<vmem>>, vector<1x32x64xbf16>
    %90 = vector.shape_cast %89 : vector<1x32x64xbf16> to vector<32x64xbf16>
    %cst_58 = arith.constant dense<0.000000e+00> : vector<32x64xf32>
    %91 = tpu.matmul %88, %90, %cst_58 {dimension_numbers = #tpu.dot_dimension_numbers<[1], [0], [0], [1], [0, 0, 1, 1], [], []>} : vector<32x32xbf16>, vector<32x64xbf16>, vector<32x64xf32> -> vector<32x64xf32>
    %92 = arith.addf %87, %91 : vector<32x64xf32>
    %c0_59 = arith.constant 0 : index
    %c0_60 = arith.constant 0 : index
    %93 = vector.load %arg6[%c0_59, %c0_60] : memref<1x64xf32, #tpu.memory_space<vmem>>, vector<1x64xf32>
    %94 = vector.broadcast %93 : vector<1x64xf32> to vector<32x64xf32>
    %95 = arith.addf %92, %94 : vector<32x64xf32>
    %cst_61 = arith.constant 0.000000e+00 : f32
    %96 = vector.broadcast %cst_61 : f32 to vector<32x64xf32>
    %97 = arith.maximumf %95, %96 : vector<32x64xf32>
    %cst_62 = arith.constant 0.000000e+00 : f32
    %98 = vector.broadcast %cst_62 : f32 to vector<2x64xf32>
    %99 = vector.extract_strided_slice %97 {offsets = [0, 0], sizes = [2, 64], strides = [1, 1]} : vector<32x64xf32> to vector<2x64xf32>
    %c0_63 = arith.constant 0 : index
    %c0_64 = arith.constant 0 : index
    %c0_65 = arith.constant 0 : index
    %100 = vector.load %arg7[%c0_63, %c0_64, %c0_65] : memref<16x64x64xf32, #tpu.memory_space<vmem>>, vector<1x64x64xf32>
    %101 = vector.shape_cast %100 : vector<1x64x64xf32> to vector<64x64xf32>
    %cst_66 = arith.constant dense<0.000000e+00> : vector<2x64xf32>
    %102 = tpu.matmul %99, %101, %cst_66 {dimension_numbers = #tpu.dot_dimension_numbers<[1], [0], [0], [1], [0, 0, 1, 1], [], []>} : vector<2x64xf32>, vector<64x64xf32>, vector<2x64xf32> -> vector<2x64xf32>
    %103 = arith.addf %98, %102 : vector<2x64xf32>
    %104 = vector.extract_strided_slice %97 {offsets = [2, 0], sizes = [2, 64], strides = [1, 1]} : vector<32x64xf32> to vector<2x64xf32>
    %c1_67 = arith.constant 1 : index
    %c0_68 = arith.constant 0 : index
    %c0_69 = arith.constant 0 : index
    %105 = vector.load %arg7[%c1_67, %c0_68, %c0_69] : memref<16x64x64xf32, #tpu.memory_space<vmem>>, vector<1x64x64xf32>
    %106 = vector.shape_cast %105 : vector<1x64x64xf32> to vector<64x64xf32>
    %cst_70 = arith.constant dense<0.000000e+00> : vector<2x64xf32>
    %107 = tpu.matmul %104, %106, %cst_70 {dimension_numbers = #tpu.dot_dimension_numbers<[1], [0], [0], [1], [0, 0, 1, 1], [], []>} : vector<2x64xf32>, vector<64x64xf32>, vector<2x64xf32> -> vector<2x64xf32>
    %108 = arith.addf %103, %107 : vector<2x64xf32>
    %109 = vector.extract_strided_slice %97 {offsets = [4, 0], sizes = [2, 64], strides = [1, 1]} : vector<32x64xf32> to vector<2x64xf32>
    %c2_71 = arith.constant 2 : index
    %c0_72 = arith.constant 0 : index
    %c0_73 = arith.constant 0 : index
    %110 = vector.load %arg7[%c2_71, %c0_72, %c0_73] : memref<16x64x64xf32, #tpu.memory_space<vmem>>, vector<1x64x64xf32>
    %111 = vector.shape_cast %110 : vector<1x64x64xf32> to vector<64x64xf32>
    %cst_74 = arith.constant dense<0.000000e+00> : vector<2x64xf32>
    %112 = tpu.matmul %109, %111, %cst_74 {dimension_numbers = #tpu.dot_dimension_numbers<[1], [0], [0], [1], [0, 0, 1, 1], [], []>} : vector<2x64xf32>, vector<64x64xf32>, vector<2x64xf32> -> vector<2x64xf32>
    %113 = arith.addf %108, %112 : vector<2x64xf32>
    %114 = vector.extract_strided_slice %97 {offsets = [6, 0], sizes = [2, 64], strides = [1, 1]} : vector<32x64xf32> to vector<2x64xf32>
    %c3_75 = arith.constant 3 : index
    %c0_76 = arith.constant 0 : index
    %c0_77 = arith.constant 0 : index
    %115 = vector.load %arg7[%c3_75, %c0_76, %c0_77] : memref<16x64x64xf32, #tpu.memory_space<vmem>>, vector<1x64x64xf32>
    %116 = vector.shape_cast %115 : vector<1x64x64xf32> to vector<64x64xf32>
    %cst_78 = arith.constant dense<0.000000e+00> : vector<2x64xf32>
    %117 = tpu.matmul %114, %116, %cst_78 {dimension_numbers = #tpu.dot_dimension_numbers<[1], [0], [0], [1], [0, 0, 1, 1], [], []>} : vector<2x64xf32>, vector<64x64xf32>, vector<2x64xf32> -> vector<2x64xf32>
    %118 = arith.addf %113, %117 : vector<2x64xf32>
    %119 = vector.extract_strided_slice %97 {offsets = [8, 0], sizes = [2, 64], strides = [1, 1]} : vector<32x64xf32> to vector<2x64xf32>
    %c4_79 = arith.constant 4 : index
    %c0_80 = arith.constant 0 : index
    %c0_81 = arith.constant 0 : index
    %120 = vector.load %arg7[%c4_79, %c0_80, %c0_81] : memref<16x64x64xf32, #tpu.memory_space<vmem>>, vector<1x64x64xf32>
    %121 = vector.shape_cast %120 : vector<1x64x64xf32> to vector<64x64xf32>
    %cst_82 = arith.constant dense<0.000000e+00> : vector<2x64xf32>
    %122 = tpu.matmul %119, %121, %cst_82 {dimension_numbers = #tpu.dot_dimension_numbers<[1], [0], [0], [1], [0, 0, 1, 1], [], []>} : vector<2x64xf32>, vector<64x64xf32>, vector<2x64xf32> -> vector<2x64xf32>
    %123 = arith.addf %118, %122 : vector<2x64xf32>
    %124 = vector.extract_strided_slice %97 {offsets = [10, 0], sizes = [2, 64], strides = [1, 1]} : vector<32x64xf32> to vector<2x64xf32>
    %c5_83 = arith.constant 5 : index
    %c0_84 = arith.constant 0 : index
    %c0_85 = arith.constant 0 : index
    %125 = vector.load %arg7[%c5_83, %c0_84, %c0_85] : memref<16x64x64xf32, #tpu.memory_space<vmem>>, vector<1x64x64xf32>
    %126 = vector.shape_cast %125 : vector<1x64x64xf32> to vector<64x64xf32>
    %cst_86 = arith.constant dense<0.000000e+00> : vector<2x64xf32>
    %127 = tpu.matmul %124, %126, %cst_86 {dimension_numbers = #tpu.dot_dimension_numbers<[1], [0], [0], [1], [0, 0, 1, 1], [], []>} : vector<2x64xf32>, vector<64x64xf32>, vector<2x64xf32> -> vector<2x64xf32>
    %128 = arith.addf %123, %127 : vector<2x64xf32>
    %129 = vector.extract_strided_slice %97 {offsets = [12, 0], sizes = [2, 64], strides = [1, 1]} : vector<32x64xf32> to vector<2x64xf32>
    %c6_87 = arith.constant 6 : index
    %c0_88 = arith.constant 0 : index
    %c0_89 = arith.constant 0 : index
    %130 = vector.load %arg7[%c6_87, %c0_88, %c0_89] : memref<16x64x64xf32, #tpu.memory_space<vmem>>, vector<1x64x64xf32>
    %131 = vector.shape_cast %130 : vector<1x64x64xf32> to vector<64x64xf32>
    %cst_90 = arith.constant dense<0.000000e+00> : vector<2x64xf32>
    %132 = tpu.matmul %129, %131, %cst_90 {dimension_numbers = #tpu.dot_dimension_numbers<[1], [0], [0], [1], [0, 0, 1, 1], [], []>} : vector<2x64xf32>, vector<64x64xf32>, vector<2x64xf32> -> vector<2x64xf32>
    %133 = arith.addf %128, %132 : vector<2x64xf32>
    %134 = vector.extract_strided_slice %97 {offsets = [14, 0], sizes = [2, 64], strides = [1, 1]} : vector<32x64xf32> to vector<2x64xf32>
    %c7_91 = arith.constant 7 : index
    %c0_92 = arith.constant 0 : index
    %c0_93 = arith.constant 0 : index
    %135 = vector.load %arg7[%c7_91, %c0_92, %c0_93] : memref<16x64x64xf32, #tpu.memory_space<vmem>>, vector<1x64x64xf32>
    %136 = vector.shape_cast %135 : vector<1x64x64xf32> to vector<64x64xf32>
    %cst_94 = arith.constant dense<0.000000e+00> : vector<2x64xf32>
    %137 = tpu.matmul %134, %136, %cst_94 {dimension_numbers = #tpu.dot_dimension_numbers<[1], [0], [0], [1], [0, 0, 1, 1], [], []>} : vector<2x64xf32>, vector<64x64xf32>, vector<2x64xf32> -> vector<2x64xf32>
    %138 = arith.addf %133, %137 : vector<2x64xf32>
    %139 = vector.extract_strided_slice %97 {offsets = [16, 0], sizes = [2, 64], strides = [1, 1]} : vector<32x64xf32> to vector<2x64xf32>
    %c8_95 = arith.constant 8 : index
    %c0_96 = arith.constant 0 : index
    %c0_97 = arith.constant 0 : index
    %140 = vector.load %arg7[%c8_95, %c0_96, %c0_97] : memref<16x64x64xf32, #tpu.memory_space<vmem>>, vector<1x64x64xf32>
    %141 = vector.shape_cast %140 : vector<1x64x64xf32> to vector<64x64xf32>
    %cst_98 = arith.constant dense<0.000000e+00> : vector<2x64xf32>
    %142 = tpu.matmul %139, %141, %cst_98 {dimension_numbers = #tpu.dot_dimension_numbers<[1], [0], [0], [1], [0, 0, 1, 1], [], []>} : vector<2x64xf32>, vector<64x64xf32>, vector<2x64xf32> -> vector<2x64xf32>
    %143 = arith.addf %138, %142 : vector<2x64xf32>
    %144 = vector.extract_strided_slice %97 {offsets = [18, 0], sizes = [2, 64], strides = [1, 1]} : vector<32x64xf32> to vector<2x64xf32>
    %c9_99 = arith.constant 9 : index
    %c0_100 = arith.constant 0 : index
    %c0_101 = arith.constant 0 : index
    %145 = vector.load %arg7[%c9_99, %c0_100, %c0_101] : memref<16x64x64xf32, #tpu.memory_space<vmem>>, vector<1x64x64xf32>
    %146 = vector.shape_cast %145 : vector<1x64x64xf32> to vector<64x64xf32>
    %cst_102 = arith.constant dense<0.000000e+00> : vector<2x64xf32>
    %147 = tpu.matmul %144, %146, %cst_102 {dimension_numbers = #tpu.dot_dimension_numbers<[1], [0], [0], [1], [0, 0, 1, 1], [], []>} : vector<2x64xf32>, vector<64x64xf32>, vector<2x64xf32> -> vector<2x64xf32>
    %148 = arith.addf %143, %147 : vector<2x64xf32>
    %149 = vector.extract_strided_slice %97 {offsets = [20, 0], sizes = [2, 64], strides = [1, 1]} : vector<32x64xf32> to vector<2x64xf32>
    %c10_103 = arith.constant 10 : index
    %c0_104 = arith.constant 0 : index
    %c0_105 = arith.constant 0 : index
    %150 = vector.load %arg7[%c10_103, %c0_104, %c0_105] : memref<16x64x64xf32, #tpu.memory_space<vmem>>, vector<1x64x64xf32>
    %151 = vector.shape_cast %150 : vector<1x64x64xf32> to vector<64x64xf32>
    %cst_106 = arith.constant dense<0.000000e+00> : vector<2x64xf32>
    %152 = tpu.matmul %149, %151, %cst_106 {dimension_numbers = #tpu.dot_dimension_numbers<[1], [0], [0], [1], [0, 0, 1, 1], [], []>} : vector<2x64xf32>, vector<64x64xf32>, vector<2x64xf32> -> vector<2x64xf32>
    %153 = arith.addf %148, %152 : vector<2x64xf32>
    %154 = vector.extract_strided_slice %97 {offsets = [22, 0], sizes = [2, 64], strides = [1, 1]} : vector<32x64xf32> to vector<2x64xf32>
    %c11_107 = arith.constant 11 : index
    %c0_108 = arith.constant 0 : index
    %c0_109 = arith.constant 0 : index
    %155 = vector.load %arg7[%c11_107, %c0_108, %c0_109] : memref<16x64x64xf32, #tpu.memory_space<vmem>>, vector<1x64x64xf32>
    %156 = vector.shape_cast %155 : vector<1x64x64xf32> to vector<64x64xf32>
    %cst_110 = arith.constant dense<0.000000e+00> : vector<2x64xf32>
    %157 = tpu.matmul %154, %156, %cst_110 {dimension_numbers = #tpu.dot_dimension_numbers<[1], [0], [0], [1], [0, 0, 1, 1], [], []>} : vector<2x64xf32>, vector<64x64xf32>, vector<2x64xf32> -> vector<2x64xf32>
    %158 = arith.addf %153, %157 : vector<2x64xf32>
    %159 = vector.extract_strided_slice %97 {offsets = [24, 0], sizes = [2, 64], strides = [1, 1]} : vector<32x64xf32> to vector<2x64xf32>
    %c12_111 = arith.constant 12 : index
    %c0_112 = arith.constant 0 : index
    %c0_113 = arith.constant 0 : index
    %160 = vector.load %arg7[%c12_111, %c0_112, %c0_113] : memref<16x64x64xf32, #tpu.memory_space<vmem>>, vector<1x64x64xf32>
    %161 = vector.shape_cast %160 : vector<1x64x64xf32> to vector<64x64xf32>
    %cst_114 = arith.constant dense<0.000000e+00> : vector<2x64xf32>
    %162 = tpu.matmul %159, %161, %cst_114 {dimension_numbers = #tpu.dot_dimension_numbers<[1], [0], [0], [1], [0, 0, 1, 1], [], []>} : vector<2x64xf32>, vector<64x64xf32>, vector<2x64xf32> -> vector<2x64xf32>
    %163 = arith.addf %158, %162 : vector<2x64xf32>
    %164 = vector.extract_strided_slice %97 {offsets = [26, 0], sizes = [2, 64], strides = [1, 1]} : vector<32x64xf32> to vector<2x64xf32>
    %c13_115 = arith.constant 13 : index
    %c0_116 = arith.constant 0 : index
    %c0_117 = arith.constant 0 : index
    %165 = vector.load %arg7[%c13_115, %c0_116, %c0_117] : memref<16x64x64xf32, #tpu.memory_space<vmem>>, vector<1x64x64xf32>
    %166 = vector.shape_cast %165 : vector<1x64x64xf32> to vector<64x64xf32>
    %cst_118 = arith.constant dense<0.000000e+00> : vector<2x64xf32>
    %167 = tpu.matmul %164, %166, %cst_118 {dimension_numbers = #tpu.dot_dimension_numbers<[1], [0], [0], [1], [0, 0, 1, 1], [], []>} : vector<2x64xf32>, vector<64x64xf32>, vector<2x64xf32> -> vector<2x64xf32>
    %168 = arith.addf %163, %167 : vector<2x64xf32>
    %169 = vector.extract_strided_slice %97 {offsets = [28, 0], sizes = [2, 64], strides = [1, 1]} : vector<32x64xf32> to vector<2x64xf32>
    %c14_119 = arith.constant 14 : index
    %c0_120 = arith.constant 0 : index
    %c0_121 = arith.constant 0 : index
    %170 = vector.load %arg7[%c14_119, %c0_120, %c0_121] : memref<16x64x64xf32, #tpu.memory_space<vmem>>, vector<1x64x64xf32>
    %171 = vector.shape_cast %170 : vector<1x64x64xf32> to vector<64x64xf32>
    %cst_122 = arith.constant dense<0.000000e+00> : vector<2x64xf32>
    %172 = tpu.matmul %169, %171, %cst_122 {dimension_numbers = #tpu.dot_dimension_numbers<[1], [0], [0], [1], [0, 0, 1, 1], [], []>} : vector<2x64xf32>, vector<64x64xf32>, vector<2x64xf32> -> vector<2x64xf32>
    %173 = arith.addf %168, %172 : vector<2x64xf32>
    %174 = vector.extract_strided_slice %97 {offsets = [30, 0], sizes = [2, 64], strides = [1, 1]} : vector<32x64xf32> to vector<2x64xf32>
    %c15_123 = arith.constant 15 : index
    %c0_124 = arith.constant 0 : index
    %c0_125 = arith.constant 0 : index
    %175 = vector.load %arg7[%c15_123, %c0_124, %c0_125] : memref<16x64x64xf32, #tpu.memory_space<vmem>>, vector<1x64x64xf32>
    %176 = vector.shape_cast %175 : vector<1x64x64xf32> to vector<64x64xf32>
    %cst_126 = arith.constant dense<0.000000e+00> : vector<2x64xf32>
    %177 = tpu.matmul %174, %176, %cst_126 {dimension_numbers = #tpu.dot_dimension_numbers<[1], [0], [0], [1], [0, 0, 1, 1], [], []>} : vector<2x64xf32>, vector<64x64xf32>, vector<2x64xf32> -> vector<2x64xf32>
    %178 = arith.addf %173, %177 : vector<2x64xf32>
    %c0_127 = arith.constant 0 : index
    %c0_128 = arith.constant 0 : index
    %179 = vector.load %arg8[%c0_127, %c0_128] : memref<1x64xf32, #tpu.memory_space<vmem>>, vector<1x64xf32>
    %180 = vector.broadcast %179 : vector<1x64xf32> to vector<2x64xf32>
    %181 = arith.addf %178, %180 : vector<2x64xf32>
    %cst_129 = arith.constant 0.000000e+00 : f32
    %182 = vector.broadcast %cst_129 : f32 to vector<2x64xf32>
    %183 = arith.maximumf %181, %182 : vector<2x64xf32>
    %c0_130 = arith.constant 0 : index
    %c0_131 = arith.constant 0 : index
    %184 = vector.load %arg9[%c0_130, %c0_131] : memref<64x32xf32, #tpu.memory_space<vmem>>, vector<64x32xf32>
    %cst_132 = arith.constant dense<0.000000e+00> : vector<2x32xf32>
    %185 = tpu.matmul %183, %184, %cst_132 {dimension_numbers = #tpu.dot_dimension_numbers<[1], [0], [0], [1], [0, 0, 1, 1], [], []>} : vector<2x64xf32>, vector<64x32xf32>, vector<2x32xf32> -> vector<2x32xf32>
    %c0_133 = arith.constant 0 : index
    %c0_134 = arith.constant 0 : index
    %186 = vector.load %arg10[%c0_133, %c0_134] : memref<1x32xf32, #tpu.memory_space<vmem>>, vector<1x32xf32>
    %187 = vector.broadcast %186 : vector<1x32xf32> to vector<2x32xf32>
    %188 = arith.addf %185, %187 : vector<2x32xf32>
    %cst_135 = arith.constant 0.000000e+00 : f32
    %189 = vector.broadcast %cst_135 : f32 to vector<2x32xf32>
    %190 = arith.maximumf %188, %189 : vector<2x32xf32>
    %c0_136 = arith.constant 0 : index
    %c0_137 = arith.constant 0 : index
    %191 = vector.load %arg11[%c0_136, %c0_137] : memref<1x32xf32, #tpu.memory_space<vmem>>, vector<1x32xf32>
    %192 = vector.broadcast %191 : vector<1x32xf32> to vector<2x32xf32>
    %193 = arith.mulf %190, %192 : vector<2x32xf32>
    %cst_138 = arith.constant dense<0.000000e+00> : vector<2xf32>
    %194 = vector.multi_reduction <add>, %193, %cst_138 [1] : vector<2x32xf32> to vector<2xf32>
    %195 = vector.shape_cast %194 : vector<2xf32> to vector<2x1xf32>
    %c0_139 = arith.constant 0 : index
    %c0_140 = arith.constant 0 : index
    %196 = vector.load %arg12[%c0_139, %c0_140] : memref<1x1xf32, #tpu.memory_space<vmem>>, vector<1x1xf32>
    %197 = vector.broadcast %196 : vector<1x1xf32> to vector<2x1xf32>
    %198 = arith.addf %195, %197 : vector<2x1xf32>
    %c0_141 = arith.constant 0 : index
    %c0_142 = arith.constant 0 : index
    %199 = vector.load %arg13[%c0_141, %c0_142] : memref<2x1xf32, #tpu.memory_space<vmem>>, vector<2x1xf32>
    tpu.vector_store %arg13[%c0_141, %c0_142], %198 {strides = array<i32>} : memref<2x1xf32, #tpu.memory_space<vmem>>, vector<2x1xf32>,
    return
  }
  func.func @transform_0(%arg0: i32) -> (i32, i32) {
    %c0_i32 = arith.constant 0 : i32
    %c0_i32_0 = arith.constant 0 : i32
    %c0_i32_1 = arith.constant 0 : i32
    return %c0_i32, %c0_i32_0 : i32, i32
  }
  func.func @transform_1(%arg0: i32) -> (i32, i32) {
    %c0_i32 = arith.constant 0 : i32
    %c0_i32_0 = arith.constant 0 : i32
    %c0_i32_1 = arith.constant 0 : i32
    return %c0_i32, %c0_i32_0 : i32, i32
  }
  func.func @transform_2(%arg0: i32) -> (i32, i32) {
    %c0_i32 = arith.constant 0 : i32
    %c0_i32_0 = arith.constant 0 : i32
    %c0_i32_1 = arith.constant 0 : i32
    return %c0_i32, %c0_i32_0 : i32, i32
  }
  func.func @transform_3(%arg0: i32) -> (i32, i32) {
    %c0_i32 = arith.constant 0 : i32
    %c0_i32_0 = arith.constant 0 : i32
    %c0_i32_1 = arith.constant 0 : i32
    return %c0_i32, %c0_i32_0 : i32, i32
  }
  func.func @transform_4(%arg0: i32) -> (i32, i32, i32) {
    %c0_i32 = arith.constant 0 : i32
    %c0_i32_0 = arith.constant 0 : i32
    %c0_i32_1 = arith.constant 0 : i32
    %c0_i32_2 = arith.constant 0 : i32
    return %c0_i32, %c0_i32_0, %c0_i32_1 : i32, i32, i32
  }
  func.func @transform_5(%arg0: i32) -> (i32, i32) {
    %c0_i32 = arith.constant 0 : i32
    %c0_i32_0 = arith.constant 0 : i32
    %c0_i32_1 = arith.constant 0 : i32
    return %c0_i32, %c0_i32_0 : i32, i32
  }
  func.func @transform_6(%arg0: i32) -> (i32, i32, i32) {
    %c0_i32 = arith.constant 0 : i32
    %c0_i32_0 = arith.constant 0 : i32
    %c0_i32_1 = arith.constant 0 : i32
    %c0_i32_2 = arith.constant 0 : i32
    return %c0_i32, %c0_i32_0, %c0_i32_1 : i32, i32, i32
  }
  func.func @transform_7(%arg0: i32) -> (i32, i32) {
    %c0_i32 = arith.constant 0 : i32
    %c0_i32_0 = arith.constant 0 : i32
    %c0_i32_1 = arith.constant 0 : i32
    return %c0_i32, %c0_i32_0 : i32, i32
  }
  func.func @transform_8(%arg0: i32) -> (i32, i32) {
    %c0_i32 = arith.constant 0 : i32
    %c0_i32_0 = arith.constant 0 : i32
    %c0_i32_1 = arith.constant 0 : i32
    return %c0_i32, %c0_i32_0 : i32, i32
  }
  func.func @transform_9(%arg0: i32) -> (i32, i32) {
    %c0_i32 = arith.constant 0 : i32
    %c0_i32_0 = arith.constant 0 : i32
    %c0_i32_1 = arith.constant 0 : i32
    return %c0_i32, %c0_i32_0 : i32, i32
  }
  func.func @transform_10(%arg0: i32) -> (i32, i32) {
    %c0_i32 = arith.constant 0 : i32
    %c0_i32_0 = arith.constant 0 : i32
    %c0_i32_1 = arith.constant 0 : i32
    return %c0_i32, %c0_i32_0 : i32, i32
  }
  func.func @transform_11(%arg0: i32) -> (i32, i32) {
    %c0_i32 = arith.constant 0 : i32
    %c0_i32_0 = arith.constant 0 : i32
    %c0_i32_1 = arith.constant 0 : i32
    return %c0_i32, %c0_i32_0 : i32, i32
  }
  func.func @transform_12(%arg0: i32) -> (i32, i32) {
    %c0_i32 = arith.constant 0 : i32
    %c0_i32_0 = arith.constant 0 : i32
    %c0_i32_1 = arith.constant 0 : i32
    return %c0_i32, %c0_i32_0 : i32, i32
  }
}

</mosaic_0001>

<bundles_post_ra>
// kernel: critic_forward.3
= control target key start
LH: loop header
LB: loop body
LE: loop exit
PB: predicated region body
PF: predicated region fallthrough
CT: control target
= control target key end

     0   :  { %v11710_v0 = vmov 0.0   ;;  %vm11711_vm0 = vmmov 0   ;;  %vm1966_vm1 = vcmask 130048   ;;  %vm7812_vm2 = vcmask 44032   ;;  %s16203_s1 = inlined_call_operand.vmem [shape: bf16[16,6], index: 1, kind: input, shape index: {}]   ;;  %s16204_s0 = inlined_call_operand.vmem [shape: bf16[4418,16], index: 0, kind: input, shape index: {}]   ;;  %s16205_s2 = inlined_call_operand.vmem [shape: f32[1,6], index: 2, kind: input, shape index: {}]   ;;  %s16206_s3 = inlined_call_operand.vmem [shape: bf16[4418,6], index: 3, kind: output, shape index: {}]  }
   0x1   :  { %10311 = vmatprep.subr.bf16.mxu0 %v11710_v0  ;;  %v11425_v1 = vld [vmem:[%s16203_s1] sm:$0xff]   ;;  %10313 = vmatprep.mubr.msk.bf16.mxu0 %vm11711_vm0, %v11710_v0  ;;  %v11427_v3 = vld [vmem:[%s16204_s0 + $0x458] sm:$0xff]   ;;  %v11428_v4 = vld [vmem:[%s16204_s0 + $0x8] sm:$0xff]   ;;  %vm8365_vm3 = vcmask 40960  }
   0x2   :  { %v11426_v2 = vld [vmem:[%s16204_s0] sm:$0xff]   ;;  %11421 = vmatprep.subr.bf16.mxu1 %v11710_v0  ;;  %10869 = vmatprep.mubr.msk.bf16.mxu1 %vm11711_vm0, %v11710_v0  ;;  %v11430_v6 = vld [vmem:[%s16204_s0 + $0x10] sm:$0xff]   ;;  %v11431_v7 = vld [vmem:[%s16204_s0 + $0x468] sm:$0xff]  }
   0x3   :  { %10312 = vmatpush3.bf16.msra.mxu0 %v11425_v1  ;;  %11422 = vmatpush3.bf16.msra.mxu1 %v11425_v1  ;;  %v11429_v5 = vld [vmem:[%s16204_s0 + $0x460] sm:$0xff]   ;;  %v11432_v8 = vld [vmem:[%s16204_s0 + $0x18] sm:$0xff]   ;;  %v11433_v9 = vld [vmem:[%s16204_s0 + $0x470] sm:$0xff]  }
   0x4   :  { %v11434_v10 = vld [vmem:[%s16204_s0 + $0x20] sm:$0xff]   ;;  %v11435_v11 = vld [vmem:[%s16204_s0 + $0x478] sm:$0xff]   ;;  %v11436_v12 = vld [vmem:[%s16204_s0 + $0x28] sm:$0xff]  }
   0x5   :  { %v11437_v13 = vld [vmem:[%s16204_s0 + $0x480] sm:$0xff]   ;;  %v11438_v14 = vld [vmem:[%s16204_s0 + $0x30] sm:$0xff]   ;;  %v11439_v15 = vld [vmem:[%s16204_s0 + $0x488] sm:$0xff]  }
   0x6   :  { %10314 = vmatmul.mubr.msk.bf16.vlgmr.msra.gmra.mrb[0].mxu0 %vm1966_vm1, %v11426_v2  ;;  %10870 = vmatmul.mubr.msk.bf16.vlgmr.msra.gmra.mrb[0].mxu1 %vm1966_vm1, %v11427_v3  ;;  %v11440_v16 = vld [vmem:[%s16204_s0 + $0x38] sm:$0xff]   ;;  %v11441_v17 = vld [vmem:[%s16204_s0 + $0x490] sm:$0xff]   ;;  %v11442_v18 = vld [vmem:[%s16204_s0 + $0x40] sm:$0xff]  }
   0x7   :  { %10317 = vmatprep.mubr.msk.bf16.mxu0 %vm11711_vm0, %v11710_v0  ;;  %10873 = vmatprep.mubr.msk.bf16.mxu1 %vm11711_vm0, %v11710_v0  ;;  %v11443_v19 = vld [vmem:[%s16204_s0 + $0x498] sm:$0xff]   ;;  %v11444_v20 = vld [vmem:[%s16204_s0 + $0x48] sm:$0xff]   ;;  %v11445_v21 = vld [vmem:[%s16204_s0 + $0x4a0] sm:$0xff]  }
   0x8   :  { %v11446_v22 = vld [vmem:[%s16204_s0 + $0x50] sm:$0xff]   ;;  %v11447_v23 = vld [vmem:[%s16204_s0 + $0x4a8] sm:$0xff]   ;;  %v11448_v24 = vld [vmem:[%s16204_s0 + $0x58] sm:$0xff]  }
   0x9   :  { %v11449_v25 = vld [vmem:[%s16204_s0 + $0x4b0] sm:$0xff]   ;;  %v11450_v26 = vld [vmem:[%s16204_s0 + $0x60] sm:$0xff]   ;;  %v11451_v27 = vld [vmem:[%s16204_s0 + $0x4b8] sm:$0xff]  }
   0xa   :  { %v11452_v28 = vld [vmem:[%s16204_s0 + $0x68] sm:$0xff]   ;;  %v11453_v29 = vld [vmem:[%s16204_s0 + $0x4c0] sm:$0xff]   ;;  %v11454_v30 = vld [vmem:[%s16204_s0 + $0x70] sm:$0xff]  }
   0xb   :  { %v11455_v31 = vld [vmem:[%s16204_s0 + $0x4c8] sm:$0xff]   ;;  %v11456_v32 = vld [vmem:[%s16204_s0 + $0x78] sm:$0xff]   ;;  %v11457_v33 = vld [vmem:[%s16204_s0 + $0x4d0] sm:$0xff]  }
   0xc   :  { %v11458_v34 = vld [vmem:[%s16204_s0 + $0x80] sm:$0xff]   ;;  %v11459_v35 = vld [vmem:[%s16204_s0 + $0x4d8] sm:$0xff]   ;;  %v11460_v36 = vld [vmem:[%s16204_s0 + $0x88] sm:$0xff]  }
   0xd   :  { %v11461_v37 = vld [vmem:[%s16204_s0 + $0x4e0] sm:$0xff]   ;;  %v11462_v38 = vld [vmem:[%s16204_s0 + $0x90] sm:$0xff]   ;;  %v11463_v39 = vld [vmem:[%s16204_s0 + $0x4e8] sm:$0xff]  }
   0xe   :  { %10318 = vmatmul.mubr.msk.bf16.gmra.mrb[4].mxu0 %vm1966_vm1, %v11428_v4  ;;  %10874 = vmatmul.mubr.msk.bf16.gmra.mrb[4].mxu1 %vm1966_vm1, %v11429_v5  ;;  %v11464_v40 = vld [vmem:[%s16204_s0 + $0x98] sm:$0xff]   ;;  %v11465_v41 = vld [vmem:[%s16204_s0 + $0x4f0] sm:$0xff]   ;;  %v11466_v42 = vld [vmem:[%s16204_s0 + $0xa0] sm:$0xff]  }
   0xf   :  { %10321 = vmatprep.mubr.msk.bf16.mxu0 %vm11711_vm0, %v11710_v0  ;;  %10877 = vmatprep.mubr.msk.bf16.mxu1 %vm11711_vm0, %v11710_v0  ;;  %v11467_v43 = vld [vmem:[%s16204_s0 + $0x4f8] sm:$0xff]   ;;  %v11468_v44 = vld [vmem:[%s16204_s0 + $0xa8] sm:$0xff]   ;;  %v11469_v45 = vld [vmem:[%s16204_s0 + $0x500] sm:$0xff]  }
  0x10   :  { %v11470_v46 = vld [vmem:[%s16204_s0 + $0xb0] sm:$0xff]   ;;  %v11471_v47 = vld [vmem:[%s16204_s0 + $0x508] sm:$0xff]   ;;  %v11472_v48 = vld [vmem:[%s16204_s0 + $0xb8] sm:$0xff]  }
  0x11   :  { %v11473_v49 = vld [vmem:[%s16204_s0 + $0x510] sm:$0xff]   ;;  %v11474_v50 = vld [vmem:[%s16204_s0 + $0xc0] sm:$0xff]   ;;  %v11475_v51 = vld [vmem:[%s16204_s0 + $0x518] sm:$0xff]  }
  0x12   :  { %v11476_v52 = vld [vmem:[%s16204_s0 + $0xc8] sm:$0xff]   ;;  %v11477_v53 = vld [vmem:[%s16204_s0 + $0x520] sm:$0xff]   ;;  %v11478_v54 = vld [vmem:[%s16204_s0 + $0xd0] sm:$0xff]  }
  0x13   :  { %v11479_v55 = vld [vmem:[%s16204_s0 + $0x528] sm:$0xff]   ;;  %v12064_v56 = vld [vmem:[%s16205_s2] ss:$0 sm:$0xff]  ;;  %v11480_v61 = vld [vmem:[%s16204_s0 + $0xd8] sm:$0xff]  }
  0x14   :  { %v11481_v1 = vld [vmem:[%s16204_s0 + $0x530] sm:$0xff]  }
  0x16   :  { %10322 = vmatmul.mubr.msk.bf16.gmra.mrb[8].mxu0 %vm1966_vm1, %v11430_v6  ;;  %10878 = vmatmul.mubr.msk.bf16.gmra.mrb[8].mxu1 %vm1966_vm1, %v11431_v7 }
  0x17   :  { %10325 = vmatprep.mubr.msk.bf16.mxu0 %vm11711_vm0, %v11710_v0  ;;  %10881 = vmatprep.mubr.msk.bf16.mxu1 %vm11711_vm0, %v11710_v0 }
  0x1e   :  { %10326 = vmatmul.mubr.msk.bf16.gmra.mrb[12].mxu0 %vm1966_vm1, %v11432_v8  ;;  %10882 = vmatmul.mubr.msk.bf16.gmra.mrb[12].mxu1 %vm1966_vm1, %v11433_v9 }
  0x1f   :  { %10329 = vmatprep.mubr.msk.bf16.mxu0 %vm11711_vm0, %v11710_v0  ;;  %10885 = vmatprep.mubr.msk.bf16.mxu1 %vm11711_vm0, %v11710_v0 }
  0x26   :  { %10330 = vmatmul.mubr.msk.bf16.gmra.mrb[16].mxu0 %vm1966_vm1, %v11434_v10  ;;  %10886 = vmatmul.mubr.msk.bf16.gmra.mrb[16].mxu1 %vm1966_vm1, %v11435_v11 }
  0x27   :  { %10333 = vmatprep.mubr.msk.bf16.mxu0 %vm11711_vm0, %v11710_v0  ;;  %10889 = vmatprep.mubr.msk.bf16.mxu1 %vm11711_vm0, %v11710_v0 }
  0x2e   :  { %10334 = vmatmul.mubr.msk.bf16.gmra.mrb[20].mxu0 %vm1966_vm1, %v11436_v12  ;;  %10890 = vmatmul.mubr.msk.bf16.gmra.mrb[20].mxu1 %vm1966_vm1, %v11437_v13 }
  0x2f   :  { %10337 = vmatprep.mubr.msk.bf16.mxu0 %vm11711_vm0, %v11710_v0  ;;  %10893 = vmatprep.mubr.msk.bf16.mxu1 %vm11711_vm0, %v11710_v0 }
  0x36   :  { %10338 = vmatmul.mubr.msk.bf16.gmra.mrb[24].mxu0 %vm1966_vm1, %v11438_v14  ;;  %10894 = vmatmul.mubr.msk.bf16.gmra.mrb[24].mxu1 %vm1966_vm1, %v11439_v15 }
  0x37   :  { %10341 = vmatprep.mubr.msk.bf16.mxu0 %vm11711_vm0, %v11710_v0  ;;  %10897 = vmatprep.mubr.msk.bf16.mxu1 %vm11711_vm0, %v11710_v0 }
  0x3e   :  { %10342 = vmatmul.mubr.msk.bf16.gmra.mrb[28].mxu0 %vm1966_vm1, %v11440_v16  ;;  %10898 = vmatmul.mubr.msk.bf16.gmra.mrb[28].mxu1 %vm1966_vm1, %v11441_v17 }
  0x3f   :  { %10345 = vmatprep.mubr.msk.bf16.mxu0 %vm11711_vm0, %v11710_v0  ;;  %10901 = vmatprep.mubr.msk.bf16.mxu1 %vm11711_vm0, %v11710_v0 }
  0x46   :  { %10346 = vmatmul.mubr.msk.bf16.gmra.mrb[32].mxu0 %vm1966_vm1, %v11442_v18  ;;  %10902 = vmatmul.mubr.msk.bf16.gmra.mrb[32].mxu1 %vm1966_vm1, %v11443_v19 }
  0x47   :  { %10349 = vmatprep.mubr.msk.bf16.mxu0 %vm11711_vm0, %v11710_v0  ;;  %10905 = vmatprep.mubr.msk.bf16.mxu1 %vm11711_vm0, %v11710_v0 }
  0x4e   :  { %10350 = vmatmul.mubr.msk.bf16.gmra.mrb[36].mxu0 %vm1966_vm1, %v11444_v20  ;;  %10906 = vmatmul.mubr.msk.bf16.gmra.mrb[36].mxu1 %vm1966_vm1, %v11445_v21  ;;  %v11482_v20 = vld [vmem:[%s16204_s0 + $0xe0] sm:$0xff]  }
  0x4f   :  { %10353 = vmatprep.mubr.msk.bf16.mxu0 %vm11711_vm0, %v11710_v0  ;;  %10909 = vmatprep.mubr.msk.bf16.mxu1 %vm11711_vm0, %v11710_v0 }
  0x56   :  { %10354 = vmatmul.mubr.msk.bf16.gmra.mrb[40].mxu0 %vm1966_vm1, %v11446_v22  ;;  %10910 = vmatmul.mubr.msk.bf16.gmra.mrb[40].mxu1 %vm1966_vm1, %v11447_v23  ;;  %v11483_v23 = vld [vmem:[%s16204_s0 + $0x538] sm:$0xff]  }
  0x57   :  { %10357 = vmatprep.mubr.msk.bf16.mxu0 %vm11711_vm0, %v11710_v0  ;;  %10913 = vmatprep.mubr.msk.bf16.mxu1 %vm11711_vm0, %v11710_v0 }
  0x5e   :  { %10358 = vmatmul.mubr.msk.bf16.gmra.mrb[44].mxu0 %vm1966_vm1, %v11448_v24  ;;  %10914 = vmatmul.mubr.msk.bf16.gmra.mrb[44].mxu1 %vm1966_vm1, %v11449_v25 }
  0x5f   :  { %10361 = vmatprep.mubr.msk.bf16.mxu0 %vm11711_vm0, %v11710_v0  ;;  %10917 = vmatprep.mubr.msk.bf16.mxu1 %vm11711_vm0, %v11710_v0 }
  0x66   :  { %10362 = vmatmul.mubr.msk.bf16.gmra.mrb[48].mxu0 %vm1966_vm1, %v11450_v26  ;;  %10918 = vmatmul.mubr.msk.bf16.gmra.mrb[48].mxu1 %vm1966_vm1, %v11451_v27 }
  0x67   :  { %10365 = vmatprep.mubr.msk.bf16.mxu0 %vm11711_vm0, %v11710_v0  ;;  %10921 = vmatprep.mubr.msk.bf16.mxu1 %vm11711_vm0, %v11710_v0 }
  0x6e   :  { %10366 = vmatmul.mubr.msk.bf16.gmra.mrb[52].mxu0 %vm1966_vm1, %v11452_v28  ;;  %10922 = vmatmul.mubr.msk.bf16.gmra.mrb[52].mxu1 %vm1966_vm1, %v11453_v29 }
  0x6f   :  { %10369 = vmatprep.mubr.msk.bf16.mxu0 %vm11711_vm0, %v11710_v0  ;;  %10925 = vmatprep.mubr.msk.bf16.mxu1 %vm11711_vm0, %v11710_v0 }
  0x76   :  { %10370 = vmatmul.mubr.msk.bf16.gmra.mrb[56].mxu0 %vm1966_vm1, %v11454_v30  ;;  %10926 = vmatmul.mubr.msk.bf16.gmra.mrb[56].mxu1 %vm1966_vm1, %v11455_v31 }
  0x77   :  { %10373 = vmatprep.mubr.msk.bf16.mxu0 %vm11711_vm0, %v11710_v0  ;;  %10929 = vmatprep.mubr.msk.bf16.mxu1 %vm11711_vm0, %v11710_v0 }
  0x7e   :  { %10374 = vmatmul.mubr.msk.bf16.gmra.mrb[60].mxu0 %vm1966_vm1, %v11456_v32  ;;  %10930 = vmatmul.mubr.msk.bf16.gmra.mrb[60].mxu1 %vm1966_vm1, %v11457_v33 }
  0x7f   :  { %10377 = vmatprep.mubr.msk.bf16.mxu0 %vm11711_vm0, %v11710_v0  ;;  %10933 = vmatprep.mubr.msk.bf16.mxu1 %vm11711_vm0, %v11710_v0 }
  0x86   :  { %10378 = vmatmul.mubr.msk.bf16.gmra.mrb[64].mxu0 %vm1966_vm1, %v11458_v34  ;;  %10934 = vmatmul.mubr.msk.bf16.gmra.mrb[64].mxu1 %vm1966_vm1, %v11459_v35 }
  0x87   :  { %10381 = vmatprep.mubr.msk.bf16.mxu0 %vm11711_vm0, %v11710_v0  ;;  %10937 = vmatprep.mubr.msk.bf16.mxu1 %vm11711_vm0, %v11710_v0 }
  0x8e   :  { %10382 = vmatmul.mubr.msk.bf16.gmra.mrb[68].mxu0 %vm1966_vm1, %v11460_v36  ;;  %10938 = vmatmul.mubr.msk.bf16.gmra.mrb[68].mxu1 %vm1966_vm1, %v11461_v37 }
  0x8f   :  { %10385 = vmatprep.mubr.msk.bf16.mxu0 %vm11711_vm0, %v11710_v0  ;;  %10941 = vmatprep.mubr.msk.bf16.mxu1 %vm11711_vm0, %v11710_v0 }
  0x96   :  { %10386 = vmatmul.mubr.msk.bf16.gmra.mrb[72].mxu0 %vm1966_vm1, %v11462_v38  ;;  %10942 = vmatmul.mubr.msk.bf16.gmra.mrb[72].mxu1 %vm1966_vm1, %v11463_v39 }
  0x97   :  { %10389 = vmatprep.mubr.msk.bf16.mxu0 %vm11711_vm0, %v11710_v0  ;;  %10945 = vmatprep.mubr.msk.bf16.mxu1 %vm11711_vm0, %v11710_v0 }
  0x9e   :  { %10390 = vmatmul.mubr.msk.bf16.gmra.mrb[76].mxu0 %vm1966_vm1, %v11464_v40  ;;  %10946 = vmatmul.mubr.msk.bf16.gmra.mrb[76].mxu1 %vm1966_vm1, %v11465_v41 }
  0x9f   :  { %10393 = vmatprep.mubr.msk.bf16.mxu0 %vm11711_vm0, %v11710_v0  ;;  %10949 = vmatprep.mubr.msk.bf16.mxu1 %vm11711_vm0, %v11710_v0 }
  0xa6   :  { %10394 = vmatmul.mubr.msk.bf16.gmra.mrb[80].mxu0 %vm1966_vm1, %v11466_v42  ;;  %10950 = vmatmul.mubr.msk.bf16.gmra.mrb[80].mxu1 %vm1966_vm1, %v11467_v43  ;;  %v11484_v42 = vld [vmem:[%s16204_s0 + $0xe8] sm:$0xff]  }
  0xa7   :  { %10397 = vmatprep.mubr.msk.bf16.mxu0 %vm11711_vm0, %v11710_v0  ;;  %10953 = vmatprep.mubr.msk.bf16.mxu1 %vm11711_vm0, %v11710_v0 }
  0xae   :  { %10398 = vmatmul.mubr.msk.bf16.gmra.mrb[84].mxu0 %vm1966_vm1, %v11468_v44  ;;  %10954 = vmatmul.mubr.msk.bf16.gmra.mrb[84].mxu1 %vm1966_vm1, %v11469_v45  ;;  %v11485_v45 = vld [vmem:[%s16204_s0 + $0x540] sm:$0xff]  }
  0xaf   :  { %10401 = vmatprep.mubr.msk.bf16.mxu0 %vm11711_vm0, %v11710_v0  ;;  %10957 = vmatprep.mubr.msk.bf16.mxu1 %vm11711_vm0, %v11710_v0 }
  0xb6   :  { %10402 = vmatmul.mubr.msk.bf16.gmra.mrb[88].mxu0 %vm1966_vm1, %v11470_v46  ;;  %10958 = vmatmul.mubr.msk.bf16.gmra.mrb[88].mxu1 %vm1966_vm1, %v11471_v47 }
  0xb7   :  { %10405 = vmatprep.mubr.msk.bf16.mxu0 %vm11711_vm0, %v11710_v0  ;;  %10961 = vmatprep.mubr.msk.bf16.mxu1 %vm11711_vm0, %v11710_v0 }
  0xbe   :  { %10406 = vmatmul.mubr.msk.bf16.gmra.mrb[92].mxu0 %vm1966_vm1, %v11472_v48  ;;  %10962 = vmatmul.mubr.msk.bf16.gmra.mrb[92].mxu1 %vm1966_vm1, %v11473_v49 }
  0xbf   :  { %10409 = vmatprep.mubr.msk.bf16.mxu0 %vm11711_vm0, %v11710_v0  ;;  %10965 = vmatprep.mubr.msk.bf16.mxu1 %vm11711_vm0, %v11710_v0 }
  0xc6   :  { %10410 = vmatmul.mubr.msk.bf16.gmra.mrb[96].mxu0 %vm1966_vm1, %v11474_v50  ;;  %10966 = vmatmul.mubr.msk.bf16.gmra.mrb[96].mxu1 %vm1966_vm1, %v11475_v51 }
  0xc7   :  { %10413 = vmatprep.mubr.msk.bf16.mxu0 %vm11711_vm0, %v11710_v0  ;;  %10969 = vmatprep.mubr.msk.bf16.mxu1 %vm11711_vm0, %v11710_v0 }
  0xce   :  { %10414 = vmatmul.mubr.msk.bf16.gmra.mrb[100].mxu0 %vm1966_vm1, %v11476_v52  ;;  %10970 = vmatmul.mubr.msk.bf16.gmra.mrb[100].mxu1 %vm1966_vm1, %v11477_v53 }
  0xcf   :  { %10417 = vmatprep.mubr.msk.bf16.mxu0 %vm11711_vm0, %v11710_v0  ;;  %10973 = vmatprep.mubr.msk.bf16.mxu1 %vm11711_vm0, %v11710_v0 }
  0xd6   :  { %10418 = vmatmul.mubr.msk.bf16.gmra.mrb[104].mxu0 %vm1966_vm1, %v11478_v54  ;;  %10974 = vmatmul.mubr.msk.bf16.gmra.mrb[104].mxu1 %vm1966_vm1, %v11479_v55 }
  0xd7   :  { %10421 = vmatprep.mubr.msk.bf16.mxu0 %vm11711_vm0, %v11710_v0  ;;  %10977 = vmatprep.mubr.msk.bf16.mxu1 %vm11711_vm0, %v11710_v0 }
  0xd9   :  { %v2832_v57 = vpop.f32.mrb[0].mxu0  ;;  %v3944_v58 = vpop.f32.mrb[0].mxu1 }
  0xda   :  { %v2833_v59 = vadd.f32 %v12064_v56, %v2832_v57  ;;  %v10315_v60 = vpop.f32.mrb[1].mxu0  ;;  %v3945_v62 = vadd.f32 %v12064_v56, %v3944_v58  ;;  %v10871_v63 = vpop.f32.mrb[1].mxu1 }
  0xdb   :  { %v2835_v2 = vpop.f32.mrb[2].mxu0  ;;  %v3947_v3 = vpop.f32.mrb[2].mxu1 }
  0xdc   :  { %v5046_v4 = vmax.f32 %v2833_v59, 0.0  ;;  %v2836_v5 = vadd.f32 %v12064_v56, %v2835_v2  ;;  %v10316_v6 = vpop.f32.mrb[3].mxu0  ;;  %v5324_v7 = vmax.f32 %v3945_v62, 0.0  ;;  %v3948_v8 = vadd.f32 %v12064_v56, %v3947_v3  ;;  %v10872_v9 = vpop.f32.mrb[3].mxu1  ;;  %v11486_v2 = vld [vmem:[%s16204_s0 + $0xf0] sm:$0xff]  }
  0xde   :  { %v9480_v10 = vpack.c.bf16 %v5046_v4, %v5046_v4  ;;  %v5047_v11 = vmax.f32 %v2836_v5, 0.0  ;;  %10422 = vmatmul.mubr.msk.bf16.gmra.mrb[108].mxu0 %vm1966_vm1, %v11480_v61  ;;  %v9758_v12 = vpack.c.bf16 %v5324_v7, %v5324_v7  ;;  %v5325_v13 = vmax.f32 %v3948_v8, 0.0  ;;  %10978 = vmatmul.mubr.msk.bf16.gmra.mrb[108].mxu1 %vm1966_vm1, %v11481_v1  ;;  %v11487_v5 = vld [vmem:[%s16204_s0 + $0x548] sm:$0xff]  }
  0xdf   :  { %10425 = vmatprep.mubr.msk.bf16.mxu0 %vm11711_vm0, %v11710_v0  ;;  %10981 = vmatprep.mubr.msk.bf16.mxu1 %vm11711_vm0, %v11710_v0 }
  0xe0   :  { %7813 = vst.msk [vmem:[%s16206_s3] sm:$0xf] %vm7812_vm2, %v9480_v10  ;;  %v9481_v14 = vpack.c.bf16 %v5047_v11, %v5047_v11  ;;  %8091 = vst.msk [vmem:[%s16206_s3 + $0x458] sm:$0xf] %vm7812_vm2, %v9758_v12  ;;  %v9759_v15 = vpack.c.bf16 %v5325_v13, %v5325_v13 }
  0xe1   :  { %v2840_v16 = vpop.f32.mrb[4].mxu0  ;;  %v3952_v17 = vpop.f32.mrb[4].mxu1 }
  0xe2   :  { %7814 = vst.msk [vmem:[%s16206_s3 + $0x4] sm:$0xf] %vm7812_vm2, %v9481_v14  ;;  %v2841_v18 = vadd.f32 %v12064_v56, %v2840_v16  ;;  %v10319_v19 = vpop.f32.mrb[5].mxu0  ;;  %8092 = vst.msk [vmem:[%s16206_s3 + $0x45c] sm:$0xf] %vm7812_vm2, %v9759_v15  ;;  %v3953_v21 = vadd.f32 %v12064_v56, %v3952_v17  ;;  %v10875_v22 = vpop.f32.mrb[5].mxu1 }
  0xe3   :  { %v2843_v24 = vpop.f32.mrb[6].mxu0  ;;  %v3955_v25 = vpop.f32.mrb[6].mxu1 }
  0xe4   :  { %v5048_v26 = vmax.f32 %v2841_v18, 0.0  ;;  %v2844_v27 = vadd.f32 %v12064_v56, %v2843_v24  ;;  %v10320_v28 = vpop.f32.mrb[7].mxu0  ;;  %v5326_v29 = vmax.f32 %v3953_v21, 0.0  ;;  %v3956_v30 = vadd.f32 %v12064_v56, %v3955_v25  ;;  %v10876_v31 = vpop.f32.mrb[7].mxu1  ;;  %v11488_v24 = vld [vmem:[%s16204_s0 + $0xf8] sm:$0xff]  }
  0xe6   :  { %v9482_v32 = vpack.c.bf16 %v5048_v26, %v5048_v26  ;;  %v5049_v33 = vmax.f32 %v2844_v27, 0.0  ;;  %10426 = vmatmul.mubr.msk.bf16.gmra.mrb[112].mxu0 %vm1966_vm1, %v11482_v20  ;;  %v9760_v34 = vpack.c.bf16 %v5326_v29, %v5326_v29  ;;  %v5327_v35 = vmax.f32 %v3956_v30, 0.0  ;;  %10982 = vmatmul.mubr.msk.bf16.gmra.mrb[112].mxu1 %vm1966_vm1, %v11483_v23  ;;  %v11489_v27 = vld [vmem:[%s16204_s0 + $0x550] sm:$0xff]  }
  0xe7   :  { %10429 = vmatprep.mubr.msk.bf16.mxu0 %vm11711_vm0, %v11710_v0  ;;  %10985 = vmatprep.mubr.msk.bf16.mxu1 %vm11711_vm0, %v11710_v0 }
  0xe8   :  { %7815 = vst.msk [vmem:[%s16206_s3 + $0x8] sm:$0xf] %vm7812_vm2, %v9482_v32  ;;  %v9483_v36 = vpack.c.bf16 %v5049_v33, %v5049_v33  ;;  %8093 = vst.msk [vmem:[%s16206_s3 + $0x460] sm:$0xf] %vm7812_vm2, %v9760_v34  ;;  %v9761_v37 = vpack.c.bf16 %v5327_v35, %v5327_v35 }
  0xe9   :  { %v2848_v38 = vpop.f32.mrb[8].mxu0  ;;  %v3960_v39 = vpop.f32.mrb[8].mxu1 }
  0xea   :  { %7816 = vst.msk [vmem:[%s16206_s3 + $0xc] sm:$0xf] %vm7812_vm2, %v9483_v36  ;;  %v2849_v40 = vadd.f32 %v12064_v56, %v2848_v38  ;;  %v10323_v41 = vpop.f32.mrb[9].mxu0  ;;  %8094 = vst.msk [vmem:[%s16206_s3 + $0x464] sm:$0xf] %vm7812_vm2, %v9761_v37  ;;  %v3961_v43 = vadd.f32 %v12064_v56, %v3960_v39  ;;  %v10879_v44 = vpop.f32.mrb[9].mxu1 }
  0xeb   :  { %v2851_v46 = vpop.f32.mrb[10].mxu0  ;;  %v3963_v47 = vpop.f32.mrb[10].mxu1 }
  0xec   :  { %v5050_v48 = vmax.f32 %v2849_v40, 0.0  ;;  %v2852_v49 = vadd.f32 %v12064_v56, %v2851_v46  ;;  %v10324_v50 = vpop.f32.mrb[11].mxu0  ;;  %v5328_v51 = vmax.f32 %v3961_v43, 0.0  ;;  %v3964_v52 = vadd.f32 %v12064_v56, %v3963_v47  ;;  %v10880_v53 = vpop.f32.mrb[11].mxu1  ;;  %v11490_v46 = vld [vmem:[%s16204_s0 + $0x100] sm:$0xff]  }
  0xee   :  { %v9484_v54 = vpack.c.bf16 %v5050_v48, %v5050_v48  ;;  %v5051_v55 = vmax.f32 %v2852_v49, 0.0  ;;  %10430 = vmatmul.mubr.msk.bf16.gmra.mrb[116].mxu0 %vm1966_vm1, %v11484_v42  ;;  %v9762_v57 = vpack.c.bf16 %v5328_v51, %v5328_v51  ;;  %v5329_v58 = vmax.f32 %v3964_v52, 0.0  ;;  %10986 = vmatmul.mubr.msk.bf16.gmra.mrb[116].mxu1 %vm1966_vm1, %v11485_v45  ;;  %v11491_v49 = vld [vmem:[%s16204_s0 + $0x558] sm:$0xff]  }
  0xef   :  { %10433 = vmatprep.mubr.msk.bf16.mxu0 %vm11711_vm0, %v11710_v0  ;;  %10989 = vmatprep.mubr.msk.bf16.mxu1 %vm11711_vm0, %v11710_v0 }
  0xf0   :  { %7817 = vst.msk [vmem:[%s16206_s3 + $0x10] sm:$0xf] %vm7812_vm2, %v9484_v54  ;;  %v9485_v59 = vpack.c.bf16 %v5051_v55, %v5051_v55  ;;  %8095 = vst.msk [vmem:[%s16206_s3 + $0x468] sm:$0xf] %vm7812_vm2, %v9762_v57  ;;  %v9763_v60 = vpack.c.bf16 %v5329_v58, %v5329_v58 }
  0xf1   :  { %v2856_v61 = vpop.f32.mrb[12].mxu0  ;;  %v3968_v62 = vpop.f32.mrb[12].mxu1 }
  0xf2   :  { %7818 = vst.msk [vmem:[%s16206_s3 + $0x14] sm:$0xf] %vm7812_vm2, %v9485_v59  ;;  %v2857_v63 = vadd.f32 %v12064_v56, %v2856_v61  ;;  %v10327_v1 = vpop.f32.mrb[13].mxu0  ;;  %8096 = vst.msk [vmem:[%s16206_s3 + $0x46c] sm:$0xf] %vm7812_vm2, %v9763_v60  ;;  %v3969_v3 = vadd.f32 %v12064_v56, %v3968_v62  ;;  %v10883_v4 = vpop.f32.mrb[13].mxu1 }
  0xf3   :  { %v2859_v6 = vpop.f32.mrb[14].mxu0  ;;  %v3971_v7 = vpop.f32.mrb[14].mxu1 }
  0xf4   :  { %v5052_v8 = vmax.f32 %v2857_v63, 0.0  ;;  %v2860_v9 = vadd.f32 %v12064_v56, %v2859_v6  ;;  %v10328_v10 = vpop.f32.mrb[15].mxu0  ;;  %v5330_v11 = vmax.f32 %v3969_v3, 0.0  ;;  %v3972_v12 = vadd.f32 %v12064_v56, %v3971_v7  ;;  %v10884_v13 = vpop.f32.mrb[15].mxu1  ;;  %v11492_v6 = vld [vmem:[%s16204_s0 + $0x108] sm:$0xff]  }
  0xf6   :  { %v9486_v14 = vpack.c.bf16 %v5052_v8, %v5052_v8  ;;  %v5053_v15 = vmax.f32 %v2860_v9, 0.0  ;;  %10434 = vmatmul.mubr.msk.bf16.gmra.mrb[120].mxu0 %vm1966_vm1, %v11486_v2  ;;  %v9764_v16 = vpack.c.bf16 %v5330_v11, %v5330_v11  ;;  %v5331_v17 = vmax.f32 %v3972_v12, 0.0  ;;  %10990 = vmatmul.mubr.msk.bf16.gmra.mrb[120].mxu1 %vm1966_vm1, %v11487_v5  ;;  %v11493_v9 = vld [vmem:[%s16204_s0 + $0x560] sm:$0xff]  }
  0xf7   :  { %10437 = vmatprep.mubr.msk.bf16.mxu0 %vm11711_vm0, %v11710_v0  ;;  %10993 = vmatprep.mubr.msk.bf16.mxu1 %vm11711_vm0, %v11710_v0 }
  0xf8   :  { %7819 = vst.msk [vmem:[%s16206_s3 + $0x18] sm:$0xf] %vm7812_vm2, %v9486_v14  ;;  %v9487_v18 = vpack.c.bf16 %v5053_v15, %v5053_v15  ;;  %8097 = vst.msk [vmem:[%s16206_s3 + $0x470] sm:$0xf] %vm7812_vm2, %v9764_v16  ;;  %v9765_v19 = vpack.c.bf16 %v5331_v17, %v5331_v17 }
  0xf9   :  { %v2864_v20 = vpop.f32.mrb[16].mxu0  ;;  %v3976_v21 = vpop.f32.mrb[16].mxu1 }
  0xfa   :  { %7820 = vst.msk [vmem:[%s16206_s3 + $0x1c] sm:$0xf] %vm7812_vm2, %v9487_v18  ;;  %v2865_v22 = vadd.f32 %v12064_v56, %v2864_v20  ;;  %v10331_v23 = vpop.f32.mrb[17].mxu0  ;;  %8098 = vst.msk [vmem:[%s16206_s3 + $0x474] sm:$0xf] %vm7812_vm2, %v9765_v19  ;;  %v3977_v25 = vadd.f32 %v12064_v56, %v3976_v21  ;;  %v10887_v26 = vpop.f32.mrb[17].mxu1 }
  0xfb   :  { %v2867_v28 = vpop.f32.mrb[18].mxu0  ;;  %v3979_v29 = vpop.f32.mrb[18].mxu1 }
  0xfc   :  { %v5054_v30 = vmax.f32 %v2865_v22, 0.0  ;;  %v2868_v31 = vadd.f32 %v12064_v56, %v2867_v28  ;;  %v10332_v32 = vpop.f32.mrb[19].mxu0  ;;  %v5332_v33 = vmax.f32 %v3977_v25, 0.0  ;;  %v3980_v34 = vadd.f32 %v12064_v56, %v3979_v29  ;;  %v10888_v35 = vpop.f32.mrb[19].mxu1  ;;  %v11494_v28 = vld [vmem:[%s16204_s0 + $0x110] sm:$0xff]  }
  0xfe   :  { %v9488_v36 = vpack.c.bf16 %v5054_v30, %v5054_v30  ;;  %v5055_v37 = vmax.f32 %v2868_v31, 0.0  ;;  %10438 = vmatmul.mubr.msk.bf16.gmra.mrb[124].mxu0 %vm1966_vm1, %v11488_v24  ;;  %v9766_v38 = vpack.c.bf16 %v5332_v33, %v5332_v33  ;;  %v5333_v39 = vmax.f32 %v3980_v34, 0.0  ;;  %10994 = vmatmul.mubr.msk.bf16.gmra.mrb[124].mxu1 %vm1966_vm1, %v11489_v27  ;;  %v11495_v31 = vld [vmem:[%s16204_s0 + $0x568] sm:$0xff]  }
  0xff   :  { %10441 = vmatprep.mubr.msk.bf16.mxu0 %vm11711_vm0, %v11710_v0  ;;  %10997 = vmatprep.mubr.msk.bf16.mxu1 %vm11711_vm0, %v11710_v0 }
 0x100   :  { %7821 = vst.msk [vmem:[%s16206_s3 + $0x20] sm:$0xf] %vm7812_vm2, %v9488_v36  ;;  %v9489_v40 = vpack.c.bf16 %v5055_v37, %v5055_v37  ;;  %8099 = vst.msk [vmem:[%s16206_s3 + $0x478] sm:$0xf] %vm7812_vm2, %v9766_v38  ;;  %v9767_v41 = vpack.c.bf16 %v5333_v39, %v5333_v39 }
 0x101   :  { %v2872_v42 = vpop.f32.mrb[20].mxu0  ;;  %v3984_v43 = vpop.f32.mrb[20].mxu1 }
 0x102   :  { %7822 = vst.msk [vmem:[%s16206_s3 + $0x24] sm:$0xf] %vm7812_vm2, %v9489_v40  ;;  %v2873_v44 = vadd.f32 %v12064_v56, %v2872_v42  ;;  %v10335_v45 = vpop.f32.mrb[21].mxu0  ;;  %8100 = vst.msk [vmem:[%s16206_s3 + $0x47c] sm:$0xf] %vm7812_vm2, %v9767_v41  ;;  %v3985_v47 = vadd.f32 %v12064_v56, %v3984_v43  ;;  %v10891_v48 = vpop.f32.mrb[21].mxu1 }
 0x103   :  { %v2875_v50 = vpop.f32.mrb[22].mxu0  ;;  %v3987_v51 = vpop.f32.mrb[22].mxu1 }
 0x104   :  { %v5056_v52 = vmax.f32 %v2873_v44, 0.0  ;;  %v2876_v53 = vadd.f32 %v12064_v56, %v2875_v50  ;;  %v10336_v54 = vpop.f32.mrb[23].mxu0  ;;  %v5334_v55 = vmax.f32 %v3985_v47, 0.0  ;;  %v3988_v57 = vadd.f32 %v12064_v56, %v3987_v51  ;;  %v10892_v58 = vpop.f32.mrb[23].mxu1  ;;  %v11496_v50 = vld [vmem:[%s16204_s0 + $0x118] sm:$0xff]  }
 0x106   :  { %v9490_v59 = vpack.c.bf16 %v5056_v52, %v5056_v52  ;;  %v5057_v60 = vmax.f32 %v2876_v53, 0.0  ;;  %10442 = vmatmul.mubr.msk.bf16.gmra.mrb[128].mxu0 %vm1966_vm1, %v11490_v46  ;;  %v9768_v61 = vpack.c.bf16 %v5334_v55, %v5334_v55  ;;  %v5335_v62 = vmax.f32 %v3988_v57, 0.0  ;;  %10998 = vmatmul.mubr.msk.bf16.gmra.mrb[128].mxu1 %vm1966_vm1, %v11491_v49  ;;  %v11497_v53 = vld [vmem:[%s16204_s0 + $0x570] sm:$0xff]  }
 0x107   :  { %10445 = vmatprep.mubr.msk.bf16.mxu0 %vm11711_vm0, %v11710_v0  ;;  %11001 = vmatprep.mubr.msk.bf16.mxu1 %vm11711_vm0, %v11710_v0 }
 0x108   :  { %7823 = vst.msk [vmem:[%s16206_s3 + $0x28] sm:$0xf] %vm7812_vm2, %v9490_v59  ;;  %v9491_v63 = vpack.c.bf16 %v5057_v60, %v5057_v60  ;;  %8101 = vst.msk [vmem:[%s16206_s3 + $0x480] sm:$0xf] %vm7812_vm2, %v9768_v61  ;;  %v9769_v1 = vpack.c.bf16 %v5335_v62, %v5335_v62 }
 0x109   :  { %v2880_v2 = vpop.f32.mrb[24].mxu0  ;;  %v3992_v3 = vpop.f32.mrb[24].mxu1 }
 0x10a   :  { %7824 = vst.msk [vmem:[%s16206_s3 + $0x2c] sm:$0xf] %vm7812_vm2, %v9491_v63  ;;  %v2881_v4 = vadd.f32 %v12064_v56, %v2880_v2  ;;  %v10339_v5 = vpop.f32.mrb[25].mxu0  ;;  %8102 = vst.msk [vmem:[%s16206_s3 + $0x484] sm:$0xf] %vm7812_vm2, %v9769_v1  ;;  %v3993_v7 = vadd.f32 %v12064_v56, %v3992_v3  ;;  %v10895_v8 = vpop.f32.mrb[25].mxu1 }
 0x10b   :  { %v2883_v10 = vpop.f32.mrb[26].mxu0  ;;  %v3995_v11 = vpop.f32.mrb[26].mxu1 }
 0x10c   :  { %v5058_v12 = vmax.f32 %v2881_v4, 0.0  ;;  %v2884_v13 = vadd.f32 %v12064_v56, %v2883_v10  ;;  %v10340_v14 = vpop.f32.mrb[27].mxu0  ;;  %v5336_v15 = vmax.f32 %v3993_v7, 0.0  ;;  %v3996_v16 = vadd.f32 %v12064_v56, %v3995_v11  ;;  %v10896_v17 = vpop.f32.mrb[27].mxu1  ;;  %v11498_v10 = vld [vmem:[%s16204_s0 + $0x120] sm:$0xff]  }
 0x10e   :  { %v9492_v18 = vpack.c.bf16 %v5058_v12, %v5058_v12  ;;  %v5059_v19 = vmax.f32 %v2884_v13, 0.0  ;;  %10446 = vmatmul.mubr.msk.bf16.gmra.mrb[132].mxu0 %vm1966_vm1, %v11492_v6  ;;  %v9770_v20 = vpack.c.bf16 %v5336_v15, %v5336_v15  ;;  %v5337_v21 = vmax.f32 %v3996_v16, 0.0  ;;  %11002 = vmatmul.mubr.msk.bf16.gmra.mrb[132].mxu1 %vm1966_vm1, %v11493_v9  ;;  %v11499_v13 = vld [vmem:[%s16204_s0 + $0x578] sm:$0xff]  }
 0x10f   :  { %10449 = vmatprep.mubr.msk.bf16.mxu0 %vm11711_vm0, %v11710_v0  ;;  %11005 = vmatprep.mubr.msk.bf16.mxu1 %vm11711_vm0, %v11710_v0 }
 0x110   :  { %7825 = vst.msk [vmem:[%s16206_s3 + $0x30] sm:$0xf] %vm7812_vm2, %v9492_v18  ;;  %v9493_v22 = vpack.c.bf16 %v5059_v19, %v5059_v19  ;;  %8103 = vst.msk [vmem:[%s16206_s3 + $0x488] sm:$0xf] %vm7812_vm2, %v9770_v20  ;;  %v9771_v23 = vpack.c.bf16 %v5337_v21, %v5337_v21 }
 0x111   :  { %v2888_v24 = vpop.f32.mrb[28].mxu0  ;;  %v4000_v25 = vpop.f32.mrb[28].mxu1 }
 0x112   :  { %7826 = vst.msk [vmem:[%s16206_s3 + $0x34] sm:$0xf] %vm7812_vm2, %v9493_v22  ;;  %v2889_v26 = vadd.f32 %v12064_v56, %v2888_v24  ;;  %v10343_v27 = vpop.f32.mrb[29].mxu0  ;;  %8104 = vst.msk [vmem:[%s16206_s3 + $0x48c] sm:$0xf] %vm7812_vm2, %v9771_v23  ;;  %v4001_v29 = vadd.f32 %v12064_v56, %v4000_v25  ;;  %v10899_v30 = vpop.f32.mrb[29].mxu1 }
 0x113   :  { %v2891_v32 = vpop.f32.mrb[30].mxu0  ;;  %v4003_v33 = vpop.f32.mrb[30].mxu1 }
 0x114   :  { %v5060_v34 = vmax.f32 %v2889_v26, 0.0  ;;  %v2892_v35 = vadd.f32 %v12064_v56, %v2891_v32  ;;  %v10344_v36 = vpop.f32.mrb[31].mxu0  ;;  %v5338_v37 = vmax.f32 %v4001_v29, 0.0  ;;  %v4004_v38 = vadd.f32 %v12064_v56, %v4003_v33  ;;  %v10900_v39 = vpop.f32.mrb[31].mxu1  ;;  %v11500_v32 = vld [vmem:[%s16204_s0 + $0x128] sm:$0xff]  }
 0x116   :  { %v9494_v40 = vpack.c.bf16 %v5060_v34, %v5060_v34  ;;  %v5061_v41 = vmax.f32 %v2892_v35, 0.0  ;;  %10450 = vmatmul.mubr.msk.bf16.gmra.mrb[136].mxu0 %vm1966_vm1, %v11494_v28  ;;  %v9772_v42 = vpack.c.bf16 %v5338_v37, %v5338_v37  ;;  %v5339_v43 = vmax.f32 %v4004_v38, 0.0  ;;  %11006 = vmatmul.mubr.msk.bf16.gmra.mrb[136].mxu1 %vm1966_vm1, %v11495_v31  ;;  %v11501_v35 = vld [vmem:[%s16204_s0 + $0x580] sm:$0xff]  }
 0x117   :  { %10453 = vmatprep.mubr.msk.bf16.mxu0 %vm11711_vm0, %v11710_v0  ;;  %11009 = vmatprep.mubr.msk.bf16.mxu1 %vm11711_vm0, %v11710_v0 }
 0x118   :  { %7827 = vst.msk [vmem:[%s16206_s3 + $0x38] sm:$0xf] %vm7812_vm2, %v9494_v40  ;;  %v9495_v44 = vpack.c.bf16 %v5061_v41, %v5061_v41  ;;  %8105 = vst.msk [vmem:[%s16206_s3 + $0x490] sm:$0xf] %vm7812_vm2, %v9772_v42  ;;  %v9773_v45 = vpack.c.bf16 %v5339_v43, %v5339_v43 }
 0x119   :  { %v2896_v46 = vpop.f32.mrb[32].mxu0  ;;  %v4008_v47 = vpop.f32.mrb[32].mxu1 }
 0x11a   :  { %7828 = vst.msk [vmem:[%s16206_s3 + $0x3c] sm:$0xf] %vm7812_vm2, %v9495_v44  ;;  %v2897_v48 = vadd.f32 %v12064_v56, %v2896_v46  ;;  %v10347_v49 = vpop.f32.mrb[33].mxu0  ;;  %8106 = vst.msk [vmem:[%s16206_s3 + $0x494] sm:$0xf] %vm7812_vm2, %v9773_v45  ;;  %v4009_v51 = vadd.f32 %v12064_v56, %v4008_v47  ;;  %v10903_v52 = vpop.f32.mrb[33].mxu1 }
 0x11b   :  { %v2899_v54 = vpop.f32.mrb[34].mxu0  ;;  %v4011_v55 = vpop.f32.mrb[34].mxu1 }
 0x11c   :  { %v5062_v57 = vmax.f32 %v2897_v48, 0.0  ;;  %v2900_v58 = vadd.f32 %v12064_v56, %v2899_v54  ;;  %v10348_v59 = vpop.f32.mrb[35].mxu0  ;;  %v5340_v60 = vmax.f32 %v4009_v51, 0.0  ;;  %v4012_v61 = vadd.f32 %v12064_v56, %v4011_v55  ;;  %v10904_v62 = vpop.f32.mrb[35].mxu1  ;;  %v11502_v54 = vld [vmem:[%s16204_s0 + $0x130] sm:$0xff]  }
 0x11e   :  { %v9496_v63 = vpack.c.bf16 %v5062_v57, %v5062_v57  ;;  %v5063_v1 = vmax.f32 %v2900_v58, 0.0  ;;  %10454 = vmatmul.mubr.msk.bf16.gmra.mrb[140].mxu0 %vm1966_vm1, %v11496_v50  ;;  %v9774_v2 = vpack.c.bf16 %v5340_v60, %v5340_v60  ;;  %v5341_v3 = vmax.f32 %v4012_v61, 0.0  ;;  %11010 = vmatmul.mubr.msk.bf16.gmra.mrb[140].mxu1 %vm1966_vm1, %v11497_v53  ;;  %v11503_v58 = vld [vmem:[%s16204_s0 + $0x588] sm:$0xff]  }
 0x11f   :  { %10457 = vmatprep.mubr.msk.bf16.mxu0 %vm11711_vm0, %v11710_v0  ;;  %11013 = vmatprep.mubr.msk.bf16.mxu1 %vm11711_vm0, %v11710_v0 }
 0x120   :  { %7829 = vst.msk [vmem:[%s16206_s3 + $0x40] sm:$0xf] %vm7812_vm2, %v9496_v63  ;;  %v9497_v4 = vpack.c.bf16 %v5063_v1, %v5063_v1  ;;  %8107 = vst.msk [vmem:[%s16206_s3 + $0x498] sm:$0xf] %vm7812_vm2, %v9774_v2  ;;  %v9775_v5 = vpack.c.bf16 %v5341_v3, %v5341_v3 }
 0x121   :  { %v2904_v6 = vpop.f32.mrb[36].mxu0  ;;  %v4016_v7 = vpop.f32.mrb[36].mxu1 }
 0x122   :  { %7830 = vst.msk [vmem:[%s16206_s3 + $0x44] sm:$0xf] %vm7812_vm2, %v9497_v4  ;;  %v2905_v8 = vadd.f32 %v12064_v56, %v2904_v6  ;;  %v10351_v9 = vpop.f32.mrb[37].mxu0  ;;  %8108 = vst.msk [vmem:[%s16206_s3 + $0x49c] sm:$0xf] %vm7812_vm2, %v9775_v5  ;;  %v4017_v11 = vadd.f32 %v12064_v56, %v4016_v7  ;;  %v10907_v12 = vpop.f32.mrb[37].mxu1 }
 0x123   :  { %v2907_v14 = vpop.f32.mrb[38].mxu0  ;;  %v4019_v15 = vpop.f32.mrb[38].mxu1 }
 0x124   :  { %v5064_v16 = vmax.f32 %v2905_v8, 0.0  ;;  %v2908_v17 = vadd.f32 %v12064_v56, %v2907_v14  ;;  %v10352_v18 = vpop.f32.mrb[39].mxu0  ;;  %v5342_v19 = vmax.f32 %v4017_v11, 0.0  ;;  %v4020_v20 = vadd.f32 %v12064_v56, %v4019_v15  ;;  %v10908_v21 = vpop.f32.mrb[39].mxu1  ;;  %v11504_v14 = vld [vmem:[%s16204_s0 + $0x138] sm:$0xff]  }
 0x126   :  { %v9498_v22 = vpack.c.bf16 %v5064_v16, %v5064_v16  ;;  %v5065_v23 = vmax.f32 %v2908_v17, 0.0  ;;  %10458 = vmatmul.mubr.msk.bf16.gmra.mrb[144].mxu0 %vm1966_vm1, %v11498_v10  ;;  %v9776_v24 = vpack.c.bf16 %v5342_v19, %v5342_v19  ;;  %v5343_v25 = vmax.f32 %v4020_v20, 0.0  ;;  %11014 = vmatmul.mubr.msk.bf16.gmra.mrb[144].mxu1 %vm1966_vm1, %v11499_v13  ;;  %v11505_v17 = vld [vmem:[%s16204_s0 + $0x590] sm:$0xff]  }
 0x127   :  { %10461 = vmatprep.mubr.msk.bf16.mxu0 %vm11711_vm0, %v11710_v0  ;;  %11017 = vmatprep.mubr.msk.bf16.mxu1 %vm11711_vm0, %v11710_v0 }
 0x128   :  { %7831 = vst.msk [vmem:[%s16206_s3 + $0x48] sm:$0xf] %vm7812_vm2, %v9498_v22  ;;  %v9499_v26 = vpack.c.bf16 %v5065_v23, %v5065_v23  ;;  %8109 = vst.msk [vmem:[%s16206_s3 + $0x4a0] sm:$0xf] %vm7812_vm2, %v9776_v24  ;;  %v9777_v27 = vpack.c.bf16 %v5343_v25, %v5343_v25 }
 0x129   :  { %v2912_v28 = vpop.f32.mrb[40].mxu0  ;;  %v4024_v29 = vpop.f32.mrb[40].mxu1 }
 0x12a   :  { %7832 = vst.msk [vmem:[%s16206_s3 + $0x4c] sm:$0xf] %vm7812_vm2, %v9499_v26  ;;  %v2913_v30 = vadd.f32 %v12064_v56, %v2912_v28  ;;  %v10355_v31 = vpop.f32.mrb[41].mxu0  ;;  %8110 = vst.msk [vmem:[%s16206_s3 + $0x4a4] sm:$0xf] %vm7812_vm2, %v9777_v27  ;;  %v4025_v33 = vadd.f32 %v12064_v56, %v4024_v29  ;;  %v10911_v34 = vpop.f32.mrb[41].mxu1 }
 0x12b   :  { %v2915_v36 = vpop.f32.mrb[42].mxu0  ;;  %v4027_v37 = vpop.f32.mrb[42].mxu1 }
 0x12c   :  { %v5066_v38 = vmax.f32 %v2913_v30, 0.0  ;;  %v2916_v39 = vadd.f32 %v12064_v56, %v2915_v36  ;;  %v10356_v40 = vpop.f32.mrb[43].mxu0  ;;  %v5344_v41 = vmax.f32 %v4025_v33, 0.0  ;;  %v4028_v42 = vadd.f32 %v12064_v56, %v4027_v37  ;;  %v10912_v43 = vpop.f32.mrb[43].mxu1  ;;  %v11506_v36 = vld [vmem:[%s16204_s0 + $0x140] sm:$0xff]  }
 0x12e   :  { %v9500_v44 = vpack.c.bf16 %v5066_v38, %v5066_v38  ;;  %v5067_v45 = vmax.f32 %v2916_v39, 0.0  ;;  %10462 = vmatmul.mubr.msk.bf16.gmra.mrb[148].mxu0 %vm1966_vm1, %v11500_v32  ;;  %v9778_v46 = vpack.c.bf16 %v5344_v41, %v5344_v41  ;;  %v5345_v47 = vmax.f32 %v4028_v42, 0.0  ;;  %11018 = vmatmul.mubr.msk.bf16.gmra.mrb[148].mxu1 %vm1966_vm1, %v11501_v35  ;;  %v11507_v39 = vld [vmem:[%s16204_s0 + $0x598] sm:$0xff]  }
 0x12f   :  { %10465 = vmatprep.mubr.msk.bf16.mxu0 %vm11711_vm0, %v11710_v0  ;;  %11021 = vmatprep.mubr.msk.bf16.mxu1 %vm11711_vm0, %v11710_v0 }
 0x130   :  { %7833 = vst.msk [vmem:[%s16206_s3 + $0x50] sm:$0xf] %vm7812_vm2, %v9500_v44  ;;  %v9501_v48 = vpack.c.bf16 %v5067_v45, %v5067_v45  ;;  %8111 = vst.msk [vmem:[%s16206_s3 + $0x4a8] sm:$0xf] %vm7812_vm2, %v9778_v46  ;;  %v9779_v49 = vpack.c.bf16 %v5345_v47, %v5345_v47 }
 0x131   :  { %v2920_v50 = vpop.f32.mrb[44].mxu0  ;;  %v4032_v51 = vpop.f32.mrb[44].mxu1 }
 0x132   :  { %7834 = vst.msk [vmem:[%s16206_s3 + $0x54] sm:$0xf] %vm7812_vm2, %v9501_v48  ;;  %v2921_v52 = vadd.f32 %v12064_v56, %v2920_v50  ;;  %v10359_v53 = vpop.f32.mrb[45].mxu0  ;;  %8112 = vst.msk [vmem:[%s16206_s3 + $0x4ac] sm:$0xf] %vm7812_vm2, %v9779_v49  ;;  %v4033_v55 = vadd.f32 %v12064_v56, %v4032_v51  ;;  %v10915_v57 = vpop.f32.mrb[45].mxu1 }
 0x133   :  { %v2923_v59 = vpop.f32.mrb[46].mxu0  ;;  %v4035_v60 = vpop.f32.mrb[46].mxu1 }
 0x134   :  { %v5068_v61 = vmax.f32 %v2921_v52, 0.0  ;;  %v2924_v62 = vadd.f32 %v12064_v56, %v2923_v59  ;;  %v10360_v63 = vpop.f32.mrb[47].mxu0  ;;  %v5346_v1 = vmax.f32 %v4033_v55, 0.0  ;;  %v4036_v2 = vadd.f32 %v12064_v56, %v4035_v60  ;;  %v10916_v3 = vpop.f32.mrb[47].mxu1  ;;  %v11508_v59 = vld [vmem:[%s16204_s0 + $0x148] sm:$0xff]  }
 0x136   :  { %v9502_v4 = vpack.c.bf16 %v5068_v61, %v5068_v61  ;;  %v5069_v5 = vmax.f32 %v2924_v62, 0.0  ;;  %10466 = vmatmul.mubr.msk.bf16.gmra.mrb[152].mxu0 %vm1966_vm1, %v11502_v54  ;;  %v9780_v6 = vpack.c.bf16 %v5346_v1, %v5346_v1  ;;  %v5347_v7 = vmax.f32 %v4036_v2, 0.0  ;;  %11022 = vmatmul.mubr.msk.bf16.gmra.mrb[152].mxu1 %vm1966_vm1, %v11503_v58  ;;  %v11509_v62 = vld [vmem:[%s16204_s0 + $0x5a0] sm:$0xff]  }
 0x137   :  { %10469 = vmatprep.mubr.msk.bf16.mxu0 %vm11711_vm0, %v11710_v0  ;;  %11025 = vmatprep.mubr.msk.bf16.mxu1 %vm11711_vm0, %v11710_v0 }
 0x138   :  { %7835 = vst.msk [vmem:[%s16206_s3 + $0x58] sm:$0xf] %vm7812_vm2, %v9502_v4  ;;  %v9503_v8 = vpack.c.bf16 %v5069_v5, %v5069_v5  ;;  %8113 = vst.msk [vmem:[%s16206_s3 + $0x4b0] sm:$0xf] %vm7812_vm2, %v9780_v6  ;;  %v9781_v9 = vpack.c.bf16 %v5347_v7, %v5347_v7 }
 0x139   :  { %v2928_v10 = vpop.f32.mrb[48].mxu0  ;;  %v4040_v11 = vpop.f32.mrb[48].mxu1 }
 0x13a   :  { %7836 = vst.msk [vmem:[%s16206_s3 + $0x5c] sm:$0xf] %vm7812_vm2, %v9503_v8  ;;  %v2929_v12 = vadd.f32 %v12064_v56, %v2928_v10  ;;  %v10363_v13 = vpop.f32.mrb[49].mxu0  ;;  %8114 = vst.msk [vmem:[%s16206_s3 + $0x4b4] sm:$0xf] %vm7812_vm2, %v9781_v9  ;;  %v4041_v15 = vadd.f32 %v12064_v56, %v4040_v11  ;;  %v10919_v16 = vpop.f32.mrb[49].mxu1 }
 0x13b   :  { %v2931_v18 = vpop.f32.mrb[50].mxu0  ;;  %v4043_v19 = vpop.f32.mrb[50].mxu1 }
 0x13c   :  { %v5070_v20 = vmax.f32 %v2929_v12, 0.0  ;;  %v2932_v21 = vadd.f32 %v12064_v56, %v2931_v18  ;;  %v10364_v22 = vpop.f32.mrb[51].mxu0  ;;  %v5348_v23 = vmax.f32 %v4041_v15, 0.0  ;;  %v4044_v24 = vadd.f32 %v12064_v56, %v4043_v19  ;;  %v10920_v25 = vpop.f32.mrb[51].mxu1  ;;  %v11510_v18 = vld [vmem:[%s16204_s0 + $0x150] sm:$0xff]  }
 0x13e   :  { %v9504_v26 = vpack.c.bf16 %v5070_v20, %v5070_v20  ;;  %v5071_v27 = vmax.f32 %v2932_v21, 0.0  ;;  %10470 = vmatmul.mubr.msk.bf16.gmra.mrb[156].mxu0 %vm1966_vm1, %v11504_v14  ;;  %v9782_v28 = vpack.c.bf16 %v5348_v23, %v5348_v23  ;;  %v5349_v29 = vmax.f32 %v4044_v24, 0.0  ;;  %11026 = vmatmul.mubr.msk.bf16.gmra.mrb[156].mxu1 %vm1966_vm1, %v11505_v17  ;;  %v11511_v21 = vld [vmem:[%s16204_s0 + $0x5a8] sm:$0xff]  }
 0x13f   :  { %10473 = vmatprep.mubr.msk.bf16.mxu0 %vm11711_vm0, %v11710_v0  ;;  %11029 = vmatprep.mubr.msk.bf16.mxu1 %vm11711_vm0, %v11710_v0 }
 0x140   :  { %7837 = vst.msk [vmem:[%s16206_s3 + $0x60] sm:$0xf] %vm7812_vm2, %v9504_v26  ;;  %v9505_v30 = vpack.c.bf16 %v5071_v27, %v5071_v27  ;;  %8115 = vst.msk [vmem:[%s16206_s3 + $0x4b8] sm:$0xf] %vm7812_vm2, %v9782_v28  ;;  %v9783_v31 = vpack.c.bf16 %v5349_v29, %v5349_v29 }
 0x141   :  { %v2936_v32 = vpop.f32.mrb[52].mxu0  ;;  %v4048_v33 = vpop.f32.mrb[52].mxu1 }
 0x142   :  { %7838 = vst.msk [vmem:[%s16206_s3 + $0x64] sm:$0xf] %vm7812_vm2, %v9505_v30  ;;  %v2937_v34 = vadd.f32 %v12064_v56, %v2936_v32  ;;  %v10367_v35 = vpop.f32.mrb[53].mxu0  ;;  %8116 = vst.msk [vmem:[%s16206_s3 + $0x4bc] sm:$0xf] %vm7812_vm2, %v9783_v31  ;;  %v4049_v37 = vadd.f32 %v12064_v56, %v4048_v33  ;;  %v10923_v38 = vpop.f32.mrb[53].mxu1 }
 0x143   :  { %v2939_v40 = vpop.f32.mrb[54].mxu0  ;;  %v4051_v41 = vpop.f32.mrb[54].mxu1 }
 0x144   :  { %v5072_v42 = vmax.f32 %v2937_v34, 0.0  ;;  %v2940_v43 = vadd.f32 %v12064_v56, %v2939_v40  ;;  %v10368_v44 = vpop.f32.mrb[55].mxu0  ;;  %v5350_v45 = vmax.f32 %v4049_v37, 0.0  ;;  %v4052_v46 = vadd.f32 %v12064_v56, %v4051_v41  ;;  %v10924_v47 = vpop.f32.mrb[55].mxu1  ;;  %v11512_v40 = vld [vmem:[%s16204_s0 + $0x158] sm:$0xff]  }
 0x146   :  { %v9506_v48 = vpack.c.bf16 %v5072_v42, %v5072_v42  ;;  %v5073_v49 = vmax.f32 %v2940_v43, 0.0  ;;  %10474 = vmatmul.mubr.msk.bf16.gmra.mrb[160].mxu0 %vm1966_vm1, %v11506_v36  ;;  %v9784_v50 = vpack.c.bf16 %v5350_v45, %v5350_v45  ;;  %v5351_v51 = vmax.f32 %v4052_v46, 0.0  ;;  %11030 = vmatmul.mubr.msk.bf16.gmra.mrb[160].mxu1 %vm1966_vm1, %v11507_v39  ;;  %v11513_v43 = vld [vmem:[%s16204_s0 + $0x5b0] sm:$0xff]  }
 0x147   :  { %10477 = vmatprep.mubr.msk.bf16.mxu0 %vm11711_vm0, %v11710_v0  ;;  %11033 = vmatprep.mubr.msk.bf16.mxu1 %vm11711_vm0, %v11710_v0 }
 0x148   :  { %7839 = vst.msk [vmem:[%s16206_s3 + $0x68] sm:$0xf] %vm7812_vm2, %v9506_v48  ;;  %v9507_v52 = vpack.c.bf16 %v5073_v49, %v5073_v49  ;;  %8117 = vst.msk [vmem:[%s16206_s3 + $0x4c0] sm:$0xf] %vm7812_vm2, %v9784_v50  ;;  %v9785_v53 = vpack.c.bf16 %v5351_v51, %v5351_v51 }
 0x149   :  { %v2944_v54 = vpop.f32.mrb[56].mxu0  ;;  %v4056_v55 = vpop.f32.mrb[56].mxu1 }
 0x14a   :  { %7840 = vst.msk [vmem:[%s16206_s3 + $0x6c] sm:$0xf] %vm7812_vm2, %v9507_v52  ;;  %v2945_v57 = vadd.f32 %v12064_v56, %v2944_v54  ;;  %v10371_v58 = vpop.f32.mrb[57].mxu0  ;;  %8118 = vst.msk [vmem:[%s16206_s3 + $0x4c4] sm:$0xf] %vm7812_vm2, %v9785_v53  ;;  %v4057_v60 = vadd.f32 %v12064_v56, %v4056_v55  ;;  %v10927_v61 = vpop.f32.mrb[57].mxu1 }
 0x14b   :  { %v2947_v63 = vpop.f32.mrb[58].mxu0  ;;  %v4059_v1 = vpop.f32.mrb[58].mxu1 }
 0x14c   :  { %v5074_v2 = vmax.f32 %v2945_v57, 0.0  ;;  %v2948_v3 = vadd.f32 %v12064_v56, %v2947_v63  ;;  %v10372_v4 = vpop.f32.mrb[59].mxu0  ;;  %v5352_v5 = vmax.f32 %v4057_v60, 0.0  ;;  %v4060_v6 = vadd.f32 %v12064_v56, %v4059_v1  ;;  %v10928_v7 = vpop.f32.mrb[59].mxu1  ;;  %v12613_v60 = vld [vmem:[%s16205_s2] ss:$0 sm:$0xff] }
 0x14d   :  { %v11514_v63 = vld [vmem:[%s16204_s0 + $0x160] sm:$0xff]  }
 0x14e   :  { %v9508_v8 = vpack.c.bf16 %v5074_v2, %v5074_v2  ;;  %v5075_v9 = vmax.f32 %v2948_v3, 0.0  ;;  %10478 = vmatmul.mubr.msk.bf16.gmra.mrb[164].mxu0 %vm1966_vm1, %v11508_v59  ;;  %v9786_v10 = vpack.c.bf16 %v5352_v5, %v5352_v5  ;;  %v5353_v11 = vmax.f32 %v4060_v6, 0.0  ;;  %11034 = vmatmul.mubr.msk.bf16.gmra.mrb[164].mxu1 %vm1966_vm1, %v11509_v62  ;;  %v11515_v3 = vld [vmem:[%s16204_s0 + $0x5b8] sm:$0xff]  }
 0x14f   :  { %10481 = vmatprep.mubr.msk.bf16.mxu0 %vm11711_vm0, %v11710_v0  ;;  %11037 = vmatprep.mubr.msk.bf16.mxu1 %vm11711_vm0, %v11710_v0 }
 0x150   :  { %7841 = vst.msk [vmem:[%s16206_s3 + $0x70] sm:$0xf] %vm7812_vm2, %v9508_v8  ;;  %v9509_v12 = vpack.c.bf16 %v5075_v9, %v5075_v9  ;;  %8119 = vst.msk [vmem:[%s16206_s3 + $0x4c8] sm:$0xf] %vm7812_vm2, %v9786_v10  ;;  %v9787_v13 = vpack.c.bf16 %v5353_v11, %v5353_v11 }
 0x151   :  { %v2952_v14 = vpop.f32.mrb[60].mxu0  ;;  %v4064_v15 = vpop.f32.mrb[60].mxu1 }
 0x152   :  { %7842 = vst.msk [vmem:[%s16206_s3 + $0x74] sm:$0xf] %vm7812_vm2, %v9509_v12  ;;  %v2953_v16 = vadd.f32 %v12064_v56, %v2952_v14  ;;  %v10375_v17 = vpop.f32.mrb[61].mxu0  ;;  %8120 = vst.msk [vmem:[%s16206_s3 + $0x4cc] sm:$0xf] %vm7812_vm2, %v9787_v13  ;;  %v4065_v19 = vadd.f32 %v12064_v56, %v4064_v15  ;;  %v10931_v20 = vpop.f32.mrb[61].mxu1 }
 0x153   :  { %v2955_v22 = vpop.f32.mrb[62].mxu0  ;;  %v4067_v23 = vpop.f32.mrb[62].mxu1 }
 0x154   :  { %v5076_v24 = vmax.f32 %v2953_v16, 0.0  ;;  %v2956_v25 = vadd.f32 %v12064_v56, %v2955_v22  ;;  %v10376_v26 = vpop.f32.mrb[63].mxu0  ;;  %v5354_v27 = vmax.f32 %v4065_v19, 0.0  ;;  %v4068_v28 = vadd.f32 %v12064_v56, %v4067_v23  ;;  %v10932_v29 = vpop.f32.mrb[63].mxu1  ;;  %v11516_v22 = vld [vmem:[%s16204_s0 + $0x168] sm:$0xff]  }
 0x156   :  { %v9510_v30 = vpack.c.bf16 %v5076_v24, %v5076_v24  ;;  %v5077_v31 = vmax.f32 %v2956_v25, 0.0  ;;  %10482 = vmatmul.mubr.msk.bf16.gmra.mrb[168].mxu0 %vm1966_vm1, %v11510_v18  ;;  %v9788_v32 = vpack.c.bf16 %v5354_v27, %v5354_v27  ;;  %v5355_v33 = vmax.f32 %v4068_v28, 0.0  ;;  %11038 = vmatmul.mubr.msk.bf16.gmra.mrb[168].mxu1 %vm1966_vm1, %v11511_v21  ;;  %v11517_v25 = vld [vmem:[%s16204_s0 + $0x5c0] sm:$0xff]  }
 0x157   :  { %10485 = vmatprep.mubr.msk.bf16.mxu0 %vm11711_vm0, %v11710_v0  ;;  %11041 = vmatprep.mubr.msk.bf16.mxu1 %vm11711_vm0, %v11710_v0 }
 0x158   :  { %7843 = vst.msk [vmem:[%s16206_s3 + $0x78] sm:$0xf] %vm7812_vm2, %v9510_v30  ;;  %v9511_v34 = vpack.c.bf16 %v5077_v31, %v5077_v31  ;;  %8121 = vst.msk [vmem:[%s16206_s3 + $0x4d0] sm:$0xf] %vm7812_vm2, %v9788_v32  ;;  %v9789_v35 = vpack.c.bf16 %v5355_v33, %v5355_v33 }
 0x159   :  { %v2960_v36 = vpop.f32.mrb[64].mxu0  ;;  %v4072_v37 = vpop.f32.mrb[64].mxu1 }
 0x15a   :  { %7844 = vst.msk [vmem:[%s16206_s3 + $0x7c] sm:$0xf] %vm7812_vm2, %v9511_v34  ;;  %v2961_v38 = vadd.f32 %v12064_v56, %v2960_v36  ;;  %v10379_v39 = vpop.f32.mrb[65].mxu0  ;;  %8122 = vst.msk [vmem:[%s16206_s3 + $0x4d4] sm:$0xf] %vm7812_vm2, %v9789_v35  ;;  %v4073_v41 = vadd.f32 %v12064_v56, %v4072_v37  ;;  %v10935_v42 = vpop.f32.mrb[65].mxu1 }
 0x15b   :  { %v2963_v44 = vpop.f32.mrb[66].mxu0  ;;  %v4075_v45 = vpop.f32.mrb[66].mxu1 }
 0x15c   :  { %v5078_v46 = vmax.f32 %v2961_v38, 0.0  ;;  %v2964_v47 = vadd.f32 %v12064_v56, %v2963_v44  ;;  %v10380_v48 = vpop.f32.mrb[67].mxu0  ;;  %v5356_v49 = vmax.f32 %v4073_v41, 0.0  ;;  %v4076_v50 = vadd.f32 %v12064_v56, %v4075_v45  ;;  %v10936_v51 = vpop.f32.mrb[67].mxu1  ;;  %v11518_v44 = vld [vmem:[%s16204_s0 + $0x170] sm:$0xff]  }
 0x15e   :  { %v9512_v52 = vpack.c.bf16 %v5078_v46, %v5078_v46  ;;  %v5079_v53 = vmax.f32 %v2964_v47, 0.0  ;;  %10486 = vmatmul.mubr.msk.bf16.gmra.mrb[172].mxu0 %vm1966_vm1, %v11512_v40  ;;  %v9790_v54 = vpack.c.bf16 %v5356_v49, %v5356_v49  ;;  %v5357_v55 = vmax.f32 %v4076_v50, 0.0  ;;  %11042 = vmatmul.mubr.msk.bf16.gmra.mrb[172].mxu1 %vm1966_vm1, %v11513_v43  ;;  %v11519_v47 = vld [vmem:[%s16204_s0 + $0x5c8] sm:$0xff]  }
 0x15f   :  { %10489 = vmatprep.mubr.msk.bf16.mxu0 %vm11711_vm0, %v11710_v0  ;;  %11045 = vmatprep.mubr.msk.bf16.mxu1 %vm11711_vm0, %v11710_v0 }
 0x160   :  { %7845 = vst.msk [vmem:[%s16206_s3 + $0x80] sm:$0xf] %vm7812_vm2, %v9512_v52  ;;  %v9513_v56 = vpack.c.bf16 %v5079_v53, %v5079_v53  ;;  %8123 = vst.msk [vmem:[%s16206_s3 + $0x4d8] sm:$0xf] %vm7812_vm2, %v9790_v54  ;;  %v9791_v57 = vpack.c.bf16 %v5357_v55, %v5357_v55 }
 0x161   :  { %v2968_v58 = vpop.f32.mrb[68].mxu0  ;;  %v4080_v59 = vpop.f32.mrb[68].mxu1 }
 0x162   :  { %7846 = vst.msk [vmem:[%s16206_s3 + $0x84] sm:$0xf] %vm7812_vm2, %v9513_v56  ;;  %v2969_v61 = vadd.f32 %v12613_v60, %v2968_v58  ;;  %v10383_v62 = vpop.f32.mrb[69].mxu0  ;;  %8124 = vst.msk [vmem:[%s16206_s3 + $0x4dc] sm:$0xf] %vm7812_vm2, %v9791_v57  ;;  %v4081_v1 = vadd.f32 %v12613_v60, %v4080_v59  ;;  %v10939_v2 = vpop.f32.mrb[69].mxu1 }
 0x163   :  { %v2971_v4 = vpop.f32.mrb[70].mxu0  ;;  %v4083_v5 = vpop.f32.mrb[70].mxu1 }
 0x164   :  { %v5080_v6 = vmax.f32 %v2969_v61, 0.0  ;;  %v2972_v7 = vadd.f32 %v12613_v60, %v2971_v4  ;;  %v10384_v8 = vpop.f32.mrb[71].mxu0  ;;  %v5358_v9 = vmax.f32 %v4081_v1, 0.0  ;;  %v4084_v10 = vadd.f32 %v12613_v60, %v4083_v5  ;;  %v10940_v11 = vpop.f32.mrb[71].mxu1  ;;  %v11520_v4 = vld [vmem:[%s16204_s0 + $0x178] sm:$0xff]  }
 0x166   :  { %v9514_v12 = vpack.c.bf16 %v5080_v6, %v5080_v6  ;;  %v5081_v13 = vmax.f32 %v2972_v7, 0.0  ;;  %10490 = vmatmul.mubr.msk.bf16.gmra.mrb[176].mxu0 %vm1966_vm1, %v11514_v63  ;;  %v9792_v14 = vpack.c.bf16 %v5358_v9, %v5358_v9  ;;  %v5359_v15 = vmax.f32 %v4084_v10, 0.0  ;;  %11046 = vmatmul.mubr.msk.bf16.gmra.mrb[176].mxu1 %vm1966_vm1, %v11515_v3  ;;  %v11521_v7 = vld [vmem:[%s16204_s0 + $0x5d0] sm:$0xff]  }
 0x167   :  { %10493 = vmatprep.mubr.msk.bf16.mxu0 %vm11711_vm0, %v11710_v0  ;;  %11049 = vmatprep.mubr.msk.bf16.mxu1 %vm11711_vm0, %v11710_v0 }
 0x168   :  { %7847 = vst.msk [vmem:[%s16206_s3 + $0x88] sm:$0xf] %vm7812_vm2, %v9514_v12  ;;  %v9515_v16 = vpack.c.bf16 %v5081_v13, %v5081_v13  ;;  %8125 = vst.msk [vmem:[%s16206_s3 + $0x4e0] sm:$0xf] %vm7812_vm2, %v9792_v14  ;;  %v9793_v17 = vpack.c.bf16 %v5359_v15, %v5359_v15 }
 0x169   :  { %v2976_v18 = vpop.f32.mrb[72].mxu0  ;;  %v4088_v19 = vpop.f32.mrb[72].mxu1 }
 0x16a   :  { %7848 = vst.msk [vmem:[%s16206_s3 + $0x8c] sm:$0xf] %vm7812_vm2, %v9515_v16  ;;  %v2977_v20 = vadd.f32 %v12613_v60, %v2976_v18  ;;  %v10387_v21 = vpop.f32.mrb[73].mxu0  ;;  %8126 = vst.msk [vmem:[%s16206_s3 + $0x4e4] sm:$0xf] %vm7812_vm2, %v9793_v17  ;;  %v4089_v23 = vadd.f32 %v12613_v60, %v4088_v19  ;;  %v10943_v24 = vpop.f32.mrb[73].mxu1 }
 0x16b   :  { %v2979_v26 = vpop.f32.mrb[74].mxu0  ;;  %v4091_v27 = vpop.f32.mrb[74].mxu1 }
 0x16c   :  { %v5082_v28 = vmax.f32 %v2977_v20, 0.0  ;;  %v2980_v29 = vadd.f32 %v12613_v60, %v2979_v26  ;;  %v10388_v30 = vpop.f32.mrb[75].mxu0  ;;  %v5360_v31 = vmax.f32 %v4089_v23, 0.0  ;;  %v4092_v32 = vadd.f32 %v12613_v60, %v4091_v27  ;;  %v10944_v33 = vpop.f32.mrb[75].mxu1  ;;  %v11522_v26 = vld [vmem:[%s16204_s0 + $0x180] sm:$0xff]  }
 0x16e   :  { %v9516_v34 = vpack.c.bf16 %v5082_v28, %v5082_v28  ;;  %v5083_v35 = vmax.f32 %v2980_v29, 0.0  ;;  %10494 = vmatmul.mubr.msk.bf16.gmra.mrb[180].mxu0 %vm1966_vm1, %v11516_v22  ;;  %v9794_v36 = vpack.c.bf16 %v5360_v31, %v5360_v31  ;;  %v5361_v37 = vmax.f32 %v4092_v32, 0.0  ;;  %11050 = vmatmul.mubr.msk.bf16.gmra.mrb[180].mxu1 %vm1966_vm1, %v11517_v25  ;;  %v11523_v29 = vld [vmem:[%s16204_s0 + $0x5d8] sm:$0xff]  }
 0x16f   :  { %10497 = vmatprep.mubr.msk.bf16.mxu0 %vm11711_vm0, %v11710_v0  ;;  %11053 = vmatprep.mubr.msk.bf16.mxu1 %vm11711_vm0, %v11710_v0 }
 0x170   :  { %7849 = vst.msk [vmem:[%s16206_s3 + $0x90] sm:$0xf] %vm7812_vm2, %v9516_v34  ;;  %v9517_v38 = vpack.c.bf16 %v5083_v35, %v5083_v35  ;;  %8127 = vst.msk [vmem:[%s16206_s3 + $0x4e8] sm:$0xf] %vm7812_vm2, %v9794_v36  ;;  %v9795_v39 = vpack.c.bf16 %v5361_v37, %v5361_v37 }
 0x171   :  { %v2984_v40 = vpop.f32.mrb[76].mxu0  ;;  %v4096_v41 = vpop.f32.mrb[76].mxu1 }
 0x172   :  { %7850 = vst.msk [vmem:[%s16206_s3 + $0x94] sm:$0xf] %vm7812_vm2, %v9517_v38  ;;  %v2985_v42 = vadd.f32 %v12613_v60, %v2984_v40  ;;  %v10391_v43 = vpop.f32.mrb[77].mxu0  ;;  %8128 = vst.msk [vmem:[%s16206_s3 + $0x4ec] sm:$0xf] %vm7812_vm2, %v9795_v39  ;;  %v4097_v45 = vadd.f32 %v12613_v60, %v4096_v41  ;;  %v10947_v46 = vpop.f32.mrb[77].mxu1 }
 0x173   :  { %v2987_v48 = vpop.f32.mrb[78].mxu0  ;;  %v4099_v49 = vpop.f32.mrb[78].mxu1 }
 0x174   :  { %v5084_v50 = vmax.f32 %v2985_v42, 0.0  ;;  %v2988_v51 = vadd.f32 %v12613_v60, %v2987_v48  ;;  %v10392_v52 = vpop.f32.mrb[79].mxu0  ;;  %v5362_v53 = vmax.f32 %v4097_v45, 0.0  ;;  %v4100_v54 = vadd.f32 %v12613_v60, %v4099_v49  ;;  %v10948_v55 = vpop.f32.mrb[79].mxu1  ;;  %v11524_v48 = vld [vmem:[%s16204_s0 + $0x188] sm:$0xff]  }
 0x176   :  { %v9518_v56 = vpack.c.bf16 %v5084_v50, %v5084_v50  ;;  %v5085_v57 = vmax.f32 %v2988_v51, 0.0  ;;  %10498 = vmatmul.mubr.msk.bf16.gmra.mrb[184].mxu0 %vm1966_vm1, %v11518_v44  ;;  %v9796_v58 = vpack.c.bf16 %v5362_v53, %v5362_v53  ;;  %v5363_v59 = vmax.f32 %v4100_v54, 0.0  ;;  %11054 = vmatmul.mubr.msk.bf16.gmra.mrb[184].mxu1 %vm1966_vm1, %v11519_v47  ;;  %v11525_v51 = vld [vmem:[%s16204_s0 + $0x5e0] sm:$0xff]  }
 0x177   :  { %10501 = vmatprep.mubr.msk.bf16.mxu0 %vm11711_vm0, %v11710_v0  ;;  %11057 = vmatprep.mubr.msk.bf16.mxu1 %vm11711_vm0, %v11710_v0 }
 0x178   :  { %7851 = vst.msk [vmem:[%s16206_s3 + $0x98] sm:$0xf] %vm7812_vm2, %v9518_v56  ;;  %v9519_v61 = vpack.c.bf16 %v5085_v57, %v5085_v57  ;;  %8129 = vst.msk [vmem:[%s16206_s3 + $0x4f0] sm:$0xf] %vm7812_vm2, %v9796_v58  ;;  %v9797_v62 = vpack.c.bf16 %v5363_v59, %v5363_v59 }
 0x179   :  { %v2992_v63 = vpop.f32.mrb[80].mxu0  ;;  %v4104_v1 = vpop.f32.mrb[80].mxu1 }
 0x17a   :  { %7852 = vst.msk [vmem:[%s16206_s3 + $0x9c] sm:$0xf] %vm7812_vm2, %v9519_v61  ;;  %v2993_v2 = vadd.f32 %v12613_v60, %v2992_v63  ;;  %v10395_v3 = vpop.f32.mrb[81].mxu0  ;;  %8130 = vst.msk [vmem:[%s16206_s3 + $0x4f4] sm:$0xf] %vm7812_vm2, %v9797_v62  ;;  %v4105_v5 = vadd.f32 %v12613_v60, %v4104_v1  ;;  %v10951_v6 = vpop.f32.mrb[81].mxu1 }
 0x17b   :  { %v2995_v8 = vpop.f32.mrb[82].mxu0  ;;  %v4107_v9 = vpop.f32.mrb[82].mxu1 }
 0x17c   :  { %v5086_v10 = vmax.f32 %v2993_v2, 0.0  ;;  %v2996_v11 = vadd.f32 %v12613_v60, %v2995_v8  ;;  %v10396_v12 = vpop.f32.mrb[83].mxu0  ;;  %v5364_v13 = vmax.f32 %v4105_v5, 0.0  ;;  %v4108_v14 = vadd.f32 %v12613_v60, %v4107_v9  ;;  %v10952_v15 = vpop.f32.mrb[83].mxu1  ;;  %v11526_v8 = vld [vmem:[%s16204_s0 + $0x190] sm:$0xff]  }
 0x17e   :  { %v9520_v16 = vpack.c.bf16 %v5086_v10, %v5086_v10  ;;  %v5087_v17 = vmax.f32 %v2996_v11, 0.0  ;;  %10502 = vmatmul.mubr.msk.bf16.gmra.mrb[188].mxu0 %vm1966_vm1, %v11520_v4  ;;  %v9798_v18 = vpack.c.bf16 %v5364_v13, %v5364_v13  ;;  %v5365_v19 = vmax.f32 %v4108_v14, 0.0  ;;  %11058 = vmatmul.mubr.msk.bf16.gmra.mrb[188].mxu1 %vm1966_vm1, %v11521_v7  ;;  %v11527_v11 = vld [vmem:[%s16204_s0 + $0x5e8] sm:$0xff]  }
 0x17f   :  { %10505 = vmatprep.mubr.msk.bf16.mxu0 %vm11711_vm0, %v11710_v0  ;;  %11061 = vmatprep.mubr.msk.bf16.mxu1 %vm11711_vm0, %v11710_v0 }
 0x180   :  { %7853 = vst.msk [vmem:[%s16206_s3 + $0xa0] sm:$0xf] %vm7812_vm2, %v9520_v16  ;;  %v9521_v20 = vpack.c.bf16 %v5087_v17, %v5087_v17  ;;  %8131 = vst.msk [vmem:[%s16206_s3 + $0x4f8] sm:$0xf] %vm7812_vm2, %v9798_v18  ;;  %v9799_v21 = vpack.c.bf16 %v5365_v19, %v5365_v19 }
 0x181   :  { %v3000_v22 = vpop.f32.mrb[84].mxu0  ;;  %v4112_v23 = vpop.f32.mrb[84].mxu1 }
 0x182   :  { %7854 = vst.msk [vmem:[%s16206_s3 + $0xa4] sm:$0xf] %vm7812_vm2, %v9521_v20  ;;  %v3001_v24 = vadd.f32 %v12613_v60, %v3000_v22  ;;  %v10399_v25 = vpop.f32.mrb[85].mxu0  ;;  %8132 = vst.msk [vmem:[%s16206_s3 + $0x4fc] sm:$0xf] %vm7812_vm2, %v9799_v21  ;;  %v4113_v27 = vadd.f32 %v12613_v60, %v4112_v23  ;;  %v10955_v28 = vpop.f32.mrb[85].mxu1 }
 0x183   :  { %v3003_v30 = vpop.f32.mrb[86].mxu0  ;;  %v4115_v31 = vpop.f32.mrb[86].mxu1 }
 0x184   :  { %v5088_v32 = vmax.f32 %v3001_v24, 0.0  ;;  %v3004_v33 = vadd.f32 %v12613_v60, %v3003_v30  ;;  %v10400_v34 = vpop.f32.mrb[87].mxu0  ;;  %v5366_v35 = vmax.f32 %v4113_v27, 0.0  ;;  %v4116_v36 = vadd.f32 %v12613_v60, %v4115_v31  ;;  %v10956_v37 = vpop.f32.mrb[87].mxu1  ;;  %v11528_v30 = vld [vmem:[%s16204_s0 + $0x198] sm:$0xff]  }
 0x186   :  { %v9522_v38 = vpack.c.bf16 %v5088_v32, %v5088_v32  ;;  %v5089_v39 = vmax.f32 %v3004_v33, 0.0  ;;  %10506 = vmatmul.mubr.msk.bf16.gmra.mrb[192].mxu0 %vm1966_vm1, %v11522_v26  ;;  %v9800_v40 = vpack.c.bf16 %v5366_v35, %v5366_v35  ;;  %v5367_v41 = vmax.f32 %v4116_v36, 0.0  ;;  %11062 = vmatmul.mubr.msk.bf16.gmra.mrb[192].mxu1 %vm1966_vm1, %v11523_v29  ;;  %v11529_v33 = vld [vmem:[%s16204_s0 + $0x5f0] sm:$0xff]  }
 0x187   :  { %10509 = vmatprep.mubr.msk.bf16.mxu0 %vm11711_vm0, %v11710_v0  ;;  %11065 = vmatprep.mubr.msk.bf16.mxu1 %vm11711_vm0, %v11710_v0 }
 0x188   :  { %7855 = vst.msk [vmem:[%s16206_s3 + $0xa8] sm:$0xf] %vm7812_vm2, %v9522_v38  ;;  %v9523_v42 = vpack.c.bf16 %v5089_v39, %v5089_v39  ;;  %8133 = vst.msk [vmem:[%s16206_s3 + $0x500] sm:$0xf] %vm7812_vm2, %v9800_v40  ;;  %v9801_v43 = vpack.c.bf16 %v5367_v41, %v5367_v41 }
 0x189   :  { %v3008_v44 = vpop.f32.mrb[88].mxu0  ;;  %v4120_v45 = vpop.f32.mrb[88].mxu1 }
 0x18a   :  { %7856 = vst.msk [vmem:[%s16206_s3 + $0xac] sm:$0xf] %vm7812_vm2, %v9523_v42  ;;  %v3009_v46 = vadd.f32 %v12613_v60, %v3008_v44  ;;  %v10403_v47 = vpop.f32.mrb[89].mxu0  ;;  %8134 = vst.msk [vmem:[%s16206_s3 + $0x504] sm:$0xf] %vm7812_vm2, %v9801_v43  ;;  %v4121_v49 = vadd.f32 %v12613_v60, %v4120_v45  ;;  %v10959_v50 = vpop.f32.mrb[89].mxu1 }
 0x18b   :  { %v3011_v52 = vpop.f32.mrb[90].mxu0  ;;  %v4123_v53 = vpop.f32.mrb[90].mxu1 }
 0x18c   :  { %v5090_v54 = vmax.f32 %v3009_v46, 0.0  ;;  %v3012_v55 = vadd.f32 %v12613_v60, %v3011_v52  ;;  %v10404_v56 = vpop.f32.mrb[91].mxu0  ;;  %v5368_v57 = vmax.f32 %v4121_v49, 0.0  ;;  %v4124_v58 = vadd.f32 %v12613_v60, %v4123_v53  ;;  %v10960_v59 = vpop.f32.mrb[91].mxu1  ;;  %v11530_v52 = vld [vmem:[%s16204_s0 + $0x1a0] sm:$0xff]  }
 0x18e   :  { %v9524_v61 = vpack.c.bf16 %v5090_v54, %v5090_v54  ;;  %v5091_v62 = vmax.f32 %v3012_v55, 0.0  ;;  %10510 = vmatmul.mubr.msk.bf16.gmra.mrb[196].mxu0 %vm1966_vm1, %v11524_v48  ;;  %v9802_v63 = vpack.c.bf16 %v5368_v57, %v5368_v57  ;;  %v5369_v1 = vmax.f32 %v4124_v58, 0.0  ;;  %11066 = vmatmul.mubr.msk.bf16.gmra.mrb[196].mxu1 %vm1966_vm1, %v11525_v51  ;;  %v11531_v55 = vld [vmem:[%s16204_s0 + $0x5f8] sm:$0xff]  }
 0x18f   :  { %10513 = vmatprep.mubr.msk.bf16.mxu0 %vm11711_vm0, %v11710_v0  ;;  %11069 = vmatprep.mubr.msk.bf16.mxu1 %vm11711_vm0, %v11710_v0 }
 0x190   :  { %7857 = vst.msk [vmem:[%s16206_s3 + $0xb0] sm:$0xf] %vm7812_vm2, %v9524_v61  ;;  %v9525_v2 = vpack.c.bf16 %v5091_v62, %v5091_v62  ;;  %8135 = vst.msk [vmem:[%s16206_s3 + $0x508] sm:$0xf] %vm7812_vm2, %v9802_v63  ;;  %v9803_v3 = vpack.c.bf16 %v5369_v1, %v5369_v1 }
 0x191   :  { %v3016_v4 = vpop.f32.mrb[92].mxu0  ;;  %v4128_v5 = vpop.f32.mrb[92].mxu1 }
 0x192   :  { %7858 = vst.msk [vmem:[%s16206_s3 + $0xb4] sm:$0xf] %vm7812_vm2, %v9525_v2  ;;  %v3017_v6 = vadd.f32 %v12613_v60, %v3016_v4  ;;  %v10407_v7 = vpop.f32.mrb[93].mxu0  ;;  %8136 = vst.msk [vmem:[%s16206_s3 + $0x50c] sm:$0xf] %vm7812_vm2, %v9803_v3  ;;  %v4129_v9 = vadd.f32 %v12613_v60, %v4128_v5  ;;  %v10963_v10 = vpop.f32.mrb[93].mxu1 }
 0x193   :  { %v3019_v12 = vpop.f32.mrb[94].mxu0  ;;  %v4131_v13 = vpop.f32.mrb[94].mxu1 }
 0x194   :  { %v5092_v14 = vmax.f32 %v3017_v6, 0.0  ;;  %v3020_v15 = vadd.f32 %v12613_v60, %v3019_v12  ;;  %v10408_v16 = vpop.f32.mrb[95].mxu0  ;;  %v5370_v17 = vmax.f32 %v4129_v9, 0.0  ;;  %v4132_v18 = vadd.f32 %v12613_v60, %v4131_v13  ;;  %v10964_v19 = vpop.f32.mrb[95].mxu1  ;;  %v11532_v12 = vld [vmem:[%s16204_s0 + $0x1a8] sm:$0xff]  }
 0x196   :  { %v9526_v20 = vpack.c.bf16 %v5092_v14, %v5092_v14  ;;  %v5093_v21 = vmax.f32 %v3020_v15, 0.0  ;;  %10514 = vmatmul.mubr.msk.bf16.gmra.mrb[200].mxu0 %vm1966_vm1, %v11526_v8  ;;  %v9804_v22 = vpack.c.bf16 %v5370_v17, %v5370_v17  ;;  %v5371_v23 = vmax.f32 %v4132_v18, 0.0  ;;  %11070 = vmatmul.mubr.msk.bf16.gmra.mrb[200].mxu1 %vm1966_vm1, %v11527_v11  ;;  %v11533_v15 = vld [vmem:[%s16204_s0 + $0x600] sm:$0xff]  }
 0x197   :  { %10517 = vmatprep.mubr.msk.bf16.mxu0 %vm11711_vm0, %v11710_v0  ;;  %11073 = vmatprep.mubr.msk.bf16.mxu1 %vm11711_vm0, %v11710_v0 }
 0x198   :  { %7859 = vst.msk [vmem:[%s16206_s3 + $0xb8] sm:$0xf] %vm7812_vm2, %v9526_v20  ;;  %v9527_v24 = vpack.c.bf16 %v5093_v21, %v5093_v21  ;;  %8137 = vst.msk [vmem:[%s16206_s3 + $0x510] sm:$0xf] %vm7812_vm2, %v9804_v22  ;;  %v9805_v25 = vpack.c.bf16 %v5371_v23, %v5371_v23 }
 0x199   :  { %v3024_v26 = vpop.f32.mrb[96].mxu0  ;;  %v4136_v27 = vpop.f32.mrb[96].mxu1 }
 0x19a   :  { %7860 = vst.msk [vmem:[%s16206_s3 + $0xbc] sm:$0xf] %vm7812_vm2, %v9527_v24  ;;  %v3025_v28 = vadd.f32 %v12613_v60, %v3024_v26  ;;  %v10411_v29 = vpop.f32.mrb[97].mxu0  ;;  %8138 = vst.msk [vmem:[%s16206_s3 + $0x514] sm:$0xf] %vm7812_vm2, %v9805_v25  ;;  %v4137_v31 = vadd.f32 %v12613_v60, %v4136_v27  ;;  %v10967_v32 = vpop.f32.mrb[97].mxu1 }
 0x19b   :  { %v3027_v34 = vpop.f32.mrb[98].mxu0  ;;  %v4139_v35 = vpop.f32.mrb[98].mxu1 }
 0x19c   :  { %v5094_v36 = vmax.f32 %v3025_v28, 0.0  ;;  %v3028_v37 = vadd.f32 %v12613_v60, %v3027_v34  ;;  %v10412_v38 = vpop.f32.mrb[99].mxu0  ;;  %v5372_v39 = vmax.f32 %v4137_v31, 0.0  ;;  %v4140_v40 = vadd.f32 %v12613_v60, %v4139_v35  ;;  %v10968_v41 = vpop.f32.mrb[99].mxu1  ;;  %v11534_v34 = vld [vmem:[%s16204_s0 + $0x1b0] sm:$0xff]  }
 0x19e   :  { %v9528_v42 = vpack.c.bf16 %v5094_v36, %v5094_v36  ;;  %v5095_v43 = vmax.f32 %v3028_v37, 0.0  ;;  %10518 = vmatmul.mubr.msk.bf16.gmra.mrb[204].mxu0 %vm1966_vm1, %v11528_v30  ;;  %v9806_v44 = vpack.c.bf16 %v5372_v39, %v5372_v39  ;;  %v5373_v45 = vmax.f32 %v4140_v40, 0.0  ;;  %11074 = vmatmul.mubr.msk.bf16.gmra.mrb[204].mxu1 %vm1966_vm1, %v11529_v33  ;;  %v11535_v37 = vld [vmem:[%s16204_s0 + $0x608] sm:$0xff]  }
 0x19f   :  { %10521 = vmatprep.mubr.msk.bf16.mxu0 %vm11711_vm0, %v11710_v0  ;;  %11077 = vmatprep.mubr.msk.bf16.mxu1 %vm11711_vm0, %v11710_v0 }
 0x1a0   :  { %7861 = vst.msk [vmem:[%s16206_s3 + $0xc0] sm:$0xf] %vm7812_vm2, %v9528_v42  ;;  %v9529_v46 = vpack.c.bf16 %v5095_v43, %v5095_v43  ;;  %8139 = vst.msk [vmem:[%s16206_s3 + $0x518] sm:$0xf] %vm7812_vm2, %v9806_v44  ;;  %v9807_v47 = vpack.c.bf16 %v5373_v45, %v5373_v45 }
 0x1a1   :  { %v3032_v48 = vpop.f32.mrb[100].mxu0  ;;  %v4144_v49 = vpop.f32.mrb[100].mxu1 }
 0x1a2   :  { %7862 = vst.msk [vmem:[%s16206_s3 + $0xc4] sm:$0xf] %vm7812_vm2, %v9529_v46  ;;  %v3033_v50 = vadd.f32 %v12613_v60, %v3032_v48  ;;  %v10415_v51 = vpop.f32.mrb[101].mxu0  ;;  %8140 = vst.msk [vmem:[%s16206_s3 + $0x51c] sm:$0xf] %vm7812_vm2, %v9807_v47  ;;  %v4145_v53 = vadd.f32 %v12613_v60, %v4144_v49  ;;  %v10971_v54 = vpop.f32.mrb[101].mxu1 }
 0x1a3   :  { %v3035_v56 = vpop.f32.mrb[102].mxu0  ;;  %v4147_v57 = vpop.f32.mrb[102].mxu1 }
 0x1a4   :  { %v5096_v58 = vmax.f32 %v3033_v50, 0.0  ;;  %v3036_v59 = vadd.f32 %v12613_v60, %v3035_v56  ;;  %v10416_v61 = vpop.f32.mrb[103].mxu0  ;;  %v5374_v62 = vmax.f32 %v4145_v53, 0.0  ;;  %v4148_v63 = vadd.f32 %v12613_v60, %v4147_v57  ;;  %v10972_v1 = vpop.f32.mrb[103].mxu1  ;;  %v11536_v56 = vld [vmem:[%s16204_s0 + $0x1b8] sm:$0xff]  }
 0x1a6   :  { %v9530_v2 = vpack.c.bf16 %v5096_v58, %v5096_v58  ;;  %v5097_v3 = vmax.f32 %v3036_v59, 0.0  ;;  %10522 = vmatmul.mubr.msk.bf16.gmra.mrb[208].mxu0 %vm1966_vm1, %v11530_v52  ;;  %v9808_v4 = vpack.c.bf16 %v5374_v62, %v5374_v62  ;;  %v5375_v5 = vmax.f32 %v4148_v63, 0.0  ;;  %11078 = vmatmul.mubr.msk.bf16.gmra.mrb[208].mxu1 %vm1966_vm1, %v11531_v55  ;;  %v11537_v59 = vld [vmem:[%s16204_s0 + $0x610] sm:$0xff]  }
 0x1a7   :  { %10525 = vmatprep.mubr.msk.bf16.mxu0 %vm11711_vm0, %v11710_v0  ;;  %11081 = vmatprep.mubr.msk.bf16.mxu1 %vm11711_vm0, %v11710_v0 }
 0x1a8   :  { %7863 = vst.msk [vmem:[%s16206_s3 + $0xc8] sm:$0xf] %vm7812_vm2, %v9530_v2  ;;  %v9531_v6 = vpack.c.bf16 %v5097_v3, %v5097_v3  ;;  %8141 = vst.msk [vmem:[%s16206_s3 + $0x520] sm:$0xf] %vm7812_vm2, %v9808_v4  ;;  %v9809_v7 = vpack.c.bf16 %v5375_v5, %v5375_v5 }
 0x1a9   :  { %v3040_v8 = vpop.f32.mrb[104].mxu0  ;;  %v4152_v9 = vpop.f32.mrb[104].mxu1 }
 0x1aa   :  { %7864 = vst.msk [vmem:[%s16206_s3 + $0xcc] sm:$0xf] %vm7812_vm2, %v9531_v6  ;;  %v3041_v10 = vadd.f32 %v12613_v60, %v3040_v8  ;;  %v10419_v11 = vpop.f32.mrb[105].mxu0  ;;  %8142 = vst.msk [vmem:[%s16206_s3 + $0x524] sm:$0xf] %vm7812_vm2, %v9809_v7  ;;  %v4153_v13 = vadd.f32 %v12613_v60, %v4152_v9  ;;  %v10975_v14 = vpop.f32.mrb[105].mxu1 }
 0x1ab   :  { %v3043_v16 = vpop.f32.mrb[106].mxu0  ;;  %v4155_v17 = vpop.f32.mrb[106].mxu1 }
 0x1ac   :  { %v5098_v18 = vmax.f32 %v3041_v10, 0.0  ;;  %v3044_v19 = vadd.f32 %v12613_v60, %v3043_v16  ;;  %v10420_v20 = vpop.f32.mrb[107].mxu0  ;;  %v5376_v21 = vmax.f32 %v4153_v13, 0.0  ;;  %v4156_v22 = vadd.f32 %v12613_v60, %v4155_v17  ;;  %v10976_v23 = vpop.f32.mrb[107].mxu1  ;;  %v11538_v16 = vld [vmem:[%s16204_s0 + $0x1c0] sm:$0xff]  }
 0x1ae   :  { %v9532_v24 = vpack.c.bf16 %v5098_v18, %v5098_v18  ;;  %v5099_v25 = vmax.f32 %v3044_v19, 0.0  ;;  %10526 = vmatmul.mubr.msk.bf16.gmra.mrb[212].mxu0 %vm1966_vm1, %v11532_v12  ;;  %v9810_v26 = vpack.c.bf16 %v5376_v21, %v5376_v21  ;;  %v5377_v27 = vmax.f32 %v4156_v22, 0.0  ;;  %11082 = vmatmul.mubr.msk.bf16.gmra.mrb[212].mxu1 %vm1966_vm1, %v11533_v15  ;;  %v11539_v19 = vld [vmem:[%s16204_s0 + $0x618] sm:$0xff]  }
 0x1af   :  { %10529 = vmatprep.mubr.msk.bf16.mxu0 %vm11711_vm0, %v11710_v0  ;;  %11085 = vmatprep.mubr.msk.bf16.mxu1 %vm11711_vm0, %v11710_v0 }
 0x1b0   :  { %7865 = vst.msk [vmem:[%s16206_s3 + $0xd0] sm:$0xf] %vm7812_vm2, %v9532_v24  ;;  %v9533_v28 = vpack.c.bf16 %v5099_v25, %v5099_v25  ;;  %8143 = vst.msk [vmem:[%s16206_s3 + $0x528] sm:$0xf] %vm7812_vm2, %v9810_v26  ;;  %v9811_v29 = vpack.c.bf16 %v5377_v27, %v5377_v27 }
 0x1b1   :  { %v3048_v30 = vpop.f32.mrb[108].mxu0  ;;  %v4160_v31 = vpop.f32.mrb[108].mxu1 }
 0x1b2   :  { %7866 = vst.msk [vmem:[%s16206_s3 + $0xd4] sm:$0xf] %vm7812_vm2, %v9533_v28  ;;  %v3049_v32 = vadd.f32 %v12613_v60, %v3048_v30  ;;  %v10423_v33 = vpop.f32.mrb[109].mxu0  ;;  %8144 = vst.msk [vmem:[%s16206_s3 + $0x52c] sm:$0xf] %vm7812_vm2, %v9811_v29  ;;  %v4161_v35 = vadd.f32 %v12613_v60, %v4160_v31  ;;  %v10979_v36 = vpop.f32.mrb[109].mxu1 }
 0x1b3   :  { %v3051_v38 = vpop.f32.mrb[110].mxu0  ;;  %v4163_v39 = vpop.f32.mrb[110].mxu1 }
 0x1b4   :  { %v5100_v40 = vmax.f32 %v3049_v32, 0.0  ;;  %v3052_v41 = vadd.f32 %v12613_v60, %v3051_v38  ;;  %v10424_v42 = vpop.f32.mrb[111].mxu0  ;;  %v5378_v43 = vmax.f32 %v4161_v35, 0.0  ;;  %v4164_v44 = vadd.f32 %v12613_v60, %v4163_v39  ;;  %v10980_v45 = vpop.f32.mrb[111].mxu1  ;;  %v11540_v38 = vld [vmem:[%s16204_s0 + $0x1c8] sm:$0xff]  }
 0x1b6   :  { %v9534_v46 = vpack.c.bf16 %v5100_v40, %v5100_v40  ;;  %v5101_v47 = vmax.f32 %v3052_v41, 0.0  ;;  %10530 = vmatmul.mubr.msk.bf16.gmra.mrb[216].mxu0 %vm1966_vm1, %v11534_v34  ;;  %v9812_v48 = vpack.c.bf16 %v5378_v43, %v5378_v43  ;;  %v5379_v49 = vmax.f32 %v4164_v44, 0.0  ;;  %11086 = vmatmul.mubr.msk.bf16.gmra.mrb[216].mxu1 %vm1966_vm1, %v11535_v37  ;;  %v11541_v41 = vld [vmem:[%s16204_s0 + $0x620] sm:$0xff]  }
 0x1b7   :  { %10533 = vmatprep.mubr.msk.bf16.mxu0 %vm11711_vm0, %v11710_v0  ;;  %11089 = vmatprep.mubr.msk.bf16.mxu1 %vm11711_vm0, %v11710_v0 }
 0x1b8   :  { %7867 = vst.msk [vmem:[%s16206_s3 + $0xd8] sm:$0xf] %vm7812_vm2, %v9534_v46  ;;  %v9535_v50 = vpack.c.bf16 %v5101_v47, %v5101_v47  ;;  %8145 = vst.msk [vmem:[%s16206_s3 + $0x530] sm:$0xf] %vm7812_vm2, %v9812_v48  ;;  %v9813_v51 = vpack.c.bf16 %v5379_v49, %v5379_v49 }
 0x1b9   :  { %v3056_v52 = vpop.f32.mrb[112].mxu0  ;;  %v4168_v53 = vpop.f32.mrb[112].mxu1 }
 0x1ba   :  { %7868 = vst.msk [vmem:[%s16206_s3 + $0xdc] sm:$0xf] %vm7812_vm2, %v9535_v50  ;;  %v3057_v54 = vadd.f32 %v12613_v60, %v3056_v52  ;;  %v10427_v55 = vpop.f32.mrb[113].mxu0  ;;  %8146 = vst.msk [vmem:[%s16206_s3 + $0x534] sm:$0xf] %vm7812_vm2, %v9813_v51  ;;  %v4169_v57 = vadd.f32 %v12613_v60, %v4168_v53  ;;  %v10983_v58 = vpop.f32.mrb[113].mxu1 }
 0x1bb   :  { %v3059_v61 = vpop.f32.mrb[114].mxu0  ;;  %v4171_v62 = vpop.f32.mrb[114].mxu1 }
 0x1bc   :  { %v5102_v63 = vmax.f32 %v3057_v54, 0.0  ;;  %v3060_v1 = vadd.f32 %v12613_v60, %v3059_v61  ;;  %v10428_v2 = vpop.f32.mrb[115].mxu0  ;;  %v5380_v3 = vmax.f32 %v4169_v57, 0.0  ;;  %v4172_v4 = vadd.f32 %v12613_v60, %v4171_v62  ;;  %v10984_v5 = vpop.f32.mrb[115].mxu1  ;;  %v11542_v61 = vld [vmem:[%s16204_s0 + $0x1d0] sm:$0xff]  }
 0x1be   :  { %v9536_v6 = vpack.c.bf16 %v5102_v63, %v5102_v63  ;;  %v5103_v7 = vmax.f32 %v3060_v1, 0.0  ;;  %10534 = vmatmul.mubr.msk.bf16.gmra.mrb[220].mxu0 %vm1966_vm1, %v11536_v56  ;;  %v9814_v8 = vpack.c.bf16 %v5380_v3, %v5380_v3  ;;  %v5381_v9 = vmax.f32 %v4172_v4, 0.0  ;;  %11090 = vmatmul.mubr.msk.bf16.gmra.mrb[220].mxu1 %vm1966_vm1, %v11537_v59  ;;  %v11543_v1 = vld [vmem:[%s16204_s0 + $0x628] sm:$0xff]  }
 0x1bf   :  { %10537 = vmatprep.mubr.msk.bf16.mxu0 %vm11711_vm0, %v11710_v0  ;;  %11093 = vmatprep.mubr.msk.bf16.mxu1 %vm11711_vm0, %v11710_v0 }
 0x1c0   :  { %7869 = vst.msk [vmem:[%s16206_s3 + $0xe0] sm:$0xf] %vm7812_vm2, %v9536_v6  ;;  %v9537_v10 = vpack.c.bf16 %v5103_v7, %v5103_v7  ;;  %8147 = vst.msk [vmem:[%s16206_s3 + $0x538] sm:$0xf] %vm7812_vm2, %v9814_v8  ;;  %v9815_v11 = vpack.c.bf16 %v5381_v9, %v5381_v9 }
 0x1c1   :  { %v3064_v12 = vpop.f32.mrb[116].mxu0  ;;  %v4176_v13 = vpop.f32.mrb[116].mxu1 }
 0x1c2   :  { %7870 = vst.msk [vmem:[%s16206_s3 + $0xe4] sm:$0xf] %vm7812_vm2, %v9537_v10  ;;  %v3065_v14 = vadd.f32 %v12613_v60, %v3064_v12  ;;  %v10431_v15 = vpop.f32.mrb[117].mxu0  ;;  %8148 = vst.msk [vmem:[%s16206_s3 + $0x53c] sm:$0xf] %vm7812_vm2, %v9815_v11  ;;  %v4177_v17 = vadd.f32 %v12613_v60, %v4176_v13  ;;  %v10987_v18 = vpop.f32.mrb[117].mxu1 }
 0x1c3   :  { %v3067_v20 = vpop.f32.mrb[118].mxu0  ;;  %v4179_v21 = vpop.f32.mrb[118].mxu1 }
 0x1c4   :  { %v5104_v22 = vmax.f32 %v3065_v14, 0.0  ;;  %v3068_v23 = vadd.f32 %v12613_v60, %v3067_v20  ;;  %v10432_v24 = vpop.f32.mrb[119].mxu0  ;;  %v5382_v25 = vmax.f32 %v4177_v17, 0.0  ;;  %v4180_v26 = vadd.f32 %v12613_v60, %v4179_v21  ;;  %v10988_v27 = vpop.f32.mrb[119].mxu1  ;;  %v11544_v20 = vld [vmem:[%s16204_s0 + $0x1d8] sm:$0xff]  }
 0x1c6   :  { %v9538_v28 = vpack.c.bf16 %v5104_v22, %v5104_v22  ;;  %v5105_v29 = vmax.f32 %v3068_v23, 0.0  ;;  %10538 = vmatmul.mubr.msk.bf16.gmra.mrb[224].mxu0 %vm1966_vm1, %v11538_v16  ;;  %v9816_v30 = vpack.c.bf16 %v5382_v25, %v5382_v25  ;;  %v5383_v31 = vmax.f32 %v4180_v26, 0.0  ;;  %11094 = vmatmul.mubr.msk.bf16.gmra.mrb[224].mxu1 %vm1966_vm1, %v11539_v19  ;;  %v11545_v23 = vld [vmem:[%s16204_s0 + $0x630] sm:$0xff]  }
 0x1c7   :  { %10541 = vmatprep.mubr.msk.bf16.mxu0 %vm11711_vm0, %v11710_v0  ;;  %11097 = vmatprep.mubr.msk.bf16.mxu1 %vm11711_vm0, %v11710_v0 }
 0x1c8   :  { %7871 = vst.msk [vmem:[%s16206_s3 + $0xe8] sm:$0xf] %vm7812_vm2, %v9538_v28  ;;  %v9539_v32 = vpack.c.bf16 %v5105_v29, %v5105_v29  ;;  %8149 = vst.msk [vmem:[%s16206_s3 + $0x540] sm:$0xf] %vm7812_vm2, %v9816_v30  ;;  %v9817_v33 = vpack.c.bf16 %v5383_v31, %v5383_v31 }
 0x1c9   :  { %v3072_v34 = vpop.f32.mrb[120].mxu0  ;;  %v4184_v35 = vpop.f32.mrb[120].mxu1 }
 0x1ca   :  { %7872 = vst.msk [vmem:[%s16206_s3 + $0xec] sm:$0xf] %vm7812_vm2, %v9539_v32  ;;  %v3073_v36 = vadd.f32 %v12613_v60, %v3072_v34  ;;  %v10435_v37 = vpop.f32.mrb[121].mxu0  ;;  %8150 = vst.msk [vmem:[%s16206_s3 + $0x544] sm:$0xf] %vm7812_vm2, %v9817_v33  ;;  %v4185_v39 = vadd.f32 %v12613_v60, %v4184_v35  ;;  %v10991_v40 = vpop.f32.mrb[121].mxu1 }
 0x1cb   :  { %v3075_v42 = vpop.f32.mrb[122].mxu0  ;;  %v4187_v43 = vpop.f32.mrb[122].mxu1 }
 0x1cc   :  { %v5106_v44 = vmax.f32 %v3073_v36, 0.0  ;;  %v3076_v45 = vadd.f32 %v12613_v60, %v3075_v42  ;;  %v10436_v46 = vpop.f32.mrb[123].mxu0  ;;  %v5384_v47 = vmax.f32 %v4185_v39, 0.0  ;;  %v4188_v48 = vadd.f32 %v12613_v60, %v4187_v43  ;;  %v10992_v49 = vpop.f32.mrb[123].mxu1  ;;  %v11546_v42 = vld [vmem:[%s16204_s0 + $0x1e0] sm:$0xff]  }
 0x1ce   :  { %v9540_v50 = vpack.c.bf16 %v5106_v44, %v5106_v44  ;;  %v5107_v51 = vmax.f32 %v3076_v45, 0.0  ;;  %10542 = vmatmul.mubr.msk.bf16.gmra.mrb[228].mxu0 %vm1966_vm1, %v11540_v38  ;;  %v9818_v52 = vpack.c.bf16 %v5384_v47, %v5384_v47  ;;  %v5385_v53 = vmax.f32 %v4188_v48, 0.0  ;;  %11098 = vmatmul.mubr.msk.bf16.gmra.mrb[228].mxu1 %vm1966_vm1, %v11541_v41  ;;  %v11547_v45 = vld [vmem:[%s16204_s0 + $0x638] sm:$0xff]  }
 0x1cf   :  { %10545 = vmatprep.mubr.msk.bf16.mxu0 %vm11711_vm0, %v11710_v0  ;;  %11101 = vmatprep.mubr.msk.bf16.mxu1 %vm11711_vm0, %v11710_v0 }
 0x1d0   :  { %7873 = vst.msk [vmem:[%s16206_s3 + $0xf0] sm:$0xf] %vm7812_vm2, %v9540_v50  ;;  %v9541_v54 = vpack.c.bf16 %v5107_v51, %v5107_v51  ;;  %8151 = vst.msk [vmem:[%s16206_s3 + $0x548] sm:$0xf] %vm7812_vm2, %v9818_v52  ;;  %v9819_v55 = vpack.c.bf16 %v5385_v53, %v5385_v53 }
 0x1d1   :  { %v3080_v56 = vpop.f32.mrb[124].mxu0  ;;  %v4192_v57 = vpop.f32.mrb[124].mxu1 }
 0x1d2   :  { %7874 = vst.msk [vmem:[%s16206_s3 + $0xf4] sm:$0xf] %vm7812_vm2, %v9541_v54  ;;  %v3081_v58 = vadd.f32 %v12613_v60, %v3080_v56  ;;  %v10439_v59 = vpop.f32.mrb[125].mxu0  ;;  %8152 = vst.msk [vmem:[%s16206_s3 + $0x54c] sm:$0xf] %vm7812_vm2, %v9819_v55  ;;  %v4193_v62 = vadd.f32 %v12613_v60, %v4192_v57  ;;  %v10995_v63 = vpop.f32.mrb[125].mxu1 }
 0x1d3   :  { %v3083_v2 = vpop.f32.mrb[126].mxu0  ;;  %v4195_v3 = vpop.f32.mrb[126].mxu1 }
 0x1d4   :  { %v5108_v4 = vmax.f32 %v3081_v58, 0.0  ;;  %v3084_v5 = vadd.f32 %v12613_v60, %v3083_v2  ;;  %v10440_v6 = vpop.f32.mrb[127].mxu0  ;;  %v5386_v7 = vmax.f32 %v4193_v62, 0.0  ;;  %v4196_v8 = vadd.f32 %v12613_v60, %v4195_v3  ;;  %v10996_v9 = vpop.f32.mrb[127].mxu1  ;;  %v11548_v2 = vld [vmem:[%s16204_s0 + $0x1e8] sm:$0xff]  }
 0x1d5   :  { %v13170_v3 = vld [vmem:[%s16205_s2] ss:$0 sm:$0xff] }
 0x1d6   :  { %v9542_v10 = vpack.c.bf16 %v5108_v4, %v5108_v4  ;;  %v5109_v11 = vmax.f32 %v3084_v5, 0.0  ;;  %10546 = vmatmul.mubr.msk.bf16.gmra.mrb[232].mxu0 %vm1966_vm1, %v11542_v61  ;;  %v9820_v12 = vpack.c.bf16 %v5386_v7, %v5386_v7  ;;  %v5387_v13 = vmax.f32 %v4196_v8, 0.0  ;;  %11102 = vmatmul.mubr.msk.bf16.gmra.mrb[232].mxu1 %vm1966_vm1, %v11543_v1 }
 0x1d7   :  { %10549 = vmatprep.mubr.msk.bf16.mxu0 %vm11711_vm0, %v11710_v0  ;;  %11105 = vmatprep.mubr.msk.bf16.mxu1 %vm11711_vm0, %v11710_v0 }
 0x1d8   :  { %7875 = vst.msk [vmem:[%s16206_s3 + $0xf8] sm:$0xf] %vm7812_vm2, %v9542_v10  ;;  %v9543_v14 = vpack.c.bf16 %v5109_v11, %v5109_v11  ;;  %8153 = vst.msk [vmem:[%s16206_s3 + $0x550] sm:$0xf] %vm7812_vm2, %v9820_v12  ;;  %v9821_v15 = vpack.c.bf16 %v5387_v13, %v5387_v13 }
 0x1d9   :  { %v3088_v16 = vpop.f32.mrb[128].mxu0  ;;  %v4200_v17 = vpop.f32.mrb[128].mxu1 }
 0x1da   :  { %7876 = vst.msk [vmem:[%s16206_s3 + $0xfc] sm:$0xf] %vm7812_vm2, %v9543_v14  ;;  %v3089_v18 = vadd.f32 %v12613_v60, %v3088_v16  ;;  %v10443_v19 = vpop.f32.mrb[129].mxu0  ;;  %8154 = vst.msk [vmem:[%s16206_s3 + $0x554] sm:$0xf] %vm7812_vm2, %v9821_v15  ;;  %v4201_v21 = vadd.f32 %v12613_v60, %v4200_v17  ;;  %v10999_v22 = vpop.f32.mrb[129].mxu1 }
 0x1db   :  { %v3091_v24 = vpop.f32.mrb[130].mxu0  ;;  %v4203_v25 = vpop.f32.mrb[130].mxu1 }
 0x1dc   :  { %v5110_v26 = vmax.f32 %v3089_v18, 0.0  ;;  %v3092_v27 = vadd.f32 %v12613_v60, %v3091_v24  ;;  %v10444_v28 = vpop.f32.mrb[131].mxu0  ;;  %v5388_v29 = vmax.f32 %v4201_v21, 0.0  ;;  %v4204_v30 = vadd.f32 %v12613_v60, %v4203_v25  ;;  %v11000_v31 = vpop.f32.mrb[131].mxu1  ;;  %v11550_v24 = vld [vmem:[%s16204_s0 + $0x1f0] sm:$0xff]  }
 0x1de   :  { %v9544_v32 = vpack.c.bf16 %v5110_v26, %v5110_v26  ;;  %v5111_v33 = vmax.f32 %v3092_v27, 0.0  ;;  %10550 = vmatmul.mubr.msk.bf16.gmra.mrb[236].mxu0 %vm1966_vm1, %v11544_v20  ;;  %v9822_v34 = vpack.c.bf16 %v5388_v29, %v5388_v29  ;;  %v5389_v35 = vmax.f32 %v4204_v30, 0.0  ;;  %11106 = vmatmul.mubr.msk.bf16.gmra.mrb[236].mxu1 %vm1966_vm1, %v11545_v23  ;;  %v11551_v27 = vld [vmem:[%s16204_s0 + $0x648] sm:$0xff]  }
 0x1df   :  { %10553 = vmatprep.mubr.msk.bf16.mxu0 %vm11711_vm0, %v11710_v0  ;;  %11109 = vmatprep.mubr.msk.bf16.mxu1 %vm11711_vm0, %v11710_v0 }
 0x1e0   :  { %7877 = vst.msk [vmem:[%s16206_s3 + $0x100] sm:$0xf] %vm7812_vm2, %v9544_v32  ;;  %v9545_v36 = vpack.c.bf16 %v5111_v33, %v5111_v33  ;;  %8155 = vst.msk [vmem:[%s16206_s3 + $0x558] sm:$0xf] %vm7812_vm2, %v9822_v34  ;;  %v9823_v37 = vpack.c.bf16 %v5389_v35, %v5389_v35 }
 0x1e1   :  { %v3096_v38 = vpop.f32.mrb[132].mxu0  ;;  %v4208_v39 = vpop.f32.mrb[132].mxu1 }
 0x1e2   :  { %7878 = vst.msk [vmem:[%s16206_s3 + $0x104] sm:$0xf] %vm7812_vm2, %v9545_v36  ;;  %v3097_v40 = vadd.f32 %v12613_v60, %v3096_v38  ;;  %v10447_v41 = vpop.f32.mrb[133].mxu0  ;;  %8156 = vst.msk [vmem:[%s16206_s3 + $0x55c] sm:$0xf] %vm7812_vm2, %v9823_v37  ;;  %v4209_v43 = vadd.f32 %v12613_v60, %v4208_v39  ;;  %v11003_v44 = vpop.f32.mrb[133].mxu1 }
 0x1e3   :  { %v3099_v46 = vpop.f32.mrb[134].mxu0  ;;  %v4211_v47 = vpop.f32.mrb[134].mxu1 }
 0x1e4   :  { %v5112_v48 = vmax.f32 %v3097_v40, 0.0  ;;  %v3100_v49 = vadd.f32 %v12613_v60, %v3099_v46  ;;  %v10448_v50 = vpop.f32.mrb[135].mxu0  ;;  %v5390_v51 = vmax.f32 %v4209_v43, 0.0  ;;  %v4212_v52 = vadd.f32 %v12613_v60, %v4211_v47  ;;  %v11004_v53 = vpop.f32.mrb[135].mxu1  ;;  %v11552_v46 = vld [vmem:[%s16204_s0 + $0x1f8] sm:$0xff]  }
 0x1e6   :  { %v9546_v54 = vpack.c.bf16 %v5112_v48, %v5112_v48  ;;  %v5113_v55 = vmax.f32 %v3100_v49, 0.0  ;;  %10554 = vmatmul.mubr.msk.bf16.gmra.mrb[240].mxu0 %vm1966_vm1, %v11546_v42  ;;  %v9824_v56 = vpack.c.bf16 %v5390_v51, %v5390_v51  ;;  %v5391_v57 = vmax.f32 %v4212_v52, 0.0  ;;  %11110 = vmatmul.mubr.msk.bf16.gmra.mrb[240].mxu1 %vm1966_vm1, %v11547_v45  ;;  %v11553_v49 = vld [vmem:[%s16204_s0 + $0x650] sm:$0xff]  }
 0x1e7   :  { %10557 = vmatprep.mubr.msk.bf16.mxu0 %vm11711_vm0, %v11710_v0  ;;  %11113 = vmatprep.mubr.msk.bf16.mxu1 %vm11711_vm0, %v11710_v0 }
 0x1e8   :  { %7879 = vst.msk [vmem:[%s16206_s3 + $0x108] sm:$0xf] %vm7812_vm2, %v9546_v54  ;;  %v9547_v58 = vpack.c.bf16 %v5113_v55, %v5113_v55  ;;  %8157 = vst.msk [vmem:[%s16206_s3 + $0x560] sm:$0xf] %vm7812_vm2, %v9824_v56  ;;  %v9825_v59 = vpack.c.bf16 %v5391_v57, %v5391_v57 }
 0x1e9   :  { %v3104_v61 = vpop.f32.mrb[136].mxu0  ;;  %v4216_v62 = vpop.f32.mrb[136].mxu1 }
 0x1ea   :  { %7880 = vst.msk [vmem:[%s16206_s3 + $0x10c] sm:$0xf] %vm7812_vm2, %v9547_v58  ;;  %v3105_v63 = vadd.f32 %v12613_v60, %v3104_v61  ;;  %v10451_v1 = vpop.f32.mrb[137].mxu0  ;;  %8158 = vst.msk [vmem:[%s16206_s3 + $0x564] sm:$0xf] %vm7812_vm2, %v9825_v59  ;;  %v4217_v4 = vadd.f32 %v13170_v3, %v4216_v62  ;;  %v11007_v5 = vpop.f32.mrb[137].mxu1 }
 0x1eb   :  { %v11549_v60 = vld [vmem:[%s16204_s0 + $0x640] sm:$0xff]   ;;  %v3107_v6 = vpop.f32.mrb[138].mxu0  ;;  %v4219_v7 = vpop.f32.mrb[138].mxu1 }
 0x1ec   :  { %v5114_v8 = vmax.f32 %v3105_v63, 0.0  ;;  %v3108_v9 = vadd.f32 %v13170_v3, %v3107_v6  ;;  %v10452_v10 = vpop.f32.mrb[139].mxu0  ;;  %v5392_v11 = vmax.f32 %v4217_v4, 0.0  ;;  %v4220_v12 = vadd.f32 %v13170_v3, %v4219_v7  ;;  %v11008_v13 = vpop.f32.mrb[139].mxu1  ;;  %v11554_v6 = vld [vmem:[%s16204_s0 + $0x200] sm:$0xff]  }
 0x1ee   :  { %v9548_v14 = vpack.c.bf16 %v5114_v8, %v5114_v8  ;;  %v5115_v15 = vmax.f32 %v3108_v9, 0.0  ;;  %10558 = vmatmul.mubr.msk.bf16.gmra.mrb[244].mxu0 %vm1966_vm1, %v11548_v2  ;;  %v9826_v16 = vpack.c.bf16 %v5392_v11, %v5392_v11  ;;  %v5393_v17 = vmax.f32 %v4220_v12, 0.0  ;;  %11114 = vmatmul.mubr.msk.bf16.gmra.mrb[244].mxu1 %vm1966_vm1, %v11549_v60  ;;  %v11555_v9 = vld [vmem:[%s16204_s0 + $0x658] sm:$0xff]  }
 0x1ef   :  { %10561 = vmatprep.mubr.msk.bf16.mxu0 %vm11711_vm0, %v11710_v0  ;;  %11117 = vmatprep.mubr.msk.bf16.mxu1 %vm11711_vm0, %v11710_v0 }
 0x1f0   :  { %7881 = vst.msk [vmem:[%s16206_s3 + $0x110] sm:$0xf] %vm7812_vm2, %v9548_v14  ;;  %v9549_v18 = vpack.c.bf16 %v5115_v15, %v5115_v15  ;;  %8159 = vst.msk [vmem:[%s16206_s3 + $0x568] sm:$0xf] %vm7812_vm2, %v9826_v16  ;;  %v9827_v19 = vpack.c.bf16 %v5393_v17, %v5393_v17 }
 0x1f1   :  { %v3112_v20 = vpop.f32.mrb[140].mxu0  ;;  %v4224_v21 = vpop.f32.mrb[140].mxu1 }
 0x1f2   :  { %7882 = vst.msk [vmem:[%s16206_s3 + $0x114] sm:$0xf] %vm7812_vm2, %v9549_v18  ;;  %v3113_v22 = vadd.f32 %v13170_v3, %v3112_v20  ;;  %v10455_v23 = vpop.f32.mrb[141].mxu0  ;;  %8160 = vst.msk [vmem:[%s16206_s3 + $0x56c] sm:$0xf] %vm7812_vm2, %v9827_v19  ;;  %v4225_v25 = vadd.f32 %v13170_v3, %v4224_v21  ;;  %v11011_v26 = vpop.f32.mrb[141].mxu1 }
 0x1f3   :  { %v3115_v28 = vpop.f32.mrb[142].mxu0  ;;  %v4227_v29 = vpop.f32.mrb[142].mxu1 }
 0x1f4   :  { %v5116_v30 = vmax.f32 %v3113_v22, 0.0  ;;  %v3116_v31 = vadd.f32 %v13170_v3, %v3115_v28  ;;  %v10456_v32 = vpop.f32.mrb[143].mxu0  ;;  %v5394_v33 = vmax.f32 %v4225_v25, 0.0  ;;  %v4228_v34 = vadd.f32 %v13170_v3, %v4227_v29  ;;  %v11012_v35 = vpop.f32.mrb[143].mxu1  ;;  %v11556_v28 = vld [vmem:[%s16204_s0 + $0x208] sm:$0xff]  }
 0x1f6   :  { %v9550_v36 = vpack.c.bf16 %v5116_v30, %v5116_v30  ;;  %v5117_v37 = vmax.f32 %v3116_v31, 0.0  ;;  %10562 = vmatmul.mubr.msk.bf16.gmra.mrb[248].mxu0 %vm1966_vm1, %v11550_v24  ;;  %v9828_v38 = vpack.c.bf16 %v5394_v33, %v5394_v33  ;;  %v5395_v39 = vmax.f32 %v4228_v34, 0.0  ;;  %11118 = vmatmul.mubr.msk.bf16.gmra.mrb[248].mxu1 %vm1966_vm1, %v11551_v27  ;;  %v11557_v31 = vld [vmem:[%s16204_s0 + $0x660] sm:$0xff]  }
 0x1f7   :  { %10565 = vmatprep.mubr.msk.bf16.mxu0 %vm11711_vm0, %v11710_v0  ;;  %11121 = vmatprep.mubr.msk.bf16.mxu1 %vm11711_vm0, %v11710_v0 }
 0x1f8   :  { %7883 = vst.msk [vmem:[%s16206_s3 + $0x118] sm:$0xf] %vm7812_vm2, %v9550_v36  ;;  %v9551_v40 = vpack.c.bf16 %v5117_v37, %v5117_v37  ;;  %8161 = vst.msk [vmem:[%s16206_s3 + $0x570] sm:$0xf] %vm7812_vm2, %v9828_v38  ;;  %v9829_v41 = vpack.c.bf16 %v5395_v39, %v5395_v39 }
 0x1f9   :  { %v3120_v42 = vpop.f32.mrb[144].mxu0  ;;  %v4232_v43 = vpop.f32.mrb[144].mxu1 }
 0x1fa   :  { %7884 = vst.msk [vmem:[%s16206_s3 + $0x11c] sm:$0xf] %vm7812_vm2, %v9551_v40  ;;  %v3121_v44 = vadd.f32 %v13170_v3, %v3120_v42  ;;  %v10459_v45 = vpop.f32.mrb[145].mxu0  ;;  %8162 = vst.msk [vmem:[%s16206_s3 + $0x574] sm:$0xf] %vm7812_vm2, %v9829_v41  ;;  %v4233_v47 = vadd.f32 %v13170_v3, %v4232_v43  ;;  %v11015_v48 = vpop.f32.mrb[145].mxu1 }
 0x1fb   :  { %v3123_v50 = vpop.f32.mrb[146].mxu0  ;;  %v4235_v51 = vpop.f32.mrb[146].mxu1 }
 0x1fc   :  { %v5118_v52 = vmax.f32 %v3121_v44, 0.0  ;;  %v3124_v53 = vadd.f32 %v13170_v3, %v3123_v50  ;;  %v10460_v54 = vpop.f32.mrb[147].mxu0  ;;  %v5396_v55 = vmax.f32 %v4233_v47, 0.0  ;;  %v4236_v56 = vadd.f32 %v13170_v3, %v4235_v51  ;;  %v11016_v57 = vpop.f32.mrb[147].mxu1  ;;  %v11558_v50 = vld [vmem:[%s16204_s0 + $0x210] sm:$0xff]  }
 0x1fe   :  { %v9552_v58 = vpack.c.bf16 %v5118_v52, %v5118_v52  ;;  %v5119_v59 = vmax.f32 %v3124_v53, 0.0  ;;  %10566 = vmatmul.mubr.msk.bf16.gmra.mrb[252].mxu0 %vm1966_vm1, %v11552_v46  ;;  %v9830_v61 = vpack.c.bf16 %v5396_v55, %v5396_v55  ;;  %v5397_v62 = vmax.f32 %v4236_v56, 0.0  ;;  %11122 = vmatmul.mubr.msk.bf16.gmra.mrb[252].mxu1 %vm1966_vm1, %v11553_v49  ;;  %v11559_v53 = vld [vmem:[%s16204_s0 + $0x668] sm:$0xff]  }
 0x1ff   :  { %10569 = vmatprep.mubr.msk.bf16.mxu0 %vm11711_vm0, %v11710_v0  ;;  %11125 = vmatprep.mubr.msk.bf16.mxu1 %vm11711_vm0, %v11710_v0 }
 0x200   :  { %7885 = vst.msk [vmem:[%s16206_s3 + $0x120] sm:$0xf] %vm7812_vm2, %v9552_v58  ;;  %v9553_v63 = vpack.c.bf16 %v5119_v59, %v5119_v59  ;;  %8163 = vst.msk [vmem:[%s16206_s3 + $0x578] sm:$0xf] %vm7812_vm2, %v9830_v61  ;;  %v9831_v1 = vpack.c.bf16 %v5397_v62, %v5397_v62 }
 0x201   :  { %v3128_v2 = vpop.f32.mrb[148].mxu0  ;;  %v4240_v4 = vpop.f32.mrb[148].mxu1 }
 0x202   :  { %7886 = vst.msk [vmem:[%s16206_s3 + $0x124] sm:$0xf] %vm7812_vm2, %v9553_v63  ;;  %v3129_v5 = vadd.f32 %v13170_v3, %v3128_v2  ;;  %v10463_v60 = vpop.f32.mrb[149].mxu0  ;;  %8164 = vst.msk [vmem:[%s16206_s3 + $0x57c] sm:$0xf] %vm7812_vm2, %v9831_v1  ;;  %v4241_v7 = vadd.f32 %v13170_v3, %v4240_v4  ;;  %v11019_v8 = vpop.f32.mrb[149].mxu1 }
 0x203   :  { %v3131_v10 = vpop.f32.mrb[150].mxu0  ;;  %v4243_v11 = vpop.f32.mrb[150].mxu1 }
 0x204   :  { %v5120_v12 = vmax.f32 %v3129_v5, 0.0  ;;  %v3132_v13 = vadd.f32 %v13170_v3, %v3131_v10  ;;  %v10464_v14 = vpop.f32.mrb[151].mxu0  ;;  %v5398_v15 = vmax.f32 %v4241_v7, 0.0  ;;  %v4244_v16 = vadd.f32 %v13170_v3, %v4243_v11  ;;  %v11020_v17 = vpop.f32.mrb[151].mxu1  ;;  %v11560_v10 = vld [vmem:[%s16204_s0 + $0x218] sm:$0xff]  }
 0x206   :  { %v9554_v18 = vpack.c.bf16 %v5120_v12, %v5120_v12  ;;  %v5121_v19 = vmax.f32 %v3132_v13, 0.0  ;;  %10570 = vmatmul.mubr.msk.bf16.gmra.mrb[0].mxu0 %vm1966_vm1, %v11554_v6  ;;  %v9832_v20 = vpack.c.bf16 %v5398_v15, %v5398_v15  ;;  %v5399_v21 = vmax.f32 %v4244_v16, 0.0  ;;  %11126 = vmatmul.mubr.msk.bf16.gmra.mrb[0].mxu1 %vm1966_vm1, %v11555_v9  ;;  %v11561_v13 = vld [vmem:[%s16204_s0 + $0x670] sm:$0xff]  }
 0x207   :  { %10573 = vmatprep.mubr.msk.bf16.mxu0 %vm11711_vm0, %v11710_v0  ;;  %11129 = vmatprep.mubr.msk.bf16.mxu1 %vm11711_vm0, %v11710_v0 }
 0x208   :  { %7887 = vst.msk [vmem:[%s16206_s3 + $0x128] sm:$0xf] %vm7812_vm2, %v9554_v18  ;;  %v9555_v22 = vpack.c.bf16 %v5121_v19, %v5121_v19  ;;  %8165 = vst.msk [vmem:[%s16206_s3 + $0x580] sm:$0xf] %vm7812_vm2, %v9832_v20  ;;  %v9833_v23 = vpack.c.bf16 %v5399_v21, %v5399_v21 }
 0x209   :  { %v3136_v24 = vpop.f32.mrb[152].mxu0  ;;  %v4248_v25 = vpop.f32.mrb[152].mxu1 }
 0x20a   :  { %7888 = vst.msk [vmem:[%s16206_s3 + $0x12c] sm:$0xf] %vm7812_vm2, %v9555_v22  ;;  %v3137_v26 = vadd.f32 %v13170_v3, %v3136_v24  ;;  %v10467_v27 = vpop.f32.mrb[153].mxu0  ;;  %8166 = vst.msk [vmem:[%s16206_s3 + $0x584] sm:$0xf] %vm7812_vm2, %v9833_v23  ;;  %v4249_v29 = vadd.f32 %v13170_v3, %v4248_v25  ;;  %v11023_v30 = vpop.f32.mrb[153].mxu1 }
 0x20b   :  { %v3139_v32 = vpop.f32.mrb[154].mxu0  ;;  %v4251_v33 = vpop.f32.mrb[154].mxu1 }
 0x20c   :  { %v5122_v34 = vmax.f32 %v3137_v26, 0.0  ;;  %v3140_v35 = vadd.f32 %v13170_v3, %v3139_v32  ;;  %v10468_v36 = vpop.f32.mrb[155].mxu0  ;;  %v5400_v37 = vmax.f32 %v4249_v29, 0.0  ;;  %v4252_v38 = vadd.f32 %v13170_v3, %v4251_v33  ;;  %v11024_v39 = vpop.f32.mrb[155].mxu1  ;;  %v11562_v32 = vld [vmem:[%s16204_s0 + $0x220] sm:$0xff]  }
 0x20e   :  { %v9556_v40 = vpack.c.bf16 %v5122_v34, %v5122_v34  ;;  %v5123_v41 = vmax.f32 %v3140_v35, 0.0  ;;  %10574 = vmatmul.mubr.msk.bf16.gmra.mrb[4].mxu0 %vm1966_vm1, %v11556_v28  ;;  %v9834_v42 = vpack.c.bf16 %v5400_v37, %v5400_v37  ;;  %v5401_v43 = vmax.f32 %v4252_v38, 0.0  ;;  %11130 = vmatmul.mubr.msk.bf16.gmra.mrb[4].mxu1 %vm1966_vm1, %v11557_v31  ;;  %v11563_v35 = vld [vmem:[%s16204_s0 + $0x678] sm:$0xff]  }
 0x20f   :  { %10577 = vmatprep.mubr.msk.bf16.mxu0 %vm11711_vm0, %v11710_v0  ;;  %11133 = vmatprep.mubr.msk.bf16.mxu1 %vm11711_vm0, %v11710_v0 }
 0x210   :  { %7889 = vst.msk [vmem:[%s16206_s3 + $0x130] sm:$0xf] %vm7812_vm2, %v9556_v40  ;;  %v9557_v44 = vpack.c.bf16 %v5123_v41, %v5123_v41  ;;  %8167 = vst.msk [vmem:[%s16206_s3 + $0x588] sm:$0xf] %vm7812_vm2, %v9834_v42  ;;  %v9835_v45 = vpack.c.bf16 %v5401_v43, %v5401_v43 }
 0x211   :  { %v3144_v46 = vpop.f32.mrb[156].mxu0  ;;  %v4256_v47 = vpop.f32.mrb[156].mxu1 }
 0x212   :  { %7890 = vst.msk [vmem:[%s16206_s3 + $0x134] sm:$0xf] %vm7812_vm2, %v9557_v44  ;;  %v3145_v48 = vadd.f32 %v13170_v3, %v3144_v46  ;;  %v10471_v49 = vpop.f32.mrb[157].mxu0  ;;  %8168 = vst.msk [vmem:[%s16206_s3 + $0x58c] sm:$0xf] %vm7812_vm2, %v9835_v45  ;;  %v4257_v51 = vadd.f32 %v13170_v3, %v4256_v47  ;;  %v11027_v52 = vpop.f32.mrb[157].mxu1 }
 0x213   :  { %v3147_v54 = vpop.f32.mrb[158].mxu0  ;;  %v4259_v55 = vpop.f32.mrb[158].mxu1 }
 0x214   :  { %v5124_v56 = vmax.f32 %v3145_v48, 0.0  ;;  %v3148_v57 = vadd.f32 %v13170_v3, %v3147_v54  ;;  %v10472_v58 = vpop.f32.mrb[159].mxu0  ;;  %v5402_v59 = vmax.f32 %v4257_v51, 0.0  ;;  %v4260_v61 = vadd.f32 %v13170_v3, %v4259_v55  ;;  %v11028_v62 = vpop.f32.mrb[159].mxu1  ;;  %v11564_v54 = vld [vmem:[%s16204_s0 + $0x228] sm:$0xff]  }
 0x216   :  { %v9558_v63 = vpack.c.bf16 %v5124_v56, %v5124_v56  ;;  %v5125_v1 = vmax.f32 %v3148_v57, 0.0  ;;  %10578 = vmatmul.mubr.msk.bf16.gmra.mrb[8].mxu0 %vm1966_vm1, %v11558_v50  ;;  %v9836_v2 = vpack.c.bf16 %v5402_v59, %v5402_v59  ;;  %v5403_v4 = vmax.f32 %v4260_v61, 0.0  ;;  %11134 = vmatmul.mubr.msk.bf16.gmra.mrb[8].mxu1 %vm1966_vm1, %v11559_v53  ;;  %v11565_v57 = vld [vmem:[%s16204_s0 + $0x680] sm:$0xff]  }
 0x217   :  { %10581 = vmatprep.mubr.msk.bf16.mxu0 %vm11711_vm0, %v11710_v0  ;;  %11137 = vmatprep.mubr.msk.bf16.mxu1 %vm11711_vm0, %v11710_v0 }
 0x218   :  { %7891 = vst.msk [vmem:[%s16206_s3 + $0x138] sm:$0xf] %vm7812_vm2, %v9558_v63  ;;  %v9559_v5 = vpack.c.bf16 %v5125_v1, %v5125_v1  ;;  %8169 = vst.msk [vmem:[%s16206_s3 + $0x590] sm:$0xf] %vm7812_vm2, %v9836_v2  ;;  %v9837_v60 = vpack.c.bf16 %v5403_v4, %v5403_v4 }
 0x219   :  { %v3152_v6 = vpop.f32.mrb[160].mxu0  ;;  %v4264_v7 = vpop.f32.mrb[160].mxu1 }
 0x21a   :  { %7892 = vst.msk [vmem:[%s16206_s3 + $0x13c] sm:$0xf] %vm7812_vm2, %v9559_v5  ;;  %v3153_v8 = vadd.f32 %v13170_v3, %v3152_v6  ;;  %v10475_v9 = vpop.f32.mrb[161].mxu0  ;;  %8170 = vst.msk [vmem:[%s16206_s3 + $0x594] sm:$0xf] %vm7812_vm2, %v9837_v60  ;;  %v4265_v11 = vadd.f32 %v13170_v3, %v4264_v7  ;;  %v11031_v12 = vpop.f32.mrb[161].mxu1 }
 0x21b   :  { %v3155_v14 = vpop.f32.mrb[162].mxu0  ;;  %v4267_v15 = vpop.f32.mrb[162].mxu1 }
 0x21c   :  { %v5126_v16 = vmax.f32 %v3153_v8, 0.0  ;;  %v3156_v17 = vadd.f32 %v13170_v3, %v3155_v14  ;;  %v10476_v18 = vpop.f32.mrb[163].mxu0  ;;  %v5404_v19 = vmax.f32 %v4265_v11, 0.0  ;;  %v4268_v20 = vadd.f32 %v13170_v3, %v4267_v15  ;;  %v11032_v21 = vpop.f32.mrb[163].mxu1  ;;  %v11566_v14 = vld [vmem:[%s16204_s0 + $0x230] sm:$0xff]  }
 0x21e   :  { %v9560_v22 = vpack.c.bf16 %v5126_v16, %v5126_v16  ;;  %v5127_v23 = vmax.f32 %v3156_v17, 0.0  ;;  %10582 = vmatmul.mubr.msk.bf16.gmra.mrb[12].mxu0 %vm1966_vm1, %v11560_v10  ;;  %v9838_v24 = vpack.c.bf16 %v5404_v19, %v5404_v19  ;;  %v5405_v25 = vmax.f32 %v4268_v20, 0.0  ;;  %11138 = vmatmul.mubr.msk.bf16.gmra.mrb[12].mxu1 %vm1966_vm1, %v11561_v13  ;;  %v11567_v17 = vld [vmem:[%s16204_s0 + $0x688] sm:$0xff]  }
 0x21f   :  { %10585 = vmatprep.mubr.msk.bf16.mxu0 %vm11711_vm0, %v11710_v0  ;;  %11141 = vmatprep.mubr.msk.bf16.mxu1 %vm11711_vm0, %v11710_v0 }
 0x220   :  { %7893 = vst.msk [vmem:[%s16206_s3 + $0x140] sm:$0xf] %vm7812_vm2, %v9560_v22  ;;  %v9561_v26 = vpack.c.bf16 %v5127_v23, %v5127_v23  ;;  %8171 = vst.msk [vmem:[%s16206_s3 + $0x598] sm:$0xf] %vm7812_vm2, %v9838_v24  ;;  %v9839_v27 = vpack.c.bf16 %v5405_v25, %v5405_v25 }
 0x221   :  { %v3160_v28 = vpop.f32.mrb[164].mxu0  ;;  %v4272_v29 = vpop.f32.mrb[164].mxu1 }
 0x222   :  { %7894 = vst.msk [vmem:[%s16206_s3 + $0x144] sm:$0xf] %vm7812_vm2, %v9561_v26  ;;  %v3161_v30 = vadd.f32 %v13170_v3, %v3160_v28  ;;  %v10479_v31 = vpop.f32.mrb[165].mxu0  ;;  %8172 = vst.msk [vmem:[%s16206_s3 + $0x59c] sm:$0xf] %vm7812_vm2, %v9839_v27  ;;  %v4273_v33 = vadd.f32 %v13170_v3, %v4272_v29  ;;  %v11035_v34 = vpop.f32.mrb[165].mxu1 }
 0x223   :  { %v3163_v36 = vpop.f32.mrb[166].mxu0  ;;  %v4275_v37 = vpop.f32.mrb[166].mxu1 }
 0x224   :  { %v5128_v38 = vmax.f32 %v3161_v30, 0.0  ;;  %v3164_v39 = vadd.f32 %v13170_v3, %v3163_v36  ;;  %v10480_v40 = vpop.f32.mrb[167].mxu0  ;;  %v5406_v41 = vmax.f32 %v4273_v33, 0.0  ;;  %v4276_v42 = vadd.f32 %v13170_v3, %v4275_v37  ;;  %v11036_v43 = vpop.f32.mrb[167].mxu1  ;;  %v11568_v36 = vld [vmem:[%s16204_s0 + $0x238] sm:$0xff]  }
 0x226   :  { %v9562_v44 = vpack.c.bf16 %v5128_v38, %v5128_v38  ;;  %v5129_v45 = vmax.f32 %v3164_v39, 0.0  ;;  %10586 = vmatmul.mubr.msk.bf16.gmra.mrb[16].mxu0 %vm1966_vm1, %v11562_v32  ;;  %v9840_v46 = vpack.c.bf16 %v5406_v41, %v5406_v41  ;;  %v5407_v47 = vmax.f32 %v4276_v42, 0.0  ;;  %11142 = vmatmul.mubr.msk.bf16.gmra.mrb[16].mxu1 %vm1966_vm1, %v11563_v35  ;;  %v11569_v39 = vld [vmem:[%s16204_s0 + $0x690] sm:$0xff]  }
 0x227   :  { %10589 = vmatprep.mubr.msk.bf16.mxu0 %vm11711_vm0, %v11710_v0  ;;  %11145 = vmatprep.mubr.msk.bf16.mxu1 %vm11711_vm0, %v11710_v0 }
 0x228   :  { %7895 = vst.msk [vmem:[%s16206_s3 + $0x148] sm:$0xf] %vm7812_vm2, %v9562_v44  ;;  %v9563_v48 = vpack.c.bf16 %v5129_v45, %v5129_v45  ;;  %8173 = vst.msk [vmem:[%s16206_s3 + $0x5a0] sm:$0xf] %vm7812_vm2, %v9840_v46  ;;  %v9841_v49 = vpack.c.bf16 %v5407_v47, %v5407_v47 }
 0x229   :  { %v3168_v50 = vpop.f32.mrb[168].mxu0  ;;  %v4280_v51 = vpop.f32.mrb[168].mxu1 }
 0x22a   :  { %7896 = vst.msk [vmem:[%s16206_s3 + $0x14c] sm:$0xf] %vm7812_vm2, %v9563_v48  ;;  %v3169_v52 = vadd.f32 %v13170_v3, %v3168_v50  ;;  %v10483_v53 = vpop.f32.mrb[169].mxu0  ;;  %8174 = vst.msk [vmem:[%s16206_s3 + $0x5a4] sm:$0xf] %vm7812_vm2, %v9841_v49  ;;  %v4281_v55 = vadd.f32 %v13170_v3, %v4280_v51  ;;  %v11039_v56 = vpop.f32.mrb[169].mxu1 }
 0x22b   :  { %v3171_v58 = vpop.f32.mrb[170].mxu0  ;;  %v4283_v59 = vpop.f32.mrb[170].mxu1 }
 0x22c   :  { %v5130_v61 = vmax.f32 %v3169_v52, 0.0  ;;  %v3172_v62 = vadd.f32 %v13170_v3, %v3171_v58  ;;  %v10484_v63 = vpop.f32.mrb[171].mxu0  ;;  %v5408_v1 = vmax.f32 %v4281_v55, 0.0  ;;  %v4284_v2 = vadd.f32 %v13170_v3, %v4283_v59  ;;  %v11040_v4 = vpop.f32.mrb[171].mxu1  ;;  %v11570_v58 = vld [vmem:[%s16204_s0 + $0x240] sm:$0xff]  }
 0x22e   :  { %v9564_v5 = vpack.c.bf16 %v5130_v61, %v5130_v61  ;;  %v5131_v60 = vmax.f32 %v3172_v62, 0.0  ;;  %10590 = vmatmul.mubr.msk.bf16.gmra.mrb[20].mxu0 %vm1966_vm1, %v11564_v54  ;;  %v9842_v6 = vpack.c.bf16 %v5408_v1, %v5408_v1  ;;  %v5409_v7 = vmax.f32 %v4284_v2, 0.0  ;;  %11146 = vmatmul.mubr.msk.bf16.gmra.mrb[20].mxu1 %vm1966_vm1, %v11565_v57  ;;  %v11571_v62 = vld [vmem:[%s16204_s0 + $0x698] sm:$0xff]  }
 0x22f   :  { %10593 = vmatprep.mubr.msk.bf16.mxu0 %vm11711_vm0, %v11710_v0  ;;  %11149 = vmatprep.mubr.msk.bf16.mxu1 %vm11711_vm0, %v11710_v0 }
 0x230   :  { %7897 = vst.msk [vmem:[%s16206_s3 + $0x150] sm:$0xf] %vm7812_vm2, %v9564_v5  ;;  %v9565_v8 = vpack.c.bf16 %v5131_v60, %v5131_v60  ;;  %8175 = vst.msk [vmem:[%s16206_s3 + $0x5a8] sm:$0xf] %vm7812_vm2, %v9842_v6  ;;  %v9843_v9 = vpack.c.bf16 %v5409_v7, %v5409_v7 }
 0x231   :  { %v3176_v10 = vpop.f32.mrb[172].mxu0  ;;  %v4288_v11 = vpop.f32.mrb[172].mxu1 }
 0x232   :  { %7898 = vst.msk [vmem:[%s16206_s3 + $0x154] sm:$0xf] %vm7812_vm2, %v9565_v8  ;;  %v3177_v12 = vadd.f32 %v13170_v3, %v3176_v10  ;;  %v10487_v13 = vpop.f32.mrb[173].mxu0  ;;  %8176 = vst.msk [vmem:[%s16206_s3 + $0x5ac] sm:$0xf] %vm7812_vm2, %v9843_v9  ;;  %v4289_v15 = vadd.f32 %v13170_v3, %v4288_v11  ;;  %v11043_v16 = vpop.f32.mrb[173].mxu1 }
 0x233   :  { %v3179_v18 = vpop.f32.mrb[174].mxu0  ;;  %v4291_v19 = vpop.f32.mrb[174].mxu1 }
 0x234   :  { %v5132_v20 = vmax.f32 %v3177_v12, 0.0  ;;  %v3180_v21 = vadd.f32 %v13170_v3, %v3179_v18  ;;  %v10488_v22 = vpop.f32.mrb[175].mxu0  ;;  %v5410_v23 = vmax.f32 %v4289_v15, 0.0  ;;  %v4292_v24 = vadd.f32 %v13170_v3, %v4291_v19  ;;  %v11044_v25 = vpop.f32.mrb[175].mxu1  ;;  %v11572_v18 = vld [vmem:[%s16204_s0 + $0x248] sm:$0xff]  }
 0x236   :  { %v9566_v26 = vpack.c.bf16 %v5132_v20, %v5132_v20  ;;  %v5133_v27 = vmax.f32 %v3180_v21, 0.0  ;;  %10594 = vmatmul.mubr.msk.bf16.gmra.mrb[24].mxu0 %vm1966_vm1, %v11566_v14  ;;  %v9844_v28 = vpack.c.bf16 %v5410_v23, %v5410_v23  ;;  %v5411_v29 = vmax.f32 %v4292_v24, 0.0  ;;  %11150 = vmatmul.mubr.msk.bf16.gmra.mrb[24].mxu1 %vm1966_vm1, %v11567_v17  ;;  %v11573_v21 = vld [vmem:[%s16204_s0 + $0x6a0] sm:$0xff]  }
 0x237   :  { %10597 = vmatprep.mubr.msk.bf16.mxu0 %vm11711_vm0, %v11710_v0  ;;  %11153 = vmatprep.mubr.msk.bf16.mxu1 %vm11711_vm0, %v11710_v0 }
 0x238   :  { %7899 = vst.msk [vmem:[%s16206_s3 + $0x158] sm:$0xf] %vm7812_vm2, %v9566_v26  ;;  %v9567_v30 = vpack.c.bf16 %v5133_v27, %v5133_v27  ;;  %8177 = vst.msk [vmem:[%s16206_s3 + $0x5b0] sm:$0xf] %vm7812_vm2, %v9844_v28  ;;  %v9845_v31 = vpack.c.bf16 %v5411_v29, %v5411_v29 }
 0x239   :  { %v3184_v32 = vpop.f32.mrb[176].mxu0  ;;  %v4296_v33 = vpop.f32.mrb[176].mxu1 }
 0x23a   :  { %7900 = vst.msk [vmem:[%s16206_s3 + $0x15c] sm:$0xf] %vm7812_vm2, %v9567_v30  ;;  %v3185_v34 = vadd.f32 %v13170_v3, %v3184_v32  ;;  %v10491_v35 = vpop.f32.mrb[177].mxu0  ;;  %8178 = vst.msk [vmem:[%s16206_s3 + $0x5b4] sm:$0xf] %vm7812_vm2, %v9845_v31  ;;  %v4297_v37 = vadd.f32 %v13170_v3, %v4296_v33  ;;  %v11047_v38 = vpop.f32.mrb[177].mxu1 }
 0x23b   :  { %v3187_v40 = vpop.f32.mrb[178].mxu0  ;;  %v4299_v41 = vpop.f32.mrb[178].mxu1 }
 0x23c   :  { %v5134_v42 = vmax.f32 %v3185_v34, 0.0  ;;  %v3188_v43 = vadd.f32 %v13170_v3, %v3187_v40  ;;  %v10492_v44 = vpop.f32.mrb[179].mxu0  ;;  %v5412_v45 = vmax.f32 %v4297_v37, 0.0  ;;  %v4300_v46 = vadd.f32 %v13170_v3, %v4299_v41  ;;  %v11048_v47 = vpop.f32.mrb[179].mxu1  ;;  %v11574_v40 = vld [vmem:[%s16204_s0 + $0x250] sm:$0xff]  }
 0x23e   :  { %v9568_v48 = vpack.c.bf16 %v5134_v42, %v5134_v42  ;;  %v5135_v49 = vmax.f32 %v3188_v43, 0.0  ;;  %10598 = vmatmul.mubr.msk.bf16.gmra.mrb[28].mxu0 %vm1966_vm1, %v11568_v36  ;;  %v9846_v50 = vpack.c.bf16 %v5412_v45, %v5412_v45  ;;  %v5413_v51 = vmax.f32 %v4300_v46, 0.0  ;;  %11154 = vmatmul.mubr.msk.bf16.gmra.mrb[28].mxu1 %vm1966_vm1, %v11569_v39  ;;  %v11575_v43 = vld [vmem:[%s16204_s0 + $0x6a8] sm:$0xff]  }
 0x23f   :  { %10601 = vmatprep.mubr.msk.bf16.mxu0 %vm11711_vm0, %v11710_v0  ;;  %11157 = vmatprep.mubr.msk.bf16.mxu1 %vm11711_vm0, %v11710_v0 }
 0x240   :  { %7901 = vst.msk [vmem:[%s16206_s3 + $0x160] sm:$0xf] %vm7812_vm2, %v9568_v48  ;;  %v9569_v52 = vpack.c.bf16 %v5135_v49, %v5135_v49  ;;  %8179 = vst.msk [vmem:[%s16206_s3 + $0x5b8] sm:$0xf] %vm7812_vm2, %v9846_v50  ;;  %v9847_v53 = vpack.c.bf16 %v5413_v51, %v5413_v51 }
 0x241   :  { %v3192_v54 = vpop.f32.mrb[180].mxu0  ;;  %v4304_v55 = vpop.f32.mrb[180].mxu1 }
 0x242   :  { %7902 = vst.msk [vmem:[%s16206_s3 + $0x164] sm:$0xf] %vm7812_vm2, %v9569_v52  ;;  %v3193_v56 = vadd.f32 %v13170_v3, %v3192_v54  ;;  %v10495_v57 = vpop.f32.mrb[181].mxu0  ;;  %8180 = vst.msk [vmem:[%s16206_s3 + $0x5bc] sm:$0xf] %vm7812_vm2, %v9847_v53  ;;  %v4305_v59 = vadd.f32 %v13170_v3, %v4304_v55  ;;  %v11051_v61 = vpop.f32.mrb[181].mxu1 }
 0x243   :  { %v3195_v63 = vpop.f32.mrb[182].mxu0  ;;  %v4307_v1 = vpop.f32.mrb[182].mxu1 }
 0x244   :  { %v5136_v2 = vmax.f32 %v3193_v56, 0.0  ;;  %v3196_v4 = vadd.f32 %v13170_v3, %v3195_v63  ;;  %v10496_v5 = vpop.f32.mrb[183].mxu0  ;;  %v5414_v60 = vmax.f32 %v4305_v59, 0.0  ;;  %v4308_v6 = vadd.f32 %v13170_v3, %v4307_v1  ;;  %v11052_v7 = vpop.f32.mrb[183].mxu1  ;;  %v11576_v63 = vld [vmem:[%s16204_s0 + $0x258] sm:$0xff]  }
 0x246   :  { %v9570_v8 = vpack.c.bf16 %v5136_v2, %v5136_v2  ;;  %v5137_v9 = vmax.f32 %v3196_v4, 0.0  ;;  %10602 = vmatmul.mubr.msk.bf16.gmra.mrb[32].mxu0 %vm1966_vm1, %v11570_v58  ;;  %v9848_v10 = vpack.c.bf16 %v5414_v60, %v5414_v60  ;;  %v5415_v11 = vmax.f32 %v4308_v6, 0.0  ;;  %11158 = vmatmul.mubr.msk.bf16.gmra.mrb[32].mxu1 %vm1966_vm1, %v11571_v62  ;;  %v11577_v4 = vld [vmem:[%s16204_s0 + $0x6b0] sm:$0xff]  }
 0x247   :  { %10605 = vmatprep.mubr.msk.bf16.mxu0 %vm11711_vm0, %v11710_v0  ;;  %11161 = vmatprep.mubr.msk.bf16.mxu1 %vm11711_vm0, %v11710_v0 }
 0x248   :  { %7903 = vst.msk [vmem:[%s16206_s3 + $0x168] sm:$0xf] %vm7812_vm2, %v9570_v8  ;;  %v9571_v12 = vpack.c.bf16 %v5137_v9, %v5137_v9  ;;  %8181 = vst.msk [vmem:[%s16206_s3 + $0x5c0] sm:$0xf] %vm7812_vm2, %v9848_v10  ;;  %v9849_v13 = vpack.c.bf16 %v5415_v11, %v5415_v11 }
 0x249   :  { %v3200_v14 = vpop.f32.mrb[184].mxu0  ;;  %v4312_v15 = vpop.f32.mrb[184].mxu1 }
 0x24a   :  { %7904 = vst.msk [vmem:[%s16206_s3 + $0x16c] sm:$0xf] %vm7812_vm2, %v9571_v12  ;;  %v3201_v16 = vadd.f32 %v13170_v3, %v3200_v14  ;;  %v10499_v17 = vpop.f32.mrb[185].mxu0  ;;  %8182 = vst.msk [vmem:[%s16206_s3 + $0x5c4] sm:$0xf] %vm7812_vm2, %v9849_v13  ;;  %v4313_v19 = vadd.f32 %v13170_v3, %v4312_v15  ;;  %v11055_v20 = vpop.f32.mrb[185].mxu1 }
 0x24b   :  { %v3203_v22 = vpop.f32.mrb[186].mxu0  ;;  %v4315_v23 = vpop.f32.mrb[186].mxu1 }
 0x24c   :  { %v5138_v24 = vmax.f32 %v3201_v16, 0.0  ;;  %v3204_v25 = vadd.f32 %v13170_v3, %v3203_v22  ;;  %v10500_v26 = vpop.f32.mrb[187].mxu0  ;;  %v5416_v27 = vmax.f32 %v4313_v19, 0.0  ;;  %v4316_v28 = vadd.f32 %v13170_v3, %v4315_v23  ;;  %v11056_v29 = vpop.f32.mrb[187].mxu1  ;;  %v11578_v22 = vld [vmem:[%s16204_s0 + $0x260] sm:$0xff]  }
 0x24e   :  { %v9572_v30 = vpack.c.bf16 %v5138_v24, %v5138_v24  ;;  %v5139_v31 = vmax.f32 %v3204_v25, 0.0  ;;  %10606 = vmatmul.mubr.msk.bf16.gmra.mrb[36].mxu0 %vm1966_vm1, %v11572_v18  ;;  %v9850_v32 = vpack.c.bf16 %v5416_v27, %v5416_v27  ;;  %v5417_v33 = vmax.f32 %v4316_v28, 0.0  ;;  %11162 = vmatmul.mubr.msk.bf16.gmra.mrb[36].mxu1 %vm1966_vm1, %v11573_v21  ;;  %v11579_v25 = vld [vmem:[%s16204_s0 + $0x6b8] sm:$0xff]  }
 0x24f   :  { %10609 = vmatprep.mubr.msk.bf16.mxu0 %vm11711_vm0, %v11710_v0  ;;  %11165 = vmatprep.mubr.msk.bf16.mxu1 %vm11711_vm0, %v11710_v0 }
 0x250   :  { %7905 = vst.msk [vmem:[%s16206_s3 + $0x170] sm:$0xf] %vm7812_vm2, %v9572_v30  ;;  %v9573_v34 = vpack.c.bf16 %v5139_v31, %v5139_v31  ;;  %8183 = vst.msk [vmem:[%s16206_s3 + $0x5c8] sm:$0xf] %vm7812_vm2, %v9850_v32  ;;  %v9851_v35 = vpack.c.bf16 %v5417_v33, %v5417_v33 }
 0x251   :  { %v3208_v36 = vpop.f32.mrb[188].mxu0  ;;  %v4320_v37 = vpop.f32.mrb[188].mxu1 }
 0x252   :  { %7906 = vst.msk [vmem:[%s16206_s3 + $0x174] sm:$0xf] %vm7812_vm2, %v9573_v34  ;;  %v3209_v38 = vadd.f32 %v13170_v3, %v3208_v36  ;;  %v10503_v39 = vpop.f32.mrb[189].mxu0  ;;  %8184 = vst.msk [vmem:[%s16206_s3 + $0x5cc] sm:$0xf] %vm7812_vm2, %v9851_v35  ;;  %v4321_v41 = vadd.f32 %v13170_v3, %v4320_v37  ;;  %v11059_v42 = vpop.f32.mrb[189].mxu1 }
 0x253   :  { %v3211_v44 = vpop.f32.mrb[190].mxu0  ;;  %v4323_v45 = vpop.f32.mrb[190].mxu1 }
 0x254   :  { %v5140_v46 = vmax.f32 %v3209_v38, 0.0  ;;  %v3212_v47 = vadd.f32 %v13170_v3, %v3211_v44  ;;  %v10504_v48 = vpop.f32.mrb[191].mxu0  ;;  %v5418_v49 = vmax.f32 %v4321_v41, 0.0  ;;  %v4324_v50 = vadd.f32 %v13170_v3, %v4323_v45  ;;  %v11060_v51 = vpop.f32.mrb[191].mxu1  ;;  %v11580_v44 = vld [vmem:[%s16204_s0 + $0x268] sm:$0xff]  }
 0x256   :  { %v9574_v52 = vpack.c.bf16 %v5140_v46, %v5140_v46  ;;  %v5141_v53 = vmax.f32 %v3212_v47, 0.0  ;;  %10610 = vmatmul.mubr.msk.bf16.gmra.mrb[40].mxu0 %vm1966_vm1, %v11574_v40  ;;  %v9852_v54 = vpack.c.bf16 %v5418_v49, %v5418_v49  ;;  %v5419_v55 = vmax.f32 %v4324_v50, 0.0  ;;  %11166 = vmatmul.mubr.msk.bf16.gmra.mrb[40].mxu1 %vm1966_vm1, %v11575_v43  ;;  %v11581_v47 = vld [vmem:[%s16204_s0 + $0x6c0] sm:$0xff]  }
 0x257   :  { %10613 = vmatprep.mubr.msk.bf16.mxu0 %vm11711_vm0, %v11710_v0  ;;  %11169 = vmatprep.mubr.msk.bf16.mxu1 %vm11711_vm0, %v11710_v0 }
 0x258   :  { %7907 = vst.msk [vmem:[%s16206_s3 + $0x178] sm:$0xf] %vm7812_vm2, %v9574_v52  ;;  %v9575_v56 = vpack.c.bf16 %v5141_v53, %v5141_v53  ;;  %8185 = vst.msk [vmem:[%s16206_s3 + $0x5d0] sm:$0xf] %vm7812_vm2, %v9852_v54  ;;  %v9853_v57 = vpack.c.bf16 %v5419_v55, %v5419_v55 }
 0x259   :  { %v3216_v58 = vpop.f32.mrb[192].mxu0  ;;  %v4328_v59 = vpop.f32.mrb[192].mxu1 }
 0x25a   :  { %7908 = vst.msk [vmem:[%s16206_s3 + $0x17c] sm:$0xf] %vm7812_vm2, %v9575_v56  ;;  %v3217_v61 = vadd.f32 %v13170_v3, %v3216_v58  ;;  %v10507_v62 = vpop.f32.mrb[193].mxu0  ;;  %8186 = vst.msk [vmem:[%s16206_s3 + $0x5d4] sm:$0xf] %vm7812_vm2, %v9853_v57  ;;  %v4329_v1 = vadd.f32 %v13170_v3, %v4328_v59  ;;  %v11063_v2 = vpop.f32.mrb[193].mxu1 }
 0x25b   :  { %v3219_v5 = vpop.f32.mrb[194].mxu0  ;;  %v4331_v60 = vpop.f32.mrb[194].mxu1 }
 0x25c   :  { %v5142_v6 = vmax.f32 %v3217_v61, 0.0  ;;  %v3220_v7 = vadd.f32 %v13170_v3, %v3219_v5  ;;  %v10508_v8 = vpop.f32.mrb[195].mxu0  ;;  %v5420_v9 = vmax.f32 %v4329_v1, 0.0  ;;  %v4332_v10 = vadd.f32 %v13170_v3, %v4331_v60  ;;  %v11064_v11 = vpop.f32.mrb[195].mxu1  ;;  %v11582_v5 = vld [vmem:[%s16204_s0 + $0x270] sm:$0xff]  }
 0x25d   :  { %v13723_v11 = vld [vmem:[%s16205_s2] ss:$0 sm:$0xff] }
 0x25e   :  { %v9576_v12 = vpack.c.bf16 %v5142_v6, %v5142_v6  ;;  %v5143_v13 = vmax.f32 %v3220_v7, 0.0  ;;  %10614 = vmatmul.mubr.msk.bf16.gmra.mrb[44].mxu0 %vm1966_vm1, %v11576_v63  ;;  %v9854_v14 = vpack.c.bf16 %v5420_v9, %v5420_v9  ;;  %v5421_v15 = vmax.f32 %v4332_v10, 0.0  ;;  %11170 = vmatmul.mubr.msk.bf16.gmra.mrb[44].mxu1 %vm1966_vm1, %v11577_v4  ;;  %v11583_v7 = vld [vmem:[%s16204_s0 + $0x6c8] sm:$0xff]  }
 0x25f   :  { %10617 = vmatprep.mubr.msk.bf16.mxu0 %vm11711_vm0, %v11710_v0  ;;  %11173 = vmatprep.mubr.msk.bf16.mxu1 %vm11711_vm0, %v11710_v0 }
 0x260   :  { %7909 = vst.msk [vmem:[%s16206_s3 + $0x180] sm:$0xf] %vm7812_vm2, %v9576_v12  ;;  %v9577_v16 = vpack.c.bf16 %v5143_v13, %v5143_v13  ;;  %8187 = vst.msk [vmem:[%s16206_s3 + $0x5d8] sm:$0xf] %vm7812_vm2, %v9854_v14  ;;  %v9855_v17 = vpack.c.bf16 %v5421_v15, %v5421_v15 }
 0x261   :  { %v3224_v18 = vpop.f32.mrb[196].mxu0  ;;  %v4336_v19 = vpop.f32.mrb[196].mxu1 }
 0x262   :  { %7910 = vst.msk [vmem:[%s16206_s3 + $0x184] sm:$0xf] %vm7812_vm2, %v9577_v16  ;;  %v3225_v20 = vadd.f32 %v13170_v3, %v3224_v18  ;;  %v10511_v21 = vpop.f32.mrb[197].mxu0  ;;  %8188 = vst.msk [vmem:[%s16206_s3 + $0x5dc] sm:$0xf] %vm7812_vm2, %v9855_v17  ;;  %v4337_v23 = vadd.f32 %v13170_v3, %v4336_v19  ;;  %v11067_v24 = vpop.f32.mrb[197].mxu1 }
 0x263   :  { %v3227_v26 = vpop.f32.mrb[198].mxu0  ;;  %v4339_v27 = vpop.f32.mrb[198].mxu1 }
 0x264   :  { %v5144_v28 = vmax.f32 %v3225_v20, 0.0  ;;  %v3228_v29 = vadd.f32 %v13170_v3, %v3227_v26  ;;  %v10512_v30 = vpop.f32.mrb[199].mxu0  ;;  %v5422_v31 = vmax.f32 %v4337_v23, 0.0  ;;  %v4340_v32 = vadd.f32 %v13170_v3, %v4339_v27  ;;  %v11068_v33 = vpop.f32.mrb[199].mxu1  ;;  %v11584_v26 = vld [vmem:[%s16204_s0 + $0x278] sm:$0xff]  }
 0x266   :  { %v9578_v34 = vpack.c.bf16 %v5144_v28, %v5144_v28  ;;  %v5145_v35 = vmax.f32 %v3228_v29, 0.0  ;;  %10618 = vmatmul.mubr.msk.bf16.gmra.mrb[48].mxu0 %vm1966_vm1, %v11578_v22  ;;  %v9856_v36 = vpack.c.bf16 %v5422_v31, %v5422_v31  ;;  %v5423_v37 = vmax.f32 %v4340_v32, 0.0  ;;  %11174 = vmatmul.mubr.msk.bf16.gmra.mrb[48].mxu1 %vm1966_vm1, %v11579_v25  ;;  %v11585_v29 = vld [vmem:[%s16204_s0 + $0x6d0] sm:$0xff]  }
 0x267   :  { %10621 = vmatprep.mubr.msk.bf16.mxu0 %vm11711_vm0, %v11710_v0  ;;  %11177 = vmatprep.mubr.msk.bf16.mxu1 %vm11711_vm0, %v11710_v0 }
 0x268   :  { %7911 = vst.msk [vmem:[%s16206_s3 + $0x188] sm:$0xf] %vm7812_vm2, %v9578_v34  ;;  %v9579_v38 = vpack.c.bf16 %v5145_v35, %v5145_v35  ;;  %8189 = vst.msk [vmem:[%s16206_s3 + $0x5e0] sm:$0xf] %vm7812_vm2, %v9856_v36  ;;  %v9857_v39 = vpack.c.bf16 %v5423_v37, %v5423_v37 }
 0x269   :  { %v3232_v40 = vpop.f32.mrb[200].mxu0  ;;  %v4344_v41 = vpop.f32.mrb[200].mxu1 }
 0x26a   :  { %7912 = vst.msk [vmem:[%s16206_s3 + $0x18c] sm:$0xf] %vm7812_vm2, %v9579_v38  ;;  %v3233_v42 = vadd.f32 %v13170_v3, %v3232_v40  ;;  %v10515_v43 = vpop.f32.mrb[201].mxu0  ;;  %8190 = vst.msk [vmem:[%s16206_s3 + $0x5e4] sm:$0xf] %vm7812_vm2, %v9857_v39  ;;  %v4345_v45 = vadd.f32 %v13170_v3, %v4344_v41  ;;  %v11071_v46 = vpop.f32.mrb[201].mxu1 }
 0x26b   :  { %v3235_v48 = vpop.f32.mrb[202].mxu0  ;;  %v4347_v49 = vpop.f32.mrb[202].mxu1 }
 0x26c   :  { %v5146_v50 = vmax.f32 %v3233_v42, 0.0  ;;  %v3236_v51 = vadd.f32 %v13170_v3, %v3235_v48  ;;  %v10516_v52 = vpop.f32.mrb[203].mxu0  ;;  %v5424_v53 = vmax.f32 %v4345_v45, 0.0  ;;  %v4348_v54 = vadd.f32 %v13170_v3, %v4347_v49  ;;  %v11072_v55 = vpop.f32.mrb[203].mxu1  ;;  %v11586_v48 = vld [vmem:[%s16204_s0 + $0x280] sm:$0xff]  }
 0x26e   :  { %v9580_v56 = vpack.c.bf16 %v5146_v50, %v5146_v50  ;;  %v5147_v57 = vmax.f32 %v3236_v51, 0.0  ;;  %10622 = vmatmul.mubr.msk.bf16.gmra.mrb[52].mxu0 %vm1966_vm1, %v11580_v44  ;;  %v9858_v58 = vpack.c.bf16 %v5424_v53, %v5424_v53  ;;  %v5425_v59 = vmax.f32 %v4348_v54, 0.0  ;;  %11178 = vmatmul.mubr.msk.bf16.gmra.mrb[52].mxu1 %vm1966_vm1, %v11581_v47  ;;  %v11587_v51 = vld [vmem:[%s16204_s0 + $0x6d8] sm:$0xff]  }
 0x26f   :  { %10625 = vmatprep.mubr.msk.bf16.mxu0 %vm11711_vm0, %v11710_v0  ;;  %11181 = vmatprep.mubr.msk.bf16.mxu1 %vm11711_vm0, %v11710_v0 }
 0x270   :  { %7913 = vst.msk [vmem:[%s16206_s3 + $0x190] sm:$0xf] %vm7812_vm2, %v9580_v56  ;;  %v9581_v61 = vpack.c.bf16 %v5147_v57, %v5147_v57  ;;  %8191 = vst.msk [vmem:[%s16206_s3 + $0x5e8] sm:$0xf] %vm7812_vm2, %v9858_v58  ;;  %v9859_v62 = vpack.c.bf16 %v5425_v59, %v5425_v59 }
 0x271   :  { %v3240_v63 = vpop.f32.mrb[204].mxu0  ;;  %v4352_v1 = vpop.f32.mrb[204].mxu1 }
 0x272   :  { %7914 = vst.msk [vmem:[%s16206_s3 + $0x194] sm:$0xf] %vm7812_vm2, %v9581_v61  ;;  %v3241_v2 = vadd.f32 %v13170_v3, %v3240_v63  ;;  %v10519_v4 = vpop.f32.mrb[205].mxu0  ;;  %8192 = vst.msk [vmem:[%s16206_s3 + $0x5ec] sm:$0xf] %vm7812_vm2, %v9859_v62  ;;  %v4353_v60 = vadd.f32 %v13170_v3, %v4352_v1  ;;  %v11075_v6 = vpop.f32.mrb[205].mxu1 }
 0x273   :  { %v3243_v8 = vpop.f32.mrb[206].mxu0  ;;  %v4355_v9 = vpop.f32.mrb[206].mxu1 }
 0x274   :  { %v5148_v10 = vmax.f32 %v3241_v2, 0.0  ;;  %v3244_v12 = vadd.f32 %v13723_v11, %v3243_v8  ;;  %v10520_v13 = vpop.f32.mrb[207].mxu0  ;;  %v5426_v14 = vmax.f32 %v4353_v60, 0.0  ;;  %v4356_v15 = vadd.f32 %v13723_v11, %v4355_v9  ;;  %v11076_v3 = vpop.f32.mrb[207].mxu1  ;;  %v11588_v8 = vld [vmem:[%s16204_s0 + $0x288] sm:$0xff]  }
 0x276   :  { %v9582_v16 = vpack.c.bf16 %v5148_v10, %v5148_v10  ;;  %v5149_v17 = vmax.f32 %v3244_v12, 0.0  ;;  %10626 = vmatmul.mubr.msk.bf16.gmra.mrb[56].mxu0 %vm1966_vm1, %v11582_v5  ;;  %v9860_v18 = vpack.c.bf16 %v5426_v14, %v5426_v14  ;;  %v5427_v19 = vmax.f32 %v4356_v15, 0.0  ;;  %11182 = vmatmul.mubr.msk.bf16.gmra.mrb[56].mxu1 %vm1966_vm1, %v11583_v7  ;;  %v11589_v12 = vld [vmem:[%s16204_s0 + $0x6e0] sm:$0xff]  }
 0x277   :  { %10629 = vmatprep.mubr.msk.bf16.mxu0 %vm11711_vm0, %v11710_v0  ;;  %11185 = vmatprep.mubr.msk.bf16.mxu1 %vm11711_vm0, %v11710_v0 }
 0x278   :  { %7915 = vst.msk [vmem:[%s16206_s3 + $0x198] sm:$0xf] %vm7812_vm2, %v9582_v16  ;;  %v9583_v20 = vpack.c.bf16 %v5149_v17, %v5149_v17  ;;  %8193 = vst.msk [vmem:[%s16206_s3 + $0x5f0] sm:$0xf] %vm7812_vm2, %v9860_v18  ;;  %v9861_v21 = vpack.c.bf16 %v5427_v19, %v5427_v19 }
 0x279   :  { %v3248_v22 = vpop.f32.mrb[208].mxu0  ;;  %v4360_v23 = vpop.f32.mrb[208].mxu1 }
 0x27a   :  { %7916 = vst.msk [vmem:[%s16206_s3 + $0x19c] sm:$0xf] %vm7812_vm2, %v9583_v20  ;;  %v3249_v24 = vadd.f32 %v13723_v11, %v3248_v22  ;;  %v10523_v25 = vpop.f32.mrb[209].mxu0  ;;  %8194 = vst.msk [vmem:[%s16206_s3 + $0x5f4] sm:$0xf] %vm7812_vm2, %v9861_v21  ;;  %v4361_v27 = vadd.f32 %v13723_v11, %v4360_v23  ;;  %v11079_v28 = vpop.f32.mrb[209].mxu1 }
 0x27b   :  { %v3251_v30 = vpop.f32.mrb[210].mxu0  ;;  %v4363_v31 = vpop.f32.mrb[210].mxu1 }
 0x27c   :  { %v5150_v32 = vmax.f32 %v3249_v24, 0.0  ;;  %v3252_v33 = vadd.f32 %v13723_v11, %v3251_v30  ;;  %v10524_v34 = vpop.f32.mrb[211].mxu0  ;;  %v5428_v35 = vmax.f32 %v4361_v27, 0.0  ;;  %v4364_v36 = vadd.f32 %v13723_v11, %v4363_v31  ;;  %v11080_v37 = vpop.f32.mrb[211].mxu1  ;;  %v11590_v30 = vld [vmem:[%s16204_s0 + $0x290] sm:$0xff]  }
 0x27e   :  { %v9584_v38 = vpack.c.bf16 %v5150_v32, %v5150_v32  ;;  %v5151_v39 = vmax.f32 %v3252_v33, 0.0  ;;  %10630 = vmatmul.mubr.msk.bf16.gmra.mrb[60].mxu0 %vm1966_vm1, %v11584_v26  ;;  %v9862_v40 = vpack.c.bf16 %v5428_v35, %v5428_v35  ;;  %v5429_v41 = vmax.f32 %v4364_v36, 0.0  ;;  %11186 = vmatmul.mubr.msk.bf16.gmra.mrb[60].mxu1 %vm1966_vm1, %v11585_v29  ;;  %v11591_v33 = vld [vmem:[%s16204_s0 + $0x6e8] sm:$0xff]  }
 0x27f   :  { %10633 = vmatprep.mubr.msk.bf16.mxu0 %vm11711_vm0, %v11710_v0  ;;  %11189 = vmatprep.mubr.msk.bf16.mxu1 %vm11711_vm0, %v11710_v0 }
 0x280   :  { %7917 = vst.msk [vmem:[%s16206_s3 + $0x1a0] sm:$0xf] %vm7812_vm2, %v9584_v38  ;;  %v9585_v42 = vpack.c.bf16 %v5151_v39, %v5151_v39  ;;  %8195 = vst.msk [vmem:[%s16206_s3 + $0x5f8] sm:$0xf] %vm7812_vm2, %v9862_v40  ;;  %v9863_v43 = vpack.c.bf16 %v5429_v41, %v5429_v41 }
 0x281   :  { %v3256_v44 = vpop.f32.mrb[212].mxu0  ;;  %v4368_v45 = vpop.f32.mrb[212].mxu1 }
 0x282   :  { %7918 = vst.msk [vmem:[%s16206_s3 + $0x1a4] sm:$0xf] %vm7812_vm2, %v9585_v42  ;;  %v3257_v46 = vadd.f32 %v13723_v11, %v3256_v44  ;;  %v10527_v47 = vpop.f32.mrb[213].mxu0  ;;  %8196 = vst.msk [vmem:[%s16206_s3 + $0x5fc] sm:$0xf] %vm7812_vm2, %v9863_v43  ;;  %v4369_v49 = vadd.f32 %v13723_v11, %v4368_v45  ;;  %v11083_v50 = vpop.f32.mrb[213].mxu1 }
 0x283   :  { %v3259_v52 = vpop.f32.mrb[214].mxu0  ;;  %v4371_v53 = vpop.f32.mrb[214].mxu1 }
 0x284   :  { %v5152_v54 = vmax.f32 %v3257_v46, 0.0  ;;  %v3260_v55 = vadd.f32 %v13723_v11, %v3259_v52  ;;  %v10528_v56 = vpop.f32.mrb[215].mxu0  ;;  %v5430_v57 = vmax.f32 %v4369_v49, 0.0  ;;  %v4372_v58 = vadd.f32 %v13723_v11, %v4371_v53  ;;  %v11084_v59 = vpop.f32.mrb[215].mxu1  ;;  %v11592_v52 = vld [vmem:[%s16204_s0 + $0x298] sm:$0xff]  }
 0x286   :  { %v9586_v61 = vpack.c.bf16 %v5152_v54, %v5152_v54  ;;  %v5153_v62 = vmax.f32 %v3260_v55, 0.0  ;;  %10634 = vmatmul.mubr.msk.bf16.gmra.mrb[64].mxu0 %vm1966_vm1, %v11586_v48  ;;  %v9864_v63 = vpack.c.bf16 %v5430_v57, %v5430_v57  ;;  %v5431_v1 = vmax.f32 %v4372_v58, 0.0  ;;  %11190 = vmatmul.mubr.msk.bf16.gmra.mrb[64].mxu1 %vm1966_vm1, %v11587_v51  ;;  %v11593_v55 = vld [vmem:[%s16204_s0 + $0x6f0] sm:$0xff]  }
 0x287   :  { %10637 = vmatprep.mubr.msk.bf16.mxu0 %vm11711_vm0, %v11710_v0  ;;  %11193 = vmatprep.mubr.msk.bf16.mxu1 %vm11711_vm0, %v11710_v0 }
 0x288   :  { %7919 = vst.msk [vmem:[%s16206_s3 + $0x1a8] sm:$0xf] %vm7812_vm2, %v9586_v61  ;;  %v9587_v2 = vpack.c.bf16 %v5153_v62, %v5153_v62  ;;  %8197 = vst.msk [vmem:[%s16206_s3 + $0x600] sm:$0xf] %vm7812_vm2, %v9864_v63  ;;  %v9865_v4 = vpack.c.bf16 %v5431_v1, %v5431_v1 }
 0x289   :  { %v3264_v5 = vpop.f32.mrb[216].mxu0  ;;  %v4376_v60 = vpop.f32.mrb[216].mxu1 }
 0x28a   :  { %7920 = vst.msk [vmem:[%s16206_s3 + $0x1ac] sm:$0xf] %vm7812_vm2, %v9587_v2  ;;  %v3265_v6 = vadd.f32 %v13723_v11, %v3264_v5  ;;  %v10531_v7 = vpop.f32.mrb[217].mxu0  ;;  %8198 = vst.msk [vmem:[%s16206_s3 + $0x604] sm:$0xf] %vm7812_vm2, %v9865_v4  ;;  %v4377_v9 = vadd.f32 %v13723_v11, %v4376_v60  ;;  %v11087_v10 = vpop.f32.mrb[217].mxu1 }
 0x28b   :  { %v3267_v13 = vpop.f32.mrb[218].mxu0  ;;  %v4379_v14 = vpop.f32.mrb[218].mxu1 }
 0x28c   :  { %v5154_v15 = vmax.f32 %v3265_v6, 0.0  ;;  %v3268_v3 = vadd.f32 %v13723_v11, %v3267_v13  ;;  %v10532_v16 = vpop.f32.mrb[219].mxu0  ;;  %v5432_v17 = vmax.f32 %v4377_v9, 0.0  ;;  %v4380_v18 = vadd.f32 %v13723_v11, %v4379_v14  ;;  %v11088_v19 = vpop.f32.mrb[219].mxu1  ;;  %v11594_v13 = vld [vmem:[%s16204_s0 + $0x2a0] sm:$0xff]  }
 0x28e   :  { %v9588_v20 = vpack.c.bf16 %v5154_v15, %v5154_v15  ;;  %v5155_v21 = vmax.f32 %v3268_v3, 0.0  ;;  %10638 = vmatmul.mubr.msk.bf16.gmra.mrb[68].mxu0 %vm1966_vm1, %v11588_v8  ;;  %v9866_v22 = vpack.c.bf16 %v5432_v17, %v5432_v17  ;;  %v5433_v23 = vmax.f32 %v4380_v18, 0.0  ;;  %11194 = vmatmul.mubr.msk.bf16.gmra.mrb[68].mxu1 %vm1966_vm1, %v11589_v12  ;;  %v11595_v3 = vld [vmem:[%s16204_s0 + $0x6f8] sm:$0xff]  }
 0x28f   :  { %10641 = vmatprep.mubr.msk.bf16.mxu0 %vm11711_vm0, %v11710_v0  ;;  %11197 = vmatprep.mubr.msk.bf16.mxu1 %vm11711_vm0, %v11710_v0 }
 0x290   :  { %7921 = vst.msk [vmem:[%s16206_s3 + $0x1b0] sm:$0xf] %vm7812_vm2, %v9588_v20  ;;  %v9589_v24 = vpack.c.bf16 %v5155_v21, %v5155_v21  ;;  %8199 = vst.msk [vmem:[%s16206_s3 + $0x608] sm:$0xf] %vm7812_vm2, %v9866_v22  ;;  %v9867_v25 = vpack.c.bf16 %v5433_v23, %v5433_v23 }
 0x291   :  { %v3272_v26 = vpop.f32.mrb[220].mxu0  ;;  %v4384_v27 = vpop.f32.mrb[220].mxu1 }
 0x292   :  { %7922 = vst.msk [vmem:[%s16206_s3 + $0x1b4] sm:$0xf] %vm7812_vm2, %v9589_v24  ;;  %v3273_v28 = vadd.f32 %v13723_v11, %v3272_v26  ;;  %v10535_v29 = vpop.f32.mrb[221].mxu0  ;;  %8200 = vst.msk [vmem:[%s16206_s3 + $0x60c] sm:$0xf] %vm7812_vm2, %v9867_v25  ;;  %v4385_v31 = vadd.f32 %v13723_v11, %v4384_v27  ;;  %v11091_v32 = vpop.f32.mrb[221].mxu1 }
 0x293   :  { %v3275_v34 = vpop.f32.mrb[222].mxu0  ;;  %v4387_v35 = vpop.f32.mrb[222].mxu1 }
 0x294   :  { %v5156_v36 = vmax.f32 %v3273_v28, 0.0  ;;  %v3276_v37 = vadd.f32 %v13723_v11, %v3275_v34  ;;  %v10536_v38 = vpop.f32.mrb[223].mxu0  ;;  %v5434_v39 = vmax.f32 %v4385_v31, 0.0  ;;  %v4388_v40 = vadd.f32 %v13723_v11, %v4387_v35  ;;  %v11092_v41 = vpop.f32.mrb[223].mxu1  ;;  %v11596_v34 = vld [vmem:[%s16204_s0 + $0x2a8] sm:$0xff]  }
 0x296   :  { %v9590_v42 = vpack.c.bf16 %v5156_v36, %v5156_v36  ;;  %v5157_v43 = vmax.f32 %v3276_v37, 0.0  ;;  %10642 = vmatmul.mubr.msk.bf16.gmra.mrb[72].mxu0 %vm1966_vm1, %v11590_v30  ;;  %v9868_v44 = vpack.c.bf16 %v5434_v39, %v5434_v39  ;;  %v5435_v45 = vmax.f32 %v4388_v40, 0.0  ;;  %11198 = vmatmul.mubr.msk.bf16.gmra.mrb[72].mxu1 %vm1966_vm1, %v11591_v33  ;;  %v11597_v37 = vld [vmem:[%s16204_s0 + $0x700] sm:$0xff]  }
 0x297   :  { %10645 = vmatprep.mubr.msk.bf16.mxu0 %vm11711_vm0, %v11710_v0  ;;  %11201 = vmatprep.mubr.msk.bf16.mxu1 %vm11711_vm0, %v11710_v0 }
 0x298   :  { %7923 = vst.msk [vmem:[%s16206_s3 + $0x1b8] sm:$0xf] %vm7812_vm2, %v9590_v42  ;;  %v9591_v46 = vpack.c.bf16 %v5157_v43, %v5157_v43  ;;  %8201 = vst.msk [vmem:[%s16206_s3 + $0x610] sm:$0xf] %vm7812_vm2, %v9868_v44  ;;  %v9869_v47 = vpack.c.bf16 %v5435_v45, %v5435_v45 }
 0x299   :  { %v3280_v48 = vpop.f32.mrb[224].mxu0  ;;  %v4392_v49 = vpop.f32.mrb[224].mxu1 }
 0x29a   :  { %7924 = vst.msk [vmem:[%s16206_s3 + $0x1bc] sm:$0xf] %vm7812_vm2, %v9591_v46  ;;  %v3281_v50 = vadd.f32 %v13723_v11, %v3280_v48  ;;  %v10539_v51 = vpop.f32.mrb[225].mxu0  ;;  %8202 = vst.msk [vmem:[%s16206_s3 + $0x614] sm:$0xf] %vm7812_vm2, %v9869_v47  ;;  %v4393_v53 = vadd.f32 %v13723_v11, %v4392_v49  ;;  %v11095_v54 = vpop.f32.mrb[225].mxu1 }
 0x29b   :  { %v3283_v56 = vpop.f32.mrb[226].mxu0  ;;  %v4395_v57 = vpop.f32.mrb[226].mxu1 }
 0x29c   :  { %v5158_v58 = vmax.f32 %v3281_v50, 0.0  ;;  %v3284_v59 = vadd.f32 %v13723_v11, %v3283_v56  ;;  %v10540_v61 = vpop.f32.mrb[227].mxu0  ;;  %v5436_v62 = vmax.f32 %v4393_v53, 0.0  ;;  %v4396_v63 = vadd.f32 %v13723_v11, %v4395_v57  ;;  %v11096_v1 = vpop.f32.mrb[227].mxu1  ;;  %v11598_v56 = vld [vmem:[%s16204_s0 + $0x2b0] sm:$0xff]  }
 0x29e   :  { %v9592_v2 = vpack.c.bf16 %v5158_v58, %v5158_v58  ;;  %v5159_v4 = vmax.f32 %v3284_v59, 0.0  ;;  %10646 = vmatmul.mubr.msk.bf16.gmra.mrb[76].mxu0 %vm1966_vm1, %v11592_v52  ;;  %v9870_v5 = vpack.c.bf16 %v5436_v62, %v5436_v62  ;;  %v5437_v60 = vmax.f32 %v4396_v63, 0.0  ;;  %11202 = vmatmul.mubr.msk.bf16.gmra.mrb[76].mxu1 %vm1966_vm1, %v11593_v55  ;;  %v11599_v59 = vld [vmem:[%s16204_s0 + $0x708] sm:$0xff]  }
 0x29f   :  { %10649 = vmatprep.mubr.msk.bf16.mxu0 %vm11711_vm0, %v11710_v0  ;;  %11205 = vmatprep.mubr.msk.bf16.mxu1 %vm11711_vm0, %v11710_v0 }
 0x2a0   :  { %7925 = vst.msk [vmem:[%s16206_s3 + $0x1c0] sm:$0xf] %vm7812_vm2, %v9592_v2  ;;  %v9593_v6 = vpack.c.bf16 %v5159_v4, %v5159_v4  ;;  %8203 = vst.msk [vmem:[%s16206_s3 + $0x618] sm:$0xf] %vm7812_vm2, %v9870_v5  ;;  %v9871_v7 = vpack.c.bf16 %v5437_v60, %v5437_v60 }
 0x2a1   :  { %v3288_v8 = vpop.f32.mrb[228].mxu0  ;;  %v4400_v9 = vpop.f32.mrb[228].mxu1 }
 0x2a2   :  { %7926 = vst.msk [vmem:[%s16206_s3 + $0x1c4] sm:$0xf] %vm7812_vm2, %v9593_v6  ;;  %v3289_v10 = vadd.f32 %v13723_v11, %v3288_v8  ;;  %v10543_v12 = vpop.f32.mrb[229].mxu0  ;;  %8204 = vst.msk [vmem:[%s16206_s3 + $0x61c] sm:$0xf] %vm7812_vm2, %v9871_v7  ;;  %v4401_v14 = vadd.f32 %v13723_v11, %v4400_v9  ;;  %v11099_v15 = vpop.f32.mrb[229].mxu1 }
 0x2a3   :  { %v3291_v16 = vpop.f32.mrb[230].mxu0  ;;  %v4403_v17 = vpop.f32.mrb[230].mxu1 }
 0x2a4   :  { %v5160_v18 = vmax.f32 %v3289_v10, 0.0  ;;  %v3292_v19 = vadd.f32 %v13723_v11, %v3291_v16  ;;  %v10544_v20 = vpop.f32.mrb[231].mxu0  ;;  %v5438_v21 = vmax.f32 %v4401_v14, 0.0  ;;  %v4404_v22 = vadd.f32 %v13723_v11, %v4403_v17  ;;  %v11100_v23 = vpop.f32.mrb[231].mxu1  ;;  %v11600_v16 = vld [vmem:[%s16204_s0 + $0x2b8] sm:$0xff]  }
 0x2a6   :  { %v9594_v24 = vpack.c.bf16 %v5160_v18, %v5160_v18  ;;  %v5161_v25 = vmax.f32 %v3292_v19, 0.0  ;;  %10650 = vmatmul.mubr.msk.bf16.gmra.mrb[80].mxu0 %vm1966_vm1, %v11594_v13  ;;  %v9872_v26 = vpack.c.bf16 %v5438_v21, %v5438_v21  ;;  %v5439_v27 = vmax.f32 %v4404_v22, 0.0  ;;  %11206 = vmatmul.mubr.msk.bf16.gmra.mrb[80].mxu1 %vm1966_vm1, %v11595_v3  ;;  %v11601_v19 = vld [vmem:[%s16204_s0 + $0x710] sm:$0xff]  }
 0x2a7   :  { %10653 = vmatprep.mubr.msk.bf16.mxu0 %vm11711_vm0, %v11710_v0  ;;  %11209 = vmatprep.mubr.msk.bf16.mxu1 %vm11711_vm0, %v11710_v0 }
 0x2a8   :  { %7927 = vst.msk [vmem:[%s16206_s3 + $0x1c8] sm:$0xf] %vm7812_vm2, %v9594_v24  ;;  %v9595_v28 = vpack.c.bf16 %v5161_v25, %v5161_v25  ;;  %8205 = vst.msk [vmem:[%s16206_s3 + $0x620] sm:$0xf] %vm7812_vm2, %v9872_v26  ;;  %v9873_v29 = vpack.c.bf16 %v5439_v27, %v5439_v27 }
 0x2a9   :  { %v3296_v30 = vpop.f32.mrb[232].mxu0  ;;  %v4408_v31 = vpop.f32.mrb[232].mxu1 }
 0x2aa   :  { %7928 = vst.msk [vmem:[%s16206_s3 + $0x1cc] sm:$0xf] %vm7812_vm2, %v9595_v28  ;;  %v3297_v32 = vadd.f32 %v13723_v11, %v3296_v30  ;;  %v10547_v33 = vpop.f32.mrb[233].mxu0  ;;  %8206 = vst.msk [vmem:[%s16206_s3 + $0x624] sm:$0xf] %vm7812_vm2, %v9873_v29  ;;  %v4409_v35 = vadd.f32 %v13723_v11, %v4408_v31  ;;  %v11103_v36 = vpop.f32.mrb[233].mxu1 }
 0x2ab   :  { %v3299_v38 = vpop.f32.mrb[234].mxu0  ;;  %v4411_v39 = vpop.f32.mrb[234].mxu1 }
 0x2ac   :  { %v5162_v40 = vmax.f32 %v3297_v32, 0.0  ;;  %v3300_v41 = vadd.f32 %v13723_v11, %v3299_v38  ;;  %v10548_v42 = vpop.f32.mrb[235].mxu0  ;;  %v5440_v43 = vmax.f32 %v4409_v35, 0.0  ;;  %v4412_v44 = vadd.f32 %v13723_v11, %v4411_v39  ;;  %v11104_v45 = vpop.f32.mrb[235].mxu1  ;;  %v11602_v38 = vld [vmem:[%s16204_s0 + $0x2c0] sm:$0xff]  }
 0x2ae   :  { %v9596_v46 = vpack.c.bf16 %v5162_v40, %v5162_v40  ;;  %v5163_v47 = vmax.f32 %v3300_v41, 0.0  ;;  %10654 = vmatmul.mubr.msk.bf16.gmra.mrb[84].mxu0 %vm1966_vm1, %v11596_v34  ;;  %v9874_v48 = vpack.c.bf16 %v5440_v43, %v5440_v43  ;;  %v5441_v49 = vmax.f32 %v4412_v44, 0.0  ;;  %11210 = vmatmul.mubr.msk.bf16.gmra.mrb[84].mxu1 %vm1966_vm1, %v11597_v37  ;;  %v11603_v41 = vld [vmem:[%s16204_s0 + $0x718] sm:$0xff]  }
 0x2af   :  { %10657 = vmatprep.mubr.msk.bf16.mxu0 %vm11711_vm0, %v11710_v0  ;;  %11213 = vmatprep.mubr.msk.bf16.mxu1 %vm11711_vm0, %v11710_v0 }
 0x2b0   :  { %7929 = vst.msk [vmem:[%s16206_s3 + $0x1d0] sm:$0xf] %vm7812_vm2, %v9596_v46  ;;  %v9597_v50 = vpack.c.bf16 %v5163_v47, %v5163_v47  ;;  %8207 = vst.msk [vmem:[%s16206_s3 + $0x628] sm:$0xf] %vm7812_vm2, %v9874_v48  ;;  %v9875_v51 = vpack.c.bf16 %v5441_v49, %v5441_v49 }
 0x2b1   :  { %v3304_v52 = vpop.f32.mrb[236].mxu0  ;;  %v4416_v53 = vpop.f32.mrb[236].mxu1 }
 0x2b2   :  { %7930 = vst.msk [vmem:[%s16206_s3 + $0x1d4] sm:$0xf] %vm7812_vm2, %v9597_v50  ;;  %v3305_v54 = vadd.f32 %v13723_v11, %v3304_v52  ;;  %v10551_v55 = vpop.f32.mrb[237].mxu0  ;;  %8208 = vst.msk [vmem:[%s16206_s3 + $0x62c] sm:$0xf] %vm7812_vm2, %v9875_v51  ;;  %v4417_v57 = vadd.f32 %v13723_v11, %v4416_v53  ;;  %v11107_v58 = vpop.f32.mrb[237].mxu1 }
 0x2b3   :  { %v3307_v61 = vpop.f32.mrb[238].mxu0  ;;  %v4419_v62 = vpop.f32.mrb[238].mxu1 }
 0x2b4   :  { %v5164_v63 = vmax.f32 %v3305_v54, 0.0  ;;  %v3308_v1 = vadd.f32 %v13723_v11, %v3307_v61  ;;  %v10552_v2 = vpop.f32.mrb[239].mxu0  ;;  %v5442_v4 = vmax.f32 %v4417_v57, 0.0  ;;  %v4420_v5 = vadd.f32 %v13723_v11, %v4419_v62  ;;  %v11108_v60 = vpop.f32.mrb[239].mxu1  ;;  %v11604_v61 = vld [vmem:[%s16204_s0 + $0x2c8] sm:$0xff]  }
 0x2b6   :  { %v9598_v6 = vpack.c.bf16 %v5164_v63, %v5164_v63  ;;  %v5165_v7 = vmax.f32 %v3308_v1, 0.0  ;;  %10658 = vmatmul.mubr.msk.bf16.gmra.mrb[88].mxu0 %vm1966_vm1, %v11598_v56  ;;  %v9876_v8 = vpack.c.bf16 %v5442_v4, %v5442_v4  ;;  %v5443_v9 = vmax.f32 %v4420_v5, 0.0  ;;  %11214 = vmatmul.mubr.msk.bf16.gmra.mrb[88].mxu1 %vm1966_vm1, %v11599_v59  ;;  %v11605_v1 = vld [vmem:[%s16204_s0 + $0x720] sm:$0xff]  }
 0x2b7   :  { %10661 = vmatprep.mubr.msk.bf16.mxu0 %vm11711_vm0, %v11710_v0  ;;  %11217 = vmatprep.mubr.msk.bf16.mxu1 %vm11711_vm0, %v11710_v0 }
 0x2b8   :  { %7931 = vst.msk [vmem:[%s16206_s3 + $0x1d8] sm:$0xf] %vm7812_vm2, %v9598_v6  ;;  %v9599_v10 = vpack.c.bf16 %v5165_v7, %v5165_v7  ;;  %8209 = vst.msk [vmem:[%s16206_s3 + $0x630] sm:$0xf] %vm7812_vm2, %v9876_v8  ;;  %v9877_v12 = vpack.c.bf16 %v5443_v9, %v5443_v9 }
 0x2b9   :  { %v3312_v13 = vpop.f32.mrb[240].mxu0  ;;  %v4424_v14 = vpop.f32.mrb[240].mxu1 }
 0x2ba   :  { %7932 = vst.msk [vmem:[%s16206_s3 + $0x1dc] sm:$0xf] %vm7812_vm2, %v9599_v10  ;;  %v3313_v15 = vadd.f32 %v13723_v11, %v3312_v13  ;;  %v10555_v3 = vpop.f32.mrb[241].mxu0  ;;  %8210 = vst.msk [vmem:[%s16206_s3 + $0x634] sm:$0xf] %vm7812_vm2, %v9877_v12  ;;  %v4425_v17 = vadd.f32 %v13723_v11, %v4424_v14  ;;  %v11111_v18 = vpop.f32.mrb[241].mxu1 }
 0x2bb   :  { %v3315_v20 = vpop.f32.mrb[242].mxu0  ;;  %v4427_v21 = vpop.f32.mrb[242].mxu1 }
 0x2bc   :  { %v5166_v22 = vmax.f32 %v3313_v15, 0.0  ;;  %v3316_v23 = vadd.f32 %v13723_v11, %v3315_v20  ;;  %v10556_v24 = vpop.f32.mrb[243].mxu0  ;;  %v5444_v25 = vmax.f32 %v4425_v17, 0.0  ;;  %v4428_v26 = vadd.f32 %v13723_v11, %v4427_v21  ;;  %v11112_v27 = vpop.f32.mrb[243].mxu1  ;;  %v11606_v20 = vld [vmem:[%s16204_s0 + $0x2d0] sm:$0xff]  }
 0x2be   :  { %v9600_v28 = vpack.c.bf16 %v5166_v22, %v5166_v22  ;;  %v5167_v29 = vmax.f32 %v3316_v23, 0.0  ;;  %10662 = vmatmul.mubr.msk.bf16.gmra.mrb[92].mxu0 %vm1966_vm1, %v11600_v16  ;;  %v9878_v30 = vpack.c.bf16 %v5444_v25, %v5444_v25  ;;  %v5445_v31 = vmax.f32 %v4428_v26, 0.0  ;;  %11218 = vmatmul.mubr.msk.bf16.gmra.mrb[92].mxu1 %vm1966_vm1, %v11601_v19  ;;  %v11607_v23 = vld [vmem:[%s16204_s0 + $0x728] sm:$0xff]  }
 0x2bf   :  { %10665 = vmatprep.mubr.msk.bf16.mxu0 %vm11711_vm0, %v11710_v0  ;;  %11221 = vmatprep.mubr.msk.bf16.mxu1 %vm11711_vm0, %v11710_v0 }
 0x2c0   :  { %7933 = vst.msk [vmem:[%s16206_s3 + $0x1e0] sm:$0xf] %vm7812_vm2, %v9600_v28  ;;  %v9601_v32 = vpack.c.bf16 %v5167_v29, %v5167_v29  ;;  %8211 = vst.msk [vmem:[%s16206_s3 + $0x638] sm:$0xf] %vm7812_vm2, %v9878_v30  ;;  %v9879_v33 = vpack.c.bf16 %v5445_v31, %v5445_v31 }
 0x2c1   :  { %v3320_v34 = vpop.f32.mrb[244].mxu0  ;;  %v4432_v35 = vpop.f32.mrb[244].mxu1 }
 0x2c2   :  { %7934 = vst.msk [vmem:[%s16206_s3 + $0x1e4] sm:$0xf] %vm7812_vm2, %v9601_v32  ;;  %v3321_v36 = vadd.f32 %v13723_v11, %v3320_v34  ;;  %v10559_v37 = vpop.f32.mrb[245].mxu0  ;;  %8212 = vst.msk [vmem:[%s16206_s3 + $0x63c] sm:$0xf] %vm7812_vm2, %v9879_v33  ;;  %v4433_v39 = vadd.f32 %v13723_v11, %v4432_v35  ;;  %v11115_v40 = vpop.f32.mrb[245].mxu1 }
 0x2c3   :  { %v3323_v42 = vpop.f32.mrb[246].mxu0  ;;  %v4435_v43 = vpop.f32.mrb[246].mxu1 }
 0x2c4   :  { %v5168_v44 = vmax.f32 %v3321_v36, 0.0  ;;  %v3324_v45 = vadd.f32 %v13723_v11, %v3323_v42  ;;  %v10560_v46 = vpop.f32.mrb[247].mxu0  ;;  %v5446_v47 = vmax.f32 %v4433_v39, 0.0  ;;  %v4436_v48 = vadd.f32 %v13723_v11, %v4435_v43  ;;  %v11116_v49 = vpop.f32.mrb[247].mxu1  ;;  %v11608_v42 = vld [vmem:[%s16204_s0 + $0x2d8] sm:$0xff]  }
 0x2c6   :  { %v9602_v50 = vpack.c.bf16 %v5168_v44, %v5168_v44  ;;  %v5169_v51 = vmax.f32 %v3324_v45, 0.0  ;;  %10666 = vmatmul.mubr.msk.bf16.gmra.mrb[96].mxu0 %vm1966_vm1, %v11602_v38  ;;  %v9880_v52 = vpack.c.bf16 %v5446_v47, %v5446_v47  ;;  %v5447_v53 = vmax.f32 %v4436_v48, 0.0  ;;  %11222 = vmatmul.mubr.msk.bf16.gmra.mrb[96].mxu1 %vm1966_vm1, %v11603_v41  ;;  %v11609_v45 = vld [vmem:[%s16204_s0 + $0x730] sm:$0xff]  }
 0x2c7   :  { %10669 = vmatprep.mubr.msk.bf16.mxu0 %vm11711_vm0, %v11710_v0  ;;  %11225 = vmatprep.mubr.msk.bf16.mxu1 %vm11711_vm0, %v11710_v0 }
 0x2c8   :  { %7935 = vst.msk [vmem:[%s16206_s3 + $0x1e8] sm:$0xf] %vm7812_vm2, %v9602_v50  ;;  %v9603_v54 = vpack.c.bf16 %v5169_v51, %v5169_v51  ;;  %8213 = vst.msk [vmem:[%s16206_s3 + $0x640] sm:$0xf] %vm7812_vm2, %v9880_v52  ;;  %v9881_v55 = vpack.c.bf16 %v5447_v53, %v5447_v53 }
 0x2c9   :  { %v3328_v56 = vpop.f32.mrb[248].mxu0  ;;  %v4440_v57 = vpop.f32.mrb[248].mxu1 }
 0x2ca   :  { %7936 = vst.msk [vmem:[%s16206_s3 + $0x1ec] sm:$0xf] %vm7812_vm2, %v9603_v54  ;;  %v3329_v58 = vadd.f32 %v13723_v11, %v3328_v56  ;;  %v10563_v59 = vpop.f32.mrb[249].mxu0  ;;  %8214 = vst.msk [vmem:[%s16206_s3 + $0x644] sm:$0xf] %vm7812_vm2, %v9881_v55  ;;  %v4441_v62 = vadd.f32 %v13723_v11, %v4440_v57  ;;  %v11119_v63 = vpop.f32.mrb[249].mxu1 }
 0x2cb   :  { %v3331_v2 = vpop.f32.mrb[250].mxu0  ;;  %v4443_v4 = vpop.f32.mrb[250].mxu1 }
 0x2cc   :  { %v5170_v5 = vmax.f32 %v3329_v58, 0.0  ;;  %v3332_v60 = vadd.f32 %v13723_v11, %v3331_v2  ;;  %v10564_v6 = vpop.f32.mrb[251].mxu0  ;;  %v5448_v7 = vmax.f32 %v4441_v62, 0.0  ;;  %v4444_v8 = vadd.f32 %v13723_v11, %v4443_v4  ;;  %v11120_v9 = vpop.f32.mrb[251].mxu1  ;;  %v11610_v2 = vld [vmem:[%s16204_s0 + $0x2e0] sm:$0xff]  }
 0x2ce   :  { %v9604_v10 = vpack.c.bf16 %v5170_v5, %v5170_v5  ;;  %v5171_v12 = vmax.f32 %v3332_v60, 0.0  ;;  %10670 = vmatmul.mubr.msk.bf16.gmra.mrb[100].mxu0 %vm1966_vm1, %v11604_v61  ;;  %v9882_v13 = vpack.c.bf16 %v5448_v7, %v5448_v7  ;;  %v5449_v14 = vmax.f32 %v4444_v8, 0.0  ;;  %11226 = vmatmul.mubr.msk.bf16.gmra.mrb[100].mxu1 %vm1966_vm1, %v11605_v1  ;;  %v11611_v60 = vld [vmem:[%s16204_s0 + $0x738] sm:$0xff]  }
 0x2cf   :  { %10673 = vmatprep.mubr.msk.bf16.mxu0 %vm11711_vm0, %v11710_v0  ;;  %11229 = vmatprep.mubr.msk.bf16.mxu1 %vm11711_vm0, %v11710_v0 }
 0x2d0   :  { %7937 = vst.msk [vmem:[%s16206_s3 + $0x1f0] sm:$0xf] %vm7812_vm2, %v9604_v10  ;;  %v9605_v15 = vpack.c.bf16 %v5171_v12, %v5171_v12  ;;  %8215 = vst.msk [vmem:[%s16206_s3 + $0x648] sm:$0xf] %vm7812_vm2, %v9882_v13  ;;  %v9883_v3 = vpack.c.bf16 %v5449_v14, %v5449_v14 }
 0x2d1   :  { %v3336_v16 = vpop.f32.mrb[252].mxu0  ;;  %v4448_v17 = vpop.f32.mrb[252].mxu1 }
 0x2d2   :  { %7938 = vst.msk [vmem:[%s16206_s3 + $0x1f4] sm:$0xf] %vm7812_vm2, %v9605_v15  ;;  %v3337_v18 = vadd.f32 %v13723_v11, %v3336_v16  ;;  %v10567_v19 = vpop.f32.mrb[253].mxu0  ;;  %8216 = vst.msk [vmem:[%s16206_s3 + $0x64c] sm:$0xf] %vm7812_vm2, %v9883_v3  ;;  %v4449_v21 = vadd.f32 %v13723_v11, %v4448_v17  ;;  %v11123_v22 = vpop.f32.mrb[253].mxu1 }
 0x2d3   :  { %v3339_v24 = vpop.f32.mrb[254].mxu0  ;;  %v4451_v25 = vpop.f32.mrb[254].mxu1 }
 0x2d4   :  { %v5172_v26 = vmax.f32 %v3337_v18, 0.0  ;;  %v3340_v27 = vadd.f32 %v13723_v11, %v3339_v24  ;;  %v10568_v28 = vpop.f32.mrb[255].mxu0  ;;  %v5450_v29 = vmax.f32 %v4449_v21, 0.0  ;;  %v4452_v30 = vadd.f32 %v13723_v11, %v4451_v25  ;;  %v11124_v31 = vpop.f32.mrb[255].mxu1  ;;  %v11612_v24 = vld [vmem:[%s16204_s0 + $0x2e8] sm:$0xff]  }
 0x2d6   :  { %v9606_v32 = vpack.c.bf16 %v5172_v26, %v5172_v26  ;;  %v5173_v33 = vmax.f32 %v3340_v27, 0.0  ;;  %10674 = vmatmul.mubr.msk.bf16.gmra.mrb[104].mxu0 %vm1966_vm1, %v11606_v20  ;;  %v9884_v34 = vpack.c.bf16 %v5450_v29, %v5450_v29  ;;  %v5451_v35 = vmax.f32 %v4452_v30, 0.0  ;;  %11230 = vmatmul.mubr.msk.bf16.gmra.mrb[104].mxu1 %vm1966_vm1, %v11607_v23  ;;  %v11613_v27 = vld [vmem:[%s16204_s0 + $0x740] sm:$0xff]  }
 0x2d7   :  { %10677 = vmatprep.mubr.msk.bf16.mxu0 %vm11711_vm0, %v11710_v0  ;;  %11233 = vmatprep.mubr.msk.bf16.mxu1 %vm11711_vm0, %v11710_v0 }
 0x2d8   :  { %7939 = vst.msk [vmem:[%s16206_s3 + $0x1f8] sm:$0xf] %vm7812_vm2, %v9606_v32  ;;  %v9607_v36 = vpack.c.bf16 %v5173_v33, %v5173_v33  ;;  %8217 = vst.msk [vmem:[%s16206_s3 + $0x650] sm:$0xf] %vm7812_vm2, %v9884_v34  ;;  %v9885_v37 = vpack.c.bf16 %v5451_v35, %v5451_v35 }
 0x2d9   :  { %v3344_v38 = vpop.f32.mrb[0].mxu0  ;;  %v4456_v39 = vpop.f32.mrb[0].mxu1 }
 0x2da   :  { %7940 = vst.msk [vmem:[%s16206_s3 + $0x1fc] sm:$0xf] %vm7812_vm2, %v9607_v36  ;;  %v3345_v40 = vadd.f32 %v13723_v11, %v3344_v38  ;;  %v10571_v41 = vpop.f32.mrb[1].mxu0  ;;  %8218 = vst.msk [vmem:[%s16206_s3 + $0x654] sm:$0xf] %vm7812_vm2, %v9885_v37  ;;  %v4457_v43 = vadd.f32 %v13723_v11, %v4456_v39  ;;  %v11127_v44 = vpop.f32.mrb[1].mxu1 }
 0x2db   :  { %v3347_v46 = vpop.f32.mrb[2].mxu0  ;;  %v4459_v47 = vpop.f32.mrb[2].mxu1 }
 0x2dc   :  { %v5174_v48 = vmax.f32 %v3345_v40, 0.0  ;;  %v3348_v49 = vadd.f32 %v13723_v11, %v3347_v46  ;;  %v10572_v50 = vpop.f32.mrb[3].mxu0  ;;  %v5452_v51 = vmax.f32 %v4457_v43, 0.0  ;;  %v4460_v52 = vadd.f32 %v13723_v11, %v4459_v47  ;;  %v11128_v53 = vpop.f32.mrb[3].mxu1  ;;  %v11614_v46 = vld [vmem:[%s16204_s0 + $0x2f0] sm:$0xff]  }
 0x2de   :  { %v9608_v54 = vpack.c.bf16 %v5174_v48, %v5174_v48  ;;  %v5175_v55 = vmax.f32 %v3348_v49, 0.0  ;;  %10678 = vmatmul.mubr.msk.bf16.gmra.mrb[108].mxu0 %vm1966_vm1, %v11608_v42  ;;  %v9886_v56 = vpack.c.bf16 %v5452_v51, %v5452_v51  ;;  %v5453_v57 = vmax.f32 %v4460_v52, 0.0  ;;  %11234 = vmatmul.mubr.msk.bf16.gmra.mrb[108].mxu1 %vm1966_vm1, %v11609_v45  ;;  %v11615_v49 = vld [vmem:[%s16204_s0 + $0x748] sm:$0xff]  }
 0x2df   :  { %10681 = vmatprep.mubr.msk.bf16.mxu0 %vm11711_vm0, %v11710_v0  ;;  %11237 = vmatprep.mubr.msk.bf16.mxu1 %vm11711_vm0, %v11710_v0 }
 0x2e0   :  { %7941 = vst.msk [vmem:[%s16206_s3 + $0x200] sm:$0xf] %vm7812_vm2, %v9608_v54  ;;  %v9609_v58 = vpack.c.bf16 %v5175_v55, %v5175_v55  ;;  %8219 = vst.msk [vmem:[%s16206_s3 + $0x658] sm:$0xf] %vm7812_vm2, %v9886_v56  ;;  %v9887_v59 = vpack.c.bf16 %v5453_v57, %v5453_v57 }
 0x2e1   :  { %v3352_v61 = vpop.f32.mrb[4].mxu0  ;;  %v4464_v62 = vpop.f32.mrb[4].mxu1 }
 0x2e2   :  { %7942 = vst.msk [vmem:[%s16206_s3 + $0x204] sm:$0xf] %vm7812_vm2, %v9609_v58  ;;  %v3353_v63 = vadd.f32 %v13723_v11, %v3352_v61  ;;  %v10575_v1 = vpop.f32.mrb[5].mxu0  ;;  %8220 = vst.msk [vmem:[%s16206_s3 + $0x65c] sm:$0xf] %vm7812_vm2, %v9887_v59  ;;  %v4465_v4 = vadd.f32 %v13723_v11, %v4464_v62  ;;  %v11131_v5 = vpop.f32.mrb[5].mxu1 }
 0x2e3   :  { %v3355_v6 = vpop.f32.mrb[6].mxu0  ;;  %v4467_v7 = vpop.f32.mrb[6].mxu1 }
 0x2e4   :  { %v5176_v8 = vmax.f32 %v3353_v63, 0.0  ;;  %v3356_v9 = vadd.f32 %v13723_v11, %v3355_v6  ;;  %v10576_v10 = vpop.f32.mrb[7].mxu0  ;;  %v5454_v12 = vmax.f32 %v4465_v4, 0.0  ;;  %v4468_v13 = vadd.f32 %v13723_v11, %v4467_v7  ;;  %v11132_v14 = vpop.f32.mrb[7].mxu1  ;;  %v11616_v6 = vld [vmem:[%s16204_s0 + $0x2f8] sm:$0xff]  }
 0x2e6   :  { %v9610_v15 = vpack.c.bf16 %v5176_v8, %v5176_v8  ;;  %v5177_v3 = vmax.f32 %v3356_v9, 0.0  ;;  %10682 = vmatmul.mubr.msk.bf16.gmra.mrb[112].mxu0 %vm1966_vm1, %v11610_v2  ;;  %v9888_v16 = vpack.c.bf16 %v5454_v12, %v5454_v12  ;;  %v5455_v17 = vmax.f32 %v4468_v13, 0.0  ;;  %11238 = vmatmul.mubr.msk.bf16.gmra.mrb[112].mxu1 %vm1966_vm1, %v11611_v60  ;;  %v11617_v9 = vld [vmem:[%s16204_s0 + $0x750] sm:$0xff]  }
 0x2e7   :  { %10685 = vmatprep.mubr.msk.bf16.mxu0 %vm11711_vm0, %v11710_v0  ;;  %11241 = vmatprep.mubr.msk.bf16.mxu1 %vm11711_vm0, %v11710_v0 }
 0x2e8   :  { %7943 = vst.msk [vmem:[%s16206_s3 + $0x208] sm:$0xf] %vm7812_vm2, %v9610_v15  ;;  %v9611_v18 = vpack.c.bf16 %v5177_v3, %v5177_v3  ;;  %8221 = vst.msk [vmem:[%s16206_s3 + $0x660] sm:$0xf] %vm7812_vm2, %v9888_v16  ;;  %v9889_v19 = vpack.c.bf16 %v5455_v17, %v5455_v17  ;;  %v14273_v16 = vld [vmem:[%s16205_s2] ss:$0 sm:$0xff] }
 0x2e9   :  { %v3360_v20 = vpop.f32.mrb[8].mxu0  ;;  %v4472_v21 = vpop.f32.mrb[8].mxu1 }
 0x2ea   :  { %7944 = vst.msk [vmem:[%s16206_s3 + $0x20c] sm:$0xf] %vm7812_vm2, %v9611_v18  ;;  %v3361_v22 = vadd.f32 %v13723_v11, %v3360_v20  ;;  %v10579_v23 = vpop.f32.mrb[9].mxu0  ;;  %8222 = vst.msk [vmem:[%s16206_s3 + $0x664] sm:$0xf] %vm7812_vm2, %v9889_v19  ;;  %v4473_v25 = vadd.f32 %v13723_v11, %v4472_v21  ;;  %v11135_v26 = vpop.f32.mrb[9].mxu1 }
 0x2eb   :  { %v3363_v28 = vpop.f32.mrb[10].mxu0  ;;  %v4475_v29 = vpop.f32.mrb[10].mxu1 }
 0x2ec   :  { %v5178_v30 = vmax.f32 %v3361_v22, 0.0  ;;  %v3364_v31 = vadd.f32 %v13723_v11, %v3363_v28  ;;  %v10580_v32 = vpop.f32.mrb[11].mxu0  ;;  %v5456_v33 = vmax.f32 %v4473_v25, 0.0  ;;  %v4476_v34 = vadd.f32 %v13723_v11, %v4475_v29  ;;  %v11136_v35 = vpop.f32.mrb[11].mxu1  ;;  %v11618_v28 = vld [vmem:[%s16204_s0 + $0x300] sm:$0xff]  }
 0x2ee   :  { %v9612_v36 = vpack.c.bf16 %v5178_v30, %v5178_v30  ;;  %v5179_v37 = vmax.f32 %v3364_v31, 0.0  ;;  %10686 = vmatmul.mubr.msk.bf16.gmra.mrb[116].mxu0 %vm1966_vm1, %v11612_v24  ;;  %v9890_v38 = vpack.c.bf16 %v5456_v33, %v5456_v33  ;;  %v5457_v39 = vmax.f32 %v4476_v34, 0.0  ;;  %11242 = vmatmul.mubr.msk.bf16.gmra.mrb[116].mxu1 %vm1966_vm1, %v11613_v27  ;;  %v11619_v31 = vld [vmem:[%s16204_s0 + $0x758] sm:$0xff]  }
 0x2ef   :  { %10689 = vmatprep.mubr.msk.bf16.mxu0 %vm11711_vm0, %v11710_v0  ;;  %11245 = vmatprep.mubr.msk.bf16.mxu1 %vm11711_vm0, %v11710_v0 }
 0x2f0   :  { %7945 = vst.msk [vmem:[%s16206_s3 + $0x210] sm:$0xf] %vm7812_vm2, %v9612_v36  ;;  %v9613_v40 = vpack.c.bf16 %v5179_v37, %v5179_v37  ;;  %8223 = vst.msk [vmem:[%s16206_s3 + $0x668] sm:$0xf] %vm7812_vm2, %v9890_v38  ;;  %v9891_v41 = vpack.c.bf16 %v5457_v39, %v5457_v39 }
 0x2f1   :  { %v3368_v42 = vpop.f32.mrb[12].mxu0  ;;  %v4480_v43 = vpop.f32.mrb[12].mxu1 }
 0x2f2   :  { %7946 = vst.msk [vmem:[%s16206_s3 + $0x214] sm:$0xf] %vm7812_vm2, %v9613_v40  ;;  %v3369_v44 = vadd.f32 %v13723_v11, %v3368_v42  ;;  %v10583_v45 = vpop.f32.mrb[13].mxu0  ;;  %8224 = vst.msk [vmem:[%s16206_s3 + $0x66c] sm:$0xf] %vm7812_vm2, %v9891_v41  ;;  %v4481_v47 = vadd.f32 %v13723_v11, %v4480_v43  ;;  %v11139_v48 = vpop.f32.mrb[13].mxu1 }
 0x2f3   :  { %v3371_v50 = vpop.f32.mrb[14].mxu0  ;;  %v4483_v51 = vpop.f32.mrb[14].mxu1 }
 0x2f4   :  { %v5180_v52 = vmax.f32 %v3369_v44, 0.0  ;;  %v3372_v53 = vadd.f32 %v13723_v11, %v3371_v50  ;;  %v10584_v54 = vpop.f32.mrb[15].mxu0  ;;  %v5458_v55 = vmax.f32 %v4481_v47, 0.0  ;;  %v4484_v56 = vadd.f32 %v13723_v11, %v4483_v51  ;;  %v11140_v57 = vpop.f32.mrb[15].mxu1  ;;  %v11620_v50 = vld [vmem:[%s16204_s0 + $0x308] sm:$0xff]  }
 0x2f6   :  { %v9614_v58 = vpack.c.bf16 %v5180_v52, %v5180_v52  ;;  %v5181_v59 = vmax.f32 %v3372_v53, 0.0  ;;  %10690 = vmatmul.mubr.msk.bf16.gmra.mrb[120].mxu0 %vm1966_vm1, %v11614_v46  ;;  %v9892_v61 = vpack.c.bf16 %v5458_v55, %v5458_v55  ;;  %v5459_v62 = vmax.f32 %v4484_v56, 0.0  ;;  %11246 = vmatmul.mubr.msk.bf16.gmra.mrb[120].mxu1 %vm1966_vm1, %v11615_v49  ;;  %v11621_v53 = vld [vmem:[%s16204_s0 + $0x760] sm:$0xff]  }
 0x2f7   :  { %10693 = vmatprep.mubr.msk.bf16.mxu0 %vm11711_vm0, %v11710_v0  ;;  %11249 = vmatprep.mubr.msk.bf16.mxu1 %vm11711_vm0, %v11710_v0 }
 0x2f8   :  { %7947 = vst.msk [vmem:[%s16206_s3 + $0x218] sm:$0xf] %vm7812_vm2, %v9614_v58  ;;  %v9615_v63 = vpack.c.bf16 %v5181_v59, %v5181_v59  ;;  %8225 = vst.msk [vmem:[%s16206_s3 + $0x670] sm:$0xf] %vm7812_vm2, %v9892_v61  ;;  %v9893_v1 = vpack.c.bf16 %v5459_v62, %v5459_v62 }
 0x2f9   :  { %v3376_v2 = vpop.f32.mrb[16].mxu0  ;;  %v4488_v4 = vpop.f32.mrb[16].mxu1 }
 0x2fa   :  { %7948 = vst.msk [vmem:[%s16206_s3 + $0x21c] sm:$0xf] %vm7812_vm2, %v9615_v63  ;;  %v3377_v5 = vadd.f32 %v13723_v11, %v3376_v2  ;;  %v10587_v60 = vpop.f32.mrb[17].mxu0  ;;  %8226 = vst.msk [vmem:[%s16206_s3 + $0x674] sm:$0xf] %vm7812_vm2, %v9893_v1  ;;  %v4489_v7 = vadd.f32 %v13723_v11, %v4488_v4  ;;  %v11143_v8 = vpop.f32.mrb[17].mxu1 }
 0x2fb   :  { %v3379_v10 = vpop.f32.mrb[18].mxu0  ;;  %v4491_v12 = vpop.f32.mrb[18].mxu1 }
 0x2fc   :  { %v5182_v13 = vmax.f32 %v3377_v5, 0.0  ;;  %v3380_v14 = vadd.f32 %v13723_v11, %v3379_v10  ;;  %v10588_v15 = vpop.f32.mrb[19].mxu0  ;;  %v5460_v3 = vmax.f32 %v4489_v7, 0.0  ;;  %v4492_v17 = vadd.f32 %v14273_v16, %v4491_v12  ;;  %v11144_v18 = vpop.f32.mrb[19].mxu1  ;;  %v11622_v10 = vld [vmem:[%s16204_s0 + $0x310] sm:$0xff]  }
 0x2fe   :  { %v9616_v19 = vpack.c.bf16 %v5182_v13, %v5182_v13  ;;  %v5183_v20 = vmax.f32 %v3380_v14, 0.0  ;;  %10694 = vmatmul.mubr.msk.bf16.gmra.mrb[124].mxu0 %vm1966_vm1, %v11616_v6  ;;  %v9894_v21 = vpack.c.bf16 %v5460_v3, %v5460_v3  ;;  %v5461_v22 = vmax.f32 %v4492_v17, 0.0  ;;  %11250 = vmatmul.mubr.msk.bf16.gmra.mrb[124].mxu1 %vm1966_vm1, %v11617_v9  ;;  %v11623_v14 = vld [vmem:[%s16204_s0 + $0x768] sm:$0xff]  }
 0x2ff   :  { %10697 = vmatprep.mubr.msk.bf16.mxu0 %vm11711_vm0, %v11710_v0  ;;  %11253 = vmatprep.mubr.msk.bf16.mxu1 %vm11711_vm0, %v11710_v0 }
 0x300   :  { %7949 = vst.msk [vmem:[%s16206_s3 + $0x220] sm:$0xf] %vm7812_vm2, %v9616_v19  ;;  %v9617_v11 = vpack.c.bf16 %v5183_v20, %v5183_v20  ;;  %8227 = vst.msk [vmem:[%s16206_s3 + $0x678] sm:$0xf] %vm7812_vm2, %v9894_v21  ;;  %v9895_v23 = vpack.c.bf16 %v5461_v22, %v5461_v22 }
 0x301   :  { %v3384_v24 = vpop.f32.mrb[20].mxu0  ;;  %v4496_v25 = vpop.f32.mrb[20].mxu1 }
 0x302   :  { %7950 = vst.msk [vmem:[%s16206_s3 + $0x224] sm:$0xf] %vm7812_vm2, %v9617_v11  ;;  %v3385_v26 = vadd.f32 %v14273_v16, %v3384_v24  ;;  %v10591_v27 = vpop.f32.mrb[21].mxu0  ;;  %8228 = vst.msk [vmem:[%s16206_s3 + $0x67c] sm:$0xf] %vm7812_vm2, %v9895_v23  ;;  %v4497_v29 = vadd.f32 %v14273_v16, %v4496_v25  ;;  %v11147_v30 = vpop.f32.mrb[21].mxu1 }
 0x303   :  { %v3387_v32 = vpop.f32.mrb[22].mxu0  ;;  %v4499_v33 = vpop.f32.mrb[22].mxu1 }
 0x304   :  { %v5184_v34 = vmax.f32 %v3385_v26, 0.0  ;;  %v3388_v35 = vadd.f32 %v14273_v16, %v3387_v32  ;;  %v10592_v36 = vpop.f32.mrb[23].mxu0  ;;  %v5462_v37 = vmax.f32 %v4497_v29, 0.0  ;;  %v4500_v38 = vadd.f32 %v14273_v16, %v4499_v33  ;;  %v11148_v39 = vpop.f32.mrb[23].mxu1  ;;  %v11624_v32 = vld [vmem:[%s16204_s0 + $0x318] sm:$0xff]  }
 0x306   :  { %v9618_v40 = vpack.c.bf16 %v5184_v34, %v5184_v34  ;;  %v5185_v41 = vmax.f32 %v3388_v35, 0.0  ;;  %10698 = vmatmul.mubr.msk.bf16.gmra.mrb[128].mxu0 %vm1966_vm1, %v11618_v28  ;;  %v9896_v42 = vpack.c.bf16 %v5462_v37, %v5462_v37  ;;  %v5463_v43 = vmax.f32 %v4500_v38, 0.0  ;;  %11254 = vmatmul.mubr.msk.bf16.gmra.mrb[128].mxu1 %vm1966_vm1, %v11619_v31  ;;  %v11625_v35 = vld [vmem:[%s16204_s0 + $0x770] sm:$0xff]  }
 0x307   :  { %10701 = vmatprep.mubr.msk.bf16.mxu0 %vm11711_vm0, %v11710_v0  ;;  %11257 = vmatprep.mubr.msk.bf16.mxu1 %vm11711_vm0, %v11710_v0 }
 0x308   :  { %7951 = vst.msk [vmem:[%s16206_s3 + $0x228] sm:$0xf] %vm7812_vm2, %v9618_v40  ;;  %v9619_v44 = vpack.c.bf16 %v5185_v41, %v5185_v41  ;;  %8229 = vst.msk [vmem:[%s16206_s3 + $0x680] sm:$0xf] %vm7812_vm2, %v9896_v42  ;;  %v9897_v45 = vpack.c.bf16 %v5463_v43, %v5463_v43 }
 0x309   :  { %v3392_v46 = vpop.f32.mrb[24].mxu0  ;;  %v4504_v47 = vpop.f32.mrb[24].mxu1 }
 0x30a   :  { %7952 = vst.msk [vmem:[%s16206_s3 + $0x22c] sm:$0xf] %vm7812_vm2, %v9619_v44  ;;  %v3393_v48 = vadd.f32 %v14273_v16, %v3392_v46  ;;  %v10595_v49 = vpop.f32.mrb[25].mxu0  ;;  %8230 = vst.msk [vmem:[%s16206_s3 + $0x684] sm:$0xf] %vm7812_vm2, %v9897_v45  ;;  %v4505_v51 = vadd.f32 %v14273_v16, %v4504_v47  ;;  %v11151_v52 = vpop.f32.mrb[25].mxu1 }
 0x30b   :  { %v3395_v54 = vpop.f32.mrb[26].mxu0  ;;  %v4507_v55 = vpop.f32.mrb[26].mxu1 }
 0x30c   :  { %v5186_v56 = vmax.f32 %v3393_v48, 0.0  ;;  %v3396_v57 = vadd.f32 %v14273_v16, %v3395_v54  ;;  %v10596_v58 = vpop.f32.mrb[27].mxu0  ;;  %v5464_v59 = vmax.f32 %v4505_v51, 0.0  ;;  %v4508_v61 = vadd.f32 %v14273_v16, %v4507_v55  ;;  %v11152_v62 = vpop.f32.mrb[27].mxu1  ;;  %v11626_v54 = vld [vmem:[%s16204_s0 + $0x320] sm:$0xff]  }
 0x30e   :  { %v9620_v63 = vpack.c.bf16 %v5186_v56, %v5186_v56  ;;  %v5187_v1 = vmax.f32 %v3396_v57, 0.0  ;;  %10702 = vmatmul.mubr.msk.bf16.gmra.mrb[132].mxu0 %vm1966_vm1, %v11620_v50  ;;  %v9898_v2 = vpack.c.bf16 %v5464_v59, %v5464_v59  ;;  %v5465_v4 = vmax.f32 %v4508_v61, 0.0  ;;  %11258 = vmatmul.mubr.msk.bf16.gmra.mrb[132].mxu1 %vm1966_vm1, %v11621_v53  ;;  %v11627_v57 = vld [vmem:[%s16204_s0 + $0x778] sm:$0xff]  }
 0x30f   :  { %10705 = vmatprep.mubr.msk.bf16.mxu0 %vm11711_vm0, %v11710_v0  ;;  %11261 = vmatprep.mubr.msk.bf16.mxu1 %vm11711_vm0, %v11710_v0 }
 0x310   :  { %7953 = vst.msk [vmem:[%s16206_s3 + $0x230] sm:$0xf] %vm7812_vm2, %v9620_v63  ;;  %v9621_v5 = vpack.c.bf16 %v5187_v1, %v5187_v1  ;;  %8231 = vst.msk [vmem:[%s16206_s3 + $0x688] sm:$0xf] %vm7812_vm2, %v9898_v2  ;;  %v9899_v60 = vpack.c.bf16 %v5465_v4, %v5465_v4 }
 0x311   :  { %v3400_v6 = vpop.f32.mrb[28].mxu0  ;;  %v4512_v7 = vpop.f32.mrb[28].mxu1 }
 0x312   :  { %7954 = vst.msk [vmem:[%s16206_s3 + $0x234] sm:$0xf] %vm7812_vm2, %v9621_v5  ;;  %v3401_v8 = vadd.f32 %v14273_v16, %v3400_v6  ;;  %v10599_v9 = vpop.f32.mrb[29].mxu0  ;;  %8232 = vst.msk [vmem:[%s16206_s3 + $0x68c] sm:$0xf] %vm7812_vm2, %v9899_v60  ;;  %v4513_v12 = vadd.f32 %v14273_v16, %v4512_v7  ;;  %v11155_v13 = vpop.f32.mrb[29].mxu1 }
 0x313   :  { %v3403_v15 = vpop.f32.mrb[30].mxu0  ;;  %v4515_v3 = vpop.f32.mrb[30].mxu1 }
 0x314   :  { %v5188_v17 = vmax.f32 %v3401_v8, 0.0  ;;  %v3404_v18 = vadd.f32 %v14273_v16, %v3403_v15  ;;  %v10600_v19 = vpop.f32.mrb[31].mxu0  ;;  %v5466_v20 = vmax.f32 %v4513_v12, 0.0  ;;  %v4516_v21 = vadd.f32 %v14273_v16, %v4515_v3  ;;  %v11156_v22 = vpop.f32.mrb[31].mxu1  ;;  %v11628_v15 = vld [vmem:[%s16204_s0 + $0x328] sm:$0xff]  }
 0x316   :  { %v9622_v11 = vpack.c.bf16 %v5188_v17, %v5188_v17  ;;  %v5189_v23 = vmax.f32 %v3404_v18, 0.0  ;;  %10706 = vmatmul.mubr.msk.bf16.gmra.mrb[136].mxu0 %vm1966_vm1, %v11622_v10  ;;  %v9900_v24 = vpack.c.bf16 %v5466_v20, %v5466_v20  ;;  %v5467_v25 = vmax.f32 %v4516_v21, 0.0  ;;  %11262 = vmatmul.mubr.msk.bf16.gmra.mrb[136].mxu1 %vm1966_vm1, %v11623_v14  ;;  %v11629_v18 = vld [vmem:[%s16204_s0 + $0x780] sm:$0xff]  }
 0x317   :  { %10709 = vmatprep.mubr.msk.bf16.mxu0 %vm11711_vm0, %v11710_v0  ;;  %11265 = vmatprep.mubr.msk.bf16.mxu1 %vm11711_vm0, %v11710_v0 }
 0x318   :  { %7955 = vst.msk [vmem:[%s16206_s3 + $0x238] sm:$0xf] %vm7812_vm2, %v9622_v11  ;;  %v9623_v26 = vpack.c.bf16 %v5189_v23, %v5189_v23  ;;  %8233 = vst.msk [vmem:[%s16206_s3 + $0x690] sm:$0xf] %vm7812_vm2, %v9900_v24  ;;  %v9901_v27 = vpack.c.bf16 %v5467_v25, %v5467_v25 }
 0x319   :  { %v3408_v28 = vpop.f32.mrb[32].mxu0  ;;  %v4520_v29 = vpop.f32.mrb[32].mxu1 }
 0x31a   :  { %7956 = vst.msk [vmem:[%s16206_s3 + $0x23c] sm:$0xf] %vm7812_vm2, %v9623_v26  ;;  %v3409_v30 = vadd.f32 %v14273_v16, %v3408_v28  ;;  %v10603_v31 = vpop.f32.mrb[33].mxu0  ;;  %8234 = vst.msk [vmem:[%s16206_s3 + $0x694] sm:$0xf] %vm7812_vm2, %v9901_v27  ;;  %v4521_v33 = vadd.f32 %v14273_v16, %v4520_v29  ;;  %v11159_v34 = vpop.f32.mrb[33].mxu1 }
 0x31b   :  { %v3411_v36 = vpop.f32.mrb[34].mxu0  ;;  %v4523_v37 = vpop.f32.mrb[34].mxu1 }
 0x31c   :  { %v5190_v38 = vmax.f32 %v3409_v30, 0.0  ;;  %v3412_v39 = vadd.f32 %v14273_v16, %v3411_v36  ;;  %v10604_v40 = vpop.f32.mrb[35].mxu0  ;;  %v5468_v41 = vmax.f32 %v4521_v33, 0.0  ;;  %v4524_v42 = vadd.f32 %v14273_v16, %v4523_v37  ;;  %v11160_v43 = vpop.f32.mrb[35].mxu1  ;;  %v11630_v36 = vld [vmem:[%s16204_s0 + $0x330] sm:$0xff]  }
 0x31e   :  { %v9624_v44 = vpack.c.bf16 %v5190_v38, %v5190_v38  ;;  %v5191_v45 = vmax.f32 %v3412_v39, 0.0  ;;  %10710 = vmatmul.mubr.msk.bf16.gmra.mrb[140].mxu0 %vm1966_vm1, %v11624_v32  ;;  %v9902_v46 = vpack.c.bf16 %v5468_v41, %v5468_v41  ;;  %v5469_v47 = vmax.f32 %v4524_v42, 0.0  ;;  %11266 = vmatmul.mubr.msk.bf16.gmra.mrb[140].mxu1 %vm1966_vm1, %v11625_v35  ;;  %v11631_v39 = vld [vmem:[%s16204_s0 + $0x788] sm:$0xff]  }
 0x31f   :  { %10713 = vmatprep.mubr.msk.bf16.mxu0 %vm11711_vm0, %v11710_v0  ;;  %11269 = vmatprep.mubr.msk.bf16.mxu1 %vm11711_vm0, %v11710_v0 }
 0x320   :  { %7957 = vst.msk [vmem:[%s16206_s3 + $0x240] sm:$0xf] %vm7812_vm2, %v9624_v44  ;;  %v9625_v48 = vpack.c.bf16 %v5191_v45, %v5191_v45  ;;  %8235 = vst.msk [vmem:[%s16206_s3 + $0x698] sm:$0xf] %vm7812_vm2, %v9902_v46  ;;  %v9903_v49 = vpack.c.bf16 %v5469_v47, %v5469_v47 }
 0x321   :  { %v3416_v50 = vpop.f32.mrb[36].mxu0  ;;  %v4528_v51 = vpop.f32.mrb[36].mxu1 }
 0x322   :  { %7958 = vst.msk [vmem:[%s16206_s3 + $0x244] sm:$0xf] %vm7812_vm2, %v9625_v48  ;;  %v3417_v52 = vadd.f32 %v14273_v16, %v3416_v50  ;;  %v10607_v53 = vpop.f32.mrb[37].mxu0  ;;  %8236 = vst.msk [vmem:[%s16206_s3 + $0x69c] sm:$0xf] %vm7812_vm2, %v9903_v49  ;;  %v4529_v55 = vadd.f32 %v14273_v16, %v4528_v51  ;;  %v11163_v56 = vpop.f32.mrb[37].mxu1 }
 0x323   :  { %v3419_v58 = vpop.f32.mrb[38].mxu0  ;;  %v4531_v59 = vpop.f32.mrb[38].mxu1 }
 0x324   :  { %v5192_v61 = vmax.f32 %v3417_v52, 0.0  ;;  %v3420_v62 = vadd.f32 %v14273_v16, %v3419_v58  ;;  %v10608_v63 = vpop.f32.mrb[39].mxu0  ;;  %v5470_v1 = vmax.f32 %v4529_v55, 0.0  ;;  %v4532_v2 = vadd.f32 %v14273_v16, %v4531_v59  ;;  %v11164_v4 = vpop.f32.mrb[39].mxu1  ;;  %v11632_v58 = vld [vmem:[%s16204_s0 + $0x338] sm:$0xff]  }
 0x326   :  { %v9626_v5 = vpack.c.bf16 %v5192_v61, %v5192_v61  ;;  %v5193_v60 = vmax.f32 %v3420_v62, 0.0  ;;  %10714 = vmatmul.mubr.msk.bf16.gmra.mrb[144].mxu0 %vm1966_vm1, %v11626_v54  ;;  %v9904_v6 = vpack.c.bf16 %v5470_v1, %v5470_v1  ;;  %v5471_v7 = vmax.f32 %v4532_v2, 0.0  ;;  %11270 = vmatmul.mubr.msk.bf16.gmra.mrb[144].mxu1 %vm1966_vm1, %v11627_v57  ;;  %v11633_v62 = vld [vmem:[%s16204_s0 + $0x790] sm:$0xff]  }
 0x327   :  { %10717 = vmatprep.mubr.msk.bf16.mxu0 %vm11711_vm0, %v11710_v0  ;;  %11273 = vmatprep.mubr.msk.bf16.mxu1 %vm11711_vm0, %v11710_v0 }
 0x328   :  { %7959 = vst.msk [vmem:[%s16206_s3 + $0x248] sm:$0xf] %vm7812_vm2, %v9626_v5  ;;  %v9627_v8 = vpack.c.bf16 %v5193_v60, %v5193_v60  ;;  %8237 = vst.msk [vmem:[%s16206_s3 + $0x6a0] sm:$0xf] %vm7812_vm2, %v9904_v6  ;;  %v9905_v9 = vpack.c.bf16 %v5471_v7, %v5471_v7 }
 0x329   :  { %v3424_v10 = vpop.f32.mrb[40].mxu0  ;;  %v4536_v12 = vpop.f32.mrb[40].mxu1 }
 0x32a   :  { %7960 = vst.msk [vmem:[%s16206_s3 + $0x24c] sm:$0xf] %vm7812_vm2, %v9627_v8  ;;  %v3425_v13 = vadd.f32 %v14273_v16, %v3424_v10  ;;  %v10611_v14 = vpop.f32.mrb[41].mxu0  ;;  %8238 = vst.msk [vmem:[%s16206_s3 + $0x6a4] sm:$0xf] %vm7812_vm2, %v9905_v9  ;;  %v4537_v3 = vadd.f32 %v14273_v16, %v4536_v12  ;;  %v11167_v17 = vpop.f32.mrb[41].mxu1 }
 0x32b   :  { %v3427_v19 = vpop.f32.mrb[42].mxu0  ;;  %v4539_v20 = vpop.f32.mrb[42].mxu1 }
 0x32c   :  { %v5194_v21 = vmax.f32 %v3425_v13, 0.0  ;;  %v3428_v22 = vadd.f32 %v14273_v16, %v3427_v19  ;;  %v10612_v11 = vpop.f32.mrb[43].mxu0  ;;  %v5472_v23 = vmax.f32 %v4537_v3, 0.0  ;;  %v4540_v24 = vadd.f32 %v14273_v16, %v4539_v20  ;;  %v11168_v25 = vpop.f32.mrb[43].mxu1  ;;  %v11634_v19 = vld [vmem:[%s16204_s0 + $0x340] sm:$0xff]  }
 0x32e   :  { %v9628_v26 = vpack.c.bf16 %v5194_v21, %v5194_v21  ;;  %v5195_v27 = vmax.f32 %v3428_v22, 0.0  ;;  %10718 = vmatmul.mubr.msk.bf16.gmra.mrb[148].mxu0 %vm1966_vm1, %v11628_v15  ;;  %v9906_v28 = vpack.c.bf16 %v5472_v23, %v5472_v23  ;;  %v5473_v29 = vmax.f32 %v4540_v24, 0.0  ;;  %11274 = vmatmul.mubr.msk.bf16.gmra.mrb[148].mxu1 %vm1966_vm1, %v11629_v18  ;;  %v11635_v22 = vld [vmem:[%s16204_s0 + $0x798] sm:$0xff]  }
 0x32f   :  { %10721 = vmatprep.mubr.msk.bf16.mxu0 %vm11711_vm0, %v11710_v0  ;;  %11277 = vmatprep.mubr.msk.bf16.mxu1 %vm11711_vm0, %v11710_v0 }
 0x330   :  { %7961 = vst.msk [vmem:[%s16206_s3 + $0x250] sm:$0xf] %vm7812_vm2, %v9628_v26  ;;  %v9629_v30 = vpack.c.bf16 %v5195_v27, %v5195_v27  ;;  %8239 = vst.msk [vmem:[%s16206_s3 + $0x6a8] sm:$0xf] %vm7812_vm2, %v9906_v28  ;;  %v9907_v31 = vpack.c.bf16 %v5473_v29, %v5473_v29 }
 0x331   :  { %v3432_v32 = vpop.f32.mrb[44].mxu0  ;;  %v4544_v33 = vpop.f32.mrb[44].mxu1 }
 0x332   :  { %7962 = vst.msk [vmem:[%s16206_s3 + $0x254] sm:$0xf] %vm7812_vm2, %v9629_v30  ;;  %v3433_v34 = vadd.f32 %v14273_v16, %v3432_v32  ;;  %v10615_v35 = vpop.f32.mrb[45].mxu0  ;;  %8240 = vst.msk [vmem:[%s16206_s3 + $0x6ac] sm:$0xf] %vm7812_vm2, %v9907_v31  ;;  %v4545_v37 = vadd.f32 %v14273_v16, %v4544_v33  ;;  %v11171_v38 = vpop.f32.mrb[45].mxu1 }
 0x333   :  { %v3435_v40 = vpop.f32.mrb[46].mxu0  ;;  %v4547_v41 = vpop.f32.mrb[46].mxu1 }
 0x334   :  { %v5196_v42 = vmax.f32 %v3433_v34, 0.0  ;;  %v3436_v43 = vadd.f32 %v14273_v16, %v3435_v40  ;;  %v10616_v44 = vpop.f32.mrb[47].mxu0  ;;  %v5474_v45 = vmax.f32 %v4545_v37, 0.0  ;;  %v4548_v46 = vadd.f32 %v14273_v16, %v4547_v41  ;;  %v11172_v47 = vpop.f32.mrb[47].mxu1  ;;  %v11636_v40 = vld [vmem:[%s16204_s0 + $0x348] sm:$0xff]  }
 0x336   :  { %v9630_v48 = vpack.c.bf16 %v5196_v42, %v5196_v42  ;;  %v5197_v49 = vmax.f32 %v3436_v43, 0.0  ;;  %10722 = vmatmul.mubr.msk.bf16.gmra.mrb[152].mxu0 %vm1966_vm1, %v11630_v36  ;;  %v9908_v50 = vpack.c.bf16 %v5474_v45, %v5474_v45  ;;  %v5475_v51 = vmax.f32 %v4548_v46, 0.0  ;;  %11278 = vmatmul.mubr.msk.bf16.gmra.mrb[152].mxu1 %vm1966_vm1, %v11631_v39  ;;  %v11637_v43 = vld [vmem:[%s16204_s0 + $0x7a0] sm:$0xff]  }
 0x337   :  { %10725 = vmatprep.mubr.msk.bf16.mxu0 %vm11711_vm0, %v11710_v0  ;;  %11281 = vmatprep.mubr.msk.bf16.mxu1 %vm11711_vm0, %v11710_v0 }
 0x338   :  { %7963 = vst.msk [vmem:[%s16206_s3 + $0x258] sm:$0xf] %vm7812_vm2, %v9630_v48  ;;  %v9631_v52 = vpack.c.bf16 %v5197_v49, %v5197_v49  ;;  %8241 = vst.msk [vmem:[%s16206_s3 + $0x6b0] sm:$0xf] %vm7812_vm2, %v9908_v50  ;;  %v9909_v53 = vpack.c.bf16 %v5475_v51, %v5475_v51 }
 0x339   :  { %v3440_v54 = vpop.f32.mrb[48].mxu0  ;;  %v4552_v55 = vpop.f32.mrb[48].mxu1 }
 0x33a   :  { %7964 = vst.msk [vmem:[%s16206_s3 + $0x25c] sm:$0xf] %vm7812_vm2, %v9631_v52  ;;  %v3441_v56 = vadd.f32 %v14273_v16, %v3440_v54  ;;  %v10619_v57 = vpop.f32.mrb[49].mxu0  ;;  %8242 = vst.msk [vmem:[%s16206_s3 + $0x6b4] sm:$0xf] %vm7812_vm2, %v9909_v53  ;;  %v4553_v59 = vadd.f32 %v14273_v16, %v4552_v55  ;;  %v11175_v61 = vpop.f32.mrb[49].mxu1 }
 0x33b   :  { %v3443_v63 = vpop.f32.mrb[50].mxu0  ;;  %v4555_v1 = vpop.f32.mrb[50].mxu1 }
 0x33c   :  { %v5198_v2 = vmax.f32 %v3441_v56, 0.0  ;;  %v3444_v4 = vadd.f32 %v14273_v16, %v3443_v63  ;;  %v10620_v5 = vpop.f32.mrb[51].mxu0  ;;  %v5476_v60 = vmax.f32 %v4553_v59, 0.0  ;;  %v4556_v6 = vadd.f32 %v14273_v16, %v4555_v1  ;;  %v11176_v7 = vpop.f32.mrb[51].mxu1  ;;  %v11638_v63 = vld [vmem:[%s16204_s0 + $0x350] sm:$0xff]  }
 0x33e   :  { %v9632_v8 = vpack.c.bf16 %v5198_v2, %v5198_v2  ;;  %v5199_v9 = vmax.f32 %v3444_v4, 0.0  ;;  %10726 = vmatmul.mubr.msk.bf16.gmra.mrb[156].mxu0 %vm1966_vm1, %v11632_v58  ;;  %v9910_v10 = vpack.c.bf16 %v5476_v60, %v5476_v60  ;;  %v5477_v12 = vmax.f32 %v4556_v6, 0.0  ;;  %11282 = vmatmul.mubr.msk.bf16.gmra.mrb[156].mxu1 %vm1966_vm1, %v11633_v62  ;;  %v11639_v4 = vld [vmem:[%s16204_s0 + $0x7a8] sm:$0xff]  }
 0x33f   :  { %10729 = vmatprep.mubr.msk.bf16.mxu0 %vm11711_vm0, %v11710_v0  ;;  %11285 = vmatprep.mubr.msk.bf16.mxu1 %vm11711_vm0, %v11710_v0 }
 0x340   :  { %7965 = vst.msk [vmem:[%s16206_s3 + $0x260] sm:$0xf] %vm7812_vm2, %v9632_v8  ;;  %v9633_v13 = vpack.c.bf16 %v5199_v9, %v5199_v9  ;;  %8243 = vst.msk [vmem:[%s16206_s3 + $0x6b8] sm:$0xf] %vm7812_vm2, %v9910_v10  ;;  %v9911_v14 = vpack.c.bf16 %v5477_v12, %v5477_v12 }
 0x341   :  { %v3448_v15 = vpop.f32.mrb[52].mxu0  ;;  %v4560_v3 = vpop.f32.mrb[52].mxu1 }
 0x342   :  { %7966 = vst.msk [vmem:[%s16206_s3 + $0x264] sm:$0xf] %vm7812_vm2, %v9633_v13  ;;  %v3449_v17 = vadd.f32 %v14273_v16, %v3448_v15  ;;  %v10623_v18 = vpop.f32.mrb[53].mxu0  ;;  %8244 = vst.msk [vmem:[%s16206_s3 + $0x6bc] sm:$0xf] %vm7812_vm2, %v9911_v14  ;;  %v4561_v20 = vadd.f32 %v14273_v16, %v4560_v3  ;;  %v11179_v21 = vpop.f32.mrb[53].mxu1 }
 0x343   :  { %v3451_v11 = vpop.f32.mrb[54].mxu0  ;;  %v4563_v23 = vpop.f32.mrb[54].mxu1 }
 0x344   :  { %v5200_v24 = vmax.f32 %v3449_v17, 0.0  ;;  %v3452_v25 = vadd.f32 %v14273_v16, %v3451_v11  ;;  %v10624_v26 = vpop.f32.mrb[55].mxu0  ;;  %v5478_v27 = vmax.f32 %v4561_v20, 0.0  ;;  %v4564_v28 = vadd.f32 %v14273_v16, %v4563_v23  ;;  %v11180_v29 = vpop.f32.mrb[55].mxu1  ;;  %v11640_v11 = vld [vmem:[%s16204_s0 + $0x358] sm:$0xff]  }
 0x346   :  { %v9634_v30 = vpack.c.bf16 %v5200_v24, %v5200_v24  ;;  %v5201_v31 = vmax.f32 %v3452_v25, 0.0  ;;  %10730 = vmatmul.mubr.msk.bf16.gmra.mrb[160].mxu0 %vm1966_vm1, %v11634_v19  ;;  %v9912_v32 = vpack.c.bf16 %v5478_v27, %v5478_v27  ;;  %v5479_v33 = vmax.f32 %v4564_v28, 0.0  ;;  %11286 = vmatmul.mubr.msk.bf16.gmra.mrb[160].mxu1 %vm1966_vm1, %v11635_v22  ;;  %v11641_v25 = vld [vmem:[%s16204_s0 + $0x7b0] sm:$0xff]  }
 0x347   :  { %10733 = vmatprep.mubr.msk.bf16.mxu0 %vm11711_vm0, %v11710_v0  ;;  %11289 = vmatprep.mubr.msk.bf16.mxu1 %vm11711_vm0, %v11710_v0 }
 0x348   :  { %7967 = vst.msk [vmem:[%s16206_s3 + $0x268] sm:$0xf] %vm7812_vm2, %v9634_v30  ;;  %v9635_v34 = vpack.c.bf16 %v5201_v31, %v5201_v31  ;;  %8245 = vst.msk [vmem:[%s16206_s3 + $0x6c0] sm:$0xf] %vm7812_vm2, %v9912_v32  ;;  %v9913_v35 = vpack.c.bf16 %v5479_v33, %v5479_v33 }
 0x349   :  { %v3456_v36 = vpop.f32.mrb[56].mxu0  ;;  %v4568_v37 = vpop.f32.mrb[56].mxu1 }
 0x34a   :  { %7968 = vst.msk [vmem:[%s16206_s3 + $0x26c] sm:$0xf] %vm7812_vm2, %v9635_v34  ;;  %v3457_v38 = vadd.f32 %v14273_v16, %v3456_v36  ;;  %v10627_v39 = vpop.f32.mrb[57].mxu0  ;;  %8246 = vst.msk [vmem:[%s16206_s3 + $0x6c4] sm:$0xf] %vm7812_vm2, %v9913_v35  ;;  %v4569_v41 = vadd.f32 %v14273_v16, %v4568_v37  ;;  %v11183_v42 = vpop.f32.mrb[57].mxu1 }
 0x34b   :  { %v3459_v44 = vpop.f32.mrb[58].mxu0  ;;  %v4571_v45 = vpop.f32.mrb[58].mxu1 }
 0x34c   :  { %v5202_v46 = vmax.f32 %v3457_v38, 0.0  ;;  %v3460_v47 = vadd.f32 %v14273_v16, %v3459_v44  ;;  %v10628_v48 = vpop.f32.mrb[59].mxu0  ;;  %v5480_v49 = vmax.f32 %v4569_v41, 0.0  ;;  %v4572_v50 = vadd.f32 %v14273_v16, %v4571_v45  ;;  %v11184_v51 = vpop.f32.mrb[59].mxu1  ;;  %v11642_v44 = vld [vmem:[%s16204_s0 + $0x360] sm:$0xff]  }
 0x34e   :  { %v9636_v52 = vpack.c.bf16 %v5202_v46, %v5202_v46  ;;  %v5203_v53 = vmax.f32 %v3460_v47, 0.0  ;;  %10734 = vmatmul.mubr.msk.bf16.gmra.mrb[164].mxu0 %vm1966_vm1, %v11636_v40  ;;  %v9914_v54 = vpack.c.bf16 %v5480_v49, %v5480_v49  ;;  %v5481_v55 = vmax.f32 %v4572_v50, 0.0  ;;  %11290 = vmatmul.mubr.msk.bf16.gmra.mrb[164].mxu1 %vm1966_vm1, %v11637_v43  ;;  %v11643_v47 = vld [vmem:[%s16204_s0 + $0x7b8] sm:$0xff]  }
 0x34f   :  { %10737 = vmatprep.mubr.msk.bf16.mxu0 %vm11711_vm0, %v11710_v0  ;;  %11293 = vmatprep.mubr.msk.bf16.mxu1 %vm11711_vm0, %v11710_v0 }
 0x350   :  { %7969 = vst.msk [vmem:[%s16206_s3 + $0x270] sm:$0xf] %vm7812_vm2, %v9636_v52  ;;  %v9637_v56 = vpack.c.bf16 %v5203_v53, %v5203_v53  ;;  %8247 = vst.msk [vmem:[%s16206_s3 + $0x6c8] sm:$0xf] %vm7812_vm2, %v9914_v54  ;;  %v9915_v57 = vpack.c.bf16 %v5481_v55, %v5481_v55 }
 0x351   :  { %v3464_v58 = vpop.f32.mrb[60].mxu0  ;;  %v4576_v59 = vpop.f32.mrb[60].mxu1 }
 0x352   :  { %7970 = vst.msk [vmem:[%s16206_s3 + $0x274] sm:$0xf] %vm7812_vm2, %v9637_v56  ;;  %v3465_v61 = vadd.f32 %v14273_v16, %v3464_v58  ;;  %v10631_v62 = vpop.f32.mrb[61].mxu0  ;;  %8248 = vst.msk [vmem:[%s16206_s3 + $0x6cc] sm:$0xf] %vm7812_vm2, %v9915_v57  ;;  %v4577_v1 = vadd.f32 %v14273_v16, %v4576_v59  ;;  %v11187_v2 = vpop.f32.mrb[61].mxu1 }
 0x353   :  { %v3467_v5 = vpop.f32.mrb[62].mxu0  ;;  %v4579_v60 = vpop.f32.mrb[62].mxu1 }
 0x354   :  { %v5204_v6 = vmax.f32 %v3465_v61, 0.0  ;;  %v3468_v7 = vadd.f32 %v14273_v16, %v3467_v5  ;;  %v10632_v8 = vpop.f32.mrb[63].mxu0  ;;  %v5482_v9 = vmax.f32 %v4577_v1, 0.0  ;;  %v4580_v10 = vadd.f32 %v14273_v16, %v4579_v60  ;;  %v11188_v12 = vpop.f32.mrb[63].mxu1  ;;  %v11644_v5 = vld [vmem:[%s16204_s0 + $0x368] sm:$0xff]  }
 0x356   :  { %v9638_v13 = vpack.c.bf16 %v5204_v6, %v5204_v6  ;;  %v5205_v14 = vmax.f32 %v3468_v7, 0.0  ;;  %10738 = vmatmul.mubr.msk.bf16.gmra.mrb[168].mxu0 %vm1966_vm1, %v11638_v63  ;;  %v9916_v15 = vpack.c.bf16 %v5482_v9, %v5482_v9  ;;  %v5483_v3 = vmax.f32 %v4580_v10, 0.0  ;;  %11294 = vmatmul.mubr.msk.bf16.gmra.mrb[168].mxu1 %vm1966_vm1, %v11639_v4  ;;  %v11645_v7 = vld [vmem:[%s16204_s0 + $0x7c0] sm:$0xff]  }
 0x357   :  { %10741 = vmatprep.mubr.msk.bf16.mxu0 %vm11711_vm0, %v11710_v0  ;;  %11297 = vmatprep.mubr.msk.bf16.mxu1 %vm11711_vm0, %v11710_v0 }
 0x358   :  { %7971 = vst.msk [vmem:[%s16206_s3 + $0x278] sm:$0xf] %vm7812_vm2, %v9638_v13  ;;  %v9639_v17 = vpack.c.bf16 %v5205_v14, %v5205_v14  ;;  %8249 = vst.msk [vmem:[%s16206_s3 + $0x6d0] sm:$0xf] %vm7812_vm2, %v9916_v15  ;;  %v9917_v18 = vpack.c.bf16 %v5483_v3, %v5483_v3 }
 0x359   :  { %v3472_v19 = vpop.f32.mrb[64].mxu0  ;;  %v4584_v20 = vpop.f32.mrb[64].mxu1 }
 0x35a   :  { %7972 = vst.msk [vmem:[%s16206_s3 + $0x27c] sm:$0xf] %vm7812_vm2, %v9639_v17  ;;  %v3473_v21 = vadd.f32 %v14273_v16, %v3472_v19  ;;  %v10635_v22 = vpop.f32.mrb[65].mxu0  ;;  %8250 = vst.msk [vmem:[%s16206_s3 + $0x6d4] sm:$0xf] %vm7812_vm2, %v9917_v18  ;;  %v4585_v23 = vadd.f32 %v14273_v16, %v4584_v20  ;;  %v11191_v24 = vpop.f32.mrb[65].mxu1 }
 0x35b   :  { %v3475_v26 = vpop.f32.mrb[66].mxu0  ;;  %v4587_v27 = vpop.f32.mrb[66].mxu1 }
 0x35c   :  { %v5206_v28 = vmax.f32 %v3473_v21, 0.0  ;;  %v3476_v29 = vadd.f32 %v14273_v16, %v3475_v26  ;;  %v10636_v30 = vpop.f32.mrb[67].mxu0  ;;  %v5484_v31 = vmax.f32 %v4585_v23, 0.0  ;;  %v4588_v32 = vadd.f32 %v14273_v16, %v4587_v27  ;;  %v11192_v33 = vpop.f32.mrb[67].mxu1  ;;  %v11646_v26 = vld [vmem:[%s16204_s0 + $0x370] sm:$0xff]  }
 0x35e   :  { %v9640_v34 = vpack.c.bf16 %v5206_v28, %v5206_v28  ;;  %v5207_v35 = vmax.f32 %v3476_v29, 0.0  ;;  %10742 = vmatmul.mubr.msk.bf16.gmra.mrb[172].mxu0 %vm1966_vm1, %v11640_v11  ;;  %v9918_v36 = vpack.c.bf16 %v5484_v31, %v5484_v31  ;;  %v5485_v37 = vmax.f32 %v4588_v32, 0.0  ;;  %11298 = vmatmul.mubr.msk.bf16.gmra.mrb[172].mxu1 %vm1966_vm1, %v11641_v25  ;;  %v11647_v29 = vld [vmem:[%s16204_s0 + $0x7c8] sm:$0xff]  }
 0x35f   :  { %10745 = vmatprep.mubr.msk.bf16.mxu0 %vm11711_vm0, %v11710_v0  ;;  %11301 = vmatprep.mubr.msk.bf16.mxu1 %vm11711_vm0, %v11710_v0 }
 0x360   :  { %7973 = vst.msk [vmem:[%s16206_s3 + $0x280] sm:$0xf] %vm7812_vm2, %v9640_v34  ;;  %v9641_v38 = vpack.c.bf16 %v5207_v35, %v5207_v35  ;;  %8251 = vst.msk [vmem:[%s16206_s3 + $0x6d8] sm:$0xf] %vm7812_vm2, %v9918_v36  ;;  %v9919_v39 = vpack.c.bf16 %v5485_v37, %v5485_v37 }
 0x361   :  { %v3480_v40 = vpop.f32.mrb[68].mxu0  ;;  %v4592_v41 = vpop.f32.mrb[68].mxu1 }
 0x362   :  { %7974 = vst.msk [vmem:[%s16206_s3 + $0x284] sm:$0xf] %vm7812_vm2, %v9641_v38  ;;  %v3481_v42 = vadd.f32 %v14273_v16, %v3480_v40  ;;  %v10639_v43 = vpop.f32.mrb[69].mxu0  ;;  %8252 = vst.msk [vmem:[%s16206_s3 + $0x6dc] sm:$0xf] %vm7812_vm2, %v9919_v39  ;;  %v4593_v45 = vadd.f32 %v14273_v16, %v4592_v41  ;;  %v11195_v46 = vpop.f32.mrb[69].mxu1 }
 0x363   :  { %v3483_v48 = vpop.f32.mrb[70].mxu0  ;;  %v4595_v49 = vpop.f32.mrb[70].mxu1 }
 0x364   :  { %v5208_v50 = vmax.f32 %v3481_v42, 0.0  ;;  %v3484_v51 = vadd.f32 %v14273_v16, %v3483_v48  ;;  %v10640_v52 = vpop.f32.mrb[71].mxu0  ;;  %v5486_v53 = vmax.f32 %v4593_v45, 0.0  ;;  %v4596_v54 = vadd.f32 %v14273_v16, %v4595_v49  ;;  %v11196_v55 = vpop.f32.mrb[71].mxu1  ;;  %v11648_v48 = vld [vmem:[%s16204_s0 + $0x378] sm:$0xff]  }
 0x366   :  { %v9642_v56 = vpack.c.bf16 %v5208_v50, %v5208_v50  ;;  %v5209_v57 = vmax.f32 %v3484_v51, 0.0  ;;  %10746 = vmatmul.mubr.msk.bf16.gmra.mrb[176].mxu0 %vm1966_vm1, %v11642_v44  ;;  %v9920_v58 = vpack.c.bf16 %v5486_v53, %v5486_v53  ;;  %v5487_v59 = vmax.f32 %v4596_v54, 0.0  ;;  %11302 = vmatmul.mubr.msk.bf16.gmra.mrb[176].mxu1 %vm1966_vm1, %v11643_v47  ;;  %v11649_v51 = vld [vmem:[%s16204_s0 + $0x7d0] sm:$0xff]  }
 0x367   :  { %10749 = vmatprep.mubr.msk.bf16.mxu0 %vm11711_vm0, %v11710_v0  ;;  %11305 = vmatprep.mubr.msk.bf16.mxu1 %vm11711_vm0, %v11710_v0 }
 0x368   :  { %7975 = vst.msk [vmem:[%s16206_s3 + $0x288] sm:$0xf] %vm7812_vm2, %v9642_v56  ;;  %v9643_v61 = vpack.c.bf16 %v5209_v57, %v5209_v57  ;;  %8253 = vst.msk [vmem:[%s16206_s3 + $0x6e0] sm:$0xf] %vm7812_vm2, %v9920_v58  ;;  %v9921_v62 = vpack.c.bf16 %v5487_v59, %v5487_v59 }
 0x369   :  { %v3488_v63 = vpop.f32.mrb[72].mxu0  ;;  %v4600_v1 = vpop.f32.mrb[72].mxu1 }
 0x36a   :  { %7976 = vst.msk [vmem:[%s16206_s3 + $0x28c] sm:$0xf] %vm7812_vm2, %v9643_v61  ;;  %v3489_v2 = vadd.f32 %v14273_v16, %v3488_v63  ;;  %v10643_v4 = vpop.f32.mrb[73].mxu0  ;;  %8254 = vst.msk [vmem:[%s16206_s3 + $0x6e4] sm:$0xf] %vm7812_vm2, %v9921_v62  ;;  %v4601_v60 = vadd.f32 %v14273_v16, %v4600_v1  ;;  %v11199_v6 = vpop.f32.mrb[73].mxu1 }
 0x36b   :  { %v3491_v8 = vpop.f32.mrb[74].mxu0  ;;  %v4603_v9 = vpop.f32.mrb[74].mxu1 }
 0x36c   :  { %v5210_v10 = vmax.f32 %v3489_v2, 0.0  ;;  %v3492_v12 = vadd.f32 %v14273_v16, %v3491_v8  ;;  %v10644_v13 = vpop.f32.mrb[75].mxu0  ;;  %v5488_v14 = vmax.f32 %v4601_v60, 0.0  ;;  %v4604_v15 = vadd.f32 %v14273_v16, %v4603_v9  ;;  %v11200_v3 = vpop.f32.mrb[75].mxu1  ;;  %v11650_v8 = vld [vmem:[%s16204_s0 + $0x380] sm:$0xff]  }
 0x36e   :  { %v9644_v17 = vpack.c.bf16 %v5210_v10, %v5210_v10  ;;  %v5211_v18 = vmax.f32 %v3492_v12, 0.0  ;;  %10750 = vmatmul.mubr.msk.bf16.gmra.mrb[180].mxu0 %vm1966_vm1, %v11644_v5  ;;  %v9922_v19 = vpack.c.bf16 %v5488_v14, %v5488_v14  ;;  %v5489_v20 = vmax.f32 %v4604_v15, 0.0  ;;  %11306 = vmatmul.mubr.msk.bf16.gmra.mrb[180].mxu1 %vm1966_vm1, %v11645_v7  ;;  %v11651_v12 = vld [vmem:[%s16204_s0 + $0x7d8] sm:$0xff]  }
 0x36f   :  { %10753 = vmatprep.mubr.msk.bf16.mxu0 %vm11711_vm0, %v11710_v0  ;;  %11309 = vmatprep.mubr.msk.bf16.mxu1 %vm11711_vm0, %v11710_v0 }
 0x370   :  { %7977 = vst.msk [vmem:[%s16206_s3 + $0x290] sm:$0xf] %vm7812_vm2, %v9644_v17  ;;  %v9645_v21 = vpack.c.bf16 %v5211_v18, %v5211_v18  ;;  %8255 = vst.msk [vmem:[%s16206_s3 + $0x6e8] sm:$0xf] %vm7812_vm2, %v9922_v19  ;;  %v9923_v22 = vpack.c.bf16 %v5489_v20, %v5489_v20 }
 0x371   :  { %v3496_v11 = vpop.f32.mrb[76].mxu0  ;;  %v4608_v23 = vpop.f32.mrb[76].mxu1 }
 0x372   :  { %7978 = vst.msk [vmem:[%s16206_s3 + $0x294] sm:$0xf] %vm7812_vm2, %v9645_v21  ;;  %v3497_v24 = vadd.f32 %v14273_v16, %v3496_v11  ;;  %v10647_v25 = vpop.f32.mrb[77].mxu0  ;;  %8256 = vst.msk [vmem:[%s16206_s3 + $0x6ec] sm:$0xf] %vm7812_vm2, %v9923_v22  ;;  %v4609_v27 = vadd.f32 %v14273_v16, %v4608_v23  ;;  %v11203_v28 = vpop.f32.mrb[77].mxu1 }
 0x373   :  { %v3499_v30 = vpop.f32.mrb[78].mxu0  ;;  %v4611_v31 = vpop.f32.mrb[78].mxu1 }
 0x374   :  { %v5212_v32 = vmax.f32 %v3497_v24, 0.0  ;;  %v3500_v33 = vadd.f32 %v14273_v16, %v3499_v30  ;;  %v10648_v34 = vpop.f32.mrb[79].mxu0  ;;  %v5490_v35 = vmax.f32 %v4609_v27, 0.0  ;;  %v4612_v36 = vadd.f32 %v14273_v16, %v4611_v31  ;;  %v11204_v37 = vpop.f32.mrb[79].mxu1  ;;  %v14841_v27 = vld [vmem:[%s16205_s2] ss:$0 sm:$0xff] }
 0x375   :  { %v11652_v30 = vld [vmem:[%s16204_s0 + $0x388] sm:$0xff]  }
 0x376   :  { %v9646_v38 = vpack.c.bf16 %v5212_v32, %v5212_v32  ;;  %v5213_v39 = vmax.f32 %v3500_v33, 0.0  ;;  %10754 = vmatmul.mubr.msk.bf16.gmra.mrb[184].mxu0 %vm1966_vm1, %v11646_v26  ;;  %v9924_v40 = vpack.c.bf16 %v5490_v35, %v5490_v35  ;;  %v5491_v41 = vmax.f32 %v4612_v36, 0.0  ;;  %11310 = vmatmul.mubr.msk.bf16.gmra.mrb[184].mxu1 %vm1966_vm1, %v11647_v29  ;;  %v11653_v33 = vld [vmem:[%s16204_s0 + $0x7e0] sm:$0xff]  }
 0x377   :  { %10757 = vmatprep.mubr.msk.bf16.mxu0 %vm11711_vm0, %v11710_v0  ;;  %11313 = vmatprep.mubr.msk.bf16.mxu1 %vm11711_vm0, %v11710_v0 }
 0x378   :  { %7979 = vst.msk [vmem:[%s16206_s3 + $0x298] sm:$0xf] %vm7812_vm2, %v9646_v38  ;;  %v9647_v42 = vpack.c.bf16 %v5213_v39, %v5213_v39  ;;  %8257 = vst.msk [vmem:[%s16206_s3 + $0x6f0] sm:$0xf] %vm7812_vm2, %v9924_v40  ;;  %v9925_v43 = vpack.c.bf16 %v5491_v41, %v5491_v41 }
 0x379   :  { %v3504_v44 = vpop.f32.mrb[80].mxu0  ;;  %v4616_v45 = vpop.f32.mrb[80].mxu1 }
 0x37a   :  { %7980 = vst.msk [vmem:[%s16206_s3 + $0x29c] sm:$0xf] %vm7812_vm2, %v9647_v42  ;;  %v3505_v46 = vadd.f32 %v14273_v16, %v3504_v44  ;;  %v10651_v47 = vpop.f32.mrb[81].mxu0  ;;  %8258 = vst.msk [vmem:[%s16206_s3 + $0x6f4] sm:$0xf] %vm7812_vm2, %v9925_v43  ;;  %v4617_v49 = vadd.f32 %v14273_v16, %v4616_v45  ;;  %v11207_v50 = vpop.f32.mrb[81].mxu1 }
 0x37b   :  { %v3507_v52 = vpop.f32.mrb[82].mxu0  ;;  %v4619_v53 = vpop.f32.mrb[82].mxu1 }
 0x37c   :  { %v5214_v54 = vmax.f32 %v3505_v46, 0.0  ;;  %v3508_v55 = vadd.f32 %v14273_v16, %v3507_v52  ;;  %v10652_v56 = vpop.f32.mrb[83].mxu0  ;;  %v5492_v57 = vmax.f32 %v4617_v49, 0.0  ;;  %v4620_v58 = vadd.f32 %v14273_v16, %v4619_v53  ;;  %v11208_v59 = vpop.f32.mrb[83].mxu1  ;;  %v11654_v52 = vld [vmem:[%s16204_s0 + $0x390] sm:$0xff]  }
 0x37e   :  { %v9648_v61 = vpack.c.bf16 %v5214_v54, %v5214_v54  ;;  %v5215_v62 = vmax.f32 %v3508_v55, 0.0  ;;  %10758 = vmatmul.mubr.msk.bf16.gmra.mrb[188].mxu0 %vm1966_vm1, %v11648_v48  ;;  %v9926_v63 = vpack.c.bf16 %v5492_v57, %v5492_v57  ;;  %v5493_v1 = vmax.f32 %v4620_v58, 0.0  ;;  %11314 = vmatmul.mubr.msk.bf16.gmra.mrb[188].mxu1 %vm1966_vm1, %v11649_v51  ;;  %v11655_v55 = vld [vmem:[%s16204_s0 + $0x7e8] sm:$0xff]  }
 0x37f   :  { %10761 = vmatprep.mubr.msk.bf16.mxu0 %vm11711_vm0, %v11710_v0  ;;  %11317 = vmatprep.mubr.msk.bf16.mxu1 %vm11711_vm0, %v11710_v0 }
 0x380   :  { %7981 = vst.msk [vmem:[%s16206_s3 + $0x2a0] sm:$0xf] %vm7812_vm2, %v9648_v61  ;;  %v9649_v2 = vpack.c.bf16 %v5215_v62, %v5215_v62  ;;  %8259 = vst.msk [vmem:[%s16206_s3 + $0x6f8] sm:$0xf] %vm7812_vm2, %v9926_v63  ;;  %v9927_v4 = vpack.c.bf16 %v5493_v1, %v5493_v1 }
 0x381   :  { %v3512_v5 = vpop.f32.mrb[84].mxu0  ;;  %v4624_v60 = vpop.f32.mrb[84].mxu1 }
 0x382   :  { %7982 = vst.msk [vmem:[%s16206_s3 + $0x2a4] sm:$0xf] %vm7812_vm2, %v9649_v2  ;;  %v3513_v6 = vadd.f32 %v14273_v16, %v3512_v5  ;;  %v10655_v7 = vpop.f32.mrb[85].mxu0  ;;  %8260 = vst.msk [vmem:[%s16206_s3 + $0x6fc] sm:$0xf] %vm7812_vm2, %v9927_v4  ;;  %v4625_v9 = vadd.f32 %v14273_v16, %v4624_v60  ;;  %v11211_v10 = vpop.f32.mrb[85].mxu1 }
 0x383   :  { %v3515_v13 = vpop.f32.mrb[86].mxu0  ;;  %v4627_v14 = vpop.f32.mrb[86].mxu1 }
 0x384   :  { %v5216_v15 = vmax.f32 %v3513_v6, 0.0  ;;  %v3516_v3 = vadd.f32 %v14273_v16, %v3515_v13  ;;  %v10656_v17 = vpop.f32.mrb[87].mxu0  ;;  %v5494_v18 = vmax.f32 %v4625_v9, 0.0  ;;  %v4628_v19 = vadd.f32 %v14273_v16, %v4627_v14  ;;  %v11212_v20 = vpop.f32.mrb[87].mxu1  ;;  %v11656_v13 = vld [vmem:[%s16204_s0 + $0x398] sm:$0xff]  }
 0x386   :  { %v9650_v21 = vpack.c.bf16 %v5216_v15, %v5216_v15  ;;  %v5217_v22 = vmax.f32 %v3516_v3, 0.0  ;;  %10762 = vmatmul.mubr.msk.bf16.gmra.mrb[192].mxu0 %vm1966_vm1, %v11650_v8  ;;  %v9928_v11 = vpack.c.bf16 %v5494_v18, %v5494_v18  ;;  %v5495_v23 = vmax.f32 %v4628_v19, 0.0  ;;  %11318 = vmatmul.mubr.msk.bf16.gmra.mrb[192].mxu1 %vm1966_vm1, %v11651_v12  ;;  %v11657_v3 = vld [vmem:[%s16204_s0 + $0x7f0] sm:$0xff]  }
 0x387   :  { %10765 = vmatprep.mubr.msk.bf16.mxu0 %vm11711_vm0, %v11710_v0  ;;  %11321 = vmatprep.mubr.msk.bf16.mxu1 %vm11711_vm0, %v11710_v0 }
 0x388   :  { %7983 = vst.msk [vmem:[%s16206_s3 + $0x2a8] sm:$0xf] %vm7812_vm2, %v9650_v21  ;;  %v9651_v16 = vpack.c.bf16 %v5217_v22, %v5217_v22  ;;  %8261 = vst.msk [vmem:[%s16206_s3 + $0x700] sm:$0xf] %vm7812_vm2, %v9928_v11  ;;  %v9929_v24 = vpack.c.bf16 %v5495_v23, %v5495_v23 }
 0x389   :  { %v3520_v25 = vpop.f32.mrb[88].mxu0  ;;  %v4632_v26 = vpop.f32.mrb[88].mxu1 }
 0x38a   :  { %7984 = vst.msk [vmem:[%s16206_s3 + $0x2ac] sm:$0xf] %vm7812_vm2, %v9651_v16  ;;  %v3521_v28 = vadd.f32 %v14841_v27, %v3520_v25  ;;  %v10659_v29 = vpop.f32.mrb[89].mxu0  ;;  %8262 = vst.msk [vmem:[%s16206_s3 + $0x704] sm:$0xf] %vm7812_vm2, %v9929_v24  ;;  %v4633_v31 = vadd.f32 %v14841_v27, %v4632_v26  ;;  %v11215_v32 = vpop.f32.mrb[89].mxu1 }
 0x38b   :  { %v3523_v34 = vpop.f32.mrb[90].mxu0  ;;  %v4635_v35 = vpop.f32.mrb[90].mxu1 }
 0x38c   :  { %v5218_v36 = vmax.f32 %v3521_v28, 0.0  ;;  %v3524_v37 = vadd.f32 %v14841_v27, %v3523_v34  ;;  %v10660_v38 = vpop.f32.mrb[91].mxu0  ;;  %v5496_v39 = vmax.f32 %v4633_v31, 0.0  ;;  %v4636_v40 = vadd.f32 %v14841_v27, %v4635_v35  ;;  %v11216_v41 = vpop.f32.mrb[91].mxu1  ;;  %v11658_v34 = vld [vmem:[%s16204_s0 + $0x3a0] sm:$0xff]  }
 0x38e   :  { %v9652_v42 = vpack.c.bf16 %v5218_v36, %v5218_v36  ;;  %v5219_v43 = vmax.f32 %v3524_v37, 0.0  ;;  %10766 = vmatmul.mubr.msk.bf16.gmra.mrb[196].mxu0 %vm1966_vm1, %v11652_v30  ;;  %v9930_v44 = vpack.c.bf16 %v5496_v39, %v5496_v39  ;;  %v5497_v45 = vmax.f32 %v4636_v40, 0.0  ;;  %11322 = vmatmul.mubr.msk.bf16.gmra.mrb[196].mxu1 %vm1966_vm1, %v11653_v33  ;;  %v11659_v37 = vld [vmem:[%s16204_s0 + $0x7f8] sm:$0xff]  }
 0x38f   :  { %10769 = vmatprep.mubr.msk.bf16.mxu0 %vm11711_vm0, %v11710_v0  ;;  %11325 = vmatprep.mubr.msk.bf16.mxu1 %vm11711_vm0, %v11710_v0 }
 0x390   :  { %7985 = vst.msk [vmem:[%s16206_s3 + $0x2b0] sm:$0xf] %vm7812_vm2, %v9652_v42  ;;  %v9653_v46 = vpack.c.bf16 %v5219_v43, %v5219_v43  ;;  %8263 = vst.msk [vmem:[%s16206_s3 + $0x708] sm:$0xf] %vm7812_vm2, %v9930_v44  ;;  %v9931_v47 = vpack.c.bf16 %v5497_v45, %v5497_v45 }
 0x391   :  { %v3528_v48 = vpop.f32.mrb[92].mxu0  ;;  %v4640_v49 = vpop.f32.mrb[92].mxu1 }
 0x392   :  { %7986 = vst.msk [vmem:[%s16206_s3 + $0x2b4] sm:$0xf] %vm7812_vm2, %v9653_v46  ;;  %v3529_v50 = vadd.f32 %v14841_v27, %v3528_v48  ;;  %v10663_v51 = vpop.f32.mrb[93].mxu0  ;;  %8264 = vst.msk [vmem:[%s16206_s3 + $0x70c] sm:$0xf] %vm7812_vm2, %v9931_v47  ;;  %v4641_v53 = vadd.f32 %v14841_v27, %v4640_v49  ;;  %v11219_v54 = vpop.f32.mrb[93].mxu1 }
 0x393   :  { %v3531_v56 = vpop.f32.mrb[94].mxu0  ;;  %v4643_v57 = vpop.f32.mrb[94].mxu1 }
 0x394   :  { %v5220_v58 = vmax.f32 %v3529_v50, 0.0  ;;  %v3532_v59 = vadd.f32 %v14841_v27, %v3531_v56  ;;  %v10664_v61 = vpop.f32.mrb[95].mxu0  ;;  %v5498_v62 = vmax.f32 %v4641_v53, 0.0  ;;  %v4644_v63 = vadd.f32 %v14841_v27, %v4643_v57  ;;  %v11220_v1 = vpop.f32.mrb[95].mxu1  ;;  %v11660_v56 = vld [vmem:[%s16204_s0 + $0x3a8] sm:$0xff]  }
 0x396   :  { %v9654_v2 = vpack.c.bf16 %v5220_v58, %v5220_v58  ;;  %v5221_v4 = vmax.f32 %v3532_v59, 0.0  ;;  %10770 = vmatmul.mubr.msk.bf16.gmra.mrb[200].mxu0 %vm1966_vm1, %v11654_v52  ;;  %v9932_v5 = vpack.c.bf16 %v5498_v62, %v5498_v62  ;;  %v5499_v60 = vmax.f32 %v4644_v63, 0.0  ;;  %11326 = vmatmul.mubr.msk.bf16.gmra.mrb[200].mxu1 %vm1966_vm1, %v11655_v55  ;;  %v11661_v59 = vld [vmem:[%s16204_s0 + $0x800] sm:$0xff]  }
 0x397   :  { %10773 = vmatprep.mubr.msk.bf16.mxu0 %vm11711_vm0, %v11710_v0  ;;  %11329 = vmatprep.mubr.msk.bf16.mxu1 %vm11711_vm0, %v11710_v0 }
 0x398   :  { %7987 = vst.msk [vmem:[%s16206_s3 + $0x2b8] sm:$0xf] %vm7812_vm2, %v9654_v2  ;;  %v9655_v6 = vpack.c.bf16 %v5221_v4, %v5221_v4  ;;  %8265 = vst.msk [vmem:[%s16206_s3 + $0x710] sm:$0xf] %vm7812_vm2, %v9932_v5  ;;  %v9933_v7 = vpack.c.bf16 %v5499_v60, %v5499_v60 }
 0x399   :  { %v3536_v8 = vpop.f32.mrb[96].mxu0  ;;  %v4648_v9 = vpop.f32.mrb[96].mxu1 }
 0x39a   :  { %7988 = vst.msk [vmem:[%s16206_s3 + $0x2bc] sm:$0xf] %vm7812_vm2, %v9655_v6  ;;  %v3537_v10 = vadd.f32 %v14841_v27, %v3536_v8  ;;  %v10667_v12 = vpop.f32.mrb[97].mxu0  ;;  %8266 = vst.msk [vmem:[%s16206_s3 + $0x714] sm:$0xf] %vm7812_vm2, %v9933_v7  ;;  %v4649_v14 = vadd.f32 %v14841_v27, %v4648_v9  ;;  %v11223_v15 = vpop.f32.mrb[97].mxu1 }
 0x39b   :  { %v3539_v17 = vpop.f32.mrb[98].mxu0  ;;  %v4651_v18 = vpop.f32.mrb[98].mxu1 }
 0x39c   :  { %v5222_v19 = vmax.f32 %v3537_v10, 0.0  ;;  %v3540_v20 = vadd.f32 %v14841_v27, %v3539_v17  ;;  %v10668_v21 = vpop.f32.mrb[99].mxu0  ;;  %v5500_v22 = vmax.f32 %v4649_v14, 0.0  ;;  %v4652_v11 = vadd.f32 %v14841_v27, %v4651_v18  ;;  %v11224_v23 = vpop.f32.mrb[99].mxu1  ;;  %v11662_v17 = vld [vmem:[%s16204_s0 + $0x3b0] sm:$0xff]  }
 0x39e   :  { %v9656_v16 = vpack.c.bf16 %v5222_v19, %v5222_v19  ;;  %v5223_v24 = vmax.f32 %v3540_v20, 0.0  ;;  %10774 = vmatmul.mubr.msk.bf16.gmra.mrb[204].mxu0 %vm1966_vm1, %v11656_v13  ;;  %v9934_v25 = vpack.c.bf16 %v5500_v22, %v5500_v22  ;;  %v5501_v26 = vmax.f32 %v4652_v11, 0.0  ;;  %11330 = vmatmul.mubr.msk.bf16.gmra.mrb[204].mxu1 %vm1966_vm1, %v11657_v3  ;;  %v11663_v20 = vld [vmem:[%s16204_s0 + $0x808] sm:$0xff]  }
 0x39f   :  { %10777 = vmatprep.mubr.msk.bf16.mxu0 %vm11711_vm0, %v11710_v0  ;;  %11333 = vmatprep.mubr.msk.bf16.mxu1 %vm11711_vm0, %v11710_v0 }
 0x3a0   :  { %7989 = vst.msk [vmem:[%s16206_s3 + $0x2c0] sm:$0xf] %vm7812_vm2, %v9656_v16  ;;  %v9657_v28 = vpack.c.bf16 %v5223_v24, %v5223_v24  ;;  %8267 = vst.msk [vmem:[%s16206_s3 + $0x718] sm:$0xf] %vm7812_vm2, %v9934_v25  ;;  %v9935_v29 = vpack.c.bf16 %v5501_v26, %v5501_v26 }
 0x3a1   :  { %v3544_v30 = vpop.f32.mrb[100].mxu0  ;;  %v4656_v31 = vpop.f32.mrb[100].mxu1 }
 0x3a2   :  { %7990 = vst.msk [vmem:[%s16206_s3 + $0x2c4] sm:$0xf] %vm7812_vm2, %v9657_v28  ;;  %v3545_v32 = vadd.f32 %v14841_v27, %v3544_v30  ;;  %v10671_v33 = vpop.f32.mrb[101].mxu0  ;;  %8268 = vst.msk [vmem:[%s16206_s3 + $0x71c] sm:$0xf] %vm7812_vm2, %v9935_v29  ;;  %v4657_v35 = vadd.f32 %v14841_v27, %v4656_v31  ;;  %v11227_v36 = vpop.f32.mrb[101].mxu1 }
 0x3a3   :  { %v3547_v38 = vpop.f32.mrb[102].mxu0  ;;  %v4659_v39 = vpop.f32.mrb[102].mxu1 }
 0x3a4   :  { %v5224_v40 = vmax.f32 %v3545_v32, 0.0  ;;  %v3548_v41 = vadd.f32 %v14841_v27, %v3547_v38  ;;  %v10672_v42 = vpop.f32.mrb[103].mxu0  ;;  %v5502_v43 = vmax.f32 %v4657_v35, 0.0  ;;  %v4660_v44 = vadd.f32 %v14841_v27, %v4659_v39  ;;  %v11228_v45 = vpop.f32.mrb[103].mxu1  ;;  %v11664_v38 = vld [vmem:[%s16204_s0 + $0x3b8] sm:$0xff]  }
 0x3a6   :  { %v9658_v46 = vpack.c.bf16 %v5224_v40, %v5224_v40  ;;  %v5225_v47 = vmax.f32 %v3548_v41, 0.0  ;;  %10778 = vmatmul.mubr.msk.bf16.gmra.mrb[208].mxu0 %vm1966_vm1, %v11658_v34  ;;  %v9936_v48 = vpack.c.bf16 %v5502_v43, %v5502_v43  ;;  %v5503_v49 = vmax.f32 %v4660_v44, 0.0  ;;  %11334 = vmatmul.mubr.msk.bf16.gmra.mrb[208].mxu1 %vm1966_vm1, %v11659_v37  ;;  %v11665_v41 = vld [vmem:[%s16204_s0 + $0x810] sm:$0xff]  }
 0x3a7   :  { %10781 = vmatprep.mubr.msk.bf16.mxu0 %vm11711_vm0, %v11710_v0  ;;  %11337 = vmatprep.mubr.msk.bf16.mxu1 %vm11711_vm0, %v11710_v0 }
 0x3a8   :  { %7991 = vst.msk [vmem:[%s16206_s3 + $0x2c8] sm:$0xf] %vm7812_vm2, %v9658_v46  ;;  %v9659_v50 = vpack.c.bf16 %v5225_v47, %v5225_v47  ;;  %8269 = vst.msk [vmem:[%s16206_s3 + $0x720] sm:$0xf] %vm7812_vm2, %v9936_v48  ;;  %v9937_v51 = vpack.c.bf16 %v5503_v49, %v5503_v49 }
 0x3a9   :  { %v3552_v52 = vpop.f32.mrb[104].mxu0  ;;  %v4664_v53 = vpop.f32.mrb[104].mxu1 }
 0x3aa   :  { %7992 = vst.msk [vmem:[%s16206_s3 + $0x2cc] sm:$0xf] %vm7812_vm2, %v9659_v50  ;;  %v3553_v54 = vadd.f32 %v14841_v27, %v3552_v52  ;;  %v10675_v55 = vpop.f32.mrb[105].mxu0  ;;  %8270 = vst.msk [vmem:[%s16206_s3 + $0x724] sm:$0xf] %vm7812_vm2, %v9937_v51  ;;  %v4665_v57 = vadd.f32 %v14841_v27, %v4664_v53  ;;  %v11231_v58 = vpop.f32.mrb[105].mxu1 }
 0x3ab   :  { %v3555_v61 = vpop.f32.mrb[106].mxu0  ;;  %v4667_v62 = vpop.f32.mrb[106].mxu1 }
 0x3ac   :  { %v5226_v63 = vmax.f32 %v3553_v54, 0.0  ;;  %v3556_v1 = vadd.f32 %v14841_v27, %v3555_v61  ;;  %v10676_v2 = vpop.f32.mrb[107].mxu0  ;;  %v5504_v4 = vmax.f32 %v4665_v57, 0.0  ;;  %v4668_v5 = vadd.f32 %v14841_v27, %v4667_v62  ;;  %v11232_v60 = vpop.f32.mrb[107].mxu1  ;;  %v11666_v61 = vld [vmem:[%s16204_s0 + $0x3c0] sm:$0xff]  }
 0x3ae   :  { %v9660_v6 = vpack.c.bf16 %v5226_v63, %v5226_v63  ;;  %v5227_v7 = vmax.f32 %v3556_v1, 0.0  ;;  %10782 = vmatmul.mubr.msk.bf16.gmra.mrb[212].mxu0 %vm1966_vm1, %v11660_v56  ;;  %v9938_v8 = vpack.c.bf16 %v5504_v4, %v5504_v4  ;;  %v5505_v9 = vmax.f32 %v4668_v5, 0.0  ;;  %11338 = vmatmul.mubr.msk.bf16.gmra.mrb[212].mxu1 %vm1966_vm1, %v11661_v59  ;;  %v11667_v1 = vld [vmem:[%s16204_s0 + $0x818] sm:$0xff]  }
 0x3af   :  { %10785 = vmatprep.mubr.msk.bf16.mxu0 %vm11711_vm0, %v11710_v0  ;;  %11341 = vmatprep.mubr.msk.bf16.mxu1 %vm11711_vm0, %v11710_v0 }
 0x3b0   :  { %7993 = vst.msk [vmem:[%s16206_s3 + $0x2d0] sm:$0xf] %vm7812_vm2, %v9660_v6  ;;  %v9661_v10 = vpack.c.bf16 %v5227_v7, %v5227_v7  ;;  %8271 = vst.msk [vmem:[%s16206_s3 + $0x728] sm:$0xf] %vm7812_vm2, %v9938_v8  ;;  %v9939_v12 = vpack.c.bf16 %v5505_v9, %v5505_v9 }
 0x3b1   :  { %v3560_v13 = vpop.f32.mrb[108].mxu0  ;;  %v4672_v14 = vpop.f32.mrb[108].mxu1 }
 0x3b2   :  { %7994 = vst.msk [vmem:[%s16206_s3 + $0x2d4] sm:$0xf] %vm7812_vm2, %v9661_v10  ;;  %v3561_v15 = vadd.f32 %v14841_v27, %v3560_v13  ;;  %v10679_v3 = vpop.f32.mrb[109].mxu0  ;;  %8272 = vst.msk [vmem:[%s16206_s3 + $0x72c] sm:$0xf] %vm7812_vm2, %v9939_v12  ;;  %v4673_v18 = vadd.f32 %v14841_v27, %v4672_v14  ;;  %v11235_v19 = vpop.f32.mrb[109].mxu1 }
 0x3b3   :  { %v3563_v21 = vpop.f32.mrb[110].mxu0  ;;  %v4675_v22 = vpop.f32.mrb[110].mxu1 }
 0x3b4   :  { %v5228_v11 = vmax.f32 %v3561_v15, 0.0  ;;  %v3564_v23 = vadd.f32 %v14841_v27, %v3563_v21  ;;  %v10680_v16 = vpop.f32.mrb[111].mxu0  ;;  %v5506_v24 = vmax.f32 %v4673_v18, 0.0  ;;  %v4676_v25 = vadd.f32 %v14841_v27, %v4675_v22  ;;  %v11236_v26 = vpop.f32.mrb[111].mxu1  ;;  %v11668_v21 = vld [vmem:[%s16204_s0 + $0x3c8] sm:$0xff]  }
 0x3b6   :  { %v9662_v28 = vpack.c.bf16 %v5228_v11, %v5228_v11  ;;  %v5229_v29 = vmax.f32 %v3564_v23, 0.0  ;;  %10786 = vmatmul.mubr.msk.bf16.gmra.mrb[216].mxu0 %vm1966_vm1, %v11662_v17  ;;  %v9940_v30 = vpack.c.bf16 %v5506_v24, %v5506_v24  ;;  %v5507_v31 = vmax.f32 %v4676_v25, 0.0  ;;  %11342 = vmatmul.mubr.msk.bf16.gmra.mrb[216].mxu1 %vm1966_vm1, %v11663_v20  ;;  %v11669_v23 = vld [vmem:[%s16204_s0 + $0x820] sm:$0xff]  }
 0x3b7   :  { %10789 = vmatprep.mubr.msk.bf16.mxu0 %vm11711_vm0, %v11710_v0  ;;  %11345 = vmatprep.mubr.msk.bf16.mxu1 %vm11711_vm0, %v11710_v0 }
 0x3b8   :  { %7995 = vst.msk [vmem:[%s16206_s3 + $0x2d8] sm:$0xf] %vm7812_vm2, %v9662_v28  ;;  %v9663_v32 = vpack.c.bf16 %v5229_v29, %v5229_v29  ;;  %8273 = vst.msk [vmem:[%s16206_s3 + $0x730] sm:$0xf] %vm7812_vm2, %v9940_v30  ;;  %v9941_v33 = vpack.c.bf16 %v5507_v31, %v5507_v31 }
 0x3b9   :  { %v3568_v34 = vpop.f32.mrb[112].mxu0  ;;  %v4680_v35 = vpop.f32.mrb[112].mxu1 }
 0x3ba   :  { %7996 = vst.msk [vmem:[%s16206_s3 + $0x2dc] sm:$0xf] %vm7812_vm2, %v9663_v32  ;;  %v3569_v36 = vadd.f32 %v14841_v27, %v3568_v34  ;;  %v10683_v37 = vpop.f32.mrb[113].mxu0  ;;  %8274 = vst.msk [vmem:[%s16206_s3 + $0x734] sm:$0xf] %vm7812_vm2, %v9941_v33  ;;  %v4681_v39 = vadd.f32 %v14841_v27, %v4680_v35  ;;  %v11239_v40 = vpop.f32.mrb[113].mxu1 }
 0x3bb   :  { %v3571_v42 = vpop.f32.mrb[114].mxu0  ;;  %v4683_v43 = vpop.f32.mrb[114].mxu1 }
 0x3bc   :  { %v5230_v44 = vmax.f32 %v3569_v36, 0.0  ;;  %v3572_v45 = vadd.f32 %v14841_v27, %v3571_v42  ;;  %v10684_v46 = vpop.f32.mrb[115].mxu0  ;;  %v5508_v47 = vmax.f32 %v4681_v39, 0.0  ;;  %v4684_v48 = vadd.f32 %v14841_v27, %v4683_v43  ;;  %v11240_v49 = vpop.f32.mrb[115].mxu1  ;;  %v11670_v42 = vld [vmem:[%s16204_s0 + $0x3d0] sm:$0xff]  }
 0x3be   :  { %v9664_v50 = vpack.c.bf16 %v5230_v44, %v5230_v44  ;;  %v5231_v51 = vmax.f32 %v3572_v45, 0.0  ;;  %10790 = vmatmul.mubr.msk.bf16.gmra.mrb[220].mxu0 %vm1966_vm1, %v11664_v38  ;;  %v9942_v52 = vpack.c.bf16 %v5508_v47, %v5508_v47  ;;  %v5509_v53 = vmax.f32 %v4684_v48, 0.0  ;;  %11346 = vmatmul.mubr.msk.bf16.gmra.mrb[220].mxu1 %vm1966_vm1, %v11665_v41  ;;  %v11671_v45 = vld [vmem:[%s16204_s0 + $0x828] sm:$0xff]  }
 0x3bf   :  { %10793 = vmatprep.mubr.msk.bf16.mxu0 %vm11711_vm0, %v11710_v0  ;;  %11349 = vmatprep.mubr.msk.bf16.mxu1 %vm11711_vm0, %v11710_v0 }
 0x3c0   :  { %7997 = vst.msk [vmem:[%s16206_s3 + $0x2e0] sm:$0xf] %vm7812_vm2, %v9664_v50  ;;  %v9665_v54 = vpack.c.bf16 %v5231_v51, %v5231_v51  ;;  %8275 = vst.msk [vmem:[%s16206_s3 + $0x738] sm:$0xf] %vm7812_vm2, %v9942_v52  ;;  %v9943_v55 = vpack.c.bf16 %v5509_v53, %v5509_v53 }
 0x3c1   :  { %v3576_v56 = vpop.f32.mrb[116].mxu0  ;;  %v4688_v57 = vpop.f32.mrb[116].mxu1 }
 0x3c2   :  { %7998 = vst.msk [vmem:[%s16206_s3 + $0x2e4] sm:$0xf] %vm7812_vm2, %v9665_v54  ;;  %v3577_v58 = vadd.f32 %v14841_v27, %v3576_v56  ;;  %v10687_v59 = vpop.f32.mrb[117].mxu0  ;;  %8276 = vst.msk [vmem:[%s16206_s3 + $0x73c] sm:$0xf] %vm7812_vm2, %v9943_v55  ;;  %v4689_v62 = vadd.f32 %v14841_v27, %v4688_v57  ;;  %v11243_v63 = vpop.f32.mrb[117].mxu1 }
 0x3c3   :  { %v3579_v2 = vpop.f32.mrb[118].mxu0  ;;  %v4691_v4 = vpop.f32.mrb[118].mxu1 }
 0x3c4   :  { %v5232_v5 = vmax.f32 %v3577_v58, 0.0  ;;  %v3580_v60 = vadd.f32 %v14841_v27, %v3579_v2  ;;  %v10688_v6 = vpop.f32.mrb[119].mxu0  ;;  %v5510_v7 = vmax.f32 %v4689_v62, 0.0  ;;  %v4692_v8 = vadd.f32 %v14841_v27, %v4691_v4  ;;  %v11244_v9 = vpop.f32.mrb[119].mxu1  ;;  %v11672_v2 = vld [vmem:[%s16204_s0 + $0x3d8] sm:$0xff]  }
 0x3c6   :  { %v9666_v10 = vpack.c.bf16 %v5232_v5, %v5232_v5  ;;  %v5233_v12 = vmax.f32 %v3580_v60, 0.0  ;;  %10794 = vmatmul.mubr.msk.bf16.gmra.mrb[224].mxu0 %vm1966_vm1, %v11666_v61  ;;  %v9944_v13 = vpack.c.bf16 %v5510_v7, %v5510_v7  ;;  %v5511_v14 = vmax.f32 %v4692_v8, 0.0  ;;  %11350 = vmatmul.mubr.msk.bf16.gmra.mrb[224].mxu1 %vm1966_vm1, %v11667_v1  ;;  %v11673_v60 = vld [vmem:[%s16204_s0 + $0x830] sm:$0xff]  }
 0x3c7   :  { %10797 = vmatprep.mubr.msk.bf16.mxu0 %vm11711_vm0, %v11710_v0  ;;  %11353 = vmatprep.mubr.msk.bf16.mxu1 %vm11711_vm0, %v11710_v0 }
 0x3c8   :  { %7999 = vst.msk [vmem:[%s16206_s3 + $0x2e8] sm:$0xf] %vm7812_vm2, %v9666_v10  ;;  %v9667_v15 = vpack.c.bf16 %v5233_v12, %v5233_v12  ;;  %8277 = vst.msk [vmem:[%s16206_s3 + $0x740] sm:$0xf] %vm7812_vm2, %v9944_v13  ;;  %v9945_v3 = vpack.c.bf16 %v5511_v14, %v5511_v14 }
 0x3c9   :  { %v3584_v17 = vpop.f32.mrb[120].mxu0  ;;  %v4696_v18 = vpop.f32.mrb[120].mxu1 }
 0x3ca   :  { %8000 = vst.msk [vmem:[%s16206_s3 + $0x2ec] sm:$0xf] %vm7812_vm2, %v9667_v15  ;;  %v3585_v19 = vadd.f32 %v14841_v27, %v3584_v17  ;;  %v10691_v20 = vpop.f32.mrb[121].mxu0  ;;  %8278 = vst.msk [vmem:[%s16206_s3 + $0x744] sm:$0xf] %vm7812_vm2, %v9945_v3  ;;  %v4697_v22 = vadd.f32 %v14841_v27, %v4696_v18  ;;  %v11247_v11 = vpop.f32.mrb[121].mxu1 }
 0x3cb   :  { %v3587_v16 = vpop.f32.mrb[122].mxu0  ;;  %v4699_v24 = vpop.f32.mrb[122].mxu1 }
 0x3cc   :  { %v5234_v25 = vmax.f32 %v3585_v19, 0.0  ;;  %v3588_v26 = vadd.f32 %v14841_v27, %v3587_v16  ;;  %v10692_v28 = vpop.f32.mrb[123].mxu0  ;;  %v5512_v29 = vmax.f32 %v4697_v22, 0.0  ;;  %v4700_v30 = vadd.f32 %v14841_v27, %v4699_v24  ;;  %v11248_v31 = vpop.f32.mrb[123].mxu1  ;;  %v11674_v16 = vld [vmem:[%s16204_s0 + $0x3e0] sm:$0xff]  }
 0x3ce   :  { %v9668_v32 = vpack.c.bf16 %v5234_v25, %v5234_v25  ;;  %v5235_v33 = vmax.f32 %v3588_v26, 0.0  ;;  %10798 = vmatmul.mubr.msk.bf16.gmra.mrb[228].mxu0 %vm1966_vm1, %v11668_v21  ;;  %v9946_v34 = vpack.c.bf16 %v5512_v29, %v5512_v29  ;;  %v5513_v35 = vmax.f32 %v4700_v30, 0.0  ;;  %11354 = vmatmul.mubr.msk.bf16.gmra.mrb[228].mxu1 %vm1966_vm1, %v11669_v23  ;;  %v11675_v26 = vld [vmem:[%s16204_s0 + $0x838] sm:$0xff]  }
 0x3cf   :  { %10801 = vmatprep.mubr.msk.bf16.mxu0 %vm11711_vm0, %v11710_v0  ;;  %11357 = vmatprep.mubr.msk.bf16.mxu1 %vm11711_vm0, %v11710_v0 }
 0x3d0   :  { %8001 = vst.msk [vmem:[%s16206_s3 + $0x2f0] sm:$0xf] %vm7812_vm2, %v9668_v32  ;;  %v9669_v36 = vpack.c.bf16 %v5235_v33, %v5235_v33  ;;  %8279 = vst.msk [vmem:[%s16206_s3 + $0x748] sm:$0xf] %vm7812_vm2, %v9946_v34  ;;  %v9947_v37 = vpack.c.bf16 %v5513_v35, %v5513_v35 }
 0x3d1   :  { %v3592_v38 = vpop.f32.mrb[124].mxu0  ;;  %v4704_v39 = vpop.f32.mrb[124].mxu1 }
 0x3d2   :  { %8002 = vst.msk [vmem:[%s16206_s3 + $0x2f4] sm:$0xf] %vm7812_vm2, %v9669_v36  ;;  %v3593_v40 = vadd.f32 %v14841_v27, %v3592_v38  ;;  %v10695_v41 = vpop.f32.mrb[125].mxu0  ;;  %8280 = vst.msk [vmem:[%s16206_s3 + $0x74c] sm:$0xf] %vm7812_vm2, %v9947_v37  ;;  %v4705_v43 = vadd.f32 %v14841_v27, %v4704_v39  ;;  %v11251_v44 = vpop.f32.mrb[125].mxu1 }
 0x3d3   :  { %v3595_v46 = vpop.f32.mrb[126].mxu0  ;;  %v4707_v47 = vpop.f32.mrb[126].mxu1 }
 0x3d4   :  { %v5236_v48 = vmax.f32 %v3593_v40, 0.0  ;;  %v3596_v49 = vadd.f32 %v14841_v27, %v3595_v46  ;;  %v10696_v50 = vpop.f32.mrb[127].mxu0  ;;  %v5514_v51 = vmax.f32 %v4705_v43, 0.0  ;;  %v4708_v52 = vadd.f32 %v14841_v27, %v4707_v47  ;;  %v11252_v53 = vpop.f32.mrb[127].mxu1  ;;  %v11676_v46 = vld [vmem:[%s16204_s0 + $0x3e8] sm:$0xff]  }
 0x3d6   :  { %v9670_v54 = vpack.c.bf16 %v5236_v48, %v5236_v48  ;;  %v5237_v55 = vmax.f32 %v3596_v49, 0.0  ;;  %10802 = vmatmul.mubr.msk.bf16.gmra.mrb[232].mxu0 %vm1966_vm1, %v11670_v42  ;;  %v9948_v56 = vpack.c.bf16 %v5514_v51, %v5514_v51  ;;  %v5515_v57 = vmax.f32 %v4708_v52, 0.0  ;;  %11358 = vmatmul.mubr.msk.bf16.gmra.mrb[232].mxu1 %vm1966_vm1, %v11671_v45  ;;  %v11677_v49 = vld [vmem:[%s16204_s0 + $0x840] sm:$0xff]  }
 0x3d7   :  { %10805 = vmatprep.mubr.msk.bf16.mxu0 %vm11711_vm0, %v11710_v0  ;;  %11361 = vmatprep.mubr.msk.bf16.mxu1 %vm11711_vm0, %v11710_v0 }
 0x3d8   :  { %8003 = vst.msk [vmem:[%s16206_s3 + $0x2f8] sm:$0xf] %vm7812_vm2, %v9670_v54  ;;  %v9671_v58 = vpack.c.bf16 %v5237_v55, %v5237_v55  ;;  %8281 = vst.msk [vmem:[%s16206_s3 + $0x750] sm:$0xf] %vm7812_vm2, %v9948_v56  ;;  %v9949_v59 = vpack.c.bf16 %v5515_v57, %v5515_v57 }
 0x3d9   :  { %v3600_v61 = vpop.f32.mrb[128].mxu0  ;;  %v4712_v62 = vpop.f32.mrb[128].mxu1 }
 0x3da   :  { %8004 = vst.msk [vmem:[%s16206_s3 + $0x2fc] sm:$0xf] %vm7812_vm2, %v9671_v58  ;;  %v3601_v63 = vadd.f32 %v14841_v27, %v3600_v61  ;;  %v10699_v1 = vpop.f32.mrb[129].mxu0  ;;  %8282 = vst.msk [vmem:[%s16206_s3 + $0x754] sm:$0xf] %vm7812_vm2, %v9949_v59  ;;  %v4713_v4 = vadd.f32 %v14841_v27, %v4712_v62  ;;  %v11255_v5 = vpop.f32.mrb[129].mxu1 }
 0x3db   :  { %v3603_v6 = vpop.f32.mrb[130].mxu0  ;;  %v4715_v7 = vpop.f32.mrb[130].mxu1 }
 0x3dc   :  { %v5238_v8 = vmax.f32 %v3601_v63, 0.0  ;;  %v3604_v9 = vadd.f32 %v14841_v27, %v3603_v6  ;;  %v10700_v10 = vpop.f32.mrb[131].mxu0  ;;  %v5516_v12 = vmax.f32 %v4713_v4, 0.0  ;;  %v4716_v13 = vadd.f32 %v14841_v27, %v4715_v7  ;;  %v11256_v14 = vpop.f32.mrb[131].mxu1  ;;  %v11678_v6 = vld [vmem:[%s16204_s0 + $0x3f0] sm:$0xff]  }
 0x3de   :  { %v9672_v15 = vpack.c.bf16 %v5238_v8, %v5238_v8  ;;  %v5239_v3 = vmax.f32 %v3604_v9, 0.0  ;;  %10806 = vmatmul.mubr.msk.bf16.gmra.mrb[236].mxu0 %vm1966_vm1, %v11672_v2  ;;  %v9950_v17 = vpack.c.bf16 %v5516_v12, %v5516_v12  ;;  %v5517_v18 = vmax.f32 %v4716_v13, 0.0  ;;  %11362 = vmatmul.mubr.msk.bf16.gmra.mrb[236].mxu1 %vm1966_vm1, %v11673_v60  ;;  %v11679_v9 = vld [vmem:[%s16204_s0 + $0x848] sm:$0xff]  }
 0x3df   :  { %10809 = vmatprep.mubr.msk.bf16.mxu0 %vm11711_vm0, %v11710_v0  ;;  %11365 = vmatprep.mubr.msk.bf16.mxu1 %vm11711_vm0, %v11710_v0 }
 0x3e0   :  { %8005 = vst.msk [vmem:[%s16206_s3 + $0x300] sm:$0xf] %vm7812_vm2, %v9672_v15  ;;  %v9673_v19 = vpack.c.bf16 %v5239_v3, %v5239_v3  ;;  %8283 = vst.msk [vmem:[%s16206_s3 + $0x758] sm:$0xf] %vm7812_vm2, %v9950_v17  ;;  %v9951_v20 = vpack.c.bf16 %v5517_v18, %v5517_v18 }
 0x3e1   :  { %v3608_v21 = vpop.f32.mrb[132].mxu0  ;;  %v4720_v22 = vpop.f32.mrb[132].mxu1 }
 0x3e2   :  { %8006 = vst.msk [vmem:[%s16206_s3 + $0x304] sm:$0xf] %vm7812_vm2, %v9673_v19  ;;  %v3609_v11 = vadd.f32 %v14841_v27, %v3608_v21  ;;  %v10703_v23 = vpop.f32.mrb[133].mxu0  ;;  %8284 = vst.msk [vmem:[%s16206_s3 + $0x75c] sm:$0xf] %vm7812_vm2, %v9951_v20  ;;  %v4721_v24 = vadd.f32 %v14841_v27, %v4720_v22  ;;  %v11259_v25 = vpop.f32.mrb[133].mxu1 }
 0x3e3   :  { %v3611_v28 = vpop.f32.mrb[134].mxu0  ;;  %v4723_v29 = vpop.f32.mrb[134].mxu1 }
 0x3e4   :  { %v5240_v30 = vmax.f32 %v3609_v11, 0.0  ;;  %v3612_v31 = vadd.f32 %v14841_v27, %v3611_v28  ;;  %v10704_v32 = vpop.f32.mrb[135].mxu0  ;;  %v5518_v33 = vmax.f32 %v4721_v24, 0.0  ;;  %v4724_v34 = vadd.f32 %v14841_v27, %v4723_v29  ;;  %v11260_v35 = vpop.f32.mrb[135].mxu1  ;;  %v11680_v28 = vld [vmem:[%s16204_s0 + $0x3f8] sm:$0xff]  }
 0x3e6   :  { %v9674_v36 = vpack.c.bf16 %v5240_v30, %v5240_v30  ;;  %v5241_v37 = vmax.f32 %v3612_v31, 0.0  ;;  %10810 = vmatmul.mubr.msk.bf16.gmra.mrb[240].mxu0 %vm1966_vm1, %v11674_v16  ;;  %v9952_v38 = vpack.c.bf16 %v5518_v33, %v5518_v33  ;;  %v5519_v39 = vmax.f32 %v4724_v34, 0.0  ;;  %11366 = vmatmul.mubr.msk.bf16.gmra.mrb[240].mxu1 %vm1966_vm1, %v11675_v26  ;;  %v11681_v31 = vld [vmem:[%s16204_s0 + $0x850] sm:$0xff]  }
 0x3e7   :  { %10813 = vmatprep.mubr.msk.bf16.mxu0 %vm11711_vm0, %v11710_v0  ;;  %11369 = vmatprep.mubr.msk.bf16.mxu1 %vm11711_vm0, %v11710_v0 }
 0x3e8   :  { %8007 = vst.msk [vmem:[%s16206_s3 + $0x308] sm:$0xf] %vm7812_vm2, %v9674_v36  ;;  %v9675_v40 = vpack.c.bf16 %v5241_v37, %v5241_v37  ;;  %8285 = vst.msk [vmem:[%s16206_s3 + $0x760] sm:$0xf] %vm7812_vm2, %v9952_v38  ;;  %v9953_v41 = vpack.c.bf16 %v5519_v39, %v5519_v39 }
 0x3e9   :  { %v3616_v42 = vpop.f32.mrb[136].mxu0  ;;  %v4728_v43 = vpop.f32.mrb[136].mxu1 }
 0x3ea   :  { %8008 = vst.msk [vmem:[%s16206_s3 + $0x30c] sm:$0xf] %vm7812_vm2, %v9675_v40  ;;  %v3617_v44 = vadd.f32 %v14841_v27, %v3616_v42  ;;  %v10707_v45 = vpop.f32.mrb[137].mxu0  ;;  %8286 = vst.msk [vmem:[%s16206_s3 + $0x764] sm:$0xf] %vm7812_vm2, %v9953_v41  ;;  %v4729_v47 = vadd.f32 %v14841_v27, %v4728_v43  ;;  %v11263_v48 = vpop.f32.mrb[137].mxu1 }
 0x3eb   :  { %v3619_v50 = vpop.f32.mrb[138].mxu0  ;;  %v4731_v51 = vpop.f32.mrb[138].mxu1 }
 0x3ec   :  { %v5242_v52 = vmax.f32 %v3617_v44, 0.0  ;;  %v3620_v53 = vadd.f32 %v14841_v27, %v3619_v50  ;;  %v10708_v54 = vpop.f32.mrb[139].mxu0  ;;  %v5520_v55 = vmax.f32 %v4729_v47, 0.0  ;;  %v4732_v56 = vadd.f32 %v14841_v27, %v4731_v51  ;;  %v11264_v57 = vpop.f32.mrb[139].mxu1  ;;  %v11682_v50 = vld [vmem:[%s16204_s0 + $0x400] sm:$0xff]  }
 0x3ee   :  { %v9676_v58 = vpack.c.bf16 %v5242_v52, %v5242_v52  ;;  %v5243_v59 = vmax.f32 %v3620_v53, 0.0  ;;  %10814 = vmatmul.mubr.msk.bf16.gmra.mrb[244].mxu0 %vm1966_vm1, %v11676_v46  ;;  %v9954_v61 = vpack.c.bf16 %v5520_v55, %v5520_v55  ;;  %v5521_v62 = vmax.f32 %v4732_v56, 0.0  ;;  %11370 = vmatmul.mubr.msk.bf16.gmra.mrb[244].mxu1 %vm1966_vm1, %v11677_v49  ;;  %v11683_v53 = vld [vmem:[%s16204_s0 + $0x858] sm:$0xff]  }
 0x3ef   :  { %10817 = vmatprep.mubr.msk.bf16.mxu0 %vm11711_vm0, %v11710_v0  ;;  %11373 = vmatprep.mubr.msk.bf16.mxu1 %vm11711_vm0, %v11710_v0 }
 0x3f0   :  { %8009 = vst.msk [vmem:[%s16206_s3 + $0x310] sm:$0xf] %vm7812_vm2, %v9676_v58  ;;  %v9677_v63 = vpack.c.bf16 %v5243_v59, %v5243_v59  ;;  %8287 = vst.msk [vmem:[%s16206_s3 + $0x768] sm:$0xf] %vm7812_vm2, %v9954_v61  ;;  %v9955_v1 = vpack.c.bf16 %v5521_v62, %v5521_v62 }
 0x3f1   :  { %v3624_v2 = vpop.f32.mrb[140].mxu0  ;;  %v4736_v4 = vpop.f32.mrb[140].mxu1 }
 0x3f2   :  { %8010 = vst.msk [vmem:[%s16206_s3 + $0x314] sm:$0xf] %vm7812_vm2, %v9677_v63  ;;  %v3625_v5 = vadd.f32 %v14841_v27, %v3624_v2  ;;  %v10711_v60 = vpop.f32.mrb[141].mxu0  ;;  %8288 = vst.msk [vmem:[%s16206_s3 + $0x76c] sm:$0xf] %vm7812_vm2, %v9955_v1  ;;  %v4737_v7 = vadd.f32 %v14841_v27, %v4736_v4  ;;  %v11267_v8 = vpop.f32.mrb[141].mxu1 }
 0x3f3   :  { %v3627_v10 = vpop.f32.mrb[142].mxu0  ;;  %v4739_v12 = vpop.f32.mrb[142].mxu1 }
 0x3f4   :  { %v5244_v13 = vmax.f32 %v3625_v5, 0.0  ;;  %v3628_v14 = vadd.f32 %v14841_v27, %v3627_v10  ;;  %v10712_v15 = vpop.f32.mrb[143].mxu0  ;;  %v5522_v3 = vmax.f32 %v4737_v7, 0.0  ;;  %v4740_v17 = vadd.f32 %v14841_v27, %v4739_v12  ;;  %v11268_v18 = vpop.f32.mrb[143].mxu1  ;;  %v11684_v10 = vld [vmem:[%s16204_s0 + $0x408] sm:$0xff]  }
 0x3f6   :  { %v9678_v19 = vpack.c.bf16 %v5244_v13, %v5244_v13  ;;  %v5245_v20 = vmax.f32 %v3628_v14, 0.0  ;;  %10818 = vmatmul.mubr.msk.bf16.gmra.mrb[248].mxu0 %vm1966_vm1, %v11678_v6  ;;  %v9956_v21 = vpack.c.bf16 %v5522_v3, %v5522_v3  ;;  %v5523_v22 = vmax.f32 %v4740_v17, 0.0  ;;  %11374 = vmatmul.mubr.msk.bf16.gmra.mrb[248].mxu1 %vm1966_vm1, %v11679_v9  ;;  %v11685_v14 = vld [vmem:[%s16204_s0 + $0x860] sm:$0xff]  }
 0x3f7   :  { %10821 = vmatprep.mubr.msk.bf16.mxu0 %vm11711_vm0, %v11710_v0  ;;  %11377 = vmatprep.mubr.msk.bf16.mxu1 %vm11711_vm0, %v11710_v0 }
 0x3f8   :  { %8011 = vst.msk [vmem:[%s16206_s3 + $0x318] sm:$0xf] %vm7812_vm2, %v9678_v19  ;;  %v9679_v11 = vpack.c.bf16 %v5245_v20, %v5245_v20  ;;  %8289 = vst.msk [vmem:[%s16206_s3 + $0x770] sm:$0xf] %vm7812_vm2, %v9956_v21  ;;  %v9957_v23 = vpack.c.bf16 %v5523_v22, %v5523_v22 }
 0x3f9   :  { %v3632_v16 = vpop.f32.mrb[144].mxu0  ;;  %v4744_v24 = vpop.f32.mrb[144].mxu1 }
 0x3fa   :  { %8012 = vst.msk [vmem:[%s16206_s3 + $0x31c] sm:$0xf] %vm7812_vm2, %v9679_v11  ;;  %v3633_v25 = vadd.f32 %v14841_v27, %v3632_v16  ;;  %v10715_v26 = vpop.f32.mrb[145].mxu0  ;;  %8290 = vst.msk [vmem:[%s16206_s3 + $0x774] sm:$0xf] %vm7812_vm2, %v9957_v23  ;;  %v4745_v29 = vadd.f32 %v14841_v27, %v4744_v24  ;;  %v11271_v30 = vpop.f32.mrb[145].mxu1 }
 0x3fb   :  { %v3635_v32 = vpop.f32.mrb[146].mxu0  ;;  %v4747_v33 = vpop.f32.mrb[146].mxu1 }
 0x3fc   :  { %v5246_v34 = vmax.f32 %v3633_v25, 0.0  ;;  %v3636_v35 = vadd.f32 %v14841_v27, %v3635_v32  ;;  %v10716_v36 = vpop.f32.mrb[147].mxu0  ;;  %v5524_v37 = vmax.f32 %v4745_v29, 0.0  ;;  %v4748_v38 = vadd.f32 %v14841_v27, %v4747_v33  ;;  %v11272_v39 = vpop.f32.mrb[147].mxu1  ;;  %v11686_v32 = vld [vmem:[%s16204_s0 + $0x410] sm:$0xff]  }
 0x3fd   :  { %v15398_v33 = vld [vmem:[%s16205_s2] ss:$0 sm:$0xff] }
 0x3fe   :  { %v9680_v40 = vpack.c.bf16 %v5246_v34, %v5246_v34  ;;  %v5247_v41 = vmax.f32 %v3636_v35, 0.0  ;;  %10822 = vmatmul.mubr.msk.bf16.gmra.mrb[252].mxu0 %vm1966_vm1, %v11680_v28  ;;  %v9958_v42 = vpack.c.bf16 %v5524_v37, %v5524_v37  ;;  %v5525_v43 = vmax.f32 %v4748_v38, 0.0  ;;  %11378 = vmatmul.mubr.msk.bf16.gmra.mrb[252].mxu1 %vm1966_vm1, %v11681_v31 }
 0x3ff   :  { %10825 = vmatprep.mubr.msk.bf16.mxu0 %vm11711_vm0, %v11710_v0  ;;  %11381 = vmatprep.mubr.msk.bf16.mxu1 %vm11711_vm0, %v11710_v0 }
 0x400   :  { %8013 = vst.msk [vmem:[%s16206_s3 + $0x320] sm:$0xf] %vm7812_vm2, %v9680_v40  ;;  %v9681_v44 = vpack.c.bf16 %v5247_v41, %v5247_v41  ;;  %8291 = vst.msk [vmem:[%s16206_s3 + $0x778] sm:$0xf] %vm7812_vm2, %v9958_v42  ;;  %v9959_v45 = vpack.c.bf16 %v5525_v43, %v5525_v43 }
 0x401   :  { %v3640_v46 = vpop.f32.mrb[148].mxu0  ;;  %v4752_v47 = vpop.f32.mrb[148].mxu1 }
 0x402   :  { %8014 = vst.msk [vmem:[%s16206_s3 + $0x324] sm:$0xf] %vm7812_vm2, %v9681_v44  ;;  %v3641_v48 = vadd.f32 %v14841_v27, %v3640_v46  ;;  %v10719_v49 = vpop.f32.mrb[149].mxu0  ;;  %8292 = vst.msk [vmem:[%s16206_s3 + $0x77c] sm:$0xf] %vm7812_vm2, %v9959_v45  ;;  %v4753_v51 = vadd.f32 %v14841_v27, %v4752_v47  ;;  %v11275_v52 = vpop.f32.mrb[149].mxu1 }
 0x403   :  { %v3643_v54 = vpop.f32.mrb[150].mxu0  ;;  %v4755_v55 = vpop.f32.mrb[150].mxu1 }
 0x404   :  { %v5248_v56 = vmax.f32 %v3641_v48, 0.0  ;;  %v3644_v57 = vadd.f32 %v14841_v27, %v3643_v54  ;;  %v10720_v58 = vpop.f32.mrb[151].mxu0  ;;  %v5526_v59 = vmax.f32 %v4753_v51, 0.0  ;;  %v4756_v61 = vadd.f32 %v14841_v27, %v4755_v55  ;;  %v11276_v62 = vpop.f32.mrb[151].mxu1  ;;  %v11688_v54 = vld [vmem:[%s16204_s0 + $0x418] sm:$0xff]  }
 0x406   :  { %v9682_v63 = vpack.c.bf16 %v5248_v56, %v5248_v56  ;;  %v5249_v1 = vmax.f32 %v3644_v57, 0.0  ;;  %10826 = vmatmul.mubr.msk.bf16.gmra.mrb[0].mxu0 %vm1966_vm1, %v11682_v50  ;;  %v9960_v2 = vpack.c.bf16 %v5526_v59, %v5526_v59  ;;  %v5527_v4 = vmax.f32 %v4756_v61, 0.0  ;;  %11382 = vmatmul.mubr.msk.bf16.gmra.mrb[0].mxu1 %vm1966_vm1, %v11683_v53  ;;  %v11689_v57 = vld [vmem:[%s16204_s0 + $0x870] sm:$0xff]  }
 0x407   :  { %10829 = vmatprep.mubr.msk.bf16.mxu0 %vm11711_vm0, %v11710_v0  ;;  %11385 = vmatprep.mubr.msk.bf16.mxu1 %vm11711_vm0, %v11710_v0 }
 0x408   :  { %8015 = vst.msk [vmem:[%s16206_s3 + $0x328] sm:$0xf] %vm7812_vm2, %v9682_v63  ;;  %v9683_v5 = vpack.c.bf16 %v5249_v1, %v5249_v1  ;;  %8293 = vst.msk [vmem:[%s16206_s3 + $0x780] sm:$0xf] %vm7812_vm2, %v9960_v2  ;;  %v9961_v60 = vpack.c.bf16 %v5527_v4, %v5527_v4 }
 0x409   :  { %v3648_v6 = vpop.f32.mrb[152].mxu0  ;;  %v4760_v7 = vpop.f32.mrb[152].mxu1 }
 0x40a   :  { %8016 = vst.msk [vmem:[%s16206_s3 + $0x32c] sm:$0xf] %vm7812_vm2, %v9683_v5  ;;  %v3649_v8 = vadd.f32 %v14841_v27, %v3648_v6  ;;  %v10723_v9 = vpop.f32.mrb[153].mxu0  ;;  %8294 = vst.msk [vmem:[%s16206_s3 + $0x784] sm:$0xf] %vm7812_vm2, %v9961_v60  ;;  %v4761_v12 = vadd.f32 %v14841_v27, %v4760_v7  ;;  %v11279_v13 = vpop.f32.mrb[153].mxu1 }
 0x40b   :  { %v3651_v15 = vpop.f32.mrb[154].mxu0  ;;  %v4763_v3 = vpop.f32.mrb[154].mxu1 }
 0x40c   :  { %v5250_v17 = vmax.f32 %v3649_v8, 0.0  ;;  %v3652_v18 = vadd.f32 %v14841_v27, %v3651_v15  ;;  %v10724_v19 = vpop.f32.mrb[155].mxu0  ;;  %v5528_v20 = vmax.f32 %v4761_v12, 0.0  ;;  %v4764_v21 = vadd.f32 %v14841_v27, %v4763_v3  ;;  %v11280_v22 = vpop.f32.mrb[155].mxu1  ;;  %v11690_v15 = vld [vmem:[%s16204_s0 + $0x420] sm:$0xff]  }
 0x40e   :  { %v9684_v11 = vpack.c.bf16 %v5250_v17, %v5250_v17  ;;  %v5251_v23 = vmax.f32 %v3652_v18, 0.0  ;;  %10830 = vmatmul.mubr.msk.bf16.gmra.mrb[4].mxu0 %vm1966_vm1, %v11684_v10  ;;  %v9962_v16 = vpack.c.bf16 %v5528_v20, %v5528_v20  ;;  %v5529_v24 = vmax.f32 %v4764_v21, 0.0  ;;  %11386 = vmatmul.mubr.msk.bf16.gmra.mrb[4].mxu1 %vm1966_vm1, %v11685_v14  ;;  %v11691_v18 = vld [vmem:[%s16204_s0 + $0x878] sm:$0xff]  }
 0x40f   :  { %10833 = vmatprep.mubr.msk.bf16.mxu0 %vm11711_vm0, %v11710_v0  ;;  %11389 = vmatprep.mubr.msk.bf16.mxu1 %vm11711_vm0, %v11710_v0 }
 0x410   :  { %8017 = vst.msk [vmem:[%s16206_s3 + $0x330] sm:$0xf] %vm7812_vm2, %v9684_v11  ;;  %v9685_v25 = vpack.c.bf16 %v5251_v23, %v5251_v23  ;;  %8295 = vst.msk [vmem:[%s16206_s3 + $0x788] sm:$0xf] %vm7812_vm2, %v9962_v16  ;;  %v9963_v26 = vpack.c.bf16 %v5529_v24, %v5529_v24 }
 0x411   :  { %v3656_v28 = vpop.f32.mrb[156].mxu0  ;;  %v4768_v29 = vpop.f32.mrb[156].mxu1 }
 0x412   :  { %8018 = vst.msk [vmem:[%s16206_s3 + $0x334] sm:$0xf] %vm7812_vm2, %v9685_v25  ;;  %v3657_v30 = vadd.f32 %v14841_v27, %v3656_v28  ;;  %v10727_v31 = vpop.f32.mrb[157].mxu0  ;;  %8296 = vst.msk [vmem:[%s16206_s3 + $0x78c] sm:$0xf] %vm7812_vm2, %v9963_v26  ;;  %v4769_v34 = vadd.f32 %v15398_v33, %v4768_v29  ;;  %v11283_v35 = vpop.f32.mrb[157].mxu1 }
 0x413   :  { %v11687_v27 = vld [vmem:[%s16204_s0 + $0x868] sm:$0xff]   ;;  %v3659_v36 = vpop.f32.mrb[158].mxu0  ;;  %v4771_v37 = vpop.f32.mrb[158].mxu1 }
 0x414   :  { %v5252_v38 = vmax.f32 %v3657_v30, 0.0  ;;  %v3660_v39 = vadd.f32 %v15398_v33, %v3659_v36  ;;  %v10728_v40 = vpop.f32.mrb[159].mxu0  ;;  %v5530_v41 = vmax.f32 %v4769_v34, 0.0  ;;  %v4772_v42 = vadd.f32 %v15398_v33, %v4771_v37  ;;  %v11284_v43 = vpop.f32.mrb[159].mxu1  ;;  %v11692_v36 = vld [vmem:[%s16204_s0 + $0x428] sm:$0xff]  }
 0x416   :  { %v9686_v44 = vpack.c.bf16 %v5252_v38, %v5252_v38  ;;  %v5253_v45 = vmax.f32 %v3660_v39, 0.0  ;;  %10834 = vmatmul.mubr.msk.bf16.gmra.mrb[8].mxu0 %vm1966_vm1, %v11686_v32  ;;  %v9964_v46 = vpack.c.bf16 %v5530_v41, %v5530_v41  ;;  %v5531_v47 = vmax.f32 %v4772_v42, 0.0  ;;  %11390 = vmatmul.mubr.msk.bf16.gmra.mrb[8].mxu1 %vm1966_vm1, %v11687_v27  ;;  %v11693_v39 = vld [vmem:[%s16204_s0 + $0x880] sm:$0xff]  }
 0x417   :  { %10837 = vmatprep.mubr.msk.bf16.mxu0 %vm11711_vm0, %v11710_v0  ;;  %11393 = vmatprep.mubr.msk.bf16.mxu1 %vm11711_vm0, %v11710_v0 }
 0x418   :  { %8019 = vst.msk [vmem:[%s16206_s3 + $0x338] sm:$0xf] %vm7812_vm2, %v9686_v44  ;;  %v9687_v48 = vpack.c.bf16 %v5253_v45, %v5253_v45  ;;  %8297 = vst.msk [vmem:[%s16206_s3 + $0x790] sm:$0xf] %vm7812_vm2, %v9964_v46  ;;  %v9965_v49 = vpack.c.bf16 %v5531_v47, %v5531_v47 }
 0x419   :  { %v3664_v50 = vpop.f32.mrb[160].mxu0  ;;  %v4776_v51 = vpop.f32.mrb[160].mxu1 }
 0x41a   :  { %8020 = vst.msk [vmem:[%s16206_s3 + $0x33c] sm:$0xf] %vm7812_vm2, %v9687_v48  ;;  %v3665_v52 = vadd.f32 %v15398_v33, %v3664_v50  ;;  %v10731_v53 = vpop.f32.mrb[161].mxu0  ;;  %8298 = vst.msk [vmem:[%s16206_s3 + $0x794] sm:$0xf] %vm7812_vm2, %v9965_v49  ;;  %v4777_v55 = vadd.f32 %v15398_v33, %v4776_v51  ;;  %v11287_v56 = vpop.f32.mrb[161].mxu1 }
 0x41b   :  { %v3667_v58 = vpop.f32.mrb[162].mxu0  ;;  %v4779_v59 = vpop.f32.mrb[162].mxu1 }
 0x41c   :  { %v5254_v61 = vmax.f32 %v3665_v52, 0.0  ;;  %v3668_v62 = vadd.f32 %v15398_v33, %v3667_v58  ;;  %v10732_v63 = vpop.f32.mrb[163].mxu0  ;;  %v5532_v1 = vmax.f32 %v4777_v55, 0.0  ;;  %v4780_v2 = vadd.f32 %v15398_v33, %v4779_v59  ;;  %v11288_v4 = vpop.f32.mrb[163].mxu1  ;;  %v11694_v58 = vld [vmem:[%s16204_s0 + $0x430] sm:$0xff]  }
 0x41e   :  { %v9688_v5 = vpack.c.bf16 %v5254_v61, %v5254_v61  ;;  %v5255_v60 = vmax.f32 %v3668_v62, 0.0  ;;  %10838 = vmatmul.mubr.msk.bf16.gmra.mrb[12].mxu0 %vm1966_vm1, %v11688_v54  ;;  %v9966_v6 = vpack.c.bf16 %v5532_v1, %v5532_v1  ;;  %v5533_v7 = vmax.f32 %v4780_v2, 0.0  ;;  %11394 = vmatmul.mubr.msk.bf16.gmra.mrb[12].mxu1 %vm1966_vm1, %v11689_v57  ;;  %v11695_v62 = vld [vmem:[%s16204_s0 + $0x888] sm:$0xff]  }
 0x41f   :  { %10841 = vmatprep.mubr.msk.bf16.mxu0 %vm11711_vm0, %v11710_v0  ;;  %11397 = vmatprep.mubr.msk.bf16.mxu1 %vm11711_vm0, %v11710_v0 }
 0x420   :  { %8021 = vst.msk [vmem:[%s16206_s3 + $0x340] sm:$0xf] %vm7812_vm2, %v9688_v5  ;;  %v9689_v8 = vpack.c.bf16 %v5255_v60, %v5255_v60  ;;  %8299 = vst.msk [vmem:[%s16206_s3 + $0x798] sm:$0xf] %vm7812_vm2, %v9966_v6  ;;  %v9967_v9 = vpack.c.bf16 %v5533_v7, %v5533_v7 }
 0x421   :  { %v3672_v10 = vpop.f32.mrb[164].mxu0  ;;  %v4784_v12 = vpop.f32.mrb[164].mxu1 }
 0x422   :  { %8022 = vst.msk [vmem:[%s16206_s3 + $0x344] sm:$0xf] %vm7812_vm2, %v9689_v8  ;;  %v3673_v13 = vadd.f32 %v15398_v33, %v3672_v10  ;;  %v10735_v14 = vpop.f32.mrb[165].mxu0  ;;  %8300 = vst.msk [vmem:[%s16206_s3 + $0x79c] sm:$0xf] %vm7812_vm2, %v9967_v9  ;;  %v4785_v3 = vadd.f32 %v15398_v33, %v4784_v12  ;;  %v11291_v17 = vpop.f32.mrb[165].mxu1 }
 0x423   :  { %v3675_v19 = vpop.f32.mrb[166].mxu0  ;;  %v4787_v20 = vpop.f32.mrb[166].mxu1 }
 0x424   :  { %v5256_v21 = vmax.f32 %v3673_v13, 0.0  ;;  %v3676_v22 = vadd.f32 %v15398_v33, %v3675_v19  ;;  %v10736_v11 = vpop.f32.mrb[167].mxu0  ;;  %v5534_v23 = vmax.f32 %v4785_v3, 0.0  ;;  %v4788_v16 = vadd.f32 %v15398_v33, %v4787_v20  ;;  %v11292_v24 = vpop.f32.mrb[167].mxu1  ;;  %v11696_v19 = vld [vmem:[%s16204_s0 + $0x438] sm:$0xff]  }
 0x426   :  { %v9690_v25 = vpack.c.bf16 %v5256_v21, %v5256_v21  ;;  %v5257_v26 = vmax.f32 %v3676_v22, 0.0  ;;  %10842 = vmatmul.mubr.msk.bf16.gmra.mrb[16].mxu0 %vm1966_vm1, %v11690_v15  ;;  %v9968_v28 = vpack.c.bf16 %v5534_v23, %v5534_v23  ;;  %v5535_v29 = vmax.f32 %v4788_v16, 0.0  ;;  %11398 = vmatmul.mubr.msk.bf16.gmra.mrb[16].mxu1 %vm1966_vm1, %v11691_v18  ;;  %v11697_v22 = vld [vmem:[%s16204_s0 + $0x890] sm:$0xff]  }
 0x427   :  { %10845 = vmatprep.mubr.msk.bf16.mxu0 %vm11711_vm0, %v11710_v0  ;;  %11401 = vmatprep.mubr.msk.bf16.mxu1 %vm11711_vm0, %v11710_v0 }
 0x428   :  { %8023 = vst.msk [vmem:[%s16206_s3 + $0x348] sm:$0xf] %vm7812_vm2, %v9690_v25  ;;  %v9691_v30 = vpack.c.bf16 %v5257_v26, %v5257_v26  ;;  %8301 = vst.msk [vmem:[%s16206_s3 + $0x7a0] sm:$0xf] %vm7812_vm2, %v9968_v28  ;;  %v9969_v31 = vpack.c.bf16 %v5535_v29, %v5535_v29 }
 0x429   :  { %v3680_v32 = vpop.f32.mrb[168].mxu0  ;;  %v4792_v34 = vpop.f32.mrb[168].mxu1 }
 0x42a   :  { %8024 = vst.msk [vmem:[%s16206_s3 + $0x34c] sm:$0xf] %vm7812_vm2, %v9691_v30  ;;  %v3681_v35 = vadd.f32 %v15398_v33, %v3680_v32  ;;  %v10739_v27 = vpop.f32.mrb[169].mxu0  ;;  %8302 = vst.msk [vmem:[%s16206_s3 + $0x7a4] sm:$0xf] %vm7812_vm2, %v9969_v31  ;;  %v4793_v37 = vadd.f32 %v15398_v33, %v4792_v34  ;;  %v11295_v38 = vpop.f32.mrb[169].mxu1 }
 0x42b   :  { %v3683_v40 = vpop.f32.mrb[170].mxu0  ;;  %v4795_v41 = vpop.f32.mrb[170].mxu1 }
 0x42c   :  { %v5258_v42 = vmax.f32 %v3681_v35, 0.0  ;;  %v3684_v43 = vadd.f32 %v15398_v33, %v3683_v40  ;;  %v10740_v44 = vpop.f32.mrb[171].mxu0  ;;  %v5536_v45 = vmax.f32 %v4793_v37, 0.0  ;;  %v4796_v46 = vadd.f32 %v15398_v33, %v4795_v41  ;;  %v11296_v47 = vpop.f32.mrb[171].mxu1  ;;  %v11698_v40 = vld [vmem:[%s16204_s0 + $0x440] sm:$0xff]  }
 0x42e   :  { %v9692_v48 = vpack.c.bf16 %v5258_v42, %v5258_v42  ;;  %v5259_v49 = vmax.f32 %v3684_v43, 0.0  ;;  %10846 = vmatmul.mubr.msk.bf16.gmra.mrb[20].mxu0 %vm1966_vm1, %v11692_v36  ;;  %v9970_v50 = vpack.c.bf16 %v5536_v45, %v5536_v45  ;;  %v5537_v51 = vmax.f32 %v4796_v46, 0.0  ;;  %11402 = vmatmul.mubr.msk.bf16.gmra.mrb[20].mxu1 %vm1966_vm1, %v11693_v39  ;;  %v11699_v43 = vld [vmem:[%s16204_s0 + $0x898] sm:$0xff]  }
 0x42f   :  { %10849 = vmatprep.mubr.msk.bf16.mxu0 %vm11711_vm0, %v11710_v0  ;;  %11405 = vmatprep.mubr.msk.bf16.mxu1 %vm11711_vm0, %v11710_v0 }
 0x430   :  { %8025 = vst.msk [vmem:[%s16206_s3 + $0x350] sm:$0xf] %vm7812_vm2, %v9692_v48  ;;  %v9693_v52 = vpack.c.bf16 %v5259_v49, %v5259_v49  ;;  %8303 = vst.msk [vmem:[%s16206_s3 + $0x7a8] sm:$0xf] %vm7812_vm2, %v9970_v50  ;;  %v9971_v53 = vpack.c.bf16 %v5537_v51, %v5537_v51 }
 0x431   :  { %v3688_v54 = vpop.f32.mrb[172].mxu0  ;;  %v4800_v55 = vpop.f32.mrb[172].mxu1 }
 0x432   :  { %8026 = vst.msk [vmem:[%s16206_s3 + $0x354] sm:$0xf] %vm7812_vm2, %v9693_v52  ;;  %v3689_v56 = vadd.f32 %v15398_v33, %v3688_v54  ;;  %v10743_v57 = vpop.f32.mrb[173].mxu0  ;;  %8304 = vst.msk [vmem:[%s16206_s3 + $0x7ac] sm:$0xf] %vm7812_vm2, %v9971_v53  ;;  %v4801_v59 = vadd.f32 %v15398_v33, %v4800_v55  ;;  %v11299_v61 = vpop.f32.mrb[173].mxu1 }
 0x433   :  { %v3691_v63 = vpop.f32.mrb[174].mxu0  ;;  %v4803_v1 = vpop.f32.mrb[174].mxu1 }
 0x434   :  { %v5260_v2 = vmax.f32 %v3689_v56, 0.0  ;;  %v3692_v4 = vadd.f32 %v15398_v33, %v3691_v63  ;;  %v10744_v5 = vpop.f32.mrb[175].mxu0  ;;  %v5538_v60 = vmax.f32 %v4801_v59, 0.0  ;;  %v4804_v6 = vadd.f32 %v15398_v33, %v4803_v1  ;;  %v11300_v7 = vpop.f32.mrb[175].mxu1  ;;  %v11700_v63 = vld [vmem:[%s16204_s0 + $0x448] sm:$0xff]  }
 0x436   :  { %v9694_v8 = vpack.c.bf16 %v5260_v2, %v5260_v2  ;;  %v5261_v9 = vmax.f32 %v3692_v4, 0.0  ;;  %10850 = vmatmul.mubr.msk.bf16.gmra.mrb[24].mxu0 %vm1966_vm1, %v11694_v58  ;;  %v9972_v10 = vpack.c.bf16 %v5538_v60, %v5538_v60  ;;  %v5539_v12 = vmax.f32 %v4804_v6, 0.0  ;;  %11406 = vmatmul.mubr.msk.bf16.gmra.mrb[24].mxu1 %vm1966_vm1, %v11695_v62  ;;  %v11701_v4 = vld [vmem:[%s16204_s0 + $0x8a0] ss:$0 sps:$4 sm:$0x11]  }
 0x437   :  { %10853 = vmatprep.mubr.msk.bf16.mxu0 %vm11711_vm0, %v11710_v0  ;;  %11409 = vmatprep.mubr.msk.bf16.mxu1 %vm11711_vm0, %v11710_v0 }
 0x438   :  { %8027 = vst.msk [vmem:[%s16206_s3 + $0x358] sm:$0xf] %vm7812_vm2, %v9694_v8  ;;  %v9695_v13 = vpack.c.bf16 %v5261_v9, %v5261_v9  ;;  %8305 = vst.msk [vmem:[%s16206_s3 + $0x7b0] sm:$0xf] %vm7812_vm2, %v9972_v10  ;;  %v9973_v14 = vpack.c.bf16 %v5539_v12, %v5539_v12 }
 0x439   :  { %v3696_v15 = vpop.f32.mrb[176].mxu0  ;;  %v4808_v3 = vpop.f32.mrb[176].mxu1 }
 0x43a   :  { %8028 = vst.msk [vmem:[%s16206_s3 + $0x35c] sm:$0xf] %vm7812_vm2, %v9695_v13  ;;  %v3697_v17 = vadd.f32 %v15398_v33, %v3696_v15  ;;  %v10747_v18 = vpop.f32.mrb[177].mxu0  ;;  %8306 = vst.msk [vmem:[%s16206_s3 + $0x7b4] sm:$0xf] %vm7812_vm2, %v9973_v14  ;;  %v4809_v20 = vadd.f32 %v15398_v33, %v4808_v3  ;;  %v11303_v21 = vpop.f32.mrb[177].mxu1 }
 0x43b   :  { %v3699_v11 = vpop.f32.mrb[178].mxu0  ;;  %v4811_v23 = vpop.f32.mrb[178].mxu1 }
 0x43c   :  { %v5262_v16 = vmax.f32 %v3697_v17, 0.0  ;;  %v3700_v24 = vadd.f32 %v15398_v33, %v3699_v11  ;;  %v10748_v25 = vpop.f32.mrb[179].mxu0  ;;  %v5540_v26 = vmax.f32 %v4809_v20, 0.0  ;;  %v4812_v28 = vadd.f32 %v15398_v33, %v4811_v23  ;;  %v11304_v29 = vpop.f32.mrb[179].mxu1 }
 0x43e   :  { %v9696_v30 = vpack.c.bf16 %v5262_v16, %v5262_v16  ;;  %v5263_v31 = vmax.f32 %v3700_v24, 0.0  ;;  %10854 = vmatmul.mubr.msk.bf16.gmra.mrb[28].mxu0 %vm1966_vm1, %v11696_v19  ;;  %v9974_v32 = vpack.c.bf16 %v5540_v26, %v5540_v26  ;;  %v5541_v34 = vmax.f32 %v4812_v28, 0.0  ;;  %11410 = vmatmul.mubr.msk.bf16.gmra.mrb[28].mxu1 %vm1966_vm1, %v11697_v22  ;;  %v11702_v22 = vld [vmem:[%s16204_s0 + $0x450] sm:$0xff]  }
 0x43f   :  { %10857 = vmatprep.mubr.msk.bf16.mxu0 %vm11711_vm0, %v11710_v0  ;;  %11413 = vmatprep.mubr.msk.bf16.mxu1 %vm11711_vm0, %v11710_v0 }
 0x440   :  { %8029 = vst.msk [vmem:[%s16206_s3 + $0x360] sm:$0xf] %vm7812_vm2, %v9696_v30  ;;  %v9697_v35 = vpack.c.bf16 %v5263_v31, %v5263_v31  ;;  %8307 = vst.msk [vmem:[%s16206_s3 + $0x7b8] sm:$0xf] %vm7812_vm2, %v9974_v32  ;;  %v9975_v27 = vpack.c.bf16 %v5541_v34, %v5541_v34 }
 0x441   :  { %v3704_v36 = vpop.f32.mrb[180].mxu0  ;;  %v4816_v37 = vpop.f32.mrb[180].mxu1 }
 0x442   :  { %8030 = vst.msk [vmem:[%s16206_s3 + $0x364] sm:$0xf] %vm7812_vm2, %v9697_v35  ;;  %v3705_v38 = vadd.f32 %v15398_v33, %v3704_v36  ;;  %v10751_v39 = vpop.f32.mrb[181].mxu0  ;;  %8308 = vst.msk [vmem:[%s16206_s3 + $0x7bc] sm:$0xf] %vm7812_vm2, %v9975_v27  ;;  %v4817_v41 = vadd.f32 %v15398_v33, %v4816_v37  ;;  %v11307_v42 = vpop.f32.mrb[181].mxu1 }
 0x443   :  { %v3707_v44 = vpop.f32.mrb[182].mxu0  ;;  %v4819_v45 = vpop.f32.mrb[182].mxu1 }
 0x444   :  { %v5264_v46 = vmax.f32 %v3705_v38, 0.0  ;;  %v3708_v47 = vadd.f32 %v15398_v33, %v3707_v44  ;;  %v10752_v48 = vpop.f32.mrb[183].mxu0  ;;  %v5542_v49 = vmax.f32 %v4817_v41, 0.0  ;;  %v4820_v50 = vadd.f32 %v15398_v33, %v4819_v45  ;;  %v11308_v51 = vpop.f32.mrb[183].mxu1 }
 0x446   :  { %v9698_v52 = vpack.c.bf16 %v5264_v46, %v5264_v46  ;;  %v5265_v53 = vmax.f32 %v3708_v47, 0.0  ;;  %10858 = vmatmul.mubr.msk.bf16.gmra.mrb[32].mxu0 %vm1966_vm1, %v11698_v40  ;;  %v9976_v54 = vpack.c.bf16 %v5542_v49, %v5542_v49  ;;  %v5543_v55 = vmax.f32 %v4820_v50, 0.0  ;;  %11414 = vmatmul.mubr.msk.bf16.gmra.mrb[32].mxu1 %vm1966_vm1, %v11699_v43 }
 0x447   :  { %10861 = vmatprep.mubr.msk.bf16.mxu0 %vm11711_vm0, %v11710_v0  ;;  %11417 = vmatprep.mubr.msk.bf16.mxu1 %vm11711_vm0, %v11710_v0 }
 0x448   :  { %8031 = vst.msk [vmem:[%s16206_s3 + $0x368] sm:$0xf] %vm7812_vm2, %v9698_v52  ;;  %v9699_v56 = vpack.c.bf16 %v5265_v53, %v5265_v53  ;;  %8309 = vst.msk [vmem:[%s16206_s3 + $0x7c0] sm:$0xf] %vm7812_vm2, %v9976_v54  ;;  %v9977_v57 = vpack.c.bf16 %v5543_v55, %v5543_v55 }
 0x449   :  { %v3712_v58 = vpop.f32.mrb[184].mxu0  ;;  %v4824_v59 = vpop.f32.mrb[184].mxu1 }
 0x44a   :  { %8032 = vst.msk [vmem:[%s16206_s3 + $0x36c] sm:$0xf] %vm7812_vm2, %v9699_v56  ;;  %v3713_v61 = vadd.f32 %v15398_v33, %v3712_v58  ;;  %v10755_v62 = vpop.f32.mrb[185].mxu0  ;;  %8310 = vst.msk [vmem:[%s16206_s3 + $0x7c4] sm:$0xf] %vm7812_vm2, %v9977_v57  ;;  %v4825_v1 = vadd.f32 %v15398_v33, %v4824_v59  ;;  %v11311_v2 = vpop.f32.mrb[185].mxu1 }
 0x44b   :  { %v3715_v5 = vpop.f32.mrb[186].mxu0  ;;  %v4827_v60 = vpop.f32.mrb[186].mxu1 }
 0x44c   :  { %v5266_v6 = vmax.f32 %v3713_v61, 0.0  ;;  %v3716_v7 = vadd.f32 %v15398_v33, %v3715_v5  ;;  %v10756_v8 = vpop.f32.mrb[187].mxu0  ;;  %v5544_v9 = vmax.f32 %v4825_v1, 0.0  ;;  %v4828_v10 = vadd.f32 %v15398_v33, %v4827_v60  ;;  %v11312_v12 = vpop.f32.mrb[187].mxu1 }
 0x44e   :  { %v9700_v13 = vpack.c.bf16 %v5266_v6, %v5266_v6  ;;  %v5267_v14 = vmax.f32 %v3716_v7, 0.0  ;;  %10862 = vmatmul.mubr.msk.bf16.gmra.mrb[36].mxu0 %vm1966_vm1, %v11700_v63  ;;  %v9978_v15 = vpack.c.bf16 %v5544_v9, %v5544_v9  ;;  %v5545_v3 = vmax.f32 %v4828_v10, 0.0  ;;  %11418 = vmatmul.mubr.msk.bf16.gmra.mrb[36].mxu1 %vm1966_vm1, %v11701_v4 }
 0x44f   :  { %10865 = vmatprep.mubr.msk.bf16.mxu0 %vm11711_vm0, %v11710_v0 }
 0x450   :  { %8033 = vst.msk [vmem:[%s16206_s3 + $0x370] sm:$0xf] %vm7812_vm2, %v9700_v13  ;;  %v9701_v17 = vpack.c.bf16 %v5267_v14, %v5267_v14  ;;  %8311 = vst.msk [vmem:[%s16206_s3 + $0x7c8] sm:$0xf] %vm7812_vm2, %v9978_v15  ;;  %v9979_v18 = vpack.c.bf16 %v5545_v3, %v5545_v3 }
 0x451   :  { %v3720_v19 = vpop.f32.mrb[188].mxu0  ;;  %v4832_v20 = vpop.f32.mrb[188].mxu1 }
 0x452   :  { %8034 = vst.msk [vmem:[%s16206_s3 + $0x374] sm:$0xf] %vm7812_vm2, %v9701_v17  ;;  %v3721_v0 = vadd.f32 %v15398_v33, %v3720_v19  ;;  %v10759_v21 = vpop.f32.mrb[189].mxu0  ;;  %8312 = vst.msk [vmem:[%s16206_s3 + $0x7cc] sm:$0xf] %vm7812_vm2, %v9979_v18  ;;  %v4833_v11 = vadd.f32 %v15398_v33, %v4832_v20  ;;  %v11315_v23 = vpop.f32.mrb[189].mxu1 }
 0x453   :  { %v3723_v16 = vpop.f32.mrb[190].mxu0  ;;  %v4835_v24 = vpop.f32.mrb[190].mxu1 }
 0x454   :  { %v5268_v25 = vmax.f32 %v3721_v0, 0.0  ;;  %v3724_v26 = vadd.f32 %v15398_v33, %v3723_v16  ;;  %v10760_v28 = vpop.f32.mrb[191].mxu0  ;;  %v5546_v29 = vmax.f32 %v4833_v11, 0.0  ;;  %v4836_v30 = vadd.f32 %v15398_v33, %v4835_v24  ;;  %v11316_v31 = vpop.f32.mrb[191].mxu1 }
 0x456   :  { %v9702_v32 = vpack.c.bf16 %v5268_v25, %v5268_v25  ;;  %v5269_v34 = vmax.f32 %v3724_v26, 0.0  ;;  %10866 = vmatmul.mubr.msk.bf16.gmra.mrb[40].mxu0 %vm1966_vm1, %v11702_v22  ;;  %v9980_v35 = vpack.c.bf16 %v5546_v29, %v5546_v29  ;;  %v5547_v27 = vmax.f32 %v4836_v30, 0.0 }
 0x458   :  { %8035 = vst.msk [vmem:[%s16206_s3 + $0x378] sm:$0xf] %vm7812_vm2, %v9702_v32  ;;  %v9703_v36 = vpack.c.bf16 %v5269_v34, %v5269_v34  ;;  %8313 = vst.msk [vmem:[%s16206_s3 + $0x7d0] sm:$0xf] %vm7812_vm2, %v9980_v35  ;;  %v9981_v37 = vpack.c.bf16 %v5547_v27, %v5547_v27 }
 0x459   :  { %v3728_v38 = vpop.f32.mrb[192].mxu0  ;;  %v4840_v39 = vpop.f32.mrb[192].mxu1 }
 0x45a   :  { %8036 = vst.msk [vmem:[%s16206_s3 + $0x37c] sm:$0xf] %vm7812_vm2, %v9703_v36  ;;  %v3729_v40 = vadd.f32 %v15398_v33, %v3728_v38  ;;  %v10763_v41 = vpop.f32.mrb[193].mxu0  ;;  %8314 = vst.msk [vmem:[%s16206_s3 + $0x7d4] sm:$0xf] %vm7812_vm2, %v9981_v37  ;;  %v4841_v42 = vadd.f32 %v15398_v33, %v4840_v39  ;;  %v11319_v43 = vpop.f32.mrb[193].mxu1 }
 0x45b   :  { %v3731_v44 = vpop.f32.mrb[194].mxu0  ;;  %v4843_v45 = vpop.f32.mrb[194].mxu1 }
 0x45c   :  { %v5270_v46 = vmax.f32 %v3729_v40, 0.0  ;;  %v3732_v47 = vadd.f32 %v15398_v33, %v3731_v44  ;;  %v10764_v48 = vpop.f32.mrb[195].mxu0  ;;  %v5548_v49 = vmax.f32 %v4841_v42, 0.0  ;;  %v4844_v50 = vadd.f32 %v15398_v33, %v4843_v45  ;;  %v11320_v51 = vpop.f32.mrb[195].mxu1 }
 0x45e   :  { %v9704_v52 = vpack.c.bf16 %v5270_v46, %v5270_v46  ;;  %v5271_v53 = vmax.f32 %v3732_v47, 0.0  ;;  %v9982_v54 = vpack.c.bf16 %v5548_v49, %v5548_v49  ;;  %v5549_v55 = vmax.f32 %v4844_v50, 0.0 }
 0x460   :  { %8037 = vst.msk [vmem:[%s16206_s3 + $0x380] sm:$0xf] %vm7812_vm2, %v9704_v52  ;;  %v9705_v56 = vpack.c.bf16 %v5271_v53, %v5271_v53  ;;  %8315 = vst.msk [vmem:[%s16206_s3 + $0x7d8] sm:$0xf] %vm7812_vm2, %v9982_v54  ;;  %v9983_v57 = vpack.c.bf16 %v5549_v55, %v5549_v55 }
 0x461   :  { %v3736_v58 = vpop.f32.mrb[196].mxu0  ;;  %v4848_v59 = vpop.f32.mrb[196].mxu1 }
 0x462   :  { %8038 = vst.msk [vmem:[%s16206_s3 + $0x384] sm:$0xf] %vm7812_vm2, %v9705_v56  ;;  %v3737_v61 = vadd.f32 %v15398_v33, %v3736_v58  ;;  %v10767_v62 = vpop.f32.mrb[197].mxu0  ;;  %8316 = vst.msk [vmem:[%s16206_s3 + $0x7dc] sm:$0xf] %vm7812_vm2, %v9983_v57  ;;  %v4849_v63 = vadd.f32 %v15398_v33, %v4848_v59  ;;  %v11323_v1 = vpop.f32.mrb[197].mxu1 }
 0x463   :  { %v3739_v2 = vpop.f32.mrb[198].mxu0  ;;  %v4851_v4 = vpop.f32.mrb[198].mxu1 }
 0x464   :  { %v5272_v5 = vmax.f32 %v3737_v61, 0.0  ;;  %v3740_v60 = vadd.f32 %v15398_v33, %v3739_v2  ;;  %v10768_v6 = vpop.f32.mrb[199].mxu0  ;;  %v5550_v7 = vmax.f32 %v4849_v63, 0.0  ;;  %v4852_v8 = vadd.f32 %v15398_v33, %v4851_v4  ;;  %v11324_v9 = vpop.f32.mrb[199].mxu1 }
 0x466   :  { %v9706_v10 = vpack.c.bf16 %v5272_v5, %v5272_v5  ;;  %v5273_v12 = vmax.f32 %v3740_v60, 0.0  ;;  %v9984_v13 = vpack.c.bf16 %v5550_v7, %v5550_v7  ;;  %v5551_v14 = vmax.f32 %v4852_v8, 0.0 }
 0x468   :  { %8039 = vst.msk [vmem:[%s16206_s3 + $0x388] sm:$0xf] %vm7812_vm2, %v9706_v10  ;;  %v9707_v15 = vpack.c.bf16 %v5273_v12, %v5273_v12  ;;  %8317 = vst.msk [vmem:[%s16206_s3 + $0x7e0] sm:$0xf] %vm7812_vm2, %v9984_v13  ;;  %v9985_v3 = vpack.c.bf16 %v5551_v14, %v5551_v14 }
 0x469   :  { %v3744_v17 = vpop.f32.mrb[200].mxu0  ;;  %v4856_v18 = vpop.f32.mrb[200].mxu1 }
 0x46a   :  { %8040 = vst.msk [vmem:[%s16206_s3 + $0x38c] sm:$0xf] %vm7812_vm2, %v9707_v15  ;;  %v3745_v19 = vadd.f32 %v15398_v33, %v3744_v17  ;;  %v10771_v20 = vpop.f32.mrb[201].mxu0  ;;  %8318 = vst.msk [vmem:[%s16206_s3 + $0x7e4] sm:$0xf] %vm7812_vm2, %v9985_v3  ;;  %v4857_v0 = vadd.f32 %v15398_v33, %v4856_v18  ;;  %v11327_v21 = vpop.f32.mrb[201].mxu1 }
 0x46b   :  { %v3747_v22 = vpop.f32.mrb[202].mxu0  ;;  %v4859_v11 = vpop.f32.mrb[202].mxu1 }
 0x46c   :  { %v5274_v23 = vmax.f32 %v3745_v19, 0.0  ;;  %v3748_v16 = vadd.f32 %v15398_v33, %v3747_v22  ;;  %v10772_v24 = vpop.f32.mrb[203].mxu0  ;;  %v5552_v25 = vmax.f32 %v4857_v0, 0.0  ;;  %v4860_v26 = vadd.f32 %v15398_v33, %v4859_v11  ;;  %v11328_v28 = vpop.f32.mrb[203].mxu1 }
 0x46e   :  { %v9708_v29 = vpack.c.bf16 %v5274_v23, %v5274_v23  ;;  %v5275_v30 = vmax.f32 %v3748_v16, 0.0  ;;  %v9986_v31 = vpack.c.bf16 %v5552_v25, %v5552_v25  ;;  %v5553_v32 = vmax.f32 %v4860_v26, 0.0 }
 0x470   :  { %8041 = vst.msk [vmem:[%s16206_s3 + $0x390] sm:$0xf] %vm7812_vm2, %v9708_v29  ;;  %v9709_v34 = vpack.c.bf16 %v5275_v30, %v5275_v30  ;;  %8319 = vst.msk [vmem:[%s16206_s3 + $0x7e8] sm:$0xf] %vm7812_vm2, %v9986_v31  ;;  %v9987_v35 = vpack.c.bf16 %v5553_v32, %v5553_v32 }
 0x471   :  { %v3752_v27 = vpop.f32.mrb[204].mxu0  ;;  %v4864_v36 = vpop.f32.mrb[204].mxu1 }
 0x472   :  { %8042 = vst.msk [vmem:[%s16206_s3 + $0x394] sm:$0xf] %vm7812_vm2, %v9709_v34  ;;  %v3753_v37 = vadd.f32 %v15398_v33, %v3752_v27  ;;  %v10775_v38 = vpop.f32.mrb[205].mxu0  ;;  %8320 = vst.msk [vmem:[%s16206_s3 + $0x7ec] sm:$0xf] %vm7812_vm2, %v9987_v35  ;;  %v4865_v39 = vadd.f32 %v15398_v33, %v4864_v36  ;;  %v11331_v40 = vpop.f32.mrb[205].mxu1 }
 0x473   :  { %v3755_v41 = vpop.f32.mrb[206].mxu0  ;;  %v4867_v42 = vpop.f32.mrb[206].mxu1 }
 0x474   :  { %v5276_v43 = vmax.f32 %v3753_v37, 0.0  ;;  %v3756_v44 = vadd.f32 %v15398_v33, %v3755_v41  ;;  %v10776_v45 = vpop.f32.mrb[207].mxu0  ;;  %v5554_v46 = vmax.f32 %v4865_v39, 0.0  ;;  %v4868_v47 = vadd.f32 %v15398_v33, %v4867_v42  ;;  %v11332_v48 = vpop.f32.mrb[207].mxu1 }
 0x476   :  { %v9710_v49 = vpack.c.bf16 %v5276_v43, %v5276_v43  ;;  %v5277_v50 = vmax.f32 %v3756_v44, 0.0  ;;  %v9988_v51 = vpack.c.bf16 %v5554_v46, %v5554_v46  ;;  %v5555_v52 = vmax.f32 %v4868_v47, 0.0 }
 0x478   :  { %8043 = vst.msk [vmem:[%s16206_s3 + $0x398] sm:$0xf] %vm7812_vm2, %v9710_v49  ;;  %v9711_v53 = vpack.c.bf16 %v5277_v50, %v5277_v50  ;;  %8321 = vst.msk [vmem:[%s16206_s3 + $0x7f0] sm:$0xf] %vm7812_vm2, %v9988_v51  ;;  %v9989_v54 = vpack.c.bf16 %v5555_v52, %v5555_v52 }
 0x479   :  { %v3760_v55 = vpop.f32.mrb[208].mxu0  ;;  %v4872_v56 = vpop.f32.mrb[208].mxu1 }
 0x47a   :  { %8044 = vst.msk [vmem:[%s16206_s3 + $0x39c] sm:$0xf] %vm7812_vm2, %v9711_v53  ;;  %v3761_v57 = vadd.f32 %v15398_v33, %v3760_v55  ;;  %v10779_v58 = vpop.f32.mrb[209].mxu0  ;;  %8322 = vst.msk [vmem:[%s16206_s3 + $0x7f4] sm:$0xf] %vm7812_vm2, %v9989_v54  ;;  %v4873_v59 = vadd.f32 %v15398_v33, %v4872_v56  ;;  %v11335_v61 = vpop.f32.mrb[209].mxu1 }
 0x47b   :  { %v3763_v62 = vpop.f32.mrb[210].mxu0  ;;  %v4875_v63 = vpop.f32.mrb[210].mxu1 }
 0x47c   :  { %v5278_v1 = vmax.f32 %v3761_v57, 0.0  ;;  %v3764_v2 = vadd.f32 %v15398_v33, %v3763_v62  ;;  %v10780_v4 = vpop.f32.mrb[211].mxu0  ;;  %v5556_v5 = vmax.f32 %v4873_v59, 0.0  ;;  %v4876_v60 = vadd.f32 %v15398_v33, %v4875_v63  ;;  %v11336_v6 = vpop.f32.mrb[211].mxu1 }
 0x47e   :  { %v9712_v7 = vpack.c.bf16 %v5278_v1, %v5278_v1  ;;  %v5279_v8 = vmax.f32 %v3764_v2, 0.0  ;;  %v9990_v9 = vpack.c.bf16 %v5556_v5, %v5556_v5  ;;  %v5557_v10 = vmax.f32 %v4876_v60, 0.0 }
 0x480   :  { %8045 = vst.msk [vmem:[%s16206_s3 + $0x3a0] sm:$0xf] %vm7812_vm2, %v9712_v7  ;;  %v9713_v12 = vpack.c.bf16 %v5279_v8, %v5279_v8  ;;  %8323 = vst.msk [vmem:[%s16206_s3 + $0x7f8] sm:$0xf] %vm7812_vm2, %v9990_v9  ;;  %v9991_v13 = vpack.c.bf16 %v5557_v10, %v5557_v10 }
 0x481   :  { %v3768_v14 = vpop.f32.mrb[212].mxu0  ;;  %v4880_v15 = vpop.f32.mrb[212].mxu1 }
 0x482   :  { %8046 = vst.msk [vmem:[%s16206_s3 + $0x3a4] sm:$0xf] %vm7812_vm2, %v9713_v12  ;;  %v3769_v3 = vadd.f32 %v15398_v33, %v3768_v14  ;;  %v10783_v17 = vpop.f32.mrb[213].mxu0  ;;  %8324 = vst.msk [vmem:[%s16206_s3 + $0x7fc] sm:$0xf] %vm7812_vm2, %v9991_v13  ;;  %v4881_v18 = vadd.f32 %v15398_v33, %v4880_v15  ;;  %v11339_v19 = vpop.f32.mrb[213].mxu1 }
 0x483   :  { %v3771_v20 = vpop.f32.mrb[214].mxu0  ;;  %v4883_v0 = vpop.f32.mrb[214].mxu1 }
 0x484   :  { %v5280_v21 = vmax.f32 %v3769_v3, 0.0  ;;  %v3772_v22 = vadd.f32 %v15398_v33, %v3771_v20  ;;  %v10784_v11 = vpop.f32.mrb[215].mxu0  ;;  %v5558_v23 = vmax.f32 %v4881_v18, 0.0  ;;  %v4884_v16 = vadd.f32 %v15398_v33, %v4883_v0  ;;  %v11340_v24 = vpop.f32.mrb[215].mxu1 }
 0x486   :  { %v9714_v25 = vpack.c.bf16 %v5280_v21, %v5280_v21  ;;  %v5281_v26 = vmax.f32 %v3772_v22, 0.0  ;;  %v9992_v28 = vpack.c.bf16 %v5558_v23, %v5558_v23  ;;  %v5559_v29 = vmax.f32 %v4884_v16, 0.0 }
 0x488   :  { %8047 = vst.msk [vmem:[%s16206_s3 + $0x3a8] sm:$0xf] %vm7812_vm2, %v9714_v25  ;;  %v9715_v30 = vpack.c.bf16 %v5281_v26, %v5281_v26  ;;  %8325 = vst.msk [vmem:[%s16206_s3 + $0x800] sm:$0xf] %vm7812_vm2, %v9992_v28  ;;  %v9993_v31 = vpack.c.bf16 %v5559_v29, %v5559_v29 }
 0x489   :  { %v3776_v32 = vpop.f32.mrb[216].mxu0  ;;  %v4888_v34 = vpop.f32.mrb[216].mxu1 }
 0x48a   :  { %8048 = vst.msk [vmem:[%s16206_s3 + $0x3ac] sm:$0xf] %vm7812_vm2, %v9715_v30  ;;  %v3777_v35 = vadd.f32 %v15398_v33, %v3776_v32  ;;  %v10787_v27 = vpop.f32.mrb[217].mxu0  ;;  %8326 = vst.msk [vmem:[%s16206_s3 + $0x804] sm:$0xf] %vm7812_vm2, %v9993_v31  ;;  %v4889_v36 = vadd.f32 %v15398_v33, %v4888_v34  ;;  %v11343_v37 = vpop.f32.mrb[217].mxu1 }
 0x48b   :  { %v3779_v38 = vpop.f32.mrb[218].mxu0  ;;  %v4891_v39 = vpop.f32.mrb[218].mxu1 }
 0x48c   :  { %v5282_v40 = vmax.f32 %v3777_v35, 0.0  ;;  %v3780_v41 = vadd.f32 %v15398_v33, %v3779_v38  ;;  %v10788_v42 = vpop.f32.mrb[219].mxu0  ;;  %v5560_v43 = vmax.f32 %v4889_v36, 0.0  ;;  %v4892_v44 = vadd.f32 %v15398_v33, %v4891_v39  ;;  %v11344_v45 = vpop.f32.mrb[219].mxu1 }
 0x48e   :  { %v9716_v46 = vpack.c.bf16 %v5282_v40, %v5282_v40  ;;  %v5283_v47 = vmax.f32 %v3780_v41, 0.0  ;;  %v9994_v48 = vpack.c.bf16 %v5560_v43, %v5560_v43  ;;  %v5561_v49 = vmax.f32 %v4892_v44, 0.0 }
 0x490   :  { %8049 = vst.msk [vmem:[%s16206_s3 + $0x3b0] sm:$0xf] %vm7812_vm2, %v9716_v46  ;;  %v9717_v50 = vpack.c.bf16 %v5283_v47, %v5283_v47  ;;  %8327 = vst.msk [vmem:[%s16206_s3 + $0x808] sm:$0xf] %vm7812_vm2, %v9994_v48  ;;  %v9995_v51 = vpack.c.bf16 %v5561_v49, %v5561_v49 }
 0x491   :  { %v3784_v52 = vpop.f32.mrb[220].mxu0  ;;  %v4896_v53 = vpop.f32.mrb[220].mxu1 }
 0x492   :  { %8050 = vst.msk [vmem:[%s16206_s3 + $0x3b4] sm:$0xf] %vm7812_vm2, %v9717_v50  ;;  %v3785_v54 = vadd.f32 %v15398_v33, %v3784_v52  ;;  %v10791_v55 = vpop.f32.mrb[221].mxu0  ;;  %8328 = vst.msk [vmem:[%s16206_s3 + $0x80c] sm:$0xf] %vm7812_vm2, %v9995_v51  ;;  %v4897_v56 = vadd.f32 %v15398_v33, %v4896_v53  ;;  %v11347_v57 = vpop.f32.mrb[221].mxu1 }
 0x493   :  { %v3787_v58 = vpop.f32.mrb[222].mxu0  ;;  %v4899_v59 = vpop.f32.mrb[222].mxu1 }
 0x494   :  { %v5284_v61 = vmax.f32 %v3785_v54, 0.0  ;;  %v3788_v62 = vadd.f32 %v15398_v33, %v3787_v58  ;;  %v10792_v63 = vpop.f32.mrb[223].mxu0  ;;  %v5562_v1 = vmax.f32 %v4897_v56, 0.0  ;;  %v4900_v2 = vadd.f32 %v15398_v33, %v4899_v59  ;;  %v11348_v4 = vpop.f32.mrb[223].mxu1 }
 0x496   :  { %v9718_v5 = vpack.c.bf16 %v5284_v61, %v5284_v61  ;;  %v5285_v60 = vmax.f32 %v3788_v62, 0.0  ;;  %v9996_v6 = vpack.c.bf16 %v5562_v1, %v5562_v1  ;;  %v5563_v7 = vmax.f32 %v4900_v2, 0.0  ;;  %v15880_v62 = vld [vmem:[%s16205_s2] ss:$0 sm:$0xff] }
 0x498   :  { %8051 = vst.msk [vmem:[%s16206_s3 + $0x3b8] sm:$0xf] %vm7812_vm2, %v9718_v5  ;;  %v9719_v8 = vpack.c.bf16 %v5285_v60, %v5285_v60  ;;  %8329 = vst.msk [vmem:[%s16206_s3 + $0x810] sm:$0xf] %vm7812_vm2, %v9996_v6  ;;  %v9997_v9 = vpack.c.bf16 %v5563_v7, %v5563_v7 }
 0x499   :  { %v3792_v10 = vpop.f32.mrb[224].mxu0  ;;  %v4904_v12 = vpop.f32.mrb[224].mxu1 }
 0x49a   :  { %8052 = vst.msk [vmem:[%s16206_s3 + $0x3bc] sm:$0xf] %vm7812_vm2, %v9719_v8  ;;  %v3793_v13 = vadd.f32 %v15398_v33, %v3792_v10  ;;  %v10795_v14 = vpop.f32.mrb[225].mxu0  ;;  %8330 = vst.msk [vmem:[%s16206_s3 + $0x814] sm:$0xf] %vm7812_vm2, %v9997_v9  ;;  %v4905_v15 = vadd.f32 %v15398_v33, %v4904_v12  ;;  %v11351_v3 = vpop.f32.mrb[225].mxu1 }
 0x49b   :  { %v3795_v17 = vpop.f32.mrb[226].mxu0  ;;  %v4907_v18 = vpop.f32.mrb[226].mxu1 }
 0x49c   :  { %v5286_v19 = vmax.f32 %v3793_v13, 0.0  ;;  %v3796_v20 = vadd.f32 %v15398_v33, %v3795_v17  ;;  %v10796_v0 = vpop.f32.mrb[227].mxu0  ;;  %v5564_v21 = vmax.f32 %v4905_v15, 0.0  ;;  %v4908_v22 = vadd.f32 %v15398_v33, %v4907_v18  ;;  %v11352_v11 = vpop.f32.mrb[227].mxu1 }
 0x49e   :  { %v9720_v23 = vpack.c.bf16 %v5286_v19, %v5286_v19  ;;  %v5287_v16 = vmax.f32 %v3796_v20, 0.0  ;;  %v9998_v24 = vpack.c.bf16 %v5564_v21, %v5564_v21  ;;  %v5565_v25 = vmax.f32 %v4908_v22, 0.0 }
 0x4a0   :  { %8053 = vst.msk [vmem:[%s16206_s3 + $0x3c0] sm:$0xf] %vm7812_vm2, %v9720_v23  ;;  %v9721_v26 = vpack.c.bf16 %v5287_v16, %v5287_v16  ;;  %8331 = vst.msk [vmem:[%s16206_s3 + $0x818] sm:$0xf] %vm7812_vm2, %v9998_v24  ;;  %v9999_v28 = vpack.c.bf16 %v5565_v25, %v5565_v25 }
 0x4a1   :  { %v3800_v29 = vpop.f32.mrb[228].mxu0  ;;  %v4912_v30 = vpop.f32.mrb[228].mxu1 }
 0x4a2   :  { %8054 = vst.msk [vmem:[%s16206_s3 + $0x3c4] sm:$0xf] %vm7812_vm2, %v9721_v26  ;;  %v3801_v31 = vadd.f32 %v15398_v33, %v3800_v29  ;;  %v10799_v32 = vpop.f32.mrb[229].mxu0  ;;  %8332 = vst.msk [vmem:[%s16206_s3 + $0x81c] sm:$0xf] %vm7812_vm2, %v9999_v28  ;;  %v4913_v34 = vadd.f32 %v15398_v33, %v4912_v30  ;;  %v11355_v35 = vpop.f32.mrb[229].mxu1 }
 0x4a3   :  { %v3803_v27 = vpop.f32.mrb[230].mxu0  ;;  %v4915_v36 = vpop.f32.mrb[230].mxu1 }
 0x4a4   :  { %v5288_v37 = vmax.f32 %v3801_v31, 0.0  ;;  %v3804_v38 = vadd.f32 %v15398_v33, %v3803_v27  ;;  %v10800_v39 = vpop.f32.mrb[231].mxu0  ;;  %v5566_v40 = vmax.f32 %v4913_v34, 0.0  ;;  %v4916_v41 = vadd.f32 %v15398_v33, %v4915_v36  ;;  %v11356_v42 = vpop.f32.mrb[231].mxu1 }
 0x4a6   :  { %v9722_v43 = vpack.c.bf16 %v5288_v37, %v5288_v37  ;;  %v5289_v44 = vmax.f32 %v3804_v38, 0.0  ;;  %v10000_v45 = vpack.c.bf16 %v5566_v40, %v5566_v40  ;;  %v5567_v46 = vmax.f32 %v4916_v41, 0.0 }
 0x4a8   :  { %8055 = vst.msk [vmem:[%s16206_s3 + $0x3c8] sm:$0xf] %vm7812_vm2, %v9722_v43  ;;  %v9723_v47 = vpack.c.bf16 %v5289_v44, %v5289_v44  ;;  %8333 = vst.msk [vmem:[%s16206_s3 + $0x820] sm:$0xf] %vm7812_vm2, %v10000_v45  ;;  %v10001_v48 = vpack.c.bf16 %v5567_v46, %v5567_v46 }
 0x4a9   :  { %v3808_v49 = vpop.f32.mrb[232].mxu0  ;;  %v4920_v50 = vpop.f32.mrb[232].mxu1 }
 0x4aa   :  { %8056 = vst.msk [vmem:[%s16206_s3 + $0x3cc] sm:$0xf] %vm7812_vm2, %v9723_v47  ;;  %v3809_v51 = vadd.f32 %v15398_v33, %v3808_v49  ;;  %v10803_v52 = vpop.f32.mrb[233].mxu0  ;;  %8334 = vst.msk [vmem:[%s16206_s3 + $0x824] sm:$0xf] %vm7812_vm2, %v10001_v48  ;;  %v4921_v53 = vadd.f32 %v15398_v33, %v4920_v50  ;;  %v11359_v54 = vpop.f32.mrb[233].mxu1 }
 0x4ab   :  { %v3811_v55 = vpop.f32.mrb[234].mxu0  ;;  %v4923_v56 = vpop.f32.mrb[234].mxu1 }
 0x4ac   :  { %v5290_v57 = vmax.f32 %v3809_v51, 0.0  ;;  %v3812_v58 = vadd.f32 %v15398_v33, %v3811_v55  ;;  %v10804_v59 = vpop.f32.mrb[235].mxu0  ;;  %v5568_v61 = vmax.f32 %v4921_v53, 0.0  ;;  %v4924_v63 = vadd.f32 %v15880_v62, %v4923_v56  ;;  %v11360_v1 = vpop.f32.mrb[235].mxu1 }
 0x4ae   :  { %v9724_v2 = vpack.c.bf16 %v5290_v57, %v5290_v57  ;;  %v5291_v4 = vmax.f32 %v3812_v58, 0.0  ;;  %v10002_v5 = vpack.c.bf16 %v5568_v61, %v5568_v61  ;;  %v5569_v60 = vmax.f32 %v4924_v63, 0.0 }
 0x4b0   :  { %8057 = vst.msk [vmem:[%s16206_s3 + $0x3d0] sm:$0xf] %vm7812_vm2, %v9724_v2  ;;  %v9725_v33 = vpack.c.bf16 %v5291_v4, %v5291_v4  ;;  %8335 = vst.msk [vmem:[%s16206_s3 + $0x828] sm:$0xf] %vm7812_vm2, %v10002_v5  ;;  %v10003_v6 = vpack.c.bf16 %v5569_v60, %v5569_v60 }
 0x4b1   :  { %v3816_v7 = vpop.f32.mrb[236].mxu0  ;;  %v4928_v8 = vpop.f32.mrb[236].mxu1 }
 0x4b2   :  { %8058 = vst.msk [vmem:[%s16206_s3 + $0x3d4] sm:$0xf] %vm7812_vm2, %v9725_v33  ;;  %v3817_v9 = vadd.f32 %v15880_v62, %v3816_v7  ;;  %v10807_v10 = vpop.f32.mrb[237].mxu0  ;;  %8336 = vst.msk [vmem:[%s16206_s3 + $0x82c] sm:$0xf] %vm7812_vm2, %v10003_v6  ;;  %v4929_v12 = vadd.f32 %v15880_v62, %v4928_v8  ;;  %v11363_v13 = vpop.f32.mrb[237].mxu1 }
 0x4b3   :  { %v3819_v14 = vpop.f32.mrb[238].mxu0  ;;  %v4931_v15 = vpop.f32.mrb[238].mxu1 }
 0x4b4   :  { %v5292_v3 = vmax.f32 %v3817_v9, 0.0  ;;  %v3820_v17 = vadd.f32 %v15880_v62, %v3819_v14  ;;  %v10808_v18 = vpop.f32.mrb[239].mxu0  ;;  %v5570_v19 = vmax.f32 %v4929_v12, 0.0  ;;  %v4932_v20 = vadd.f32 %v15880_v62, %v4931_v15  ;;  %v11364_v0 = vpop.f32.mrb[239].mxu1 }
 0x4b6   :  { %v9726_v21 = vpack.c.bf16 %v5292_v3, %v5292_v3  ;;  %v5293_v22 = vmax.f32 %v3820_v17, 0.0  ;;  %v10004_v11 = vpack.c.bf16 %v5570_v19, %v5570_v19  ;;  %v5571_v23 = vmax.f32 %v4932_v20, 0.0 }
 0x4b8   :  { %8059 = vst.msk [vmem:[%s16206_s3 + $0x3d8] sm:$0xf] %vm7812_vm2, %v9726_v21  ;;  %v9727_v16 = vpack.c.bf16 %v5293_v22, %v5293_v22  ;;  %8337 = vst.msk [vmem:[%s16206_s3 + $0x830] sm:$0xf] %vm7812_vm2, %v10004_v11  ;;  %v10005_v24 = vpack.c.bf16 %v5571_v23, %v5571_v23 }
 0x4b9   :  { %v3824_v25 = vpop.f32.mrb[240].mxu0  ;;  %v4936_v26 = vpop.f32.mrb[240].mxu1 }
 0x4ba   :  { %8060 = vst.msk [vmem:[%s16206_s3 + $0x3dc] sm:$0xf] %vm7812_vm2, %v9727_v16  ;;  %v3825_v28 = vadd.f32 %v15880_v62, %v3824_v25  ;;  %v10811_v29 = vpop.f32.mrb[241].mxu0  ;;  %8338 = vst.msk [vmem:[%s16206_s3 + $0x834] sm:$0xf] %vm7812_vm2, %v10005_v24  ;;  %v4937_v30 = vadd.f32 %v15880_v62, %v4936_v26  ;;  %v11367_v31 = vpop.f32.mrb[241].mxu1 }
 0x4bb   :  { %v3827_v32 = vpop.f32.mrb[242].mxu0  ;;  %v4939_v34 = vpop.f32.mrb[242].mxu1 }
 0x4bc   :  { %v5294_v35 = vmax.f32 %v3825_v28, 0.0  ;;  %v3828_v27 = vadd.f32 %v15880_v62, %v3827_v32  ;;  %v10812_v36 = vpop.f32.mrb[243].mxu0  ;;  %v5572_v37 = vmax.f32 %v4937_v30, 0.0  ;;  %v4940_v38 = vadd.f32 %v15880_v62, %v4939_v34  ;;  %v11368_v39 = vpop.f32.mrb[243].mxu1 }
 0x4be   :  { %v9728_v40 = vpack.c.bf16 %v5294_v35, %v5294_v35  ;;  %v5295_v41 = vmax.f32 %v3828_v27, 0.0  ;;  %v10006_v42 = vpack.c.bf16 %v5572_v37, %v5572_v37  ;;  %v5573_v43 = vmax.f32 %v4940_v38, 0.0 }
 0x4c0   :  { %8061 = vst.msk [vmem:[%s16206_s3 + $0x3e0] sm:$0xf] %vm7812_vm2, %v9728_v40  ;;  %v9729_v44 = vpack.c.bf16 %v5295_v41, %v5295_v41  ;;  %8339 = vst.msk [vmem:[%s16206_s3 + $0x838] sm:$0xf] %vm7812_vm2, %v10006_v42  ;;  %v10007_v45 = vpack.c.bf16 %v5573_v43, %v5573_v43 }
 0x4c1   :  { %v3832_v46 = vpop.f32.mrb[244].mxu0  ;;  %v4944_v47 = vpop.f32.mrb[244].mxu1 }
 0x4c2   :  { %8062 = vst.msk [vmem:[%s16206_s3 + $0x3e4] sm:$0xf] %vm7812_vm2, %v9729_v44  ;;  %v3833_v48 = vadd.f32 %v15880_v62, %v3832_v46  ;;  %v10815_v49 = vpop.f32.mrb[245].mxu0  ;;  %8340 = vst.msk [vmem:[%s16206_s3 + $0x83c] sm:$0xf] %vm7812_vm2, %v10007_v45  ;;  %v4945_v50 = vadd.f32 %v15880_v62, %v4944_v47  ;;  %v11371_v51 = vpop.f32.mrb[245].mxu1 }
 0x4c3   :  { %v3835_v52 = vpop.f32.mrb[246].mxu0  ;;  %v4947_v53 = vpop.f32.mrb[246].mxu1 }
 0x4c4   :  { %v5296_v54 = vmax.f32 %v3833_v48, 0.0  ;;  %v3836_v55 = vadd.f32 %v15880_v62, %v3835_v52  ;;  %v10816_v56 = vpop.f32.mrb[247].mxu0  ;;  %v5574_v57 = vmax.f32 %v4945_v50, 0.0  ;;  %v4948_v58 = vadd.f32 %v15880_v62, %v4947_v53  ;;  %v11372_v59 = vpop.f32.mrb[247].mxu1 }
 0x4c6   :  { %v9730_v61 = vpack.c.bf16 %v5296_v54, %v5296_v54  ;;  %v5297_v63 = vmax.f32 %v3836_v55, 0.0  ;;  %v10008_v1 = vpack.c.bf16 %v5574_v57, %v5574_v57  ;;  %v5575_v2 = vmax.f32 %v4948_v58, 0.0 }
 0x4c8   :  { %8063 = vst.msk [vmem:[%s16206_s3 + $0x3e8] sm:$0xf] %vm7812_vm2, %v9730_v61  ;;  %v9731_v4 = vpack.c.bf16 %v5297_v63, %v5297_v63  ;;  %8341 = vst.msk [vmem:[%s16206_s3 + $0x840] sm:$0xf] %vm7812_vm2, %v10008_v1  ;;  %v10009_v5 = vpack.c.bf16 %v5575_v2, %v5575_v2 }
 0x4c9   :  { %v3840_v60 = vpop.f32.mrb[248].mxu0  ;;  %v4952_v33 = vpop.f32.mrb[248].mxu1 }
 0x4ca   :  { %8064 = vst.msk [vmem:[%s16206_s3 + $0x3ec] sm:$0xf] %vm7812_vm2, %v9731_v4  ;;  %v3841_v6 = vadd.f32 %v15880_v62, %v3840_v60  ;;  %v10819_v7 = vpop.f32.mrb[249].mxu0  ;;  %8342 = vst.msk [vmem:[%s16206_s3 + $0x844] sm:$0xf] %vm7812_vm2, %v10009_v5  ;;  %v4953_v8 = vadd.f32 %v15880_v62, %v4952_v33  ;;  %v11375_v9 = vpop.f32.mrb[249].mxu1 }
 0x4cb   :  { %v3843_v10 = vpop.f32.mrb[250].mxu0  ;;  %v4955_v12 = vpop.f32.mrb[250].mxu1 }
 0x4cc   :  { %v5298_v13 = vmax.f32 %v3841_v6, 0.0  ;;  %v3844_v14 = vadd.f32 %v15880_v62, %v3843_v10  ;;  %v10820_v15 = vpop.f32.mrb[251].mxu0  ;;  %v5576_v3 = vmax.f32 %v4953_v8, 0.0  ;;  %v4956_v17 = vadd.f32 %v15880_v62, %v4955_v12  ;;  %v11376_v18 = vpop.f32.mrb[251].mxu1 }
 0x4ce   :  { %v9732_v19 = vpack.c.bf16 %v5298_v13, %v5298_v13  ;;  %v5299_v20 = vmax.f32 %v3844_v14, 0.0  ;;  %v10010_v0 = vpack.c.bf16 %v5576_v3, %v5576_v3  ;;  %v5577_v21 = vmax.f32 %v4956_v17, 0.0 }
 0x4d0   :  { %8065 = vst.msk [vmem:[%s16206_s3 + $0x3f0] sm:$0xf] %vm7812_vm2, %v9732_v19  ;;  %v9733_v22 = vpack.c.bf16 %v5299_v20, %v5299_v20  ;;  %8343 = vst.msk [vmem:[%s16206_s3 + $0x848] sm:$0xf] %vm7812_vm2, %v10010_v0  ;;  %v10011_v11 = vpack.c.bf16 %v5577_v21, %v5577_v21 }
 0x4d1   :  { %v3848_v23 = vpop.f32.mrb[252].mxu0  ;;  %v4960_v16 = vpop.f32.mrb[252].mxu1 }
 0x4d2   :  { %8066 = vst.msk [vmem:[%s16206_s3 + $0x3f4] sm:$0xf] %vm7812_vm2, %v9733_v22  ;;  %v3849_v24 = vadd.f32 %v15880_v62, %v3848_v23  ;;  %v10823_v25 = vpop.f32.mrb[253].mxu0  ;;  %8344 = vst.msk [vmem:[%s16206_s3 + $0x84c] sm:$0xf] %vm7812_vm2, %v10011_v11  ;;  %v4961_v26 = vadd.f32 %v15880_v62, %v4960_v16  ;;  %v11379_v28 = vpop.f32.mrb[253].mxu1 }
 0x4d3   :  { %v3851_v29 = vpop.f32.mrb[254].mxu0  ;;  %v4963_v30 = vpop.f32.mrb[254].mxu1 }
 0x4d4   :  { %v5300_v31 = vmax.f32 %v3849_v24, 0.0  ;;  %v3852_v32 = vadd.f32 %v15880_v62, %v3851_v29  ;;  %v10824_v34 = vpop.f32.mrb[255].mxu0  ;;  %v5578_v35 = vmax.f32 %v4961_v26, 0.0  ;;  %v4964_v27 = vadd.f32 %v15880_v62, %v4963_v30  ;;  %v11380_v36 = vpop.f32.mrb[255].mxu1 }
 0x4d6   :  { %v9734_v37 = vpack.c.bf16 %v5300_v31, %v5300_v31  ;;  %v5301_v38 = vmax.f32 %v3852_v32, 0.0  ;;  %v10012_v39 = vpack.c.bf16 %v5578_v35, %v5578_v35  ;;  %v5579_v40 = vmax.f32 %v4964_v27, 0.0 }
 0x4d8   :  { %8067 = vst.msk [vmem:[%s16206_s3 + $0x3f8] sm:$0xf] %vm7812_vm2, %v9734_v37  ;;  %v9735_v41 = vpack.c.bf16 %v5301_v38, %v5301_v38  ;;  %8345 = vst.msk [vmem:[%s16206_s3 + $0x850] sm:$0xf] %vm7812_vm2, %v10012_v39  ;;  %v10013_v42 = vpack.c.bf16 %v5579_v40, %v5579_v40 }
 0x4d9   :  { %v3856_v43 = vpop.f32.mrb[0].mxu0  ;;  %v4968_v44 = vpop.f32.mrb[0].mxu1 }
 0x4da   :  { %8068 = vst.msk [vmem:[%s16206_s3 + $0x3fc] sm:$0xf] %vm7812_vm2, %v9735_v41  ;;  %v3857_v45 = vadd.f32 %v15880_v62, %v3856_v43  ;;  %v10827_v46 = vpop.f32.mrb[1].mxu0  ;;  %8346 = vst.msk [vmem:[%s16206_s3 + $0x854] sm:$0xf] %vm7812_vm2, %v10013_v42  ;;  %v4969_v47 = vadd.f32 %v15880_v62, %v4968_v44  ;;  %v11383_v48 = vpop.f32.mrb[1].mxu1 }
 0x4db   :  { %v3859_v49 = vpop.f32.mrb[2].mxu0  ;;  %v4971_v50 = vpop.f32.mrb[2].mxu1 }
 0x4dc   :  { %v5302_v51 = vmax.f32 %v3857_v45, 0.0  ;;  %v3860_v52 = vadd.f32 %v15880_v62, %v3859_v49  ;;  %v10828_v53 = vpop.f32.mrb[3].mxu0  ;;  %v5580_v54 = vmax.f32 %v4969_v47, 0.0  ;;  %v4972_v55 = vadd.f32 %v15880_v62, %v4971_v50  ;;  %v11384_v56 = vpop.f32.mrb[3].mxu1 }
 0x4de   :  { %v9736_v57 = vpack.c.bf16 %v5302_v51, %v5302_v51  ;;  %v5303_v58 = vmax.f32 %v3860_v52, 0.0  ;;  %v10014_v59 = vpack.c.bf16 %v5580_v54, %v5580_v54  ;;  %v5581_v61 = vmax.f32 %v4972_v55, 0.0 }
 0x4e0   :  { %8069 = vst.msk [vmem:[%s16206_s3 + $0x400] sm:$0xf] %vm7812_vm2, %v9736_v57  ;;  %v9737_v63 = vpack.c.bf16 %v5303_v58, %v5303_v58  ;;  %8347 = vst.msk [vmem:[%s16206_s3 + $0x858] sm:$0xf] %vm7812_vm2, %v10014_v59  ;;  %v10015_v1 = vpack.c.bf16 %v5581_v61, %v5581_v61 }
 0x4e1   :  { %v3864_v2 = vpop.f32.mrb[4].mxu0  ;;  %v4976_v4 = vpop.f32.mrb[4].mxu1 }
 0x4e2   :  { %8070 = vst.msk [vmem:[%s16206_s3 + $0x404] sm:$0xf] %vm7812_vm2, %v9737_v63  ;;  %v3865_v5 = vadd.f32 %v15880_v62, %v3864_v2  ;;  %v10831_v60 = vpop.f32.mrb[5].mxu0  ;;  %8348 = vst.msk [vmem:[%s16206_s3 + $0x85c] sm:$0xf] %vm7812_vm2, %v10015_v1  ;;  %v4977_v33 = vadd.f32 %v15880_v62, %v4976_v4  ;;  %v11387_v6 = vpop.f32.mrb[5].mxu1 }
 0x4e3   :  { %v3867_v7 = vpop.f32.mrb[6].mxu0  ;;  %v4979_v8 = vpop.f32.mrb[6].mxu1 }
 0x4e4   :  { %v5304_v9 = vmax.f32 %v3865_v5, 0.0  ;;  %v3868_v10 = vadd.f32 %v15880_v62, %v3867_v7  ;;  %v10832_v12 = vpop.f32.mrb[7].mxu0  ;;  %v5582_v13 = vmax.f32 %v4977_v33, 0.0  ;;  %v4980_v14 = vadd.f32 %v15880_v62, %v4979_v8  ;;  %v11388_v15 = vpop.f32.mrb[7].mxu1 }
 0x4e6   :  { %v9738_v3 = vpack.c.bf16 %v5304_v9, %v5304_v9  ;;  %v5305_v17 = vmax.f32 %v3868_v10, 0.0  ;;  %v10016_v18 = vpack.c.bf16 %v5582_v13, %v5582_v13  ;;  %v5583_v19 = vmax.f32 %v4980_v14, 0.0 }
 0x4e8   :  { %8071 = vst.msk [vmem:[%s16206_s3 + $0x408] sm:$0xf] %vm7812_vm2, %v9738_v3  ;;  %v9739_v20 = vpack.c.bf16 %v5305_v17, %v5305_v17  ;;  %8349 = vst.msk [vmem:[%s16206_s3 + $0x860] sm:$0xf] %vm7812_vm2, %v10016_v18  ;;  %v10017_v0 = vpack.c.bf16 %v5583_v19, %v5583_v19 }
 0x4e9   :  { %v3872_v21 = vpop.f32.mrb[8].mxu0  ;;  %v4984_v22 = vpop.f32.mrb[8].mxu1 }
 0x4ea   :  { %8072 = vst.msk [vmem:[%s16206_s3 + $0x40c] sm:$0xf] %vm7812_vm2, %v9739_v20  ;;  %v3873_v11 = vadd.f32 %v15880_v62, %v3872_v21  ;;  %v10835_v23 = vpop.f32.mrb[9].mxu0  ;;  %8350 = vst.msk [vmem:[%s16206_s3 + $0x864] sm:$0xf] %vm7812_vm2, %v10017_v0  ;;  %v4985_v16 = vadd.f32 %v15880_v62, %v4984_v22  ;;  %v11391_v24 = vpop.f32.mrb[9].mxu1 }
 0x4eb   :  { %v3875_v25 = vpop.f32.mrb[10].mxu0  ;;  %v4987_v26 = vpop.f32.mrb[10].mxu1 }
 0x4ec   :  { %v5306_v28 = vmax.f32 %v3873_v11, 0.0  ;;  %v3876_v29 = vadd.f32 %v15880_v62, %v3875_v25  ;;  %v10836_v30 = vpop.f32.mrb[11].mxu0  ;;  %v5584_v31 = vmax.f32 %v4985_v16, 0.0  ;;  %v4988_v32 = vadd.f32 %v15880_v62, %v4987_v26  ;;  %v11392_v34 = vpop.f32.mrb[11].mxu1 }
 0x4ee   :  { %v9740_v35 = vpack.c.bf16 %v5306_v28, %v5306_v28  ;;  %v5307_v27 = vmax.f32 %v3876_v29, 0.0  ;;  %v10018_v36 = vpack.c.bf16 %v5584_v31, %v5584_v31  ;;  %v5585_v37 = vmax.f32 %v4988_v32, 0.0 }
 0x4f0   :  { %8073 = vst.msk [vmem:[%s16206_s3 + $0x410] sm:$0xf] %vm7812_vm2, %v9740_v35  ;;  %v9741_v38 = vpack.c.bf16 %v5307_v27, %v5307_v27  ;;  %8351 = vst.msk [vmem:[%s16206_s3 + $0x868] sm:$0xf] %vm7812_vm2, %v10018_v36  ;;  %v10019_v39 = vpack.c.bf16 %v5585_v37, %v5585_v37 }
 0x4f1   :  { %v3880_v40 = vpop.f32.mrb[12].mxu0  ;;  %v4992_v41 = vpop.f32.mrb[12].mxu1 }
 0x4f2   :  { %8074 = vst.msk [vmem:[%s16206_s3 + $0x414] sm:$0xf] %vm7812_vm2, %v9741_v38  ;;  %v3881_v42 = vadd.f32 %v15880_v62, %v3880_v40  ;;  %v10839_v43 = vpop.f32.mrb[13].mxu0  ;;  %8352 = vst.msk [vmem:[%s16206_s3 + $0x86c] sm:$0xf] %vm7812_vm2, %v10019_v39  ;;  %v4993_v44 = vadd.f32 %v15880_v62, %v4992_v41  ;;  %v11395_v45 = vpop.f32.mrb[13].mxu1 }
 0x4f3   :  { %v3883_v46 = vpop.f32.mrb[14].mxu0  ;;  %v4995_v47 = vpop.f32.mrb[14].mxu1 }
 0x4f4   :  { %v5308_v48 = vmax.f32 %v3881_v42, 0.0  ;;  %v3884_v49 = vadd.f32 %v15880_v62, %v3883_v46  ;;  %v10840_v50 = vpop.f32.mrb[15].mxu0  ;;  %v5586_v51 = vmax.f32 %v4993_v44, 0.0  ;;  %v4996_v52 = vadd.f32 %v15880_v62, %v4995_v47  ;;  %v11396_v53 = vpop.f32.mrb[15].mxu1 }
 0x4f6   :  { %v9742_v54 = vpack.c.bf16 %v5308_v48, %v5308_v48  ;;  %v5309_v55 = vmax.f32 %v3884_v49, 0.0  ;;  %v10020_v56 = vpack.c.bf16 %v5586_v51, %v5586_v51  ;;  %v5587_v57 = vmax.f32 %v4996_v52, 0.0 }
 0x4f8   :  { %8075 = vst.msk [vmem:[%s16206_s3 + $0x418] sm:$0xf] %vm7812_vm2, %v9742_v54  ;;  %v9743_v58 = vpack.c.bf16 %v5309_v55, %v5309_v55  ;;  %8353 = vst.msk [vmem:[%s16206_s3 + $0x870] sm:$0xf] %vm7812_vm2, %v10020_v56  ;;  %v10021_v59 = vpack.c.bf16 %v5587_v57, %v5587_v57 }
 0x4f9   :  { %v3888_v61 = vpop.f32.mrb[16].mxu0  ;;  %v5000_v63 = vpop.f32.mrb[16].mxu1 }
 0x4fa   :  { %8076 = vst.msk [vmem:[%s16206_s3 + $0x41c] sm:$0xf] %vm7812_vm2, %v9743_v58  ;;  %v3889_v1 = vadd.f32 %v15880_v62, %v3888_v61  ;;  %v10843_v2 = vpop.f32.mrb[17].mxu0  ;;  %8354 = vst.msk [vmem:[%s16206_s3 + $0x874] sm:$0xf] %vm7812_vm2, %v10021_v59  ;;  %v5001_v4 = vadd.f32 %v15880_v62, %v5000_v63  ;;  %v11399_v5 = vpop.f32.mrb[17].mxu1 }
 0x4fb   :  { %v3891_v60 = vpop.f32.mrb[18].mxu0  ;;  %v5003_v33 = vpop.f32.mrb[18].mxu1 }
 0x4fc   :  { %v5310_v6 = vmax.f32 %v3889_v1, 0.0  ;;  %v3892_v7 = vadd.f32 %v15880_v62, %v3891_v60  ;;  %v10844_v8 = vpop.f32.mrb[19].mxu0  ;;  %v5588_v9 = vmax.f32 %v5001_v4, 0.0  ;;  %v5004_v10 = vadd.f32 %v15880_v62, %v5003_v33  ;;  %v11400_v12 = vpop.f32.mrb[19].mxu1 }
 0x4fe   :  { %v9744_v13 = vpack.c.bf16 %v5310_v6, %v5310_v6  ;;  %v5311_v14 = vmax.f32 %v3892_v7, 0.0  ;;  %v10022_v15 = vpack.c.bf16 %v5588_v9, %v5588_v9  ;;  %v5589_v3 = vmax.f32 %v5004_v10, 0.0 }
 0x500   :  { %8077 = vst.msk [vmem:[%s16206_s3 + $0x420] sm:$0xf] %vm7812_vm2, %v9744_v13  ;;  %v9745_v17 = vpack.c.bf16 %v5311_v14, %v5311_v14  ;;  %8355 = vst.msk [vmem:[%s16206_s3 + $0x878] sm:$0xf] %vm7812_vm2, %v10022_v15  ;;  %v10023_v18 = vpack.c.bf16 %v5589_v3, %v5589_v3 }
 0x501   :  { %v3896_v19 = vpop.f32.mrb[20].mxu0  ;;  %v5008_v20 = vpop.f32.mrb[20].mxu1 }
 0x502   :  { %8078 = vst.msk [vmem:[%s16206_s3 + $0x424] sm:$0xf] %vm7812_vm2, %v9745_v17  ;;  %v3897_v0 = vadd.f32 %v15880_v62, %v3896_v19  ;;  %v10847_v21 = vpop.f32.mrb[21].mxu0  ;;  %8356 = vst.msk [vmem:[%s16206_s3 + $0x87c] sm:$0xf] %vm7812_vm2, %v10023_v18  ;;  %v5009_v22 = vadd.f32 %v15880_v62, %v5008_v20  ;;  %v11403_v11 = vpop.f32.mrb[21].mxu1 }
 0x503   :  { %v3899_v23 = vpop.f32.mrb[22].mxu0  ;;  %v5011_v16 = vpop.f32.mrb[22].mxu1 }
 0x504   :  { %v5312_v24 = vmax.f32 %v3897_v0, 0.0  ;;  %v3900_v25 = vadd.f32 %v15880_v62, %v3899_v23  ;;  %v10848_v26 = vpop.f32.mrb[23].mxu0  ;;  %v5590_v28 = vmax.f32 %v5009_v22, 0.0  ;;  %v5012_v29 = vadd.f32 %v15880_v62, %v5011_v16  ;;  %v11404_v30 = vpop.f32.mrb[23].mxu1 }
 0x506   :  { %v9746_v31 = vpack.c.bf16 %v5312_v24, %v5312_v24  ;;  %v5313_v32 = vmax.f32 %v3900_v25, 0.0  ;;  %v10024_v34 = vpack.c.bf16 %v5590_v28, %v5590_v28  ;;  %v5591_v35 = vmax.f32 %v5012_v29, 0.0 }
 0x508   :  { %8079 = vst.msk [vmem:[%s16206_s3 + $0x428] sm:$0xf] %vm7812_vm2, %v9746_v31  ;;  %v9747_v27 = vpack.c.bf16 %v5313_v32, %v5313_v32  ;;  %8357 = vst.msk [vmem:[%s16206_s3 + $0x880] sm:$0xf] %vm7812_vm2, %v10024_v34  ;;  %v10025_v36 = vpack.c.bf16 %v5591_v35, %v5591_v35 }
 0x509   :  { %v3904_v37 = vpop.f32.mrb[24].mxu0  ;;  %v5016_v38 = vpop.f32.mrb[24].mxu1 }
 0x50a   :  { %8080 = vst.msk [vmem:[%s16206_s3 + $0x42c] sm:$0xf] %vm7812_vm2, %v9747_v27  ;;  %v3905_v39 = vadd.f32 %v15880_v62, %v3904_v37  ;;  %v10851_v40 = vpop.f32.mrb[25].mxu0  ;;  %8358 = vst.msk [vmem:[%s16206_s3 + $0x884] sm:$0xf] %vm7812_vm2, %v10025_v36  ;;  %v5017_v41 = vadd.f32 %v15880_v62, %v5016_v38  ;;  %v11407_v42 = vpop.f32.mrb[25].mxu1 }
 0x50b   :  { %v3907_v43 = vpop.f32.mrb[26].mxu0  ;;  %v5019_v44 = vpop.f32.mrb[26].mxu1 }
 0x50c   :  { %v5314_v45 = vmax.f32 %v3905_v39, 0.0  ;;  %v3908_v46 = vadd.f32 %v15880_v62, %v3907_v43  ;;  %v10852_v47 = vpop.f32.mrb[27].mxu0  ;;  %v5592_v48 = vmax.f32 %v5017_v41, 0.0  ;;  %v5020_v49 = vadd.f32 %v15880_v62, %v5019_v44  ;;  %v11408_v50 = vpop.f32.mrb[27].mxu1 }
 0x50e   :  { %v9748_v51 = vpack.c.bf16 %v5314_v45, %v5314_v45  ;;  %v5315_v52 = vmax.f32 %v3908_v46, 0.0  ;;  %v10026_v53 = vpack.c.bf16 %v5592_v48, %v5592_v48  ;;  %v5593_v54 = vmax.f32 %v5020_v49, 0.0 }
 0x510   :  { %8081 = vst.msk [vmem:[%s16206_s3 + $0x430] sm:$0xf] %vm7812_vm2, %v9748_v51  ;;  %v9749_v55 = vpack.c.bf16 %v5315_v52, %v5315_v52  ;;  %8359 = vst.msk [vmem:[%s16206_s3 + $0x888] sm:$0xf] %vm7812_vm2, %v10026_v53  ;;  %v10027_v56 = vpack.c.bf16 %v5593_v54, %v5593_v54 }
 0x511   :  { %v3912_v57 = vpop.f32.mrb[28].mxu0  ;;  %v5024_v58 = vpop.f32.mrb[28].mxu1 }
 0x512   :  { %8082 = vst.msk [vmem:[%s16206_s3 + $0x434] sm:$0xf] %vm7812_vm2, %v9749_v55  ;;  %v3913_v59 = vadd.f32 %v15880_v62, %v3912_v57  ;;  %v10855_v61 = vpop.f32.mrb[29].mxu0  ;;  %8360 = vst.msk [vmem:[%s16206_s3 + $0x88c] sm:$0xf] %vm7812_vm2, %v10027_v56  ;;  %v5025_v63 = vadd.f32 %v15880_v62, %v5024_v58  ;;  %v11411_v1 = vpop.f32.mrb[29].mxu1 }
 0x513   :  { %v3915_v2 = vpop.f32.mrb[30].mxu0  ;;  %v5027_v4 = vpop.f32.mrb[30].mxu1 }
 0x514   :  { %v5316_v5 = vmax.f32 %v3913_v59, 0.0  ;;  %v3916_v60 = vadd.f32 %v15880_v62, %v3915_v2  ;;  %v10856_v33 = vpop.f32.mrb[31].mxu0  ;;  %v5594_v6 = vmax.f32 %v5025_v63, 0.0  ;;  %v5028_v7 = vadd.f32 %v15880_v62, %v5027_v4  ;;  %v11412_v8 = vpop.f32.mrb[31].mxu1 }
 0x516   :  { %v9750_v9 = vpack.c.bf16 %v5316_v5, %v5316_v5  ;;  %v5317_v10 = vmax.f32 %v3916_v60, 0.0  ;;  %v10028_v12 = vpack.c.bf16 %v5594_v6, %v5594_v6  ;;  %v5595_v13 = vmax.f32 %v5028_v7, 0.0 }
 0x518   :  { %8083 = vst.msk [vmem:[%s16206_s3 + $0x438] sm:$0xf] %vm7812_vm2, %v9750_v9  ;;  %v9751_v14 = vpack.c.bf16 %v5317_v10, %v5317_v10  ;;  %8361 = vst.msk [vmem:[%s16206_s3 + $0x890] sm:$0xf] %vm7812_vm2, %v10028_v12  ;;  %v10029_v15 = vpack.c.bf16 %v5595_v13, %v5595_v13 }
 0x519   :  { %v3920_v3 = vpop.f32.mrb[32].mxu0  ;;  %v5032_v17 = vpop.f32.mrb[32].mxu1 }
 0x51a   :  { %8084 = vst.msk [vmem:[%s16206_s3 + $0x43c] sm:$0xf] %vm7812_vm2, %v9751_v14  ;;  %v3921_v18 = vadd.f32 %v15880_v62, %v3920_v3  ;;  %v10859_v19 = vpop.f32.mrb[33].mxu0  ;;  %8362 = vst.msk [vmem:[%s16206_s3 + $0x894] sm:$0xf] %vm7812_vm2, %v10029_v15  ;;  %v5033_v20 = vadd.f32 %v15880_v62, %v5032_v17  ;;  %v11415_v0 = vpop.f32.mrb[33].mxu1 }
 0x51b   :  { %v3923_v21 = vpop.f32.mrb[34].mxu0  ;;  %v5035_v22 = vpop.f32.mrb[34].mxu1 }
 0x51c   :  { %v5318_v11 = vmax.f32 %v3921_v18, 0.0  ;;  %v3924_v23 = vadd.f32 %v15880_v62, %v3923_v21  ;;  %v10860_v16 = vpop.f32.mrb[35].mxu0  ;;  %v5596_v24 = vmax.f32 %v5033_v20, 0.0  ;;  %v5036_v25 = vadd.f32 %v15880_v62, %v5035_v22  ;;  %v11416_v26 = vpop.f32.mrb[35].mxu1 }
 0x51e   :  { %v9752_v28 = vpack.c.bf16 %v5318_v11, %v5318_v11  ;;  %v5319_v29 = vmax.f32 %v3924_v23, 0.0  ;;  %v10030_v30 = vpack.c.bf16 %v5596_v24, %v5596_v24  ;;  %v5597_v31 = vmax.f32 %v5036_v25, 0.0 }
 0x520   :  { %8085 = vst.msk [vmem:[%s16206_s3 + $0x440] sm:$0xf] %vm7812_vm2, %v9752_v28  ;;  %v9753_v32 = vpack.c.bf16 %v5319_v29, %v5319_v29  ;;  %8363 = vst.msk [vmem:[%s16206_s3 + $0x898] sm:$0xf] %vm7812_vm2, %v10030_v30  ;;  %v10031_v34 = vpack.c.bf16 %v5597_v31, %v5597_v31 }
 0x521   :  { %v3928_v35 = vpop.f32.mrb[36].mxu0  ;;  %v5040_v27 = vpop.f32.mrb[36].mxu1 }
 0x522   :  { %8086 = vst.msk [vmem:[%s16206_s3 + $0x444] sm:$0xf] %vm7812_vm2, %v9753_v32  ;;  %v3929_v36 = vadd.f32 %v15880_v62, %v3928_v35  ;;  %v10863_v37 = vpop.f32.mrb[37].mxu0  ;;  %8364 = vst.msk [vmem:[%s16206_s3 + $0x89c] sm:$0xf] %vm7812_vm2, %v10031_v34  ;;  %v5041_v38 = vadd.f32 %v15880_v62, %v5040_v27  ;;  %v11419_v39 = vpop.f32.mrb[37].mxu1 }
 0x523   :  { %v3931_v40 = vpop.f32.mrb[38].mxu0  ;;  %v5043_v41 = vpop.f32.mrb[38].mxu1 }
 0x524   :  { %v5320_v42 = vmax.f32 %v3929_v36, 0.0  ;;  %v3932_v43 = vadd.f32 %v15880_v62, %v3931_v40  ;;  %v10864_v44 = vpop.f32.mrb[39].mxu0  ;;  %v5598_v45 = vmax.f32 %v5041_v38, 0.0  ;;  %v11420_v46 = vpop.f32.mrb[39].mxu1 }
 0x526   :  { %v9754_v47 = vpack.c.bf16 %v5320_v42, %v5320_v42  ;;  %v5321_v48 = vmax.f32 %v3932_v43, 0.0  ;;  %v10032_v49 = vpack.c.bf16 %v5598_v45, %v5598_v45 }
 0x528   :  { %8087 = vst.msk [vmem:[%s16206_s3 + $0x448] sm:$0xf] %vm7812_vm2, %v9754_v47  ;;  %v9755_v50 = vpack.c.bf16 %v5321_v48, %v5321_v48 }
 0x529   :  { %8366 = vst.msk [vmem:[%s16206_s3 + $0x8a0] sm:$0x1] %vm8365_vm3, %v10032_v49  ;;  %v3936_v51 = vpop.f32.mrb[40].mxu0 }
 0x52a   :  { %8088 = vst.msk [vmem:[%s16206_s3 + $0x44c] sm:$0xf] %vm7812_vm2, %v9755_v50  ;;  %v3937_v52 = vadd.f32 %v15880_v62, %v3936_v51  ;;  %v10867_v53 = vpop.f32.mrb[41].mxu0 }
 0x52b   :  { %v3939_v54 = vpop.f32.mrb[42].mxu0 }
 0x52c   :  { %v5322_v55 = vmax.f32 %v3937_v52, 0.0  ;;  %v3940_v56 = vadd.f32 %v15880_v62, %v3939_v54  ;;  %v10868_v57 = vpop.f32.mrb[43].mxu0 }
 0x52e   :  { %v9756_v58 = vpack.c.bf16 %v5322_v55, %v5322_v55  ;;  %v5323_v59 = vmax.f32 %v3940_v56, 0.0 }
 0x530   :  { %8089 = vst.msk [vmem:[%s16206_s3 + $0x450] sm:$0xf] %vm7812_vm2, %v9756_v58  ;;  %v9757_v61 = vpack.c.bf16 %v5323_v59, %v5323_v59 }
 0x532   :  { %8090 = vst.msk [vmem:[%s16206_s3 + $0x454] sm:$0xf] %vm7812_vm2, %v9757_v61 }

// kernel: critic_forward.4
= control target key start
LH: loop header
LB: loop body
LE: loop exit
PB: predicated region body
PF: predicated region fallthrough
CT: control target
= control target key end

     0   :  { %v2706_v0 = vmov 0.0   ;;  %vm2707_vm0 = vmmov 0   ;;  %vm494_vm1 = vcmask 785408   ;;  %vm1804_vm2 = vcmask 125952   ;;  %s3739_s1 = inlined_call_operand.vmem [shape: bf16[96,16], index: 1, kind: input, shape index: {}]   ;;  %s3740_s0 = inlined_call_operand.vmem [shape: bf16[968,96], index: 0, kind: input, shape index: {}]   ;;  %s3741_s2 = inlined_call_operand.vmem [shape: f32[1,16], index: 2, kind: input, shape index: {}]   ;;  %s3742_s3 = inlined_call_operand.vmem [shape: bf16[968,16], index: 3, kind: output, shape index: {}]  }
   0x1   :  { %2368 = vmatprep.subr.bf16.mxu0 %v2706_v0  ;;  %v2638_v1 = vld [vmem:[%s3739_s1] sm:$0xff]   ;;  %2624 = vmatprep.subr.bf16.mxu1 %v2706_v0  ;;  %v2639_v2 = vld [vmem:[%s3739_s1 + $0x8] sm:$0xff]   ;;  %v2640_v3 = vld [vmem:[%s3739_s1 + $0x10] sm:$0xff]  }
   0x2   :  { %2380 = vmatprep.mubr.msk.bf16.mxu0 %vm2707_vm0, %v2706_v0  ;;  %2504 = vmatprep.mubr.msk.bf16.mxu1 %vm2707_vm0, %v2706_v0  ;;  %v2641_v4 = vld [vmem:[%s3739_s1 + $0x18] sm:$0xff]   ;;  %v2642_v5 = vld [vmem:[%s3739_s1 + $0x20] sm:$0xff]   ;;  %v2643_v6 = vld [vmem:[%s3739_s1 + $0x28] sm:$0xff]  }
   0x3   :  { %2369 = vmatpush3.bf16.msra.mxu0 %v2638_v1  ;;  %2630 = vmatpush3.bf16.msra.mxu1 %v2638_v1  ;;  %v2644_v7 = vld [vmem:[%s3740_s0] sm:$0xff]   ;;  %v2645_v8 = vld [vmem:[%s3740_s0 + $0xf8] sm:$0xff]   ;;  %v2646_v9 = vld [vmem:[%s3740_s0 + $0x8] sm:$0xff]  }
   0x4   :  { %2370 = vmatprep.subr.bf16.mxu0 %v2706_v0  ;;  %2625 = vmatprep.subr.bf16.mxu1 %v2706_v0  ;;  %v2647_v10 = vld [vmem:[%s3740_s0 + $0x100] sm:$0xff]   ;;  %v2648_v11 = vld [vmem:[%s3740_s0 + $0x10] sm:$0xff]   ;;  %v2649_v12 = vld [vmem:[%s3740_s0 + $0x108] sm:$0xff]  }
   0x5   :  { %v2650_v13 = vld [vmem:[%s3740_s0 + $0x18] sm:$0xff]   ;;  %v2651_v14 = vld [vmem:[%s3740_s0 + $0x110] sm:$0xff]   ;;  %v2652_v15 = vld [vmem:[%s3740_s0 + $0x20] sm:$0xff]  }
   0x6   :  { %v2653_v16 = vld [vmem:[%s3740_s0 + $0x118] sm:$0xff]   ;;  %v2654_v17 = vld [vmem:[%s3740_s0 + $0x28] sm:$0xff]   ;;  %v2655_v18 = vld [vmem:[%s3740_s0 + $0x120] sm:$0xff]  }
   0x7   :  { %2371 = vmatpush3.bf16.msra.mxu0 %v2639_v2  ;;  %2631 = vmatpush3.bf16.msra.mxu1 %v2639_v2  ;;  %v2656_v19 = vld [vmem:[%s3740_s0 + $0x30] sm:$0xff]   ;;  %v2657_v20 = vld [vmem:[%s3740_s0 + $0x128] sm:$0xff]   ;;  %v2658_v21 = vld [vmem:[%s3740_s0 + $0x38] sm:$0xff]  }
   0x8   :  { %2372 = vmatprep.subr.bf16.mxu0 %v2706_v0  ;;  %2626 = vmatprep.subr.bf16.mxu1 %v2706_v0  ;;  %v2659_v22 = vld [vmem:[%s3740_s0 + $0x130] sm:$0xff]   ;;  %v2660_v23 = vld [vmem:[%s3740_s0 + $0x40] sm:$0xff]   ;;  %v2661_v24 = vld [vmem:[%s3740_s0 + $0x138] sm:$0xff]  }
   0x9   :  { %v2662_v25 = vld [vmem:[%s3740_s0 + $0x48] sm:$0xff]   ;;  %v2663_v26 = vld [vmem:[%s3740_s0 + $0x140] sm:$0xff]   ;;  %v2664_v27 = vld [vmem:[%s3740_s0 + $0x50] sm:$0xff]  }
   0xa   :  { %v2665_v28 = vld [vmem:[%s3740_s0 + $0x148] sm:$0xff]   ;;  %v2666_v29 = vld [vmem:[%s3740_s0 + $0x58] sm:$0xff]   ;;  %v2667_v30 = vld [vmem:[%s3740_s0 + $0x150] sm:$0xff]  }
   0xb   :  { %2373 = vmatpush3.bf16.msra.mxu0 %v2640_v3  ;;  %2632 = vmatpush3.bf16.msra.mxu1 %v2640_v3  ;;  %v2668_v31 = vld [vmem:[%s3740_s0 + $0x60] sm:$0xff]   ;;  %v2669_v32 = vld [vmem:[%s3740_s0 + $0x158] sm:$0xff]   ;;  %v2670_v33 = vld [vmem:[%s3740_s0 + $0x68] sm:$0xff]  }
   0xc   :  { %2374 = vmatprep.subr.bf16.mxu0 %v2706_v0  ;;  %2627 = vmatprep.subr.bf16.mxu1 %v2706_v0  ;;  %v2671_v34 = vld [vmem:[%s3740_s0 + $0x160] sm:$0xff]   ;;  %v2672_v35 = vld [vmem:[%s3740_s0 + $0x70] sm:$0xff]   ;;  %v2673_v36 = vld [vmem:[%s3740_s0 + $0x168] sm:$0xff]  }
   0xd   :  { %v2674_v37 = vld [vmem:[%s3740_s0 + $0x78] sm:$0xff]   ;;  %v2675_v38 = vld [vmem:[%s3740_s0 + $0x170] sm:$0xff]   ;;  %v2676_v39 = vld [vmem:[%s3740_s0 + $0x80] sm:$0xff]  }
   0xe   :  { %v2677_v40 = vld [vmem:[%s3740_s0 + $0x178] sm:$0xff]   ;;  %v2678_v41 = vld [vmem:[%s3740_s0 + $0x88] sm:$0xff]   ;;  %v2679_v42 = vld [vmem:[%s3740_s0 + $0x180] sm:$0xff]  }
   0xf   :  { %2375 = vmatpush3.bf16.msra.mxu0 %v2641_v4  ;;  %2633 = vmatpush3.bf16.msra.mxu1 %v2641_v4  ;;  %v2680_v43 = vld [vmem:[%s3740_s0 + $0x90] sm:$0xff]   ;;  %v2681_v44 = vld [vmem:[%s3740_s0 + $0x188] sm:$0xff]   ;;  %v2682_v45 = vld [vmem:[%s3740_s0 + $0x98] sm:$0xff]  }
  0x10   :  { %2376 = vmatprep.subr.bf16.mxu0 %v2706_v0  ;;  %2628 = vmatprep.subr.bf16.mxu1 %v2706_v0  ;;  %v2683_v46 = vld [vmem:[%s3740_s0 + $0x190] sm:$0xff]   ;;  %v2684_v47 = vld [vmem:[%s3740_s0 + $0xa0] sm:$0xff]   ;;  %v2685_v48 = vld [vmem:[%s3740_s0 + $0x198] sm:$0xff]  }
  0x11   :  { %v2686_v49 = vld [vmem:[%s3740_s0 + $0xa8] sm:$0xff]   ;;  %v2687_v50 = vld [vmem:[%s3740_s0 + $0x1a0] sm:$0xff]   ;;  %v2688_v51 = vld [vmem:[%s3740_s0 + $0xb0] sm:$0xff]  }
  0x12   :  { %v2689_v52 = vld [vmem:[%s3740_s0 + $0x1a8] sm:$0xff]   ;;  %v2690_v53 = vld [vmem:[%s3740_s0 + $0xb8] sm:$0xff]   ;;  %v2691_v54 = vld [vmem:[%s3740_s0 + $0x1b0] sm:$0xff]  }
  0x13   :  { %2377 = vmatpush3.bf16.msra.mxu0 %v2642_v5  ;;  %2634 = vmatpush3.bf16.msra.mxu1 %v2642_v5  ;;  %v2692_v55 = vld [vmem:[%s3740_s0 + $0xc0] sm:$0xff]   ;;  %v2693_v56 = vld [vmem:[%s3740_s0 + $0x1b8] sm:$0xff]   ;;  %v2694_v57 = vld [vmem:[%s3740_s0 + $0xc8] sm:$0xff]  }
  0x14   :  { %2378 = vmatprep.subr.bf16.mxu0 %v2706_v0  ;;  %2629 = vmatprep.subr.bf16.mxu1 %v2706_v0  ;;  %v2695_v58 = vld [vmem:[%s3740_s0 + $0x1c0] sm:$0xff]   ;;  %v2696_v59 = vld [vmem:[%s3740_s0 + $0xd0] sm:$0xff]   ;;  %v2697_v60 = vld [vmem:[%s3740_s0 + $0x1c8] sm:$0xff]  }
  0x15   :  { %v3085_v61 = vld [vmem:[%s3741_s2] ss:$0 sm:$0xff]  ;;  %v2698_v3 = vld [vmem:[%s3740_s0 + $0xd8] sm:$0xff]  }
  0x17   :  { %2379 = vmatpush3.bf16.msra.mxu0 %v2643_v6  ;;  %2635 = vmatpush3.bf16.msra.mxu1 %v2643_v6  ;;  %v2699_v6 = vld [vmem:[%s3740_s0 + $0x1d0] sm:$0xff]  }
  0x1a   :  { %2381 = vmatmul.mubr.msk.bf16.vlgmr.msra.gmra.mrb[0].mxu0 %vm494_vm1, %v2644_v7  ;;  %2505 = vmatmul.mubr.msk.bf16.vlgmr.msra.gmra.mrb[0].mxu1 %vm494_vm1, %v2645_v8 }
  0x1b   :  { %2384 = vmatprep.mubr.msk.bf16.mxu0 %vm2707_vm0, %v2706_v0  ;;  %2508 = vmatprep.mubr.msk.bf16.mxu1 %vm2707_vm0, %v2706_v0 }
  0x22   :  { %2385 = vmatmul.mubr.msk.bf16.gmra.mrb[4].mxu0 %vm494_vm1, %v2646_v9  ;;  %2509 = vmatmul.mubr.msk.bf16.gmra.mrb[4].mxu1 %vm494_vm1, %v2647_v10 }
  0x23   :  { %2388 = vmatprep.mubr.msk.bf16.mxu0 %vm2707_vm0, %v2706_v0  ;;  %2512 = vmatprep.mubr.msk.bf16.mxu1 %vm2707_vm0, %v2706_v0 }
  0x2a   :  { %2389 = vmatmul.mubr.msk.bf16.gmra.mrb[8].mxu0 %vm494_vm1, %v2648_v11  ;;  %2513 = vmatmul.mubr.msk.bf16.gmra.mrb[8].mxu1 %vm494_vm1, %v2649_v12 }
  0x2b   :  { %2392 = vmatprep.mubr.msk.bf16.mxu0 %vm2707_vm0, %v2706_v0  ;;  %2516 = vmatprep.mubr.msk.bf16.mxu1 %vm2707_vm0, %v2706_v0 }
  0x32   :  { %2393 = vmatmul.mubr.msk.bf16.gmra.mrb[12].mxu0 %vm494_vm1, %v2650_v13  ;;  %2517 = vmatmul.mubr.msk.bf16.gmra.mrb[12].mxu1 %vm494_vm1, %v2651_v14 }
  0x33   :  { %2396 = vmatprep.mubr.msk.bf16.mxu0 %vm2707_vm0, %v2706_v0  ;;  %2520 = vmatprep.mubr.msk.bf16.mxu1 %vm2707_vm0, %v2706_v0 }
  0x3a   :  { %2397 = vmatmul.mubr.msk.bf16.gmra.mrb[16].mxu0 %vm494_vm1, %v2652_v15  ;;  %2521 = vmatmul.mubr.msk.bf16.gmra.mrb[16].mxu1 %vm494_vm1, %v2653_v16 }
  0x3b   :  { %2400 = vmatprep.mubr.msk.bf16.mxu0 %vm2707_vm0, %v2706_v0  ;;  %2524 = vmatprep.mubr.msk.bf16.mxu1 %vm2707_vm0, %v2706_v0 }
  0x42   :  { %2401 = vmatmul.mubr.msk.bf16.gmra.mrb[20].mxu0 %vm494_vm1, %v2654_v17  ;;  %2525 = vmatmul.mubr.msk.bf16.gmra.mrb[20].mxu1 %vm494_vm1, %v2655_v18 }
  0x43   :  { %2404 = vmatprep.mubr.msk.bf16.mxu0 %vm2707_vm0, %v2706_v0  ;;  %2528 = vmatprep.mubr.msk.bf16.mxu1 %vm2707_vm0, %v2706_v0 }
  0x4a   :  { %2405 = vmatmul.mubr.msk.bf16.gmra.mrb[24].mxu0 %vm494_vm1, %v2656_v19  ;;  %2529 = vmatmul.mubr.msk.bf16.gmra.mrb[24].mxu1 %vm494_vm1, %v2657_v20 }
  0x4b   :  { %2408 = vmatprep.mubr.msk.bf16.mxu0 %vm2707_vm0, %v2706_v0  ;;  %2532 = vmatprep.mubr.msk.bf16.mxu1 %vm2707_vm0, %v2706_v0 }
  0x52   :  { %2409 = vmatmul.mubr.msk.bf16.gmra.mrb[28].mxu0 %vm494_vm1, %v2658_v21  ;;  %2533 = vmatmul.mubr.msk.bf16.gmra.mrb[28].mxu1 %vm494_vm1, %v2659_v22 }
  0x53   :  { %2412 = vmatprep.mubr.msk.bf16.mxu0 %vm2707_vm0, %v2706_v0  ;;  %2536 = vmatprep.mubr.msk.bf16.mxu1 %vm2707_vm0, %v2706_v0 }
  0x5a   :  { %2413 = vmatmul.mubr.msk.bf16.gmra.mrb[32].mxu0 %vm494_vm1, %v2660_v23  ;;  %2537 = vmatmul.mubr.msk.bf16.gmra.mrb[32].mxu1 %vm494_vm1, %v2661_v24 }
  0x5b   :  { %2416 = vmatprep.mubr.msk.bf16.mxu0 %vm2707_vm0, %v2706_v0  ;;  %2540 = vmatprep.mubr.msk.bf16.mxu1 %vm2707_vm0, %v2706_v0 }
  0x62   :  { %2417 = vmatmul.mubr.msk.bf16.gmra.mrb[36].mxu0 %vm494_vm1, %v2662_v25  ;;  %2541 = vmatmul.mubr.msk.bf16.gmra.mrb[36].mxu1 %vm494_vm1, %v2663_v26  ;;  %v2700_v25 = vld [vmem:[%s3740_s0 + $0xe0] sm:$0xff]  }
  0x63   :  { %2420 = vmatprep.mubr.msk.bf16.mxu0 %vm2707_vm0, %v2706_v0  ;;  %2544 = vmatprep.mubr.msk.bf16.mxu1 %vm2707_vm0, %v2706_v0 }
  0x6a   :  { %2421 = vmatmul.mubr.msk.bf16.gmra.mrb[40].mxu0 %vm494_vm1, %v2664_v27  ;;  %2545 = vmatmul.mubr.msk.bf16.gmra.mrb[40].mxu1 %vm494_vm1, %v2665_v28  ;;  %v2701_v28 = vld [vmem:[%s3740_s0 + $0x1d8] sm:$0xff]  }
  0x6b   :  { %2424 = vmatprep.mubr.msk.bf16.mxu0 %vm2707_vm0, %v2706_v0  ;;  %2548 = vmatprep.mubr.msk.bf16.mxu1 %vm2707_vm0, %v2706_v0 }
  0x72   :  { %2425 = vmatmul.mubr.msk.bf16.gmra.mrb[44].mxu0 %vm494_vm1, %v2666_v29  ;;  %2549 = vmatmul.mubr.msk.bf16.gmra.mrb[44].mxu1 %vm494_vm1, %v2667_v30 }
  0x73   :  { %2428 = vmatprep.mubr.msk.bf16.mxu0 %vm2707_vm0, %v2706_v0  ;;  %2552 = vmatprep.mubr.msk.bf16.mxu1 %vm2707_vm0, %v2706_v0 }
  0x7a   :  { %2429 = vmatmul.mubr.msk.bf16.gmra.mrb[48].mxu0 %vm494_vm1, %v2668_v31  ;;  %2553 = vmatmul.mubr.msk.bf16.gmra.mrb[48].mxu1 %vm494_vm1, %v2669_v32 }
  0x7b   :  { %2432 = vmatprep.mubr.msk.bf16.mxu0 %vm2707_vm0, %v2706_v0  ;;  %2556 = vmatprep.mubr.msk.bf16.mxu1 %vm2707_vm0, %v2706_v0 }
  0x82   :  { %2433 = vmatmul.mubr.msk.bf16.gmra.mrb[52].mxu0 %vm494_vm1, %v2670_v33  ;;  %2557 = vmatmul.mubr.msk.bf16.gmra.mrb[52].mxu1 %vm494_vm1, %v2671_v34 }
  0x83   :  { %2436 = vmatprep.mubr.msk.bf16.mxu0 %vm2707_vm0, %v2706_v0  ;;  %2560 = vmatprep.mubr.msk.bf16.mxu1 %vm2707_vm0, %v2706_v0 }
  0x8a   :  { %2437 = vmatmul.mubr.msk.bf16.gmra.mrb[56].mxu0 %vm494_vm1, %v2672_v35  ;;  %2561 = vmatmul.mubr.msk.bf16.gmra.mrb[56].mxu1 %vm494_vm1, %v2673_v36 }
  0x8b   :  { %2440 = vmatprep.mubr.msk.bf16.mxu0 %vm2707_vm0, %v2706_v0  ;;  %2564 = vmatprep.mubr.msk.bf16.mxu1 %vm2707_vm0, %v2706_v0 }
  0x92   :  { %2441 = vmatmul.mubr.msk.bf16.gmra.mrb[60].mxu0 %vm494_vm1, %v2674_v37  ;;  %2565 = vmatmul.mubr.msk.bf16.gmra.mrb[60].mxu1 %vm494_vm1, %v2675_v38 }
  0x93   :  { %2444 = vmatprep.mubr.msk.bf16.mxu0 %vm2707_vm0, %v2706_v0  ;;  %2568 = vmatprep.mubr.msk.bf16.mxu1 %vm2707_vm0, %v2706_v0 }
  0x9a   :  { %2445 = vmatmul.mubr.msk.bf16.gmra.mrb[64].mxu0 %vm494_vm1, %v2676_v39  ;;  %2569 = vmatmul.mubr.msk.bf16.gmra.mrb[64].mxu1 %vm494_vm1, %v2677_v40 }
  0x9b   :  { %2448 = vmatprep.mubr.msk.bf16.mxu0 %vm2707_vm0, %v2706_v0  ;;  %2572 = vmatprep.mubr.msk.bf16.mxu1 %vm2707_vm0, %v2706_v0 }
  0xa2   :  { %2449 = vmatmul.mubr.msk.bf16.gmra.mrb[68].mxu0 %vm494_vm1, %v2678_v41  ;;  %2573 = vmatmul.mubr.msk.bf16.gmra.mrb[68].mxu1 %vm494_vm1, %v2679_v42 }
  0xa3   :  { %2452 = vmatprep.mubr.msk.bf16.mxu0 %vm2707_vm0, %v2706_v0  ;;  %2576 = vmatprep.mubr.msk.bf16.mxu1 %vm2707_vm0, %v2706_v0 }
  0xaa   :  { %2453 = vmatmul.mubr.msk.bf16.gmra.mrb[72].mxu0 %vm494_vm1, %v2680_v43  ;;  %2577 = vmatmul.mubr.msk.bf16.gmra.mrb[72].mxu1 %vm494_vm1, %v2681_v44 }
  0xab   :  { %2456 = vmatprep.mubr.msk.bf16.mxu0 %vm2707_vm0, %v2706_v0  ;;  %2580 = vmatprep.mubr.msk.bf16.mxu1 %vm2707_vm0, %v2706_v0 }
  0xb2   :  { %2457 = vmatmul.mubr.msk.bf16.gmra.mrb[76].mxu0 %vm494_vm1, %v2682_v45  ;;  %2581 = vmatmul.mubr.msk.bf16.gmra.mrb[76].mxu1 %vm494_vm1, %v2683_v46 }
  0xb3   :  { %2460 = vmatprep.mubr.msk.bf16.mxu0 %vm2707_vm0, %v2706_v0  ;;  %2584 = vmatprep.mubr.msk.bf16.mxu1 %vm2707_vm0, %v2706_v0 }
  0xba   :  { %2461 = vmatmul.mubr.msk.bf16.gmra.mrb[80].mxu0 %vm494_vm1, %v2684_v47  ;;  %2585 = vmatmul.mubr.msk.bf16.gmra.mrb[80].mxu1 %vm494_vm1, %v2685_v48  ;;  %v2702_v47 = vld [vmem:[%s3740_s0 + $0xe8] sm:$0xff]  }
  0xbb   :  { %2464 = vmatprep.mubr.msk.bf16.mxu0 %vm2707_vm0, %v2706_v0  ;;  %2588 = vmatprep.mubr.msk.bf16.mxu1 %vm2707_vm0, %v2706_v0 }
  0xc2   :  { %2465 = vmatmul.mubr.msk.bf16.gmra.mrb[84].mxu0 %vm494_vm1, %v2686_v49  ;;  %2589 = vmatmul.mubr.msk.bf16.gmra.mrb[84].mxu1 %vm494_vm1, %v2687_v50  ;;  %v2703_v50 = vld [vmem:[%s3740_s0 + $0x1e0] ss:$0 sps:$4 sm:$0xff]  }
  0xc3   :  { %2468 = vmatprep.mubr.msk.bf16.mxu0 %vm2707_vm0, %v2706_v0  ;;  %2592 = vmatprep.mubr.msk.bf16.mxu1 %vm2707_vm0, %v2706_v0 }
  0xca   :  { %2469 = vmatmul.mubr.msk.bf16.gmra.mrb[88].mxu0 %vm494_vm1, %v2688_v51  ;;  %2593 = vmatmul.mubr.msk.bf16.gmra.mrb[88].mxu1 %vm494_vm1, %v2689_v52 }
  0xcb   :  { %2472 = vmatprep.mubr.msk.bf16.mxu0 %vm2707_vm0, %v2706_v0  ;;  %2596 = vmatprep.mubr.msk.bf16.mxu1 %vm2707_vm0, %v2706_v0 }
  0xd2   :  { %2473 = vmatmul.mubr.msk.bf16.gmra.mrb[92].mxu0 %vm494_vm1, %v2690_v53  ;;  %2597 = vmatmul.mubr.msk.bf16.gmra.mrb[92].mxu1 %vm494_vm1, %v2691_v54 }
  0xd3   :  { %2476 = vmatprep.mubr.msk.bf16.mxu0 %vm2707_vm0, %v2706_v0  ;;  %2600 = vmatprep.mubr.msk.bf16.mxu1 %vm2707_vm0, %v2706_v0 }
  0xda   :  { %2477 = vmatmul.mubr.msk.bf16.gmra.mrb[96].mxu0 %vm494_vm1, %v2692_v55  ;;  %2601 = vmatmul.mubr.msk.bf16.gmra.mrb[96].mxu1 %vm494_vm1, %v2693_v56 }
  0xdb   :  { %2480 = vmatprep.mubr.msk.bf16.mxu0 %vm2707_vm0, %v2706_v0  ;;  %2604 = vmatprep.mubr.msk.bf16.mxu1 %vm2707_vm0, %v2706_v0 }
  0xe2   :  { %2481 = vmatmul.mubr.msk.bf16.gmra.mrb[100].mxu0 %vm494_vm1, %v2694_v57  ;;  %2605 = vmatmul.mubr.msk.bf16.gmra.mrb[100].mxu1 %vm494_vm1, %v2695_v58 }
  0xe3   :  { %2484 = vmatprep.mubr.msk.bf16.mxu0 %vm2707_vm0, %v2706_v0  ;;  %2608 = vmatprep.mubr.msk.bf16.mxu1 %vm2707_vm0, %v2706_v0 }
  0xea   :  { %2485 = vmatmul.mubr.msk.bf16.gmra.mrb[104].mxu0 %vm494_vm1, %v2696_v59  ;;  %2609 = vmatmul.mubr.msk.bf16.gmra.mrb[104].mxu1 %vm494_vm1, %v2697_v60 }
  0xeb   :  { %2488 = vmatprep.mubr.msk.bf16.mxu0 %vm2707_vm0, %v2706_v0  ;;  %2612 = vmatprep.mubr.msk.bf16.mxu1 %vm2707_vm0, %v2706_v0 }
  0xed   :  { %v712_v62 = vpop.f32.mrb[0].mxu0  ;;  %v960_v63 = vpop.f32.mrb[0].mxu1 }
  0xee   :  { %v713_v1 = vadd.f32 %v3085_v61, %v712_v62  ;;  %v2382_v2 = vpop.f32.mrb[1].mxu0  ;;  %v961_v4 = vadd.f32 %v3085_v61, %v960_v63  ;;  %v2506_v5 = vpop.f32.mrb[1].mxu1 }
  0xef   :  { %v715_v7 = vpop.f32.mrb[2].mxu0  ;;  %v963_v8 = vpop.f32.mrb[2].mxu1 }
  0xf0   :  { %v1198_v9 = vmax.f32 %v713_v1, 0.0  ;;  %v716_v10 = vadd.f32 %v3085_v61, %v715_v7  ;;  %v2383_v11 = vpop.f32.mrb[3].mxu0  ;;  %v1260_v12 = vmax.f32 %v961_v4, 0.0  ;;  %v964_v13 = vadd.f32 %v3085_v61, %v963_v8  ;;  %v2507_v14 = vpop.f32.mrb[3].mxu1 }
  0xf2   :  { %v2180_v15 = vpack.c.bf16 %v1198_v9, %v1198_v9  ;;  %v1199_v16 = vmax.f32 %v716_v10, 0.0  ;;  %2489 = vmatmul.mubr.msk.bf16.gmra.mrb[108].mxu0 %vm494_vm1, %v2698_v3  ;;  %v2242_v17 = vpack.c.bf16 %v1260_v12, %v1260_v12  ;;  %v1261_v18 = vmax.f32 %v964_v13, 0.0  ;;  %2613 = vmatmul.mubr.msk.bf16.gmra.mrb[108].mxu1 %vm494_vm1, %v2699_v6  ;;  %v2704_v6 = vld [vmem:[%s3740_s0 + $0xf0] sm:$0xff]  }
  0xf3   :  { %2492 = vmatprep.mubr.msk.bf16.mxu0 %vm2707_vm0, %v2706_v0  ;;  %2616 = vmatprep.mubr.msk.bf16.mxu1 %vm2707_vm0, %v2706_v0 }
  0xf4   :  { %1805 = vst.msk [vmem:[%s3742_s3] sm:$0xf] %vm1804_vm2, %v2180_v15  ;;  %v2181_v19 = vpack.c.bf16 %v1199_v16, %v1199_v16  ;;  %1867 = vst.msk [vmem:[%s3742_s3 + $0xf8] sm:$0xf] %vm1804_vm2, %v2242_v17  ;;  %v2243_v20 = vpack.c.bf16 %v1261_v18, %v1261_v18 }
  0xf5   :  { %v720_v21 = vpop.f32.mrb[4].mxu0  ;;  %v968_v22 = vpop.f32.mrb[4].mxu1 }
  0xf6   :  { %1806 = vst.msk [vmem:[%s3742_s3 + $0x4] sm:$0xf] %vm1804_vm2, %v2181_v19  ;;  %v721_v23 = vadd.f32 %v3085_v61, %v720_v21  ;;  %v2386_v24 = vpop.f32.mrb[5].mxu0  ;;  %1868 = vst.msk [vmem:[%s3742_s3 + $0xfc] sm:$0xf] %vm1804_vm2, %v2243_v20  ;;  %v969_v26 = vadd.f32 %v3085_v61, %v968_v22  ;;  %v2510_v27 = vpop.f32.mrb[5].mxu1 }
  0xf7   :  { %v723_v29 = vpop.f32.mrb[6].mxu0  ;;  %v971_v30 = vpop.f32.mrb[6].mxu1 }
  0xf8   :  { %v1200_v31 = vmax.f32 %v721_v23, 0.0  ;;  %v724_v32 = vadd.f32 %v3085_v61, %v723_v29  ;;  %v2387_v33 = vpop.f32.mrb[7].mxu0  ;;  %v1262_v34 = vmax.f32 %v969_v26, 0.0  ;;  %v972_v35 = vadd.f32 %v3085_v61, %v971_v30  ;;  %v2511_v36 = vpop.f32.mrb[7].mxu1 }
  0xfa   :  { %v2182_v37 = vpack.c.bf16 %v1200_v31, %v1200_v31  ;;  %v1201_v38 = vmax.f32 %v724_v32, 0.0  ;;  %2493 = vmatmul.mubr.msk.bf16.gmra.mrb[112].mxu0 %vm494_vm1, %v2700_v25  ;;  %v2244_v39 = vpack.c.bf16 %v1262_v34, %v1262_v34  ;;  %v1263_v40 = vmax.f32 %v972_v35, 0.0  ;;  %2617 = vmatmul.mubr.msk.bf16.gmra.mrb[112].mxu1 %vm494_vm1, %v2701_v28 }
  0xfb   :  { %2496 = vmatprep.mubr.msk.bf16.mxu0 %vm2707_vm0, %v2706_v0  ;;  %2620 = vmatprep.mubr.msk.bf16.mxu1 %vm2707_vm0, %v2706_v0 }
  0xfc   :  { %1807 = vst.msk [vmem:[%s3742_s3 + $0x8] sm:$0xf] %vm1804_vm2, %v2182_v37  ;;  %v2183_v41 = vpack.c.bf16 %v1201_v38, %v1201_v38  ;;  %1869 = vst.msk [vmem:[%s3742_s3 + $0x100] sm:$0xf] %vm1804_vm2, %v2244_v39  ;;  %v2245_v42 = vpack.c.bf16 %v1263_v40, %v1263_v40 }
  0xfd   :  { %v728_v43 = vpop.f32.mrb[8].mxu0  ;;  %v976_v44 = vpop.f32.mrb[8].mxu1 }
  0xfe   :  { %1808 = vst.msk [vmem:[%s3742_s3 + $0xc] sm:$0xf] %vm1804_vm2, %v2183_v41  ;;  %v729_v45 = vadd.f32 %v3085_v61, %v728_v43  ;;  %v2390_v46 = vpop.f32.mrb[9].mxu0  ;;  %1870 = vst.msk [vmem:[%s3742_s3 + $0x104] sm:$0xf] %vm1804_vm2, %v2245_v42  ;;  %v977_v48 = vadd.f32 %v3085_v61, %v976_v44  ;;  %v2514_v49 = vpop.f32.mrb[9].mxu1 }
  0xff   :  { %v731_v51 = vpop.f32.mrb[10].mxu0  ;;  %v979_v52 = vpop.f32.mrb[10].mxu1 }
 0x100   :  { %v1202_v53 = vmax.f32 %v729_v45, 0.0  ;;  %v732_v54 = vadd.f32 %v3085_v61, %v731_v51  ;;  %v2391_v55 = vpop.f32.mrb[11].mxu0  ;;  %v1264_v56 = vmax.f32 %v977_v48, 0.0  ;;  %v980_v57 = vadd.f32 %v3085_v61, %v979_v52  ;;  %v2515_v58 = vpop.f32.mrb[11].mxu1 }
 0x102   :  { %v2184_v59 = vpack.c.bf16 %v1202_v53, %v1202_v53  ;;  %v1203_v60 = vmax.f32 %v732_v54, 0.0  ;;  %2497 = vmatmul.mubr.msk.bf16.gmra.mrb[116].mxu0 %vm494_vm1, %v2702_v47  ;;  %v2246_v62 = vpack.c.bf16 %v1264_v56, %v1264_v56  ;;  %v1265_v63 = vmax.f32 %v980_v57, 0.0  ;;  %2621 = vmatmul.mubr.msk.bf16.gmra.mrb[116].mxu1 %vm494_vm1, %v2703_v50 }
 0x103   :  { %2500 = vmatprep.mubr.msk.bf16.mxu0 %vm2707_vm0, %v2706_v0 }
 0x104   :  { %1809 = vst.msk [vmem:[%s3742_s3 + $0x10] sm:$0xf] %vm1804_vm2, %v2184_v59  ;;  %v2185_v1 = vpack.c.bf16 %v1203_v60, %v1203_v60  ;;  %1871 = vst.msk [vmem:[%s3742_s3 + $0x108] sm:$0xf] %vm1804_vm2, %v2246_v62  ;;  %v2247_v2 = vpack.c.bf16 %v1265_v63, %v1265_v63 }
 0x105   :  { %v736_v3 = vpop.f32.mrb[12].mxu0  ;;  %v984_v4 = vpop.f32.mrb[12].mxu1 }
 0x106   :  { %1810 = vst.msk [vmem:[%s3742_s3 + $0x14] sm:$0xf] %vm1804_vm2, %v2185_v1  ;;  %v737_v0 = vadd.f32 %v3085_v61, %v736_v3  ;;  %v2394_v5 = vpop.f32.mrb[13].mxu0  ;;  %1872 = vst.msk [vmem:[%s3742_s3 + $0x10c] sm:$0xf] %vm1804_vm2, %v2247_v2  ;;  %v985_v7 = vadd.f32 %v3085_v61, %v984_v4  ;;  %v2518_v8 = vpop.f32.mrb[13].mxu1 }
 0x107   :  { %v739_v9 = vpop.f32.mrb[14].mxu0  ;;  %v987_v10 = vpop.f32.mrb[14].mxu1 }
 0x108   :  { %v1204_v11 = vmax.f32 %v737_v0, 0.0  ;;  %v740_v12 = vadd.f32 %v3085_v61, %v739_v9  ;;  %v2395_v13 = vpop.f32.mrb[15].mxu0  ;;  %v1266_v14 = vmax.f32 %v985_v7, 0.0  ;;  %v988_v15 = vadd.f32 %v3085_v61, %v987_v10  ;;  %v2519_v16 = vpop.f32.mrb[15].mxu1 }
 0x10a   :  { %v2186_v17 = vpack.c.bf16 %v1204_v11, %v1204_v11  ;;  %v1205_v18 = vmax.f32 %v740_v12, 0.0  ;;  %2501 = vmatmul.mubr.msk.bf16.gmra.mrb[120].mxu0 %vm494_vm1, %v2704_v6  ;;  %v2248_v19 = vpack.c.bf16 %v1266_v14, %v1266_v14  ;;  %v1267_v20 = vmax.f32 %v988_v15, 0.0 }
 0x10c   :  { %1811 = vst.msk [vmem:[%s3742_s3 + $0x18] sm:$0xf] %vm1804_vm2, %v2186_v17  ;;  %v2187_v21 = vpack.c.bf16 %v1205_v18, %v1205_v18  ;;  %1873 = vst.msk [vmem:[%s3742_s3 + $0x110] sm:$0xf] %vm1804_vm2, %v2248_v19  ;;  %v2249_v22 = vpack.c.bf16 %v1267_v20, %v1267_v20 }
 0x10d   :  { %v744_v23 = vpop.f32.mrb[16].mxu0  ;;  %v992_v24 = vpop.f32.mrb[16].mxu1 }
 0x10e   :  { %1812 = vst.msk [vmem:[%s3742_s3 + $0x1c] sm:$0xf] %vm1804_vm2, %v2187_v21  ;;  %v745_v25 = vadd.f32 %v3085_v61, %v744_v23  ;;  %v2398_v26 = vpop.f32.mrb[17].mxu0  ;;  %1874 = vst.msk [vmem:[%s3742_s3 + $0x114] sm:$0xf] %vm1804_vm2, %v2249_v22  ;;  %v993_v27 = vadd.f32 %v3085_v61, %v992_v24  ;;  %v2522_v28 = vpop.f32.mrb[17].mxu1 }
 0x10f   :  { %v747_v29 = vpop.f32.mrb[18].mxu0  ;;  %v995_v30 = vpop.f32.mrb[18].mxu1 }
 0x110   :  { %v1206_v31 = vmax.f32 %v745_v25, 0.0  ;;  %v748_v32 = vadd.f32 %v3085_v61, %v747_v29  ;;  %v2399_v33 = vpop.f32.mrb[19].mxu0  ;;  %v1268_v34 = vmax.f32 %v993_v27, 0.0  ;;  %v996_v35 = vadd.f32 %v3085_v61, %v995_v30  ;;  %v2523_v36 = vpop.f32.mrb[19].mxu1 }
 0x112   :  { %v2188_v37 = vpack.c.bf16 %v1206_v31, %v1206_v31  ;;  %v1207_v38 = vmax.f32 %v748_v32, 0.0  ;;  %v2250_v39 = vpack.c.bf16 %v1268_v34, %v1268_v34  ;;  %v1269_v40 = vmax.f32 %v996_v35, 0.0 }
 0x114   :  { %1813 = vst.msk [vmem:[%s3742_s3 + $0x20] sm:$0xf] %vm1804_vm2, %v2188_v37  ;;  %v2189_v41 = vpack.c.bf16 %v1207_v38, %v1207_v38  ;;  %1875 = vst.msk [vmem:[%s3742_s3 + $0x118] sm:$0xf] %vm1804_vm2, %v2250_v39  ;;  %v2251_v42 = vpack.c.bf16 %v1269_v40, %v1269_v40 }
 0x115   :  { %v752_v43 = vpop.f32.mrb[20].mxu0  ;;  %v1000_v44 = vpop.f32.mrb[20].mxu1 }
 0x116   :  { %1814 = vst.msk [vmem:[%s3742_s3 + $0x24] sm:$0xf] %vm1804_vm2, %v2189_v41  ;;  %v753_v45 = vadd.f32 %v3085_v61, %v752_v43  ;;  %v2402_v46 = vpop.f32.mrb[21].mxu0  ;;  %1876 = vst.msk [vmem:[%s3742_s3 + $0x11c] sm:$0xf] %vm1804_vm2, %v2251_v42  ;;  %v1001_v47 = vadd.f32 %v3085_v61, %v1000_v44  ;;  %v2526_v48 = vpop.f32.mrb[21].mxu1 }
 0x117   :  { %v755_v49 = vpop.f32.mrb[22].mxu0  ;;  %v1003_v50 = vpop.f32.mrb[22].mxu1 }
 0x118   :  { %v1208_v51 = vmax.f32 %v753_v45, 0.0  ;;  %v756_v52 = vadd.f32 %v3085_v61, %v755_v49  ;;  %v2403_v53 = vpop.f32.mrb[23].mxu0  ;;  %v1270_v54 = vmax.f32 %v1001_v47, 0.0  ;;  %v1004_v55 = vadd.f32 %v3085_v61, %v1003_v50  ;;  %v2527_v56 = vpop.f32.mrb[23].mxu1 }
 0x11a   :  { %v2190_v57 = vpack.c.bf16 %v1208_v51, %v1208_v51  ;;  %v1209_v58 = vmax.f32 %v756_v52, 0.0  ;;  %v2252_v59 = vpack.c.bf16 %v1270_v54, %v1270_v54  ;;  %v1271_v60 = vmax.f32 %v1004_v55, 0.0 }
 0x11c   :  { %1815 = vst.msk [vmem:[%s3742_s3 + $0x28] sm:$0xf] %vm1804_vm2, %v2190_v57  ;;  %v2191_v62 = vpack.c.bf16 %v1209_v58, %v1209_v58  ;;  %1877 = vst.msk [vmem:[%s3742_s3 + $0x120] sm:$0xf] %vm1804_vm2, %v2252_v59  ;;  %v2253_v63 = vpack.c.bf16 %v1271_v60, %v1271_v60 }
 0x11d   :  { %v760_v1 = vpop.f32.mrb[24].mxu0  ;;  %v1008_v2 = vpop.f32.mrb[24].mxu1 }
 0x11e   :  { %1816 = vst.msk [vmem:[%s3742_s3 + $0x2c] sm:$0xf] %vm1804_vm2, %v2191_v62  ;;  %v761_v3 = vadd.f32 %v3085_v61, %v760_v1  ;;  %v2406_v4 = vpop.f32.mrb[25].mxu0  ;;  %1878 = vst.msk [vmem:[%s3742_s3 + $0x124] sm:$0xf] %vm1804_vm2, %v2253_v63  ;;  %v1009_v0 = vadd.f32 %v3085_v61, %v1008_v2  ;;  %v2530_v5 = vpop.f32.mrb[25].mxu1 }
 0x11f   :  { %v763_v6 = vpop.f32.mrb[26].mxu0  ;;  %v1011_v7 = vpop.f32.mrb[26].mxu1 }
 0x120   :  { %v1210_v8 = vmax.f32 %v761_v3, 0.0  ;;  %v764_v9 = vadd.f32 %v3085_v61, %v763_v6  ;;  %v2407_v10 = vpop.f32.mrb[27].mxu0  ;;  %v1272_v11 = vmax.f32 %v1009_v0, 0.0  ;;  %v1012_v12 = vadd.f32 %v3085_v61, %v1011_v7  ;;  %v2531_v13 = vpop.f32.mrb[27].mxu1 }
 0x122   :  { %v2192_v14 = vpack.c.bf16 %v1210_v8, %v1210_v8  ;;  %v1211_v15 = vmax.f32 %v764_v9, 0.0  ;;  %v2254_v16 = vpack.c.bf16 %v1272_v11, %v1272_v11  ;;  %v1273_v17 = vmax.f32 %v1012_v12, 0.0 }
 0x124   :  { %1817 = vst.msk [vmem:[%s3742_s3 + $0x30] sm:$0xf] %vm1804_vm2, %v2192_v14  ;;  %v2193_v18 = vpack.c.bf16 %v1211_v15, %v1211_v15  ;;  %1879 = vst.msk [vmem:[%s3742_s3 + $0x128] sm:$0xf] %vm1804_vm2, %v2254_v16  ;;  %v2255_v19 = vpack.c.bf16 %v1273_v17, %v1273_v17 }
 0x125   :  { %v768_v20 = vpop.f32.mrb[28].mxu0  ;;  %v1016_v21 = vpop.f32.mrb[28].mxu1 }
 0x126   :  { %1818 = vst.msk [vmem:[%s3742_s3 + $0x34] sm:$0xf] %vm1804_vm2, %v2193_v18  ;;  %v769_v22 = vadd.f32 %v3085_v61, %v768_v20  ;;  %v2410_v23 = vpop.f32.mrb[29].mxu0  ;;  %1880 = vst.msk [vmem:[%s3742_s3 + $0x12c] sm:$0xf] %vm1804_vm2, %v2255_v19  ;;  %v1017_v24 = vadd.f32 %v3085_v61, %v1016_v21  ;;  %v2534_v25 = vpop.f32.mrb[29].mxu1 }
 0x127   :  { %v771_v26 = vpop.f32.mrb[30].mxu0  ;;  %v1019_v27 = vpop.f32.mrb[30].mxu1 }
 0x128   :  { %v1212_v28 = vmax.f32 %v769_v22, 0.0  ;;  %v772_v29 = vadd.f32 %v3085_v61, %v771_v26  ;;  %v2411_v30 = vpop.f32.mrb[31].mxu0  ;;  %v1274_v31 = vmax.f32 %v1017_v24, 0.0  ;;  %v1020_v32 = vadd.f32 %v3085_v61, %v1019_v27  ;;  %v2535_v33 = vpop.f32.mrb[31].mxu1 }
 0x12a   :  { %v2194_v34 = vpack.c.bf16 %v1212_v28, %v1212_v28  ;;  %v1213_v35 = vmax.f32 %v772_v29, 0.0  ;;  %v2256_v36 = vpack.c.bf16 %v1274_v31, %v1274_v31  ;;  %v1275_v37 = vmax.f32 %v1020_v32, 0.0 }
 0x12c   :  { %1819 = vst.msk [vmem:[%s3742_s3 + $0x38] sm:$0xf] %vm1804_vm2, %v2194_v34  ;;  %v2195_v38 = vpack.c.bf16 %v1213_v35, %v1213_v35  ;;  %1881 = vst.msk [vmem:[%s3742_s3 + $0x130] sm:$0xf] %vm1804_vm2, %v2256_v36  ;;  %v2257_v39 = vpack.c.bf16 %v1275_v37, %v1275_v37 }
 0x12d   :  { %v776_v40 = vpop.f32.mrb[32].mxu0  ;;  %v1024_v41 = vpop.f32.mrb[32].mxu1 }
 0x12e   :  { %1820 = vst.msk [vmem:[%s3742_s3 + $0x3c] sm:$0xf] %vm1804_vm2, %v2195_v38  ;;  %v777_v42 = vadd.f32 %v3085_v61, %v776_v40  ;;  %v2414_v43 = vpop.f32.mrb[33].mxu0  ;;  %1882 = vst.msk [vmem:[%s3742_s3 + $0x134] sm:$0xf] %vm1804_vm2, %v2257_v39  ;;  %v1025_v44 = vadd.f32 %v3085_v61, %v1024_v41  ;;  %v2538_v45 = vpop.f32.mrb[33].mxu1 }
 0x12f   :  { %v779_v46 = vpop.f32.mrb[34].mxu0  ;;  %v1027_v47 = vpop.f32.mrb[34].mxu1 }
 0x130   :  { %v1214_v48 = vmax.f32 %v777_v42, 0.0  ;;  %v780_v49 = vadd.f32 %v3085_v61, %v779_v46  ;;  %v2415_v50 = vpop.f32.mrb[35].mxu0  ;;  %v1276_v51 = vmax.f32 %v1025_v44, 0.0  ;;  %v1028_v52 = vadd.f32 %v3085_v61, %v1027_v47  ;;  %v2539_v53 = vpop.f32.mrb[35].mxu1 }
 0x132   :  { %v2196_v54 = vpack.c.bf16 %v1214_v48, %v1214_v48  ;;  %v1215_v55 = vmax.f32 %v780_v49, 0.0  ;;  %v2258_v56 = vpack.c.bf16 %v1276_v51, %v1276_v51  ;;  %v1277_v57 = vmax.f32 %v1028_v52, 0.0 }
 0x134   :  { %1821 = vst.msk [vmem:[%s3742_s3 + $0x40] sm:$0xf] %vm1804_vm2, %v2196_v54  ;;  %v2197_v58 = vpack.c.bf16 %v1215_v55, %v1215_v55  ;;  %1883 = vst.msk [vmem:[%s3742_s3 + $0x138] sm:$0xf] %vm1804_vm2, %v2258_v56  ;;  %v2259_v59 = vpack.c.bf16 %v1277_v57, %v1277_v57 }
 0x135   :  { %v784_v60 = vpop.f32.mrb[36].mxu0  ;;  %v1032_v62 = vpop.f32.mrb[36].mxu1 }
 0x136   :  { %1822 = vst.msk [vmem:[%s3742_s3 + $0x44] sm:$0xf] %vm1804_vm2, %v2197_v58  ;;  %v785_v63 = vadd.f32 %v3085_v61, %v784_v60  ;;  %v2418_v1 = vpop.f32.mrb[37].mxu0  ;;  %1884 = vst.msk [vmem:[%s3742_s3 + $0x13c] sm:$0xf] %vm1804_vm2, %v2259_v59  ;;  %v1033_v2 = vadd.f32 %v3085_v61, %v1032_v62  ;;  %v2542_v3 = vpop.f32.mrb[37].mxu1 }
 0x137   :  { %v787_v4 = vpop.f32.mrb[38].mxu0  ;;  %v1035_v0 = vpop.f32.mrb[38].mxu1 }
 0x138   :  { %v1216_v5 = vmax.f32 %v785_v63, 0.0  ;;  %v788_v6 = vadd.f32 %v3085_v61, %v787_v4  ;;  %v2419_v7 = vpop.f32.mrb[39].mxu0  ;;  %v1278_v8 = vmax.f32 %v1033_v2, 0.0  ;;  %v1036_v9 = vadd.f32 %v3085_v61, %v1035_v0  ;;  %v2543_v10 = vpop.f32.mrb[39].mxu1 }
 0x13a   :  { %v2198_v11 = vpack.c.bf16 %v1216_v5, %v1216_v5  ;;  %v1217_v12 = vmax.f32 %v788_v6, 0.0  ;;  %v2260_v13 = vpack.c.bf16 %v1278_v8, %v1278_v8  ;;  %v1279_v14 = vmax.f32 %v1036_v9, 0.0 }
 0x13c   :  { %1823 = vst.msk [vmem:[%s3742_s3 + $0x48] sm:$0xf] %vm1804_vm2, %v2198_v11  ;;  %v2199_v15 = vpack.c.bf16 %v1217_v12, %v1217_v12  ;;  %1885 = vst.msk [vmem:[%s3742_s3 + $0x140] sm:$0xf] %vm1804_vm2, %v2260_v13  ;;  %v2261_v16 = vpack.c.bf16 %v1279_v14, %v1279_v14 }
 0x13d   :  { %v792_v17 = vpop.f32.mrb[40].mxu0  ;;  %v1040_v18 = vpop.f32.mrb[40].mxu1 }
 0x13e   :  { %1824 = vst.msk [vmem:[%s3742_s3 + $0x4c] sm:$0xf] %vm1804_vm2, %v2199_v15  ;;  %v793_v19 = vadd.f32 %v3085_v61, %v792_v17  ;;  %v2422_v20 = vpop.f32.mrb[41].mxu0  ;;  %1886 = vst.msk [vmem:[%s3742_s3 + $0x144] sm:$0xf] %vm1804_vm2, %v2261_v16  ;;  %v1041_v21 = vadd.f32 %v3085_v61, %v1040_v18  ;;  %v2546_v22 = vpop.f32.mrb[41].mxu1 }
 0x13f   :  { %v795_v23 = vpop.f32.mrb[42].mxu0  ;;  %v1043_v24 = vpop.f32.mrb[42].mxu1 }
 0x140   :  { %v1218_v25 = vmax.f32 %v793_v19, 0.0  ;;  %v796_v26 = vadd.f32 %v3085_v61, %v795_v23  ;;  %v2423_v27 = vpop.f32.mrb[43].mxu0  ;;  %v1280_v28 = vmax.f32 %v1041_v21, 0.0  ;;  %v1044_v29 = vadd.f32 %v3085_v61, %v1043_v24  ;;  %v2547_v30 = vpop.f32.mrb[43].mxu1 }
 0x142   :  { %v2200_v31 = vpack.c.bf16 %v1218_v25, %v1218_v25  ;;  %v1219_v32 = vmax.f32 %v796_v26, 0.0  ;;  %v2262_v33 = vpack.c.bf16 %v1280_v28, %v1280_v28  ;;  %v1281_v34 = vmax.f32 %v1044_v29, 0.0 }
 0x144   :  { %1825 = vst.msk [vmem:[%s3742_s3 + $0x50] sm:$0xf] %vm1804_vm2, %v2200_v31  ;;  %v2201_v35 = vpack.c.bf16 %v1219_v32, %v1219_v32  ;;  %1887 = vst.msk [vmem:[%s3742_s3 + $0x148] sm:$0xf] %vm1804_vm2, %v2262_v33  ;;  %v2263_v36 = vpack.c.bf16 %v1281_v34, %v1281_v34 }
 0x145   :  { %v800_v37 = vpop.f32.mrb[44].mxu0  ;;  %v1048_v38 = vpop.f32.mrb[44].mxu1 }
 0x146   :  { %1826 = vst.msk [vmem:[%s3742_s3 + $0x54] sm:$0xf] %vm1804_vm2, %v2201_v35  ;;  %v801_v39 = vadd.f32 %v3085_v61, %v800_v37  ;;  %v2426_v40 = vpop.f32.mrb[45].mxu0  ;;  %1888 = vst.msk [vmem:[%s3742_s3 + $0x14c] sm:$0xf] %vm1804_vm2, %v2263_v36  ;;  %v1049_v41 = vadd.f32 %v3085_v61, %v1048_v38  ;;  %v2550_v42 = vpop.f32.mrb[45].mxu1 }
 0x147   :  { %v803_v43 = vpop.f32.mrb[46].mxu0  ;;  %v1051_v44 = vpop.f32.mrb[46].mxu1 }
 0x148   :  { %v1220_v45 = vmax.f32 %v801_v39, 0.0  ;;  %v804_v46 = vadd.f32 %v3085_v61, %v803_v43  ;;  %v2427_v47 = vpop.f32.mrb[47].mxu0  ;;  %v1282_v48 = vmax.f32 %v1049_v41, 0.0  ;;  %v1052_v49 = vadd.f32 %v3085_v61, %v1051_v44  ;;  %v2551_v50 = vpop.f32.mrb[47].mxu1 }
 0x14a   :  { %v2202_v51 = vpack.c.bf16 %v1220_v45, %v1220_v45  ;;  %v1221_v52 = vmax.f32 %v804_v46, 0.0  ;;  %v2264_v53 = vpack.c.bf16 %v1282_v48, %v1282_v48  ;;  %v1283_v54 = vmax.f32 %v1052_v49, 0.0 }
 0x14c   :  { %1827 = vst.msk [vmem:[%s3742_s3 + $0x58] sm:$0xf] %vm1804_vm2, %v2202_v51  ;;  %v2203_v55 = vpack.c.bf16 %v1221_v52, %v1221_v52  ;;  %1889 = vst.msk [vmem:[%s3742_s3 + $0x150] sm:$0xf] %vm1804_vm2, %v2264_v53  ;;  %v2265_v56 = vpack.c.bf16 %v1283_v54, %v1283_v54 }
 0x14d   :  { %v808_v57 = vpop.f32.mrb[48].mxu0  ;;  %v1056_v58 = vpop.f32.mrb[48].mxu1 }
 0x14e   :  { %1828 = vst.msk [vmem:[%s3742_s3 + $0x5c] sm:$0xf] %vm1804_vm2, %v2203_v55  ;;  %v809_v59 = vadd.f32 %v3085_v61, %v808_v57  ;;  %v2430_v60 = vpop.f32.mrb[49].mxu0  ;;  %1890 = vst.msk [vmem:[%s3742_s3 + $0x154] sm:$0xf] %vm1804_vm2, %v2265_v56  ;;  %v1057_v62 = vadd.f32 %v3085_v61, %v1056_v58  ;;  %v2554_v63 = vpop.f32.mrb[49].mxu1 }
 0x14f   :  { %v811_v1 = vpop.f32.mrb[50].mxu0  ;;  %v1059_v2 = vpop.f32.mrb[50].mxu1 }
 0x150   :  { %v1222_v3 = vmax.f32 %v809_v59, 0.0  ;;  %v812_v4 = vadd.f32 %v3085_v61, %v811_v1  ;;  %v2431_v0 = vpop.f32.mrb[51].mxu0  ;;  %v1284_v5 = vmax.f32 %v1057_v62, 0.0  ;;  %v1060_v6 = vadd.f32 %v3085_v61, %v1059_v2  ;;  %v2555_v7 = vpop.f32.mrb[51].mxu1 }
 0x152   :  { %v2204_v8 = vpack.c.bf16 %v1222_v3, %v1222_v3  ;;  %v1223_v9 = vmax.f32 %v812_v4, 0.0  ;;  %v2266_v10 = vpack.c.bf16 %v1284_v5, %v1284_v5  ;;  %v1285_v11 = vmax.f32 %v1060_v6, 0.0 }
 0x154   :  { %1829 = vst.msk [vmem:[%s3742_s3 + $0x60] sm:$0xf] %vm1804_vm2, %v2204_v8  ;;  %v2205_v12 = vpack.c.bf16 %v1223_v9, %v1223_v9  ;;  %1891 = vst.msk [vmem:[%s3742_s3 + $0x158] sm:$0xf] %vm1804_vm2, %v2266_v10  ;;  %v2267_v13 = vpack.c.bf16 %v1285_v11, %v1285_v11 }
 0x155   :  { %v816_v14 = vpop.f32.mrb[52].mxu0  ;;  %v1064_v15 = vpop.f32.mrb[52].mxu1 }
 0x156   :  { %1830 = vst.msk [vmem:[%s3742_s3 + $0x64] sm:$0xf] %vm1804_vm2, %v2205_v12  ;;  %v817_v16 = vadd.f32 %v3085_v61, %v816_v14  ;;  %v2434_v17 = vpop.f32.mrb[53].mxu0  ;;  %1892 = vst.msk [vmem:[%s3742_s3 + $0x15c] sm:$0xf] %vm1804_vm2, %v2267_v13  ;;  %v1065_v18 = vadd.f32 %v3085_v61, %v1064_v15  ;;  %v2558_v19 = vpop.f32.mrb[53].mxu1 }
 0x157   :  { %v819_v20 = vpop.f32.mrb[54].mxu0  ;;  %v1067_v21 = vpop.f32.mrb[54].mxu1 }
 0x158   :  { %v1224_v22 = vmax.f32 %v817_v16, 0.0  ;;  %v820_v23 = vadd.f32 %v3085_v61, %v819_v20  ;;  %v2435_v24 = vpop.f32.mrb[55].mxu0  ;;  %v1286_v25 = vmax.f32 %v1065_v18, 0.0  ;;  %v1068_v26 = vadd.f32 %v3085_v61, %v1067_v21  ;;  %v2559_v27 = vpop.f32.mrb[55].mxu1 }
 0x15a   :  { %v2206_v28 = vpack.c.bf16 %v1224_v22, %v1224_v22  ;;  %v1225_v29 = vmax.f32 %v820_v23, 0.0  ;;  %v2268_v30 = vpack.c.bf16 %v1286_v25, %v1286_v25  ;;  %v1287_v31 = vmax.f32 %v1068_v26, 0.0 }
 0x15c   :  { %1831 = vst.msk [vmem:[%s3742_s3 + $0x68] sm:$0xf] %vm1804_vm2, %v2206_v28  ;;  %v2207_v32 = vpack.c.bf16 %v1225_v29, %v1225_v29  ;;  %1893 = vst.msk [vmem:[%s3742_s3 + $0x160] sm:$0xf] %vm1804_vm2, %v2268_v30  ;;  %v2269_v33 = vpack.c.bf16 %v1287_v31, %v1287_v31 }
 0x15d   :  { %v824_v34 = vpop.f32.mrb[56].mxu0  ;;  %v1072_v35 = vpop.f32.mrb[56].mxu1 }
 0x15e   :  { %1832 = vst.msk [vmem:[%s3742_s3 + $0x6c] sm:$0xf] %vm1804_vm2, %v2207_v32  ;;  %v825_v36 = vadd.f32 %v3085_v61, %v824_v34  ;;  %v2438_v37 = vpop.f32.mrb[57].mxu0  ;;  %1894 = vst.msk [vmem:[%s3742_s3 + $0x164] sm:$0xf] %vm1804_vm2, %v2269_v33  ;;  %v1073_v38 = vadd.f32 %v3085_v61, %v1072_v35  ;;  %v2562_v39 = vpop.f32.mrb[57].mxu1 }
 0x15f   :  { %v827_v40 = vpop.f32.mrb[58].mxu0  ;;  %v1075_v41 = vpop.f32.mrb[58].mxu1 }
 0x160   :  { %v1226_v42 = vmax.f32 %v825_v36, 0.0  ;;  %v828_v43 = vadd.f32 %v3085_v61, %v827_v40  ;;  %v2439_v44 = vpop.f32.mrb[59].mxu0  ;;  %v1288_v45 = vmax.f32 %v1073_v38, 0.0  ;;  %v1076_v46 = vadd.f32 %v3085_v61, %v1075_v41  ;;  %v2563_v47 = vpop.f32.mrb[59].mxu1 }
 0x162   :  { %v2208_v48 = vpack.c.bf16 %v1226_v42, %v1226_v42  ;;  %v1227_v49 = vmax.f32 %v828_v43, 0.0  ;;  %v2270_v50 = vpack.c.bf16 %v1288_v45, %v1288_v45  ;;  %v1289_v51 = vmax.f32 %v1076_v46, 0.0 }
 0x164   :  { %1833 = vst.msk [vmem:[%s3742_s3 + $0x70] sm:$0xf] %vm1804_vm2, %v2208_v48  ;;  %v2209_v52 = vpack.c.bf16 %v1227_v49, %v1227_v49  ;;  %1895 = vst.msk [vmem:[%s3742_s3 + $0x168] sm:$0xf] %vm1804_vm2, %v2270_v50  ;;  %v2271_v53 = vpack.c.bf16 %v1289_v51, %v1289_v51 }
 0x165   :  { %v832_v54 = vpop.f32.mrb[60].mxu0  ;;  %v1080_v55 = vpop.f32.mrb[60].mxu1 }
 0x166   :  { %1834 = vst.msk [vmem:[%s3742_s3 + $0x74] sm:$0xf] %vm1804_vm2, %v2209_v52  ;;  %v833_v56 = vadd.f32 %v3085_v61, %v832_v54  ;;  %v2442_v57 = vpop.f32.mrb[61].mxu0  ;;  %1896 = vst.msk [vmem:[%s3742_s3 + $0x16c] sm:$0xf] %vm1804_vm2, %v2271_v53  ;;  %v1081_v58 = vadd.f32 %v3085_v61, %v1080_v55  ;;  %v2566_v59 = vpop.f32.mrb[61].mxu1 }
 0x167   :  { %v835_v60 = vpop.f32.mrb[62].mxu0  ;;  %v1083_v62 = vpop.f32.mrb[62].mxu1 }
 0x168   :  { %v1228_v63 = vmax.f32 %v833_v56, 0.0  ;;  %v836_v1 = vadd.f32 %v3085_v61, %v835_v60  ;;  %v2443_v2 = vpop.f32.mrb[63].mxu0  ;;  %v1290_v3 = vmax.f32 %v1081_v58, 0.0  ;;  %v1084_v4 = vadd.f32 %v3085_v61, %v1083_v62  ;;  %v2567_v0 = vpop.f32.mrb[63].mxu1 }
 0x16a   :  { %v2210_v5 = vpack.c.bf16 %v1228_v63, %v1228_v63  ;;  %v1229_v6 = vmax.f32 %v836_v1, 0.0  ;;  %v2272_v7 = vpack.c.bf16 %v1290_v3, %v1290_v3  ;;  %v1291_v8 = vmax.f32 %v1084_v4, 0.0 }
 0x16c   :  { %1835 = vst.msk [vmem:[%s3742_s3 + $0x78] sm:$0xf] %vm1804_vm2, %v2210_v5  ;;  %v2211_v9 = vpack.c.bf16 %v1229_v6, %v1229_v6  ;;  %1897 = vst.msk [vmem:[%s3742_s3 + $0x170] sm:$0xf] %vm1804_vm2, %v2272_v7  ;;  %v2273_v10 = vpack.c.bf16 %v1291_v8, %v1291_v8 }
 0x16d   :  { %v840_v11 = vpop.f32.mrb[64].mxu0  ;;  %v1088_v12 = vpop.f32.mrb[64].mxu1 }
 0x16e   :  { %1836 = vst.msk [vmem:[%s3742_s3 + $0x7c] sm:$0xf] %vm1804_vm2, %v2211_v9  ;;  %v841_v13 = vadd.f32 %v3085_v61, %v840_v11  ;;  %v2446_v14 = vpop.f32.mrb[65].mxu0  ;;  %1898 = vst.msk [vmem:[%s3742_s3 + $0x174] sm:$0xf] %vm1804_vm2, %v2273_v10  ;;  %v1089_v15 = vadd.f32 %v3085_v61, %v1088_v12  ;;  %v2570_v16 = vpop.f32.mrb[65].mxu1 }
 0x16f   :  { %v843_v17 = vpop.f32.mrb[66].mxu0  ;;  %v1091_v18 = vpop.f32.mrb[66].mxu1 }
 0x170   :  { %v1230_v19 = vmax.f32 %v841_v13, 0.0  ;;  %v844_v20 = vadd.f32 %v3085_v61, %v843_v17  ;;  %v2447_v21 = vpop.f32.mrb[67].mxu0  ;;  %v1292_v22 = vmax.f32 %v1089_v15, 0.0  ;;  %v1092_v23 = vadd.f32 %v3085_v61, %v1091_v18  ;;  %v2571_v24 = vpop.f32.mrb[67].mxu1 }
 0x172   :  { %v2212_v25 = vpack.c.bf16 %v1230_v19, %v1230_v19  ;;  %v1231_v26 = vmax.f32 %v844_v20, 0.0  ;;  %v2274_v27 = vpack.c.bf16 %v1292_v22, %v1292_v22  ;;  %v1293_v28 = vmax.f32 %v1092_v23, 0.0 }
 0x174   :  { %1837 = vst.msk [vmem:[%s3742_s3 + $0x80] sm:$0xf] %vm1804_vm2, %v2212_v25  ;;  %v2213_v29 = vpack.c.bf16 %v1231_v26, %v1231_v26  ;;  %1899 = vst.msk [vmem:[%s3742_s3 + $0x178] sm:$0xf] %vm1804_vm2, %v2274_v27  ;;  %v2275_v30 = vpack.c.bf16 %v1293_v28, %v1293_v28 }
 0x175   :  { %v848_v31 = vpop.f32.mrb[68].mxu0  ;;  %v1096_v32 = vpop.f32.mrb[68].mxu1 }
 0x176   :  { %1838 = vst.msk [vmem:[%s3742_s3 + $0x84] sm:$0xf] %vm1804_vm2, %v2213_v29  ;;  %v849_v33 = vadd.f32 %v3085_v61, %v848_v31  ;;  %v2450_v34 = vpop.f32.mrb[69].mxu0  ;;  %1900 = vst.msk [vmem:[%s3742_s3 + $0x17c] sm:$0xf] %vm1804_vm2, %v2275_v30  ;;  %v1097_v35 = vadd.f32 %v3085_v61, %v1096_v32  ;;  %v2574_v36 = vpop.f32.mrb[69].mxu1 }
 0x177   :  { %v851_v37 = vpop.f32.mrb[70].mxu0  ;;  %v1099_v38 = vpop.f32.mrb[70].mxu1 }
 0x178   :  { %v1232_v39 = vmax.f32 %v849_v33, 0.0  ;;  %v852_v40 = vadd.f32 %v3085_v61, %v851_v37  ;;  %v2451_v41 = vpop.f32.mrb[71].mxu0  ;;  %v1294_v42 = vmax.f32 %v1097_v35, 0.0  ;;  %v1100_v43 = vadd.f32 %v3085_v61, %v1099_v38  ;;  %v2575_v44 = vpop.f32.mrb[71].mxu1  ;;  %v3534_v37 = vld [vmem:[%s3741_s2] ss:$0 sm:$0xff] }
 0x17a   :  { %v2214_v45 = vpack.c.bf16 %v1232_v39, %v1232_v39  ;;  %v1233_v46 = vmax.f32 %v852_v40, 0.0  ;;  %v2276_v47 = vpack.c.bf16 %v1294_v42, %v1294_v42  ;;  %v1295_v48 = vmax.f32 %v1100_v43, 0.0 }
 0x17c   :  { %1839 = vst.msk [vmem:[%s3742_s3 + $0x88] sm:$0xf] %vm1804_vm2, %v2214_v45  ;;  %v2215_v49 = vpack.c.bf16 %v1233_v46, %v1233_v46  ;;  %1901 = vst.msk [vmem:[%s3742_s3 + $0x180] sm:$0xf] %vm1804_vm2, %v2276_v47  ;;  %v2277_v50 = vpack.c.bf16 %v1295_v48, %v1295_v48 }
 0x17d   :  { %v856_v51 = vpop.f32.mrb[72].mxu0  ;;  %v1104_v52 = vpop.f32.mrb[72].mxu1 }
 0x17e   :  { %1840 = vst.msk [vmem:[%s3742_s3 + $0x8c] sm:$0xf] %vm1804_vm2, %v2215_v49  ;;  %v857_v53 = vadd.f32 %v3085_v61, %v856_v51  ;;  %v2454_v54 = vpop.f32.mrb[73].mxu0  ;;  %1902 = vst.msk [vmem:[%s3742_s3 + $0x184] sm:$0xf] %vm1804_vm2, %v2277_v50  ;;  %v1105_v55 = vadd.f32 %v3085_v61, %v1104_v52  ;;  %v2578_v56 = vpop.f32.mrb[73].mxu1 }
 0x17f   :  { %v859_v57 = vpop.f32.mrb[74].mxu0  ;;  %v1107_v58 = vpop.f32.mrb[74].mxu1 }
 0x180   :  { %v1234_v59 = vmax.f32 %v857_v53, 0.0  ;;  %v860_v60 = vadd.f32 %v3085_v61, %v859_v57  ;;  %v2455_v62 = vpop.f32.mrb[75].mxu0  ;;  %v1296_v63 = vmax.f32 %v1105_v55, 0.0  ;;  %v1108_v1 = vadd.f32 %v3085_v61, %v1107_v58  ;;  %v2579_v2 = vpop.f32.mrb[75].mxu1 }
 0x182   :  { %v2216_v3 = vpack.c.bf16 %v1234_v59, %v1234_v59  ;;  %v1235_v4 = vmax.f32 %v860_v60, 0.0  ;;  %v2278_v0 = vpack.c.bf16 %v1296_v63, %v1296_v63  ;;  %v1297_v5 = vmax.f32 %v1108_v1, 0.0 }
 0x184   :  { %1841 = vst.msk [vmem:[%s3742_s3 + $0x90] sm:$0xf] %vm1804_vm2, %v2216_v3  ;;  %v2217_v6 = vpack.c.bf16 %v1235_v4, %v1235_v4  ;;  %1903 = vst.msk [vmem:[%s3742_s3 + $0x188] sm:$0xf] %vm1804_vm2, %v2278_v0  ;;  %v2279_v7 = vpack.c.bf16 %v1297_v5, %v1297_v5 }
 0x185   :  { %v864_v8 = vpop.f32.mrb[76].mxu0  ;;  %v1112_v9 = vpop.f32.mrb[76].mxu1 }
 0x186   :  { %1842 = vst.msk [vmem:[%s3742_s3 + $0x94] sm:$0xf] %vm1804_vm2, %v2217_v6  ;;  %v865_v10 = vadd.f32 %v3085_v61, %v864_v8  ;;  %v2458_v11 = vpop.f32.mrb[77].mxu0  ;;  %1904 = vst.msk [vmem:[%s3742_s3 + $0x18c] sm:$0xf] %vm1804_vm2, %v2279_v7  ;;  %v1113_v12 = vadd.f32 %v3085_v61, %v1112_v9  ;;  %v2582_v13 = vpop.f32.mrb[77].mxu1 }
 0x187   :  { %v867_v14 = vpop.f32.mrb[78].mxu0  ;;  %v1115_v15 = vpop.f32.mrb[78].mxu1 }
 0x188   :  { %v1236_v16 = vmax.f32 %v865_v10, 0.0  ;;  %v868_v17 = vadd.f32 %v3085_v61, %v867_v14  ;;  %v2459_v18 = vpop.f32.mrb[79].mxu0  ;;  %v1298_v19 = vmax.f32 %v1113_v12, 0.0  ;;  %v1116_v20 = vadd.f32 %v3085_v61, %v1115_v15  ;;  %v2583_v21 = vpop.f32.mrb[79].mxu1 }
 0x18a   :  { %v2218_v22 = vpack.c.bf16 %v1236_v16, %v1236_v16  ;;  %v1237_v23 = vmax.f32 %v868_v17, 0.0  ;;  %v2280_v24 = vpack.c.bf16 %v1298_v19, %v1298_v19  ;;  %v1299_v25 = vmax.f32 %v1116_v20, 0.0 }
 0x18c   :  { %1843 = vst.msk [vmem:[%s3742_s3 + $0x98] sm:$0xf] %vm1804_vm2, %v2218_v22  ;;  %v2219_v26 = vpack.c.bf16 %v1237_v23, %v1237_v23  ;;  %1905 = vst.msk [vmem:[%s3742_s3 + $0x190] sm:$0xf] %vm1804_vm2, %v2280_v24  ;;  %v2281_v27 = vpack.c.bf16 %v1299_v25, %v1299_v25 }
 0x18d   :  { %v872_v28 = vpop.f32.mrb[80].mxu0  ;;  %v1120_v29 = vpop.f32.mrb[80].mxu1 }
 0x18e   :  { %1844 = vst.msk [vmem:[%s3742_s3 + $0x9c] sm:$0xf] %vm1804_vm2, %v2219_v26  ;;  %v873_v30 = vadd.f32 %v3085_v61, %v872_v28  ;;  %v2462_v31 = vpop.f32.mrb[81].mxu0  ;;  %1906 = vst.msk [vmem:[%s3742_s3 + $0x194] sm:$0xf] %vm1804_vm2, %v2281_v27  ;;  %v1121_v32 = vadd.f32 %v3085_v61, %v1120_v29  ;;  %v2586_v33 = vpop.f32.mrb[81].mxu1 }
 0x18f   :  { %v875_v34 = vpop.f32.mrb[82].mxu0  ;;  %v1123_v35 = vpop.f32.mrb[82].mxu1 }
 0x190   :  { %v1238_v36 = vmax.f32 %v873_v30, 0.0  ;;  %v876_v38 = vadd.f32 %v3534_v37, %v875_v34  ;;  %v2463_v39 = vpop.f32.mrb[83].mxu0  ;;  %v1300_v40 = vmax.f32 %v1121_v32, 0.0  ;;  %v1124_v41 = vadd.f32 %v3534_v37, %v1123_v35  ;;  %v2587_v42 = vpop.f32.mrb[83].mxu1 }
 0x192   :  { %v2220_v43 = vpack.c.bf16 %v1238_v36, %v1238_v36  ;;  %v1239_v44 = vmax.f32 %v876_v38, 0.0  ;;  %v2282_v45 = vpack.c.bf16 %v1300_v40, %v1300_v40  ;;  %v1301_v61 = vmax.f32 %v1124_v41, 0.0 }
 0x194   :  { %1845 = vst.msk [vmem:[%s3742_s3 + $0xa0] sm:$0xf] %vm1804_vm2, %v2220_v43  ;;  %v2221_v46 = vpack.c.bf16 %v1239_v44, %v1239_v44  ;;  %1907 = vst.msk [vmem:[%s3742_s3 + $0x198] sm:$0xf] %vm1804_vm2, %v2282_v45  ;;  %v2283_v47 = vpack.c.bf16 %v1301_v61, %v1301_v61 }
 0x195   :  { %v880_v48 = vpop.f32.mrb[84].mxu0  ;;  %v1128_v49 = vpop.f32.mrb[84].mxu1 }
 0x196   :  { %1846 = vst.msk [vmem:[%s3742_s3 + $0xa4] sm:$0xf] %vm1804_vm2, %v2221_v46  ;;  %v881_v50 = vadd.f32 %v3534_v37, %v880_v48  ;;  %v2466_v51 = vpop.f32.mrb[85].mxu0  ;;  %1908 = vst.msk [vmem:[%s3742_s3 + $0x19c] sm:$0xf] %vm1804_vm2, %v2283_v47  ;;  %v1129_v52 = vadd.f32 %v3534_v37, %v1128_v49  ;;  %v2590_v53 = vpop.f32.mrb[85].mxu1 }
 0x197   :  { %v883_v54 = vpop.f32.mrb[86].mxu0  ;;  %v1131_v55 = vpop.f32.mrb[86].mxu1 }
 0x198   :  { %v1240_v56 = vmax.f32 %v881_v50, 0.0  ;;  %v884_v57 = vadd.f32 %v3534_v37, %v883_v54  ;;  %v2467_v58 = vpop.f32.mrb[87].mxu0  ;;  %v1302_v59 = vmax.f32 %v1129_v52, 0.0  ;;  %v1132_v60 = vadd.f32 %v3534_v37, %v1131_v55  ;;  %v2591_v62 = vpop.f32.mrb[87].mxu1 }
 0x19a   :  { %v2222_v63 = vpack.c.bf16 %v1240_v56, %v1240_v56  ;;  %v1241_v1 = vmax.f32 %v884_v57, 0.0  ;;  %v2284_v2 = vpack.c.bf16 %v1302_v59, %v1302_v59  ;;  %v1303_v3 = vmax.f32 %v1132_v60, 0.0 }
 0x19c   :  { %1847 = vst.msk [vmem:[%s3742_s3 + $0xa8] sm:$0xf] %vm1804_vm2, %v2222_v63  ;;  %v2223_v4 = vpack.c.bf16 %v1241_v1, %v1241_v1  ;;  %1909 = vst.msk [vmem:[%s3742_s3 + $0x1a0] sm:$0xf] %vm1804_vm2, %v2284_v2  ;;  %v2285_v0 = vpack.c.bf16 %v1303_v3, %v1303_v3 }
 0x19d   :  { %v888_v5 = vpop.f32.mrb[88].mxu0  ;;  %v1136_v6 = vpop.f32.mrb[88].mxu1 }
 0x19e   :  { %1848 = vst.msk [vmem:[%s3742_s3 + $0xac] sm:$0xf] %vm1804_vm2, %v2223_v4  ;;  %v889_v7 = vadd.f32 %v3534_v37, %v888_v5  ;;  %v2470_v8 = vpop.f32.mrb[89].mxu0  ;;  %1910 = vst.msk [vmem:[%s3742_s3 + $0x1a4] sm:$0xf] %vm1804_vm2, %v2285_v0  ;;  %v1137_v9 = vadd.f32 %v3534_v37, %v1136_v6  ;;  %v2594_v10 = vpop.f32.mrb[89].mxu1 }
 0x19f   :  { %v891_v11 = vpop.f32.mrb[90].mxu0  ;;  %v1139_v12 = vpop.f32.mrb[90].mxu1 }
 0x1a0   :  { %v1242_v13 = vmax.f32 %v889_v7, 0.0  ;;  %v892_v14 = vadd.f32 %v3534_v37, %v891_v11  ;;  %v2471_v15 = vpop.f32.mrb[91].mxu0  ;;  %v1304_v16 = vmax.f32 %v1137_v9, 0.0  ;;  %v1140_v17 = vadd.f32 %v3534_v37, %v1139_v12  ;;  %v2595_v18 = vpop.f32.mrb[91].mxu1 }
 0x1a2   :  { %v2224_v19 = vpack.c.bf16 %v1242_v13, %v1242_v13  ;;  %v1243_v20 = vmax.f32 %v892_v14, 0.0  ;;  %v2286_v21 = vpack.c.bf16 %v1304_v16, %v1304_v16  ;;  %v1305_v22 = vmax.f32 %v1140_v17, 0.0 }
 0x1a4   :  { %1849 = vst.msk [vmem:[%s3742_s3 + $0xb0] sm:$0xf] %vm1804_vm2, %v2224_v19  ;;  %v2225_v23 = vpack.c.bf16 %v1243_v20, %v1243_v20  ;;  %1911 = vst.msk [vmem:[%s3742_s3 + $0x1a8] sm:$0xf] %vm1804_vm2, %v2286_v21  ;;  %v2287_v24 = vpack.c.bf16 %v1305_v22, %v1305_v22 }
 0x1a5   :  { %v896_v25 = vpop.f32.mrb[92].mxu0  ;;  %v1144_v26 = vpop.f32.mrb[92].mxu1 }
 0x1a6   :  { %1850 = vst.msk [vmem:[%s3742_s3 + $0xb4] sm:$0xf] %vm1804_vm2, %v2225_v23  ;;  %v897_v27 = vadd.f32 %v3534_v37, %v896_v25  ;;  %v2474_v28 = vpop.f32.mrb[93].mxu0  ;;  %1912 = vst.msk [vmem:[%s3742_s3 + $0x1ac] sm:$0xf] %vm1804_vm2, %v2287_v24  ;;  %v1145_v29 = vadd.f32 %v3534_v37, %v1144_v26  ;;  %v2598_v30 = vpop.f32.mrb[93].mxu1 }
 0x1a7   :  { %v899_v31 = vpop.f32.mrb[94].mxu0  ;;  %v1147_v32 = vpop.f32.mrb[94].mxu1 }
 0x1a8   :  { %v1244_v33 = vmax.f32 %v897_v27, 0.0  ;;  %v900_v34 = vadd.f32 %v3534_v37, %v899_v31  ;;  %v2475_v35 = vpop.f32.mrb[95].mxu0  ;;  %v1306_v36 = vmax.f32 %v1145_v29, 0.0  ;;  %v1148_v38 = vadd.f32 %v3534_v37, %v1147_v32  ;;  %v2599_v39 = vpop.f32.mrb[95].mxu1 }
 0x1aa   :  { %v2226_v40 = vpack.c.bf16 %v1244_v33, %v1244_v33  ;;  %v1245_v41 = vmax.f32 %v900_v34, 0.0  ;;  %v2288_v42 = vpack.c.bf16 %v1306_v36, %v1306_v36  ;;  %v1307_v43 = vmax.f32 %v1148_v38, 0.0 }
 0x1ac   :  { %1851 = vst.msk [vmem:[%s3742_s3 + $0xb8] sm:$0xf] %vm1804_vm2, %v2226_v40  ;;  %v2227_v44 = vpack.c.bf16 %v1245_v41, %v1245_v41  ;;  %1913 = vst.msk [vmem:[%s3742_s3 + $0x1b0] sm:$0xf] %vm1804_vm2, %v2288_v42  ;;  %v2289_v45 = vpack.c.bf16 %v1307_v43, %v1307_v43 }
 0x1ad   :  { %v904_v61 = vpop.f32.mrb[96].mxu0  ;;  %v1152_v46 = vpop.f32.mrb[96].mxu1 }
 0x1ae   :  { %1852 = vst.msk [vmem:[%s3742_s3 + $0xbc] sm:$0xf] %vm1804_vm2, %v2227_v44  ;;  %v905_v47 = vadd.f32 %v3534_v37, %v904_v61  ;;  %v2478_v48 = vpop.f32.mrb[97].mxu0  ;;  %1914 = vst.msk [vmem:[%s3742_s3 + $0x1b4] sm:$0xf] %vm1804_vm2, %v2289_v45  ;;  %v1153_v49 = vadd.f32 %v3534_v37, %v1152_v46  ;;  %v2602_v50 = vpop.f32.mrb[97].mxu1 }
 0x1af   :  { %v907_v51 = vpop.f32.mrb[98].mxu0  ;;  %v1155_v52 = vpop.f32.mrb[98].mxu1 }
 0x1b0   :  { %v1246_v53 = vmax.f32 %v905_v47, 0.0  ;;  %v908_v54 = vadd.f32 %v3534_v37, %v907_v51  ;;  %v2479_v55 = vpop.f32.mrb[99].mxu0  ;;  %v1308_v56 = vmax.f32 %v1153_v49, 0.0  ;;  %v1156_v57 = vadd.f32 %v3534_v37, %v1155_v52  ;;  %v2603_v58 = vpop.f32.mrb[99].mxu1 }
 0x1b2   :  { %v2228_v59 = vpack.c.bf16 %v1246_v53, %v1246_v53  ;;  %v1247_v60 = vmax.f32 %v908_v54, 0.0  ;;  %v2290_v62 = vpack.c.bf16 %v1308_v56, %v1308_v56  ;;  %v1309_v63 = vmax.f32 %v1156_v57, 0.0 }
 0x1b4   :  { %1853 = vst.msk [vmem:[%s3742_s3 + $0xc0] sm:$0xf] %vm1804_vm2, %v2228_v59  ;;  %v2229_v1 = vpack.c.bf16 %v1247_v60, %v1247_v60  ;;  %1915 = vst.msk [vmem:[%s3742_s3 + $0x1b8] sm:$0xf] %vm1804_vm2, %v2290_v62  ;;  %v2291_v2 = vpack.c.bf16 %v1309_v63, %v1309_v63 }
 0x1b5   :  { %v912_v3 = vpop.f32.mrb[100].mxu0  ;;  %v1160_v4 = vpop.f32.mrb[100].mxu1 }
 0x1b6   :  { %1854 = vst.msk [vmem:[%s3742_s3 + $0xc4] sm:$0xf] %vm1804_vm2, %v2229_v1  ;;  %v913_v0 = vadd.f32 %v3534_v37, %v912_v3  ;;  %v2482_v5 = vpop.f32.mrb[101].mxu0  ;;  %1916 = vst.msk [vmem:[%s3742_s3 + $0x1bc] sm:$0xf] %vm1804_vm2, %v2291_v2  ;;  %v1161_v6 = vadd.f32 %v3534_v37, %v1160_v4  ;;  %v2606_v7 = vpop.f32.mrb[101].mxu1 }
 0x1b7   :  { %v915_v8 = vpop.f32.mrb[102].mxu0  ;;  %v1163_v9 = vpop.f32.mrb[102].mxu1 }
 0x1b8   :  { %v1248_v10 = vmax.f32 %v913_v0, 0.0  ;;  %v916_v11 = vadd.f32 %v3534_v37, %v915_v8  ;;  %v2483_v12 = vpop.f32.mrb[103].mxu0  ;;  %v1310_v13 = vmax.f32 %v1161_v6, 0.0  ;;  %v1164_v14 = vadd.f32 %v3534_v37, %v1163_v9  ;;  %v2607_v15 = vpop.f32.mrb[103].mxu1 }
 0x1ba   :  { %v2230_v16 = vpack.c.bf16 %v1248_v10, %v1248_v10  ;;  %v1249_v17 = vmax.f32 %v916_v11, 0.0  ;;  %v2292_v18 = vpack.c.bf16 %v1310_v13, %v1310_v13  ;;  %v1311_v19 = vmax.f32 %v1164_v14, 0.0 }
 0x1bc   :  { %1855 = vst.msk [vmem:[%s3742_s3 + $0xc8] sm:$0xf] %vm1804_vm2, %v2230_v16  ;;  %v2231_v20 = vpack.c.bf16 %v1249_v17, %v1249_v17  ;;  %1917 = vst.msk [vmem:[%s3742_s3 + $0x1c0] sm:$0xf] %vm1804_vm2, %v2292_v18  ;;  %v2293_v21 = vpack.c.bf16 %v1311_v19, %v1311_v19 }
 0x1bd   :  { %v920_v22 = vpop.f32.mrb[104].mxu0  ;;  %v1168_v23 = vpop.f32.mrb[104].mxu1 }
 0x1be   :  { %1856 = vst.msk [vmem:[%s3742_s3 + $0xcc] sm:$0xf] %vm1804_vm2, %v2231_v20  ;;  %v921_v24 = vadd.f32 %v3534_v37, %v920_v22  ;;  %v2486_v25 = vpop.f32.mrb[105].mxu0  ;;  %1918 = vst.msk [vmem:[%s3742_s3 + $0x1c4] sm:$0xf] %vm1804_vm2, %v2293_v21  ;;  %v1169_v26 = vadd.f32 %v3534_v37, %v1168_v23  ;;  %v2610_v27 = vpop.f32.mrb[105].mxu1 }
 0x1bf   :  { %v923_v28 = vpop.f32.mrb[106].mxu0  ;;  %v1171_v29 = vpop.f32.mrb[106].mxu1 }
 0x1c0   :  { %v1250_v30 = vmax.f32 %v921_v24, 0.0  ;;  %v924_v31 = vadd.f32 %v3534_v37, %v923_v28  ;;  %v2487_v32 = vpop.f32.mrb[107].mxu0  ;;  %v1312_v33 = vmax.f32 %v1169_v26, 0.0  ;;  %v1172_v34 = vadd.f32 %v3534_v37, %v1171_v29  ;;  %v2611_v35 = vpop.f32.mrb[107].mxu1 }
 0x1c2   :  { %v2232_v36 = vpack.c.bf16 %v1250_v30, %v1250_v30  ;;  %v1251_v38 = vmax.f32 %v924_v31, 0.0  ;;  %v2294_v39 = vpack.c.bf16 %v1312_v33, %v1312_v33  ;;  %v1313_v40 = vmax.f32 %v1172_v34, 0.0 }
 0x1c4   :  { %1857 = vst.msk [vmem:[%s3742_s3 + $0xd0] sm:$0xf] %vm1804_vm2, %v2232_v36  ;;  %v2233_v41 = vpack.c.bf16 %v1251_v38, %v1251_v38  ;;  %1919 = vst.msk [vmem:[%s3742_s3 + $0x1c8] sm:$0xf] %vm1804_vm2, %v2294_v39  ;;  %v2295_v42 = vpack.c.bf16 %v1313_v40, %v1313_v40 }
 0x1c5   :  { %v928_v43 = vpop.f32.mrb[108].mxu0  ;;  %v1176_v44 = vpop.f32.mrb[108].mxu1 }
 0x1c6   :  { %1858 = vst.msk [vmem:[%s3742_s3 + $0xd4] sm:$0xf] %vm1804_vm2, %v2233_v41  ;;  %v929_v45 = vadd.f32 %v3534_v37, %v928_v43  ;;  %v2490_v61 = vpop.f32.mrb[109].mxu0  ;;  %1920 = vst.msk [vmem:[%s3742_s3 + $0x1cc] sm:$0xf] %vm1804_vm2, %v2295_v42  ;;  %v1177_v46 = vadd.f32 %v3534_v37, %v1176_v44  ;;  %v2614_v47 = vpop.f32.mrb[109].mxu1 }
 0x1c7   :  { %v931_v48 = vpop.f32.mrb[110].mxu0  ;;  %v1179_v49 = vpop.f32.mrb[110].mxu1 }
 0x1c8   :  { %v1252_v50 = vmax.f32 %v929_v45, 0.0  ;;  %v932_v51 = vadd.f32 %v3534_v37, %v931_v48  ;;  %v2491_v52 = vpop.f32.mrb[111].mxu0  ;;  %v1314_v53 = vmax.f32 %v1177_v46, 0.0  ;;  %v1180_v54 = vadd.f32 %v3534_v37, %v1179_v49  ;;  %v2615_v55 = vpop.f32.mrb[111].mxu1 }
 0x1ca   :  { %v2234_v56 = vpack.c.bf16 %v1252_v50, %v1252_v50  ;;  %v1253_v57 = vmax.f32 %v932_v51, 0.0  ;;  %v2296_v58 = vpack.c.bf16 %v1314_v53, %v1314_v53  ;;  %v1315_v59 = vmax.f32 %v1180_v54, 0.0 }
 0x1cc   :  { %1859 = vst.msk [vmem:[%s3742_s3 + $0xd8] sm:$0xf] %vm1804_vm2, %v2234_v56  ;;  %v2235_v60 = vpack.c.bf16 %v1253_v57, %v1253_v57  ;;  %1921 = vst.msk [vmem:[%s3742_s3 + $0x1d0] sm:$0xf] %vm1804_vm2, %v2296_v58  ;;  %v2297_v62 = vpack.c.bf16 %v1315_v59, %v1315_v59 }
 0x1cd   :  { %v936_v63 = vpop.f32.mrb[112].mxu0  ;;  %v1184_v1 = vpop.f32.mrb[112].mxu1 }
 0x1ce   :  { %1860 = vst.msk [vmem:[%s3742_s3 + $0xdc] sm:$0xf] %vm1804_vm2, %v2235_v60  ;;  %v937_v2 = vadd.f32 %v3534_v37, %v936_v63  ;;  %v2494_v3 = vpop.f32.mrb[113].mxu0  ;;  %1922 = vst.msk [vmem:[%s3742_s3 + $0x1d4] sm:$0xf] %vm1804_vm2, %v2297_v62  ;;  %v1185_v4 = vadd.f32 %v3534_v37, %v1184_v1  ;;  %v2618_v0 = vpop.f32.mrb[113].mxu1 }
 0x1cf   :  { %v939_v5 = vpop.f32.mrb[114].mxu0  ;;  %v1187_v6 = vpop.f32.mrb[114].mxu1 }
 0x1d0   :  { %v1254_v7 = vmax.f32 %v937_v2, 0.0  ;;  %v940_v8 = vadd.f32 %v3534_v37, %v939_v5  ;;  %v2495_v9 = vpop.f32.mrb[115].mxu0  ;;  %v1316_v10 = vmax.f32 %v1185_v4, 0.0  ;;  %v1188_v11 = vadd.f32 %v3534_v37, %v1187_v6  ;;  %v2619_v12 = vpop.f32.mrb[115].mxu1 }
 0x1d2   :  { %v2236_v13 = vpack.c.bf16 %v1254_v7, %v1254_v7  ;;  %v1255_v14 = vmax.f32 %v940_v8, 0.0  ;;  %v2298_v15 = vpack.c.bf16 %v1316_v10, %v1316_v10  ;;  %v1317_v16 = vmax.f32 %v1188_v11, 0.0 }
 0x1d4   :  { %1861 = vst.msk [vmem:[%s3742_s3 + $0xe0] sm:$0xf] %vm1804_vm2, %v2236_v13  ;;  %v2237_v17 = vpack.c.bf16 %v1255_v14, %v1255_v14  ;;  %1923 = vst.msk [vmem:[%s3742_s3 + $0x1d8] sm:$0xf] %vm1804_vm2, %v2298_v15  ;;  %v2299_v18 = vpack.c.bf16 %v1317_v16, %v1317_v16 }
 0x1d5   :  { %v944_v19 = vpop.f32.mrb[116].mxu0  ;;  %v1192_v20 = vpop.f32.mrb[116].mxu1 }
 0x1d6   :  { %1862 = vst.msk [vmem:[%s3742_s3 + $0xe4] sm:$0xf] %vm1804_vm2, %v2237_v17  ;;  %v945_v21 = vadd.f32 %v3534_v37, %v944_v19  ;;  %v2498_v22 = vpop.f32.mrb[117].mxu0  ;;  %1924 = vst.msk [vmem:[%s3742_s3 + $0x1dc] sm:$0xf] %vm1804_vm2, %v2299_v18  ;;  %v1193_v23 = vadd.f32 %v3534_v37, %v1192_v20  ;;  %v2622_v24 = vpop.f32.mrb[117].mxu1 }
 0x1d7   :  { %v947_v25 = vpop.f32.mrb[118].mxu0  ;;  %v1195_v26 = vpop.f32.mrb[118].mxu1 }
 0x1d8   :  { %v1256_v27 = vmax.f32 %v945_v21, 0.0  ;;  %v948_v28 = vadd.f32 %v3534_v37, %v947_v25  ;;  %v2499_v29 = vpop.f32.mrb[119].mxu0  ;;  %v1318_v30 = vmax.f32 %v1193_v23, 0.0  ;;  %v2623_v31 = vpop.f32.mrb[119].mxu1 }
 0x1da   :  { %v2238_v32 = vpack.c.bf16 %v1256_v27, %v1256_v27  ;;  %v1257_v33 = vmax.f32 %v948_v28, 0.0  ;;  %v2300_v34 = vpack.c.bf16 %v1318_v30, %v1318_v30 }
 0x1dc   :  { %1863 = vst.msk [vmem:[%s3742_s3 + $0xe8] sm:$0xf] %vm1804_vm2, %v2238_v32  ;;  %v2239_v35 = vpack.c.bf16 %v1257_v33, %v1257_v33  ;;  %1925 = vst.msk [vmem:[%s3742_s3 + $0x1e0] sm:$0xf] %vm1804_vm2, %v2300_v34 }
 0x1dd   :  { %v952_v36 = vpop.f32.mrb[120].mxu0 }
 0x1de   :  { %1864 = vst.msk [vmem:[%s3742_s3 + $0xec] sm:$0xf] %vm1804_vm2, %v2239_v35  ;;  %v953_v38 = vadd.f32 %v3534_v37, %v952_v36  ;;  %v2502_v39 = vpop.f32.mrb[121].mxu0 }
 0x1df   :  { %v955_v40 = vpop.f32.mrb[122].mxu0 }
 0x1e0   :  { %v1258_v41 = vmax.f32 %v953_v38, 0.0  ;;  %v956_v42 = vadd.f32 %v3534_v37, %v955_v40  ;;  %v2503_v43 = vpop.f32.mrb[123].mxu0 }
 0x1e2   :  { %v2240_v44 = vpack.c.bf16 %v1258_v41, %v1258_v41  ;;  %v1259_v45 = vmax.f32 %v956_v42, 0.0 }
 0x1e4   :  { %1865 = vst.msk [vmem:[%s3742_s3 + $0xf0] sm:$0xf] %vm1804_vm2, %v2240_v44  ;;  %v2241_v61 = vpack.c.bf16 %v1259_v45, %v1259_v45 }
 0x1e6   :  { %1866 = vst.msk [vmem:[%s3742_s3 + $0xf4] sm:$0xf] %vm1804_vm2, %v2241_v61 }

// kernel: critic_forward.5
= control target key start
LH: loop header
LB: loop body
LE: loop exit
PB: predicated region body
PF: predicated region fallthrough
CT: control target
= control target key end

     0   :  { %v5569_v43 = vmov 0   ;;  %vm857_vm0 = vcmask 588800   ;;  %vm954_vm1 = vcmask 1043456   ;;  %vm1300_vm2 = vcmask 261120   ;;  %s6741_s1 = inlined_call_operand.vmem [shape: bf16[256,32], index: 1, kind: input, shape index: {}]   ;;  %s6742_s0 = inlined_call_operand.vmem [shape: bf16[200,256], index: 0, kind: input, shape index: {}]   ;;  %s6743_s3 = inlined_call_operand.vmem [shape: bf16[512,200], index: 3, kind: input, shape index: {}]   ;;  %s6744_s2 = inlined_call_operand.vmem [shape: f32[1,32], index: 2, kind: input, shape index: {}]   ;;  %s6745_s4 = inlined_call_operand.vmem [shape: bf16[16,32,64], index: 4, kind: input, shape index: {}]   ;;  %s6746_s6 = inlined_call_operand.vmem [shape: f32[16,64,64], index: 6, kind: input, shape index: {}]   ;;  %s6747_s5 = inlined_call_operand.vmem [shape: f32[1,64], index: 5, kind: input, shape index: {}]   ;;  %s6748_s8 = inlined_call_operand.vmem [shape: f32[64,32], index: 8, kind: input, shape index: {}]   ;;  %s6749_s7 = inlined_call_operand.vmem [shape: f32[1,64], index: 7, kind: input, shape index: {}]   ;;  %s6750_s11 = inlined_call_operand.<no memory space> [shape: f32[1,1], index: 11, kind: input, shape index: {}]   ;;  %s6751_s9 = inlined_call_operand.vmem [shape: f32[1,32], index: 9, kind: input, shape index: {}]   ;;  %s6752_s10 = inlined_call_operand.vmem [shape: f32[1,32], index: 10, kind: input, shape index: {}]   ;;  %s6753_s12 = inlined_call_operand.vmem [shape: f32[2,1], index: 12, kind: output, shape index: {}]  }
   0x1   :  { %v5387_v0 = vld [vmem:[%s6741_s1 + $0x40] sm:$0xff]   ;;  %v5389_v2 = vld [vmem:[%s6741_s1 + $0x48] sm:$0xff]   ;;  %v5391_v4 = vld [vmem:[%s6741_s1 + $0x50] sm:$0xff]   ;;  %958 = vmatprep.subr.bf16.mxu1 %v5569_v43  ;;  %vm5571_vm3 = vmmov 0   ;;  %vm2521_vm4 = vcmask 523264   ;;  %vm3934_vm5 = vcmask 254976  }
   0x2   :  { %v5388_v1 = vld [vmem:[%s6741_s1] sm:$0xff]   ;;  %4357 = vmatprep.subr.bf16.mxu0 %v5387_v0  ;;  %v5390_v3 = vld [vmem:[%s6741_s1 + $0x8] sm:$0xff]   ;;  %v5392_v5 = vld [vmem:[%s6741_s1 + $0x10] sm:$0xff]   ;;  %vm3946_vm6 = vcmask 1024  }
   0x3   :  { %4358 = vmatpush3.bf16.msra.mxu0 %v5388_v1  ;;  %v5393_v6 = vld [vmem:[%s6741_s1 + $0x58] sm:$0xff]   ;;  %v5395_v8 = vld [vmem:[%s6741_s1 + $0x60] sm:$0xff]   ;;  %v5397_v10 = vld [vmem:[%s6741_s1 + $0x68] sm:$0xff]  }
   0x4   :  { %4359 = vmatprep.subr.bf16.mxu0 %v5389_v2  ;;  %v5394_v7 = vld [vmem:[%s6741_s1 + $0x18] sm:$0xff]   ;;  %v5396_v9 = vld [vmem:[%s6741_s1 + $0x20] sm:$0xff]   ;;  %v5398_v12 = vld [vmem:[%s6741_s1 + $0x28] sm:$0xff]  }
   0x5   :  { %v5405_v11 = vld [vmem:[%s6742_s0 + $0x4] ss:$8 sps:$4 sm:$0xff]   ;;  %v5399_v13 = vld [vmem:[%s6741_s1 + $0x70] sm:$0xff]   ;;  %v5401_v15 = vld [vmem:[%s6741_s1 + $0x78] sm:$0xff]  }
   0x6   :  { %363 = vmatprep.mubr.bf16.mxu0 %v5405_v11  ;;  %v5400_v14 = vld [vmem:[%s6741_s1 + $0x30] sm:$0xff]   ;;  %v5402_v16 = vld [vmem:[%s6741_s1 + $0x38] sm:$0xff]   ;;  %v5403_v17 = vld [vmem:[%s6742_s0] ss:$8 sps:$4 sm:$0xff]  }
   0x7   :  { %4360 = vmatpush3.bf16.msra.mxu0 %v5390_v3  ;;  %v5406_v18 = vld [vmem:[%s6742_s0 + $0x14] ss:$8 sps:$4 sm:$0xff]   ;;  %v5408_v19 = vld [vmem:[%s6742_s0 + $0x10] ss:$8 sps:$4 sm:$0xff]   ;;  %v5409_v20 = vld [vmem:[%s6742_s0 + $0x24] ss:$8 sps:$4 sm:$0xff]  }
   0x8   :  { %4361 = vmatprep.subr.bf16.mxu0 %v5391_v4  ;;  %v5411_v21 = vld [vmem:[%s6742_s0 + $0x20] ss:$8 sps:$4 sm:$0xff]   ;;  %v5412_v22 = vld [vmem:[%s6742_s0 + $0x34] ss:$8 sps:$4 sm:$0xff]   ;;  %v5414_v23 = vld [vmem:[%s6742_s0 + $0x30] ss:$8 sps:$4 sm:$0xff]  }
   0x9   :  { %v5415_v24 = vld [vmem:[%s6742_s0 + $0x44] ss:$8 sps:$4 sm:$0xff]   ;;  %v5417_v25 = vld [vmem:[%s6742_s0 + $0x40] ss:$8 sps:$4 sm:$0xff]   ;;  %v5418_v26 = vld [vmem:[%s6742_s0 + $0x54] ss:$8 sps:$4 sm:$0xff]  }
   0xa   :  { %v5420_v27 = vld [vmem:[%s6742_s0 + $0x50] ss:$8 sps:$4 sm:$0xff]   ;;  %v5421_v28 = vld [vmem:[%s6742_s0 + $0x64] ss:$8 sps:$4 sm:$0xff]   ;;  %v5423_v29 = vld [vmem:[%s6742_s0 + $0x60] ss:$8 sps:$4 sm:$0xff]  }
   0xb   :  { %4362 = vmatpush3.bf16.msra.mxu0 %v5392_v5  ;;  %v5424_v30 = vld [vmem:[%s6742_s0 + $0x74] ss:$8 sps:$4 sm:$0xff]   ;;  %v5426_v31 = vld [vmem:[%s6742_s0 + $0x70] ss:$8 sps:$4 sm:$0xff]   ;;  %v5427_v32 = vld [vmem:[%s6742_s0 + $0x84] ss:$8 sps:$4 sm:$0xff]  }
   0xc   :  { %4363 = vmatprep.subr.bf16.mxu0 %v5393_v6  ;;  %v5429_v33 = vld [vmem:[%s6742_s0 + $0x80] ss:$8 sps:$4 sm:$0xff]   ;;  %v5430_v34 = vld [vmem:[%s6742_s0 + $0x94] ss:$8 sps:$4 sm:$0xff]   ;;  %v5432_v35 = vld [vmem:[%s6742_s0 + $0x90] ss:$8 sps:$4 sm:$0xff]  }
   0xd   :  { %v5433_v36 = vld [vmem:[%s6742_s0 + $0xa4] ss:$8 sps:$4 sm:$0xff]   ;;  %v5435_v37 = vld [vmem:[%s6742_s0 + $0xa0] ss:$8 sps:$4 sm:$0xff]   ;;  %v5436_v38 = vld [vmem:[%s6742_s0 + $0xb4] ss:$8 sps:$4 sm:$0xff]  }
   0xe   :  { %v68_v39 = vld [vmem:[%s6742_s0 + $0xc0] sm:$0xff]  ;;  %v5438_v40 = vld [vmem:[%s6742_s0 + $0xb0] ss:$8 sps:$4 sm:$0xff]  }
   0xf   :  { %4364 = vmatpush3.bf16.msra.mxu0 %v5394_v7  ;;  %v3978_v41 = vcombine.high %v68_v39, %v68_v39  ;;  %v3977_v42 = vcombine.low %v68_v39, %v68_v39  ;;  %v5443_v44 = vld [vmem:[%s6743_s3 + $0x4] ss:$8 sps:$4 sm:$0xff]   ;;  %v5769_v45 = vld [vmem:[%s6744_s2] ss:$0 sm:$0xff] }
  0x10   :  { %4365 = vmatprep.subr.bf16.mxu0 %v5395_v8  ;;  %4059 = vmatprep.mubr.msk.bf16.mxu1 %vm857_vm0, %v5443_v44 }
  0x13   :  { %4366 = vmatpush3.bf16.msra.mxu0 %v5396_v9 }
  0x14   :  { %4367 = vmatprep.subr.bf16.mxu0 %v5397_v10 }
  0x17   :  { %4368 = vmatpush3.bf16.msra.mxu0 %v5398_v12 }
  0x18   :  { %4369 = vmatprep.subr.bf16.mxu0 %v5399_v13 }
  0x1b   :  { %4370 = vmatpush3.bf16.msra.mxu0 %v5400_v14 }
  0x1c   :  { %4371 = vmatprep.subr.bf16.mxu0 %v5401_v15 }
  0x1f   :  { %4372 = vmatpush3.bf16.msra.mxu0 %v5402_v16 }
  0x22   :  { %364 = vmatmul.mubr.bf16.vlgmr.msra.gmra.mrb[0].mxu0 %v5403_v17 }
  0x23   :  { %371 = vmatprep.mubr.bf16.mxu0 %v5406_v18 }
  0x2a   :  { %372 = vmatmul.mubr.bf16.gmra.mrb[4].mxu0 %v5408_v19 }
  0x2b   :  { %379 = vmatprep.mubr.bf16.mxu0 %v5409_v20 }
  0x32   :  { %380 = vmatmul.mubr.bf16.gmra.mrb[8].mxu0 %v5411_v21 }
  0x33   :  { %387 = vmatprep.mubr.bf16.mxu0 %v5412_v22 }
  0x3a   :  { %388 = vmatmul.mubr.bf16.gmra.mrb[12].mxu0 %v5414_v23 }
  0x3b   :  { %395 = vmatprep.mubr.bf16.mxu0 %v5415_v24 }
  0x42   :  { %396 = vmatmul.mubr.bf16.gmra.mrb[16].mxu0 %v5417_v25 }
  0x43   :  { %403 = vmatprep.mubr.bf16.mxu0 %v5418_v26 }
  0x4a   :  { %404 = vmatmul.mubr.bf16.gmra.mrb[20].mxu0 %v5420_v27 }
  0x4b   :  { %411 = vmatprep.mubr.bf16.mxu0 %v5421_v28 }
  0x52   :  { %412 = vmatmul.mubr.bf16.gmra.mrb[24].mxu0 %v5423_v29 }
  0x53   :  { %419 = vmatprep.mubr.bf16.mxu0 %v5424_v30 }
  0x5a   :  { %420 = vmatmul.mubr.bf16.gmra.mrb[28].mxu0 %v5426_v31 }
  0x5b   :  { %427 = vmatprep.mubr.bf16.mxu0 %v5427_v32 }
  0x62   :  { %428 = vmatmul.mubr.bf16.gmra.mrb[32].mxu0 %v5429_v33 }
  0x63   :  { %435 = vmatprep.mubr.bf16.mxu0 %v5430_v34 }
  0x6a   :  { %436 = vmatmul.mubr.bf16.gmra.mrb[36].mxu0 %v5432_v35 }
  0x6b   :  { %443 = vmatprep.mubr.bf16.mxu0 %v5433_v36 }
  0x72   :  { %444 = vmatmul.mubr.bf16.gmra.mrb[40].mxu0 %v5435_v37 }
  0x73   :  { %451 = vmatprep.mubr.bf16.mxu0 %v5436_v38 }
  0x7a   :  { %452 = vmatmul.mubr.bf16.gmra.mrb[44].mxu0 %v5438_v40 }
  0x7b   :  { %459 = vmatprep.mubr.bf16.mxu0 %v3978_v41 }
  0x82   :  { %460 = vmatmul.mubr.bf16.gmra.mrb[48].mxu0 %v3977_v42 }
  0xf5   :  { %v4373_v46 = vpop.f32.mrb[0].mxu0 }
  0xf6   :  { %v4374_v47 = vpop.f32.mrb[1].mxu0 }
  0xf7   :  { %v4375_v48 = vadd.f32 %v4374_v47, %v4373_v46  ;;  %v4376_v49 = vpop.f32.mrb[2].mxu0 }
  0xf8   :  { %v4377_v50 = vpop.f32.mrb[3].mxu0 }
  0xf9   :  { %v366_v51 = vadd.f32 %v4375_v48, %v5769_v45  ;;  %v4378_v52 = vadd.f32 %v4377_v50, %v4376_v49 }
  0xfb   :  { %v369_v53 = vadd.f32 %v4378_v52, %v5769_v45  ;;  %v467_v54 = vmax.f32 %v366_v51, 0.0 }
  0xfd   :  { %v468_v55 = vmax.f32 %v369_v53, 0.0  ;;  %v4379_v56 = vpop.f32.mrb[4].mxu0 }
  0xfe   :  { %v4380_v57 = vpop.f32.mrb[5].mxu0 }
  0xff   :  { %v4381_v58 = vadd.f32 %v4380_v57, %v4379_v56  ;;  %v4382_v59 = vpop.f32.mrb[6].mxu0  ;;  %v492_v60 = vpack.c.bf16 %v468_v55, %v467_v54 }
 0x100   :  { %v4383_v61 = vpop.f32.mrb[7].mxu0 }
 0x101   :  { %v374_v62 = vadd.f32 %v4381_v58, %v5769_v45  ;;  %v4384_v63 = vadd.f32 %v4383_v61, %v4382_v59  ;;  %959 = vmatpush1.bf16.msra.mxu1 %v492_v60 }
 0x102   :  { %960 = vmatprep.subr.bf16.mxu1 %v5569_v43 }
 0x103   :  { %v377_v0 = vadd.f32 %v4384_v63, %v5769_v45  ;;  %v469_v1 = vmax.f32 %v374_v62, 0.0 }
 0x105   :  { %v470_v2 = vmax.f32 %v377_v0, 0.0  ;;  %v4385_v3 = vpop.f32.mrb[8].mxu0 }
 0x106   :  { %v4386_v4 = vpop.f32.mrb[9].mxu0 }
 0x107   :  { %v4387_v5 = vadd.f32 %v4386_v4, %v4385_v3  ;;  %v4388_v6 = vpop.f32.mrb[10].mxu0  ;;  %v493_v7 = vpack.c.bf16 %v470_v2, %v469_v1 }
 0x108   :  { %v4389_v8 = vpop.f32.mrb[11].mxu0 }
 0x109   :  { %v382_v9 = vadd.f32 %v4387_v5, %v5769_v45  ;;  %v4390_v10 = vadd.f32 %v4389_v8, %v4388_v6  ;;  %961 = vmatpush1.bf16.msra.mxu1 %v493_v7 }
 0x10a   :  { %962 = vmatprep.subr.bf16.mxu1 %v5569_v43 }
 0x10b   :  { %v385_v11 = vadd.f32 %v4390_v10, %v5769_v45  ;;  %v471_v12 = vmax.f32 %v382_v9, 0.0 }
 0x10d   :  { %v472_v13 = vmax.f32 %v385_v11, 0.0  ;;  %v4391_v14 = vpop.f32.mrb[12].mxu0 }
 0x10e   :  { %v4392_v15 = vpop.f32.mrb[13].mxu0 }
 0x10f   :  { %v4393_v16 = vadd.f32 %v4392_v15, %v4391_v14  ;;  %v4394_v17 = vpop.f32.mrb[14].mxu0  ;;  %v494_v18 = vpack.c.bf16 %v472_v13, %v471_v12 }
 0x110   :  { %v4395_v19 = vpop.f32.mrb[15].mxu0 }
 0x111   :  { %v390_v20 = vadd.f32 %v4393_v16, %v5769_v45  ;;  %v4396_v21 = vadd.f32 %v4395_v19, %v4394_v17  ;;  %963 = vmatpush1.bf16.msra.mxu1 %v494_v18 }
 0x112   :  { %964 = vmatprep.subr.bf16.mxu1 %v5569_v43 }
 0x113   :  { %v393_v22 = vadd.f32 %v4396_v21, %v5769_v45  ;;  %v473_v23 = vmax.f32 %v390_v20, 0.0 }
 0x115   :  { %v474_v24 = vmax.f32 %v393_v22, 0.0  ;;  %v4397_v25 = vpop.f32.mrb[16].mxu0 }
 0x116   :  { %v4398_v26 = vpop.f32.mrb[17].mxu0 }
 0x117   :  { %v4399_v27 = vadd.f32 %v4398_v26, %v4397_v25  ;;  %v4400_v28 = vpop.f32.mrb[18].mxu0  ;;  %v495_v29 = vpack.c.bf16 %v474_v24, %v473_v23 }
 0x118   :  { %v4401_v30 = vpop.f32.mrb[19].mxu0 }
 0x119   :  { %v398_v31 = vadd.f32 %v4399_v27, %v5769_v45  ;;  %v4402_v32 = vadd.f32 %v4401_v30, %v4400_v28  ;;  %965 = vmatpush1.bf16.msra.mxu1 %v495_v29 }
 0x11a   :  { %966 = vmatprep.subr.bf16.mxu1 %v5569_v43 }
 0x11b   :  { %v401_v33 = vadd.f32 %v4402_v32, %v5769_v45  ;;  %v475_v34 = vmax.f32 %v398_v31, 0.0 }
 0x11d   :  { %v476_v35 = vmax.f32 %v401_v33, 0.0  ;;  %v4403_v36 = vpop.f32.mrb[20].mxu0 }
 0x11e   :  { %v4404_v37 = vpop.f32.mrb[21].mxu0 }
 0x11f   :  { %v4405_v38 = vadd.f32 %v4404_v37, %v4403_v36  ;;  %v4406_v39 = vpop.f32.mrb[22].mxu0  ;;  %v496_v40 = vpack.c.bf16 %v476_v35, %v475_v34 }
 0x120   :  { %v4407_v41 = vpop.f32.mrb[23].mxu0 }
 0x121   :  { %v406_v42 = vadd.f32 %v4405_v38, %v5769_v45  ;;  %v4408_v44 = vadd.f32 %v4407_v41, %v4406_v39  ;;  %967 = vmatpush1.bf16.msra.mxu1 %v496_v40 }
 0x122   :  { %968 = vmatprep.subr.bf16.mxu1 %v5569_v43 }
 0x123   :  { %v409_v46 = vadd.f32 %v4408_v44, %v5769_v45  ;;  %v477_v47 = vmax.f32 %v406_v42, 0.0 }
 0x125   :  { %v478_v48 = vmax.f32 %v409_v46, 0.0  ;;  %v4409_v49 = vpop.f32.mrb[24].mxu0 }
 0x126   :  { %v4410_v50 = vpop.f32.mrb[25].mxu0 }
 0x127   :  { %v4411_v51 = vadd.f32 %v4410_v50, %v4409_v49  ;;  %v4412_v52 = vpop.f32.mrb[26].mxu0  ;;  %v497_v53 = vpack.c.bf16 %v478_v48, %v477_v47 }
 0x128   :  { %v4413_v54 = vpop.f32.mrb[27].mxu0 }
 0x129   :  { %v414_v55 = vadd.f32 %v4411_v51, %v5769_v45  ;;  %v4414_v56 = vadd.f32 %v4413_v54, %v4412_v52  ;;  %969 = vmatpush1.bf16.msra.mxu1 %v497_v53 }
 0x12a   :  { %970 = vmatprep.subr.bf16.mxu1 %v5569_v43 }
 0x12b   :  { %v417_v57 = vadd.f32 %v4414_v56, %v5769_v45  ;;  %v479_v58 = vmax.f32 %v414_v55, 0.0 }
 0x12d   :  { %v480_v59 = vmax.f32 %v417_v57, 0.0  ;;  %v4415_v60 = vpop.f32.mrb[28].mxu0 }
 0x12e   :  { %v4416_v61 = vpop.f32.mrb[29].mxu0 }
 0x12f   :  { %v4417_v62 = vadd.f32 %v4416_v61, %v4415_v60  ;;  %v4418_v63 = vpop.f32.mrb[30].mxu0  ;;  %v498_v0 = vpack.c.bf16 %v480_v59, %v479_v58 }
 0x130   :  { %v4419_v1 = vpop.f32.mrb[31].mxu0 }
 0x131   :  { %v422_v2 = vadd.f32 %v4417_v62, %v5769_v45  ;;  %v4420_v3 = vadd.f32 %v4419_v1, %v4418_v63  ;;  %971 = vmatpush1.bf16.msra.mxu1 %v498_v0  ;;  %v5441_v63 = vld [vmem:[%s6743_s3] ss:$8 sps:$4 sm:$0xff]   ;;  %v5444_v0 = vld [vmem:[%s6743_s3 + $0x14] ss:$8 sps:$4 sm:$0xff]  }
 0x132   :  { %972 = vmatprep.subr.bf16.mxu1 %v5569_v43  ;;  %v5449_v1 = vld [vmem:[%s6743_s3 + $0x20] ss:$8 sps:$4 sm:$0xff]  }
 0x133   :  { %v425_v4 = vadd.f32 %v4420_v3, %v5769_v45  ;;  %v481_v5 = vmax.f32 %v422_v2, 0.0  ;;  %v5450_v2 = vld [vmem:[%s6743_s3 + $0x34] ss:$8 sps:$4 sm:$0xff]   ;;  %v5452_v3 = vld [vmem:[%s6743_s3 + $0x30] ss:$8 sps:$4 sm:$0xff]  }
 0x135   :  { %v482_v6 = vmax.f32 %v425_v4, 0.0  ;;  %v4421_v7 = vpop.f32.mrb[32].mxu0  ;;  %v5453_v4 = vld [vmem:[%s6743_s3 + $0x44] ss:$8 sps:$4 sm:$0xff]  }
 0x136   :  { %v4422_v8 = vpop.f32.mrb[33].mxu0 }
 0x137   :  { %v4423_v9 = vadd.f32 %v4422_v8, %v4421_v7  ;;  %v4424_v10 = vpop.f32.mrb[34].mxu0  ;;  %v499_v11 = vpack.c.bf16 %v482_v6, %v481_v5  ;;  %v5455_v5 = vld [vmem:[%s6743_s3 + $0x40] ss:$8 sps:$4 sm:$0xff]   ;;  %v5456_v6 = vld [vmem:[%s6743_s3 + $0x54] ss:$8 sps:$4 sm:$0xff]  }
 0x138   :  { %v4425_v12 = vpop.f32.mrb[35].mxu0  ;;  %v5458_v7 = vld [vmem:[%s6743_s3 + $0x50] ss:$8 sps:$4 sm:$0xff]   ;;  %v5459_v8 = vld [vmem:[%s6743_s3 + $0x64] ss:$8 sps:$4 sm:$0xff]  }
 0x139   :  { %v430_v13 = vadd.f32 %v4423_v9, %v5769_v45  ;;  %v4426_v14 = vadd.f32 %v4425_v12, %v4424_v10  ;;  %973 = vmatpush1.bf16.msra.mxu1 %v499_v11  ;;  %v5461_v9 = vld [vmem:[%s6743_s3 + $0x60] ss:$8 sps:$4 sm:$0xff]   ;;  %v5462_v10 = vld [vmem:[%s6743_s3 + $0x74] ss:$8 sps:$4 sm:$0xff]   ;;  %v5464_v12 = vld [vmem:[%s6743_s3 + $0x70] ss:$8 sps:$4 sm:$0xff]  }
 0x13a   :  { %974 = vmatprep.subr.bf16.mxu1 %v5569_v43  ;;  %v5510_v11 = vld [vmem:[%s6745_s4 + $0x10] sm:$0xff]  }
 0x13b   :  { %v433_v15 = vadd.f32 %v4426_v14, %v5769_v45  ;;  %v483_v16 = vmax.f32 %v430_v13, 0.0  ;;  %v5465_v13 = vld [vmem:[%s6743_s3 + $0x84] ss:$8 sps:$4 sm:$0xff]   ;;  %4668 = vmatprep.subr.bf16.mxu0 %v5510_v11  ;;  %v5467_v14 = vld [vmem:[%s6743_s3 + $0x80] ss:$8 sps:$4 sm:$0xff]  }
 0x13c   :  { %4669 = vmatpush3.bf16.msra.mxu0 %v5510_v11 }
 0x13d   :  { %v484_v17 = vmax.f32 %v433_v15, 0.0  ;;  %v4427_v18 = vpop.f32.mrb[36].mxu0  ;;  %v5468_v15 = vld [vmem:[%s6743_s3 + $0x94] ss:$8 sps:$4 sm:$0xff]  }
 0x13e   :  { %v4428_v19 = vpop.f32.mrb[37].mxu0 }
 0x13f   :  { %v4429_v20 = vadd.f32 %v4428_v19, %v4427_v18  ;;  %v4430_v21 = vpop.f32.mrb[38].mxu0  ;;  %v500_v22 = vpack.c.bf16 %v484_v17, %v483_v16  ;;  %v5470_v16 = vld [vmem:[%s6743_s3 + $0x90] ss:$8 sps:$4 sm:$0xff]   ;;  %v5471_v17 = vld [vmem:[%s6743_s3 + $0xa4] ss:$8 sps:$4 sm:$0xff]  }
 0x140   :  { %v4431_v23 = vpop.f32.mrb[39].mxu0  ;;  %v5473_v18 = vld [vmem:[%s6743_s3 + $0xa0] ss:$8 sps:$4 sm:$0xff]   ;;  %v5474_v19 = vld [vmem:[%s6743_s3 + $0xb4] ss:$8 sps:$4 sm:$0xff]  }
 0x141   :  { %v438_v24 = vadd.f32 %v4429_v20, %v5769_v45  ;;  %v4432_v25 = vadd.f32 %v4431_v23, %v4430_v21  ;;  %975 = vmatpush1.bf16.msra.mxu1 %v500_v22  ;;  %v5476_v20 = vld [vmem:[%s6743_s3 + $0xb0] ss:$8 sps:$4 sm:$0xff]   ;;  %v5477_v21 = vld [vmem:[%s6743_s3 + $0xc4] ss:$8 sps:$4 sm:$0xff]   ;;  %v5479_v22 = vld [vmem:[%s6743_s3 + $0xc0] ss:$8 sps:$4 sm:$0xff]  }
 0x142   :  { %976 = vmatprep.subr.bf16.mxu1 %v5569_v43  ;;  %v5480_v23 = vld [vmem:[%s6743_s3 + $0xd4] ss:$8 sps:$4 sm:$0xff]  }
 0x143   :  { %v441_v26 = vadd.f32 %v4432_v25, %v5769_v45  ;;  %v485_v27 = vmax.f32 %v438_v24, 0.0  ;;  %v5482_v24 = vld [vmem:[%s6743_s3 + $0xd0] ss:$8 sps:$4 sm:$0xff]   ;;  %v5483_v25 = vld [vmem:[%s6743_s3 + $0xe4] ss:$8 sps:$4 sm:$0xff]  }
 0x145   :  { %v486_v28 = vmax.f32 %v441_v26, 0.0  ;;  %v4433_v29 = vpop.f32.mrb[40].mxu0  ;;  %v5531_v26 = vld [vmem:[%s6745_s4 + $0x18] sm:$0xff]  }
 0x146   :  { %v4434_v30 = vpop.f32.mrb[41].mxu0  ;;  %4670 = vmatprep.subr.bf16.mxu0 %v5531_v26 }
 0x147   :  { %v4435_v31 = vadd.f32 %v4434_v30, %v4433_v29  ;;  %v4436_v32 = vpop.f32.mrb[42].mxu0  ;;  %v501_v33 = vpack.c.bf16 %v486_v28, %v485_v27  ;;  %4671 = vmatpush3.bf16.msra.mxu0 %v5531_v26  ;;  %v5485_v27 = vld [vmem:[%s6743_s3 + $0xe0] ss:$8 sps:$4 sm:$0xff]   ;;  %v5486_v28 = vld [vmem:[%s6743_s3 + $0xf4] ss:$8 sps:$4 sm:$0xff]  }
 0x148   :  { %v4437_v34 = vpop.f32.mrb[43].mxu0  ;;  %v5922_v29 = vld [vmem:[%s6745_s4] sm:$0xff]   ;;  %v5488_v30 = vld [vmem:[%s6743_s3 + $0xf0] ss:$8 sps:$4 sm:$0xff]   ;;  %v5542_v26 = vld [vmem:[%s6745_s4 + $0x28] sm:$0xff]  }
 0x149   :  { %v446_v35 = vadd.f32 %v4435_v31, %v5769_v45  ;;  %v4438_v36 = vadd.f32 %v4437_v34, %v4436_v32  ;;  %977 = vmatpush1.bf16.msra.mxu1 %v501_v33  ;;  %4676 = vmatprep.subr.bf16.mxu0 %v5922_v29  ;;  %v5489_v31 = vld [vmem:[%s6743_s3 + $0x104] ss:$8 sps:$4 sm:$0xff]   ;;  %v5491_v32 = vld [vmem:[%s6743_s3 + $0x100] ss:$8 sps:$4 sm:$0xff]   ;;  %v5492_v33 = vld [vmem:[%s6743_s3 + $0x114] ss:$8 sps:$4 sm:$0xff]  }
 0x14a   :  { %978 = vmatprep.subr.bf16.mxu1 %v5569_v43  ;;  %v5494_v34 = vld [vmem:[%s6743_s3 + $0x110] ss:$8 sps:$4 sm:$0xff]  }
 0x14b   :  { %v449_v37 = vadd.f32 %v4438_v36, %v5769_v45  ;;  %v487_v38 = vmax.f32 %v446_v35, 0.0  ;;  %v5495_v35 = vld [vmem:[%s6743_s3 + $0x124] ss:$8 sps:$4 sm:$0xff]   ;;  %v5497_v36 = vld [vmem:[%s6743_s3 + $0x120] ss:$8 sps:$4 sm:$0xff]  }
 0x14d   :  { %v488_v39 = vmax.f32 %v449_v37, 0.0  ;;  %v4439_v40 = vpop.f32.mrb[44].mxu0  ;;  %v5498_v37 = vld [vmem:[%s6743_s3 + $0x134] ss:$8 sps:$4 sm:$0xff]  }
 0x14e   :  { %v4440_v41 = vpop.f32.mrb[45].mxu0 }
 0x14f   :  { %v4441_v42 = vadd.f32 %v4440_v41, %v4439_v40  ;;  %v4442_v44 = vpop.f32.mrb[46].mxu0  ;;  %v502_v46 = vpack.c.bf16 %v488_v39, %v487_v38  ;;  %v5500_v38 = vld [vmem:[%s6743_s3 + $0x130] ss:$8 sps:$4 sm:$0xff]   ;;  %v5501_v39 = vld [vmem:[%s6743_s3 + $0x144] ss:$8 sps:$4 sm:$0xff]  }
 0x150   :  { %v4443_v47 = vpop.f32.mrb[47].mxu0  ;;  %v5503_v40 = vld [vmem:[%s6743_s3 + $0x140] ss:$8 sps:$4 sm:$0xff]   ;;  %v5504_v41 = vld [vmem:[%s6743_s3 + $0x154] ss:$8 sps:$4 sm:$0xff]  }
 0x151   :  { %v454_v48 = vadd.f32 %v4441_v42, %v5769_v45  ;;  %v4444_v49 = vadd.f32 %v4443_v47, %v4442_v44  ;;  %979 = vmatpush1.bf16.msra.mxu1 %v502_v46  ;;  %v5506_v42 = vld [vmem:[%s6743_s3 + $0x150] ss:$8 sps:$4 sm:$0xff]   ;;  %v5507_v44 = vld [vmem:[%s6743_s3 + $0x164] ss:$8 sps:$4 sm:$0xff]   ;;  %v5509_v46 = vld [vmem:[%s6743_s3 + $0x160] ss:$8 sps:$4 sm:$0xff]  }
 0x152   :  { %980 = vmatprep.subr.bf16.mxu1 %v5569_v43  ;;  %v5511_v47 = vld [vmem:[%s6743_s3 + $0x174] ss:$8 sps:$4 sm:$0xff]  }
 0x153   :  { %v457_v50 = vadd.f32 %v4444_v49, %v5769_v45  ;;  %v489_v51 = vmax.f32 %v454_v48, 0.0  ;;  %v5513_v48 = vld [vmem:[%s6743_s3 + $0x170] ss:$8 sps:$4 sm:$0xff]   ;;  %v5514_v49 = vld [vmem:[%s6743_s3 + $0x184] ss:$8 sps:$4 sm:$0xff]  }
 0x155   :  { %v490_v52 = vmax.f32 %v457_v50, 0.0  ;;  %v4445_v53 = vpop.f32.mrb[48].mxu0  ;;  %v5516_v50 = vld [vmem:[%s6743_s3 + $0x180] ss:$8 sps:$4 sm:$0xff]  }
 0x156   :  { %v4446_v54 = vpop.f32.mrb[49].mxu0 }
 0x157   :  { %v4447_v55 = vadd.f32 %v4446_v54, %v4445_v53  ;;  %v4448_v56 = vpop.f32.mrb[50].mxu0  ;;  %v503_v57 = vpack.c.bf16 %v490_v52, %v489_v51  ;;  %v5517_v51 = vld [vmem:[%s6743_s3 + $0x194] ss:$8 sps:$4 sm:$0xff]   ;;  %v5519_v52 = vld [vmem:[%s6743_s3 + $0x190] ss:$8 sps:$4 sm:$0xff]  }
 0x158   :  { %v4449_v58 = vpop.f32.mrb[51].mxu0  ;;  %v5520_v53 = vld [vmem:[%s6743_s3 + $0x1a4] ss:$8 sps:$4 sm:$0xff]   ;;  %v5522_v54 = vld [vmem:[%s6743_s3 + $0x1a0] ss:$8 sps:$4 sm:$0xff]  }
 0x159   :  { %v462_v59 = vadd.f32 %v4447_v55, %v5769_v45  ;;  %981 = vmatpush1.bf16.msra.mxu1 %v503_v57  ;;  %v5447_v45 = vld [vmem:[%s6743_s3 + $0x24] ss:$8 sps:$4 sm:$0xff]   ;;  %v5523_v55 = vld [vmem:[%s6743_s3 + $0x1b4] ss:$8 sps:$4 sm:$0xff]   ;;  %v5525_v58 = vld [vmem:[%s6743_s3 + $0x1b0] ss:$8 sps:$4 sm:$0xff]  }
 0x15a   :  { %982 = vmatprep.subr.bf16.mxu1 %v5569_v43  ;;  %v5446_v43 = vld [vmem:[%s6743_s3 + $0x10] ss:$8 sps:$4 sm:$0xff]  }
 0x15b   :  { %v491_v60 = vmax.f32 %v462_v59, 0.0 }
 0x15d   :  { %v504_v61 = vpack.c.bf16 %v491_v60, %v491_v60  ;;  %v5526_v60 = vld [vmem:[%s6743_s3 + $0x1c4] ss:$8 sps:$4 sm:$0xff]  }
 0x15f   :  { %v956_v62 = vsel %vm954_vm1, %v504_v61, 0 }
 0x160   :  { %983 = vmatpush1.bf16.msra.mxu1 %v956_v62 }
 0x163   :  { %991 = vmatmul.mubr.bf16.vlgmr.msra.gmra.mrb[0].mxu1 %v5441_v63 }
 0x164   :  { %4060 = vmatprep.mubr.msk.bf16.mxu1 %vm857_vm0, %v5444_v0 }
 0x16b   :  { %999 = vmatmul.mubr.bf16.gmra.mrb[4].mxu1 %v5446_v43  ;;  %v5528_v43 = vld [vmem:[%s6743_s3 + $0x1c0] ss:$8 sps:$4 sm:$0xff]  }
 0x16c   :  { %4061 = vmatprep.mubr.msk.bf16.mxu1 %vm857_vm0, %v5447_v45 }
 0x173   :  { %1007 = vmatmul.mubr.bf16.gmra.mrb[8].mxu1 %v5449_v1  ;;  %v5529_v1 = vld [vmem:[%s6743_s3 + $0x1d4] ss:$8 sps:$4 sm:$0xff]  }
 0x174   :  { %4062 = vmatprep.mubr.msk.bf16.mxu1 %vm857_vm0, %v5450_v2 }
 0x17b   :  { %1015 = vmatmul.mubr.bf16.gmra.mrb[12].mxu1 %v5452_v3 }
 0x17c   :  { %4063 = vmatprep.mubr.msk.bf16.mxu1 %vm857_vm0, %v5453_v4 }
 0x183   :  { %1023 = vmatmul.mubr.bf16.gmra.mrb[16].mxu1 %v5455_v5 }
 0x184   :  { %4064 = vmatprep.mubr.msk.bf16.mxu1 %vm857_vm0, %v5456_v6  ;;  %v5532_v6 = vld [vmem:[%s6743_s3 + $0x1d0] ss:$8 sps:$4 sm:$0xff]  }
 0x18b   :  { %1031 = vmatmul.mubr.bf16.gmra.mrb[20].mxu1 %v5458_v7 }
 0x18c   :  { %4065 = vmatprep.mubr.msk.bf16.mxu1 %vm857_vm0, %v5459_v8  ;;  %v5533_v8 = vld [vmem:[%s6743_s3 + $0x1e4] ss:$8 sps:$4 sm:$0xff]  }
 0x193   :  { %1039 = vmatmul.mubr.bf16.gmra.mrb[24].mxu1 %v5461_v9 }
 0x194   :  { %4066 = vmatprep.mubr.msk.bf16.mxu1 %vm857_vm0, %v5462_v10 }
 0x19b   :  { %1047 = vmatmul.mubr.bf16.gmra.mrb[28].mxu1 %v5464_v12 }
 0x19c   :  { %4067 = vmatprep.mubr.msk.bf16.mxu1 %vm857_vm0, %v5465_v13  ;;  %v5535_v13 = vld [vmem:[%s6743_s3 + $0x1e0] ss:$8 sps:$4 sm:$0xff]  }
 0x1a3   :  { %1055 = vmatmul.mubr.bf16.gmra.mrb[32].mxu1 %v5467_v14 }
 0x1a4   :  { %4068 = vmatprep.mubr.msk.bf16.mxu1 %vm857_vm0, %v5468_v15 }
 0x1ab   :  { %1063 = vmatmul.mubr.bf16.gmra.mrb[36].mxu1 %v5470_v16 }
 0x1ac   :  { %4069 = vmatprep.mubr.msk.bf16.mxu1 %vm857_vm0, %v5471_v17  ;;  %v5537_v17 = vld [vmem:[%s6743_s3 + $0x1f4] ss:$8 sps:$4 sm:$0xff]  }
 0x1b3   :  { %1071 = vmatmul.mubr.bf16.gmra.mrb[40].mxu1 %v5473_v18  ;;  %v5540_v18 = vld [vmem:[%s6745_s4 + $0x8] sm:$0xff]  }
 0x1b4   :  { %4070 = vmatprep.mubr.msk.bf16.mxu1 %vm857_vm0, %v5474_v19  ;;  %v5541_v19 = vld [vmem:[%s6745_s4 + $0x20] sm:$0xff]  }
 0x1bb   :  { %1079 = vmatmul.mubr.bf16.gmra.mrb[44].mxu1 %v5476_v20 }
 0x1bc   :  { %4071 = vmatprep.mubr.msk.bf16.mxu1 %vm857_vm0, %v5477_v21 }
 0x1c3   :  { %1087 = vmatmul.mubr.bf16.gmra.mrb[48].mxu1 %v5479_v22  ;;  %v5539_v22 = vld [vmem:[%s6743_s3 + $0x1f0] ss:$8 sps:$4 sm:$0xff]  }
 0x1c4   :  { %4072 = vmatprep.mubr.msk.bf16.mxu1 %vm857_vm0, %v5480_v23 }
 0x1cb   :  { %1095 = vmatmul.mubr.bf16.gmra.mrb[52].mxu1 %v5482_v24 }
 0x1cc   :  { %4073 = vmatprep.mubr.msk.bf16.mxu1 %vm857_vm0, %v5483_v25 }
 0x1d3   :  { %1103 = vmatmul.mubr.bf16.gmra.mrb[56].mxu1 %v5485_v27 }
 0x1d4   :  { %4074 = vmatprep.mubr.msk.bf16.mxu1 %vm857_vm0, %v5486_v28 }
 0x1db   :  { %1111 = vmatmul.mubr.bf16.gmra.mrb[60].mxu1 %v5488_v30 }
 0x1dc   :  { %4075 = vmatprep.mubr.msk.bf16.mxu1 %vm857_vm0, %v5489_v31 }
 0x1e3   :  { %1119 = vmatmul.mubr.bf16.gmra.mrb[64].mxu1 %v5491_v32  ;;  %v5543_v32 = vld [vmem:[%s6745_s4 + $0x30] sm:$0xff]  }
 0x1e4   :  { %4076 = vmatprep.mubr.msk.bf16.mxu1 %vm857_vm0, %v5492_v33 }
 0x1eb   :  { %1127 = vmatmul.mubr.bf16.gmra.mrb[68].mxu1 %v5494_v34 }
 0x1ec   :  { %4077 = vmatprep.mubr.msk.bf16.mxu1 %vm857_vm0, %v5495_v35 }
 0x1f3   :  { %1135 = vmatmul.mubr.bf16.gmra.mrb[72].mxu1 %v5497_v36 }
 0x1f4   :  { %4078 = vmatprep.mubr.msk.bf16.mxu1 %vm857_vm0, %v5498_v37 }
 0x1fb   :  { %1143 = vmatmul.mubr.bf16.gmra.mrb[76].mxu1 %v5500_v38  ;;  %v5544_v38 = vld [vmem:[%s6745_s4 + $0x38] sm:$0xff]  }
 0x1fc   :  { %4079 = vmatprep.mubr.msk.bf16.mxu1 %vm857_vm0, %v5501_v39  ;;  %v5545_v39 = vld [vmem:[%s6745_s4 + $0x40] sm:$0xff]  }
 0x203   :  { %1151 = vmatmul.mubr.bf16.gmra.mrb[80].mxu1 %v5503_v40 }
 0x204   :  { %4080 = vmatprep.mubr.msk.bf16.mxu1 %vm857_vm0, %v5504_v41 }
 0x20b   :  { %1159 = vmatmul.mubr.bf16.gmra.mrb[84].mxu1 %v5506_v42 }
 0x20c   :  { %4081 = vmatprep.mubr.msk.bf16.mxu1 %vm857_vm0, %v5507_v44 }
 0x213   :  { %1167 = vmatmul.mubr.bf16.gmra.mrb[88].mxu1 %v5509_v46 }
 0x214   :  { %4082 = vmatprep.mubr.msk.bf16.mxu1 %vm857_vm0, %v5511_v47  ;;  %v5546_v47 = vld [vmem:[%s6745_s4 + $0x48] sm:$0xff]  }
 0x21b   :  { %1175 = vmatmul.mubr.bf16.gmra.mrb[92].mxu1 %v5513_v48 }
 0x21c   :  { %4083 = vmatprep.mubr.msk.bf16.mxu1 %vm857_vm0, %v5514_v49 }
 0x223   :  { %1183 = vmatmul.mubr.bf16.gmra.mrb[96].mxu1 %v5516_v50 }
 0x224   :  { %4084 = vmatprep.mubr.msk.bf16.mxu1 %vm857_vm0, %v5517_v51 }
 0x22b   :  { %1191 = vmatmul.mubr.bf16.gmra.mrb[100].mxu1 %v5519_v52 }
 0x22c   :  { %4085 = vmatprep.mubr.msk.bf16.mxu1 %vm857_vm0, %v5520_v53  ;;  %v5547_v53 = vld [vmem:[%s6745_s4 + $0x50] sm:$0xff]  }
 0x233   :  { %1199 = vmatmul.mubr.bf16.gmra.mrb[104].mxu1 %v5522_v54 }
 0x234   :  { %4086 = vmatprep.mubr.msk.bf16.mxu1 %vm857_vm0, %v5523_v55 }
 0x236   :  { %v992_v56 = vpop.f32.mrb[0].mxu1 }
 0x237   :  { %v994_v57 = vpop.f32.mrb[1].mxu1 }
 0x238   :  { %v995_v59 = vpop.f32.mrb[2].mxu1 }
 0x239   :  { %v1247_v61 = vpack.c.bf16 %v995_v59, %v992_v56  ;;  %v997_v62 = vpop.f32.mrb[3].mxu1  ;;  %v5548_v59 = vld [vmem:[%s6745_s4 + $0x58] sm:$0xff]  }
 0x23b   :  { %1207 = vmatmul.mubr.bf16.gmra.mrb[108].mxu1 %v5525_v58 }
 0x23c   :  { %4087 = vmatprep.mubr.msk.bf16.mxu1 %vm857_vm0, %v5526_v60  ;;  %v5549_v60 = vld [vmem:[%s6745_s4 + $0x60] sm:$0xff]  }
 0x23e   :  { %v1000_v63 = vpop.f32.mrb[4].mxu1 }
 0x23f   :  { %v1002_v0 = vpop.f32.mrb[5].mxu1 }
 0x240   :  { %v1003_v45 = vpop.f32.mrb[6].mxu1 }
 0x241   :  { %v1248_v2 = vpack.c.bf16 %v1003_v45, %v1000_v63  ;;  %v1005_v3 = vpop.f32.mrb[7].mxu1 }
 0x243   :  { %1215 = vmatmul.mubr.bf16.gmra.mrb[112].mxu1 %v5528_v43 }
 0x244   :  { %4088 = vmatprep.mubr.msk.bf16.mxu1 %vm857_vm0, %v5529_v1 }
 0x246   :  { %v1008_v4 = vpop.f32.mrb[8].mxu1 }
 0x247   :  { %v1010_v5 = vpop.f32.mrb[9].mxu1 }
 0x248   :  { %v1011_v7 = vpop.f32.mrb[10].mxu1  ;;  %v5550_v5 = vld [vmem:[%s6745_s4 + $0x68] sm:$0xff]  }
 0x249   :  { %v1249_v9 = vpack.c.bf16 %v1011_v7, %v1008_v4  ;;  %v1013_v10 = vpop.f32.mrb[11].mxu1 }
 0x24b   :  { %1223 = vmatmul.mubr.bf16.gmra.mrb[116].mxu1 %v5532_v6  ;;  %4672 = vmatprep.mubr.msk.bf16.mxu0 %vm1300_vm2, %v1249_v9  ;;  %v5551_v6 = vld [vmem:[%s6745_s4 + $0x70] sm:$0xff]  }
 0x24c   :  { %4089 = vmatprep.mubr.msk.bf16.mxu1 %vm857_vm0, %v5533_v8 }
 0x24e   :  { %v1016_v11 = vpop.f32.mrb[12].mxu1 }
 0x24f   :  { %v1018_v12 = vpop.f32.mrb[13].mxu1 }
 0x250   :  { %v1019_v14 = vpop.f32.mrb[14].mxu1 }
 0x251   :  { %v1250_v15 = vpack.c.bf16 %v1019_v14, %v1016_v11  ;;  %v1021_v16 = vpop.f32.mrb[15].mxu1 }
 0x253   :  { %1231 = vmatmul.mubr.bf16.gmra.mrb[120].mxu1 %v5535_v13  ;;  %4673 = vmatmul.mubr.msk.bf16.vlgmr.msra.gmra.mrb[52].mxu0 %vm1300_vm2, %v1250_v15 }
 0x254   :  { %4680 = vmatprep.mubr.msk.bf16.mxu0 %vm1300_vm2, %v1247_v61  ;;  %4677 = vmatpush3.bf16.msra.mxu0 %v5922_v29 }
 0x255   :  { %4090 = vmatprep.mubr.msk.bf16.mxu1 %vm857_vm0, %v5537_v17  ;;  %4678 = vmatprep.subr.bf16.mxu0 %v5540_v18  ;;  %v5552_v17 = vld [vmem:[%s6745_s4 + $0x78] sm:$0xff]  }
 0x256   :  { %v1024_v20 = vpop.f32.mrb[16].mxu1 }
 0x257   :  { %v1026_v21 = vpop.f32.mrb[17].mxu1 }
 0x258   :  { %v1027_v23 = vpop.f32.mrb[18].mxu1  ;;  %4679 = vmatpush3.bf16.msra.mxu0 %v5540_v18  ;;  %v5553_v18 = vld [vmem:[%s6745_s4 + $0x80] sm:$0xff]  }
 0x259   :  { %v1251_v24 = vpack.c.bf16 %v1027_v23, %v1024_v20  ;;  %v1029_v25 = vpop.f32.mrb[19].mxu1  ;;  %4684 = vmatprep.subr.bf16.mxu0 %v5541_v19 }
 0x25b   :  { %1239 = vmatmul.mubr.bf16.gmra.mrb[124].mxu1 %v5539_v22 }
 0x25e   :  { %v1032_v27 = vpop.f32.mrb[20].mxu1 }
 0x25f   :  { %v1034_v28 = vpop.f32.mrb[21].mxu1  ;;  %4681 = vmatmul.mubr.msk.bf16.vlgmr.msra.gmra.mrb[52].mxu0 %vm1300_vm2, %v1248_v2 }
 0x260   :  { %v1035_v29 = vpop.f32.mrb[22].mxu1  ;;  %4688 = vmatprep.mubr.msk.bf16.mxu0 %vm1300_vm2, %v1251_v24  ;;  %4685 = vmatpush3.bf16.msra.mxu0 %v5541_v19 }
 0x261   :  { %v1252_v30 = vpack.c.bf16 %v1035_v29, %v1032_v27  ;;  %v1037_v31 = vpop.f32.mrb[23].mxu1  ;;  %4686 = vmatprep.subr.bf16.mxu0 %v5542_v26  ;;  %v5570_v27 = vmov 0.0|0.0  }
 0x262   :  { %5155 = vmatprep.subr.bf16.mxu1 %v5570_v27  ;;  %v4235_v31 = vld [vmem:[%s6746_s6 + $0xc0] sm:$0xff] }
 0x264   :  { %4687 = vmatpush3.bf16.msra.mxu0 %v5542_v26 }
 0x265   :  { %4692 = vmatprep.subr.bf16.mxu0 %v5543_v32 }
 0x266   :  { %v1040_v33 = vpop.f32.mrb[24].mxu1 }
 0x267   :  { %v1042_v34 = vpop.f32.mrb[25].mxu1 }
 0x268   :  { %v1043_v35 = vpop.f32.mrb[26].mxu1  ;;  %v4237_v34 = vld [vmem:[%s6746_s6 + $0xd0] sm:$0xff] }
 0x269   :  { %v1253_v36 = vpack.c.bf16 %v1043_v35, %v1040_v33  ;;  %v1045_v37 = vpop.f32.mrb[27].mxu1  ;;  %v4238_v35 = vld [vmem:[%s6746_s6 + $0xd8] sm:$0xff] }
 0x26a   :  { %v5159_v37 = vpack.c.bf16 %v4238_v35, %v4237_v34 }
 0x26b   :  { %4689 = vmatmul.mubr.msk.bf16.vlgmr.msra.gmra.mrb[52].mxu0 %vm1300_vm2, %v1252_v30  ;;  %v5554_v30 = vld [vmem:[%s6745_s4 + $0x88] sm:$0xff]  }
 0x26c   :  { %4696 = vmatprep.mubr.msk.bf16.mxu0 %vm1300_vm2, %v1253_v36  ;;  %4693 = vmatpush3.bf16.msra.mxu0 %v5543_v32  ;;  %v4236_v32 = vld [vmem:[%s6746_s6 + $0xc8] sm:$0xff]  ;;  %v5555_v36 = vld [vmem:[%s6745_s4 + $0x90] sm:$0xff]  }
 0x26d   :  { %4694 = vmatprep.subr.bf16.mxu0 %v5544_v38  ;;  %v5156_v33 = vpack.c.bf16 %v4236_v32, %v4235_v31 }
 0x26e   :  { %v1048_v40 = vpop.f32.mrb[28].mxu1 }
 0x26f   :  { %v1050_v41 = vpop.f32.mrb[29].mxu1  ;;  %5157 = vmatpush3.bf16.msra.mxu1 %v5156_v33 }
 0x270   :  { %v1051_v42 = vpop.f32.mrb[30].mxu1  ;;  %4695 = vmatpush3.bf16.msra.mxu0 %v5544_v38  ;;  %5158 = vmatprep.subr.bf16.mxu1 %v5570_v27 }
 0x271   :  { %v1254_v44 = vpack.c.bf16 %v1051_v42, %v1048_v40  ;;  %v1053_v46 = vpop.f32.mrb[31].mxu1  ;;  %4700 = vmatprep.subr.bf16.mxu0 %v5545_v39  ;;  %v4240_v40 = vld [vmem:[%s6746_s6 + $0xe8] sm:$0xff] }
 0x273   :  { %5160 = vmatpush3.bf16.msra.mxu1 %v5159_v37 }
 0x274   :  { %5161 = vmatprep.subr.bf16.mxu1 %v5570_v27 }
 0x276   :  { %v1056_v48 = vpop.f32.mrb[32].mxu1 }
 0x277   :  { %v1058_v49 = vpop.f32.mrb[33].mxu1  ;;  %4697 = vmatmul.mubr.msk.bf16.vlgmr.msra.gmra.mrb[52].mxu0 %vm1300_vm2, %v1254_v44 }
 0x278   :  { %v1059_v50 = vpop.f32.mrb[34].mxu1  ;;  %4701 = vmatpush3.bf16.msra.mxu0 %v5545_v39  ;;  %v4239_v39 = vld [vmem:[%s6746_s6 + $0xe0] sm:$0xff]  ;;  %v4242_v49 = vld [vmem:[%s6746_s6 + $0xf8] sm:$0xff] }
 0x279   :  { %v1255_v51 = vpack.c.bf16 %v1059_v50, %v1056_v48  ;;  %v1061_v52 = vpop.f32.mrb[35].mxu1  ;;  %4702 = vmatprep.subr.bf16.mxu0 %v5546_v47  ;;  %v4241_v48 = vld [vmem:[%s6746_s6 + $0xf0] sm:$0xff] }
 0x27a   :  { %v5165_v50 = vpack.c.bf16 %v4242_v49, %v4241_v48 }
 0x27b   :  { %4704 = vmatprep.mubr.msk.bf16.mxu0 %vm1300_vm2, %v1255_v51 }
 0x27c   :  { %4703 = vmatpush3.bf16.msra.mxu0 %v5546_v47  ;;  %v5162_v47 = vpack.c.bf16 %v4240_v40, %v4239_v39  ;;  %v5564_v39 = vld [vmem:[%s6745_s4 + $0xd8] sm:$0xff]   ;;  %v5565_v40 = vld [vmem:[%s6745_s4 + $0xe0] sm:$0xff]  }
 0x27d   :  { %4708 = vmatprep.subr.bf16.mxu0 %v5547_v53 }
 0x27e   :  { %v1064_v54 = vpop.f32.mrb[36].mxu1  ;;  %5163 = vmatpush3.bf16.msra.mxu1 %v5162_v47 }
 0x27f   :  { %v1066_v55 = vpop.f32.mrb[37].mxu1  ;;  %5164 = vmatprep.subr.bf16.mxu1 %v5570_v27 }
 0x280   :  { %v1067_v56 = vpop.f32.mrb[38].mxu1 }
 0x281   :  { %v1256_v57 = vpack.c.bf16 %v1067_v56, %v1064_v54  ;;  %v1069_v58 = vpop.f32.mrb[39].mxu1  ;;  %v5556_v56 = vld [vmem:[%s6745_s4 + $0x98] sm:$0xff]  }
 0x282   :  { %5166 = vmatpush3.bf16.msra.mxu1 %v5165_v50 }
 0x283   :  { %4705 = vmatmul.mubr.msk.bf16.vlgmr.msra.gmra.mrb[52].mxu0 %vm1300_vm2, %v1256_v57  ;;  %5179 = vmatprep.subr.bf16.mxu1 %v5570_v27  ;;  %v5557_v57 = vld [vmem:[%s6745_s4 + $0xa0] sm:$0xff]  }
 0x284   :  { %4709 = vmatpush3.bf16.msra.mxu0 %v5547_v53 }
 0x285   :  { %4710 = vmatprep.subr.bf16.mxu0 %v5548_v59 }
 0x286   :  { %v1072_v61 = vpop.f32.mrb[40].mxu1 }
 0x287   :  { %v1074_v62 = vpop.f32.mrb[41].mxu1 }
 0x288   :  { %v1075_v63 = vpop.f32.mrb[42].mxu1  ;;  %4711 = vmatpush3.bf16.msra.mxu0 %v5548_v59 }
 0x289   :  { %v1257_v0 = vpack.c.bf16 %v1075_v63, %v1072_v61  ;;  %v1077_v43 = vpop.f32.mrb[43].mxu1  ;;  %4716 = vmatprep.subr.bf16.mxu0 %v5549_v60 }
 0x28b   :  { %4712 = vmatprep.mubr.msk.bf16.mxu0 %vm1300_vm2, %v1257_v0 }
 0x28e   :  { %v1080_v45 = vpop.f32.mrb[44].mxu1 }
 0x28f   :  { %v1082_v1 = vpop.f32.mrb[45].mxu1 }
 0x290   :  { %v1083_v2 = vpop.f32.mrb[46].mxu1 }
 0x291   :  { %v1258_v3 = vpack.c.bf16 %v1083_v2, %v1080_v45  ;;  %v1085_v4 = vpop.f32.mrb[47].mxu1  ;;  %v5558_v2 = vld [vmem:[%s6745_s4 + $0xa8] sm:$0xff]  }
 0x293   :  { %4713 = vmatmul.mubr.msk.bf16.vlgmr.msra.gmra.mrb[52].mxu0 %vm1300_vm2, %v1258_v3  ;;  %v5559_v3 = vld [vmem:[%s6745_s4 + $0xb0] sm:$0xff]  }
 0x294   :  { %4717 = vmatpush3.bf16.msra.mxu0 %v5549_v60 }
 0x295   :  { %4718 = vmatprep.subr.bf16.mxu0 %v5550_v5 }
 0x296   :  { %v1088_v7 = vpop.f32.mrb[48].mxu1 }
 0x297   :  { %v1090_v8 = vpop.f32.mrb[49].mxu1 }
 0x298   :  { %v1091_v9 = vpop.f32.mrb[50].mxu1  ;;  %4719 = vmatpush3.bf16.msra.mxu0 %v5550_v5 }
 0x299   :  { %v1259_v10 = vpack.c.bf16 %v1091_v9, %v1088_v7  ;;  %v1093_v11 = vpop.f32.mrb[51].mxu1  ;;  %4724 = vmatprep.subr.bf16.mxu0 %v5551_v6 }
 0x29b   :  { %4720 = vmatprep.mubr.msk.bf16.mxu0 %vm1300_vm2, %v1259_v10 }
 0x29e   :  { %v1096_v12 = vpop.f32.mrb[52].mxu1 }
 0x29f   :  { %v1098_v13 = vpop.f32.mrb[53].mxu1 }
 0x2a0   :  { %v1099_v14 = vpop.f32.mrb[54].mxu1 }
 0x2a1   :  { %v1260_v15 = vpack.c.bf16 %v1099_v14, %v1096_v12  ;;  %v1101_v16 = vpop.f32.mrb[55].mxu1  ;;  %v5560_v14 = vld [vmem:[%s6745_s4 + $0xb8] sm:$0xff]  }
 0x2a3   :  { %4721 = vmatmul.mubr.msk.bf16.vlgmr.msra.gmra.mrb[52].mxu0 %vm1300_vm2, %v1260_v15  ;;  %v5561_v15 = vld [vmem:[%s6745_s4 + $0xc0] sm:$0xff]  }
 0x2a4   :  { %4725 = vmatpush3.bf16.msra.mxu0 %v5551_v6 }
 0x2a5   :  { %4726 = vmatprep.subr.bf16.mxu0 %v5552_v17 }
 0x2a6   :  { %v1104_v19 = vpop.f32.mrb[56].mxu1 }
 0x2a7   :  { %v1106_v20 = vpop.f32.mrb[57].mxu1 }
 0x2a8   :  { %v1107_v21 = vpop.f32.mrb[58].mxu1  ;;  %4727 = vmatpush3.bf16.msra.mxu0 %v5552_v17 }
 0x2a9   :  { %v1261_v22 = vpack.c.bf16 %v1107_v21, %v1104_v19  ;;  %v1109_v23 = vpop.f32.mrb[59].mxu1  ;;  %4732 = vmatprep.subr.bf16.mxu0 %v5553_v18 }
 0x2ab   :  { %4728 = vmatprep.mubr.msk.bf16.mxu0 %vm1300_vm2, %v1261_v22 }
 0x2ae   :  { %v1112_v24 = vpop.f32.mrb[60].mxu1 }
 0x2af   :  { %v1114_v25 = vpop.f32.mrb[61].mxu1 }
 0x2b0   :  { %v1115_v26 = vpop.f32.mrb[62].mxu1 }
 0x2b1   :  { %v1262_v28 = vpack.c.bf16 %v1115_v26, %v1112_v24  ;;  %v1117_v29 = vpop.f32.mrb[63].mxu1  ;;  %v5562_v26 = vld [vmem:[%s6745_s4 + $0xc8] sm:$0xff]  }
 0x2b3   :  { %4729 = vmatmul.mubr.msk.bf16.vlgmr.msra.gmra.mrb[52].mxu0 %vm1300_vm2, %v1262_v28  ;;  %v5563_v28 = vld [vmem:[%s6745_s4 + $0xd0] sm:$0xff]  }
 0x2b4   :  { %4733 = vmatpush3.bf16.msra.mxu0 %v5553_v18 }
 0x2b5   :  { %4734 = vmatprep.subr.bf16.mxu0 %v5554_v30 }
 0x2b6   :  { %v1120_v38 = vpop.f32.mrb[64].mxu1 }
 0x2b7   :  { %v1122_v41 = vpop.f32.mrb[65].mxu1 }
 0x2b8   :  { %v1123_v42 = vpop.f32.mrb[66].mxu1  ;;  %4735 = vmatpush3.bf16.msra.mxu0 %v5554_v30 }
 0x2b9   :  { %v1263_v44 = vpack.c.bf16 %v1123_v42, %v1120_v38  ;;  %v1125_v46 = vpop.f32.mrb[67].mxu1  ;;  %4740 = vmatprep.subr.bf16.mxu0 %v5555_v36 }
 0x2bb   :  { %4736 = vmatprep.mubr.msk.bf16.mxu0 %vm1300_vm2, %v1263_v44 }
 0x2be   :  { %v1128_v51 = vpop.f32.mrb[68].mxu1 }
 0x2bf   :  { %v1130_v52 = vpop.f32.mrb[69].mxu1 }
 0x2c0   :  { %v1131_v53 = vpop.f32.mrb[70].mxu1 }
 0x2c1   :  { %v1264_v54 = vpack.c.bf16 %v1131_v53, %v1128_v51  ;;  %v1133_v55 = vpop.f32.mrb[71].mxu1  ;;  %v5566_v53 = vld [vmem:[%s6745_s4 + $0xe8] sm:$0xff]  }
 0x2c3   :  { %4737 = vmatmul.mubr.msk.bf16.vlgmr.msra.gmra.mrb[52].mxu0 %vm1300_vm2, %v1264_v54  ;;  %v5567_v54 = vld [vmem:[%s6745_s4 + $0xf0] sm:$0xff]  }
 0x2c4   :  { %4741 = vmatpush3.bf16.msra.mxu0 %v5555_v36 }
 0x2c5   :  { %4742 = vmatprep.subr.bf16.mxu0 %v5556_v56 }
 0x2c6   :  { %v1136_v58 = vpop.f32.mrb[72].mxu1 }
 0x2c7   :  { %v1138_v59 = vpop.f32.mrb[73].mxu1 }
 0x2c8   :  { %v1139_v60 = vpop.f32.mrb[74].mxu1  ;;  %4743 = vmatpush3.bf16.msra.mxu0 %v5556_v56 }
 0x2c9   :  { %v1265_v61 = vpack.c.bf16 %v1139_v60, %v1136_v58  ;;  %v1141_v62 = vpop.f32.mrb[75].mxu1  ;;  %4748 = vmatprep.subr.bf16.mxu0 %v5557_v57 }
 0x2cb   :  { %4744 = vmatprep.mubr.msk.bf16.mxu0 %vm1300_vm2, %v1265_v61 }
 0x2ce   :  { %v1144_v63 = vpop.f32.mrb[76].mxu1 }
 0x2cf   :  { %v1146_v0 = vpop.f32.mrb[77].mxu1 }
 0x2d0   :  { %v1147_v43 = vpop.f32.mrb[78].mxu1 }
 0x2d1   :  { %v1266_v45 = vpack.c.bf16 %v1147_v43, %v1144_v63  ;;  %v1149_v1 = vpop.f32.mrb[79].mxu1  ;;  %v5568_v43 = vld [vmem:[%s6745_s4 + $0xf8] sm:$0xff]  }
 0x2d3   :  { %4745 = vmatmul.mubr.msk.bf16.vlgmr.msra.gmra.mrb[52].mxu0 %vm1300_vm2, %v1266_v45 }
 0x2d4   :  { %4749 = vmatpush3.bf16.msra.mxu0 %v5557_v57 }
 0x2d5   :  { %4750 = vmatprep.subr.bf16.mxu0 %v5558_v2 }
 0x2d6   :  { %v1152_v4 = vpop.f32.mrb[80].mxu1 }
 0x2d7   :  { %v1154_v5 = vpop.f32.mrb[81].mxu1 }
 0x2d8   :  { %v1155_v6 = vpop.f32.mrb[82].mxu1  ;;  %4751 = vmatpush3.bf16.msra.mxu0 %v5558_v2  ;;  %v4216_v5 = vld [vmem:[%s6746_s6 + $0x40] sm:$0xff] }
 0x2d9   :  { %v1267_v7 = vpack.c.bf16 %v1155_v6, %v1152_v4  ;;  %v1157_v8 = vpop.f32.mrb[83].mxu1  ;;  %4756 = vmatprep.subr.bf16.mxu0 %v5559_v3  ;;  %v4217_v6 = vld [vmem:[%s6746_s6 + $0x48] sm:$0xff] }
 0x2db   :  { %4752 = vmatprep.mubr.msk.bf16.mxu0 %vm1300_vm2, %v1267_v7 }
 0x2de   :  { %v1160_v9 = vpop.f32.mrb[84].mxu1 }
 0x2df   :  { %v1162_v10 = vpop.f32.mrb[85].mxu1 }
 0x2e0   :  { %v1163_v11 = vpop.f32.mrb[86].mxu1  ;;  %v5120_v10 = vpack.c.bf16 %v4217_v6, %v4216_v5  ;;  %v4273_v5 = vld [vmem:[%s6746_s6 + $0x1d0] sm:$0xff]  ;;  %v4274_v6 = vld [vmem:[%s6746_s6 + $0x1d8] sm:$0xff] }
 0x2e1   :  { %v1268_v12 = vpack.c.bf16 %v1163_v11, %v1160_v9  ;;  %v1165_v13 = vpop.f32.mrb[87].mxu1 }
 0x2e2   :  { %v4218_v13 = vld [vmem:[%s6746_s6 + $0x50] sm:$0xff] }
 0x2e3   :  { %4753 = vmatmul.mubr.msk.bf16.vlgmr.msra.gmra.mrb[52].mxu0 %vm1300_vm2, %v1268_v12 }
 0x2e4   :  { %4757 = vmatpush3.bf16.msra.mxu0 %v5559_v3 }
 0x2e5   :  { %4758 = vmatprep.subr.bf16.mxu0 %v5560_v14 }
 0x2e6   :  { %v1168_v16 = vpop.f32.mrb[88].mxu1 }
 0x2e7   :  { %v1170_v17 = vpop.f32.mrb[89].mxu1 }
 0x2e8   :  { %v1171_v18 = vpop.f32.mrb[90].mxu1  ;;  %4759 = vmatpush3.bf16.msra.mxu0 %v5560_v14  ;;  %v4219_v14 = vld [vmem:[%s6746_s6 + $0x58] sm:$0xff]  ;;  %v4221_v17 = vld [vmem:[%s6746_s6 + $0x68] sm:$0xff] }
 0x2e9   :  { %v1269_v19 = vpack.c.bf16 %v1171_v18, %v1168_v16  ;;  %v1173_v20 = vpop.f32.mrb[91].mxu1  ;;  %4764 = vmatprep.subr.bf16.mxu0 %v5561_v15  ;;  %v4220_v16 = vld [vmem:[%s6746_s6 + $0x60] sm:$0xff] }
 0x2ea   :  { %v5126_v18 = vpack.c.bf16 %v4221_v17, %v4220_v16  ;;  %v4223_v20 = vld [vmem:[%s6746_s6 + $0x78] sm:$0xff]  ;;  %v4277_v17 = vld [vmem:[%s6746_s6 + $0x1f0] sm:$0xff] }
 0x2eb   :  { %4760 = vmatprep.mubr.msk.bf16.mxu0 %vm1300_vm2, %v1269_v19  ;;  %v4222_v19 = vld [vmem:[%s6746_s6 + $0x70] sm:$0xff]  ;;  %v4233_v16 = vld [vmem:[%s6746_s6 + $0xb8] sm:$0xff] }
 0x2ee   :  { %v1176_v21 = vpop.f32.mrb[92].mxu1 }
 0x2ef   :  { %v1178_v22 = vpop.f32.mrb[93].mxu1 }
 0x2f0   :  { %v1179_v23 = vpop.f32.mrb[94].mxu1  ;;  %v5572_v22 = vmov 0.0  }
 0x2f1   :  { %v1270_v24 = vpack.c.bf16 %v1179_v23, %v1176_v21  ;;  %v1181_v25 = vpop.f32.mrb[95].mxu1  ;;  %v5129_v21 = vpack.c.bf16 %v4223_v20, %v4222_v19  ;;  %4869 = vmatprep.mubr.msk.f32.mxu1 %vm5571_vm3, %v5572_v22  ;;  %v6225_v23 = vld [vmem:[%s6747_s5] ss:$0 sm:$0xff] }
 0x2f3   :  { %4761 = vmatmul.mubr.msk.bf16.vlgmr.msra.gmra.mrb[52].mxu0 %vm1300_vm2, %v1270_v24 }
 0x2f4   :  { %4765 = vmatpush3.bf16.msra.mxu0 %v5561_v15  ;;  %v5123_v15 = vpack.c.bf16 %v4219_v14, %v4218_v13 }
 0x2f5   :  { %4766 = vmatprep.subr.bf16.mxu0 %v5562_v26 }
 0x2f6   :  { %v1184_v29 = vpop.f32.mrb[96].mxu1 }
 0x2f7   :  { %v1186_v30 = vpop.f32.mrb[97].mxu1 }
 0x2f8   :  { %v1187_v31 = vpop.f32.mrb[98].mxu1  ;;  %4767 = vmatpush3.bf16.msra.mxu0 %v5562_v26  ;;  %v2502_v26 = vld [vmem:[%s6746_s6] sm:$0xff]  ;;  %v2503_v30 = vld [vmem:[%s6746_s6 + $0x8] sm:$0xff] }
 0x2f9   :  { %v1271_v32 = vpack.c.bf16 %v1187_v31, %v1184_v29  ;;  %v1189_v33 = vpop.f32.mrb[99].mxu1  ;;  %4772 = vmatprep.subr.bf16.mxu0 %v5563_v28  ;;  %v4253_v31 = vld [vmem:[%s6746_s6 + $0x140] sm:$0xff] }
 0x2fb   :  { %4768 = vmatprep.mubr.msk.bf16.mxu0 %vm1300_vm2, %v1271_v32  ;;  %v4254_v32 = vld [vmem:[%s6746_s6 + $0x148] sm:$0xff] }
 0x2fe   :  { %v1192_v34 = vpop.f32.mrb[100].mxu1 }
 0x2ff   :  { %v1194_v35 = vpop.f32.mrb[101].mxu1 }
 0x300   :  { %v1195_v36 = vpop.f32.mrb[102].mxu1 }
 0x301   :  { %v1272_v37 = vpack.c.bf16 %v1195_v36, %v1192_v34  ;;  %v1197_v38 = vpop.f32.mrb[103].mxu1  ;;  %v5132_v36 = vpack.c.bf16 %v2503_v30, %v2502_v26  ;;  %v4289_v26 = vld [vmem:[%s6746_s6 + $0x240] sm:$0xff] }
 0x302   :  { %v2504_v38 = vld [vmem:[%s6746_s6 + $0x10] sm:$0xff] }
 0x303   :  { %4769 = vmatmul.mubr.msk.bf16.vlgmr.msra.gmra.mrb[52].mxu0 %vm1300_vm2, %v1272_v37  ;;  %v5180_v37 = vpack.c.bf16 %v4254_v32, %v4253_v31  ;;  %v4246_v31 = vld [vmem:[%s6746_s6 + $0x110] sm:$0xff] }
 0x304   :  { %4773 = vmatpush3.bf16.msra.mxu0 %v5563_v28 }
 0x305   :  { %4774 = vmatprep.subr.bf16.mxu0 %v5564_v39 }
 0x306   :  { %v1200_v41 = vpop.f32.mrb[104].mxu1 }
 0x307   :  { %v1202_v42 = vpop.f32.mrb[105].mxu1 }
 0x308   :  { %v1203_v44 = vpop.f32.mrb[106].mxu1  ;;  %4775 = vmatpush3.bf16.msra.mxu0 %v5564_v39  ;;  %v4255_v42 = vld [vmem:[%s6746_s6 + $0x150] sm:$0xff] }
 0x309   :  { %v1273_v46 = vpack.c.bf16 %v1203_v44, %v1200_v41  ;;  %v1205_v47 = vpop.f32.mrb[107].mxu1  ;;  %4780 = vmatprep.subr.bf16.mxu0 %v5565_v40  ;;  %v2505_v41 = vld [vmem:[%s6746_s6 + $0x18] sm:$0xff] }
 0x30a   :  { %v4256_v44 = vld [vmem:[%s6746_s6 + $0x158] sm:$0xff] }
 0x30b   :  { %4776 = vmatprep.mubr.msk.bf16.mxu0 %vm1300_vm2, %v1273_v46  ;;  %v5135_v46 = vpack.c.bf16 %v2505_v41, %v2504_v38  ;;  %v5183_v47 = vpack.c.bf16 %v4256_v44, %v4255_v42  ;;  %v4292_v38 = vld [vmem:[%s6746_s6 + $0x258] sm:$0xff]  ;;  %v4249_v41 = vld [vmem:[%s6746_s6 + $0x128] sm:$0xff]  ;;  %v4293_v42 = vld [vmem:[%s6746_s6 + $0x260] sm:$0xff] }
 0x30c   :  { %v4294_v44 = vld [vmem:[%s6746_s6 + $0x268] sm:$0xff] }
 0x30e   :  { %v1208_v48 = vpop.f32.mrb[108].mxu1 }
 0x30f   :  { %v1210_v49 = vpop.f32.mrb[109].mxu1 }
 0x310   :  { %v1211_v50 = vpop.f32.mrb[110].mxu1  ;;  %v2507_v49 = vld [vmem:[%s6746_s6 + $0x28] sm:$0xff] }
 0x311   :  { %v1274_v51 = vpack.c.bf16 %v1211_v50, %v1208_v48  ;;  %v1213_v52 = vpop.f32.mrb[111].mxu1  ;;  %v2506_v48 = vld [vmem:[%s6746_s6 + $0x20] sm:$0xff] }
 0x312   :  { %v4257_v50 = vld [vmem:[%s6746_s6 + $0x160] sm:$0xff]  ;;  %v5138_v52 = vpack.c.bf16 %v2507_v49, %v2506_v48  ;;  %v4250_v48 = vld [vmem:[%s6746_s6 + $0x130] sm:$0xff] }
 0x313   :  { %4777 = vmatmul.mubr.msk.bf16.vlgmr.msra.gmra.mrb[52].mxu0 %vm1300_vm2, %v1274_v51  ;;  %v4258_v51 = vld [vmem:[%s6746_s6 + $0x168] sm:$0xff] }
 0x314   :  { %4781 = vmatpush3.bf16.msra.mxu0 %v5565_v40 }
 0x315   :  { %4782 = vmatprep.subr.bf16.mxu0 %v5566_v53 }
 0x316   :  { %v1216_v55 = vpop.f32.mrb[112].mxu1 }
 0x317   :  { %v1218_v56 = vpop.f32.mrb[113].mxu1 }
 0x318   :  { %v1219_v57 = vpop.f32.mrb[114].mxu1  ;;  %4783 = vmatpush3.bf16.msra.mxu0 %v5566_v53  ;;  %v5186_v53 = vpack.c.bf16 %v4258_v51, %v4257_v50  ;;  %v2509_v56 = vld [vmem:[%s6746_s6 + $0x38] sm:$0xff]  ;;  %v4295_v51 = vld [vmem:[%s6746_s6 + $0x270] sm:$0xff] }
 0x319   :  { %v1275_v58 = vpack.c.bf16 %v1219_v57, %v1216_v55  ;;  %v1221_v59 = vpop.f32.mrb[115].mxu1  ;;  %4788 = vmatprep.subr.bf16.mxu0 %v5567_v54  ;;  %v4259_v57 = vld [vmem:[%s6746_s6 + $0x170] sm:$0xff]  ;;  %v4251_v50 = vld [vmem:[%s6746_s6 + $0x138] sm:$0xff] }
 0x31b   :  { %4784 = vmatprep.mubr.msk.bf16.mxu0 %vm1300_vm2, %v1275_v58  ;;  %v4260_v58 = vld [vmem:[%s6746_s6 + $0x178] sm:$0xff] }
 0x31e   :  { %v1224_v60 = vpop.f32.mrb[116].mxu1 }
 0x31f   :  { %v1226_v61 = vpop.f32.mrb[117].mxu1 }
 0x320   :  { %v1227_v62 = vpop.f32.mrb[118].mxu1  ;;  %v4226_v61 = vld [vmem:[%s6746_s6 + $0x80] sm:$0xff] }
 0x321   :  { %v1276_v63 = vpack.c.bf16 %v1227_v62, %v1224_v60  ;;  %v1229_v0 = vpop.f32.mrb[119].mxu1  ;;  %v5189_v60 = vpack.c.bf16 %v4260_v58, %v4259_v57  ;;  %v4308_v57 = vld [vmem:[%s6746_s6 + $0x2c8] sm:$0xff] }
 0x322   :  { %v4271_v0 = vld [vmem:[%s6746_s6 + $0x1c0] sm:$0xff] }
 0x323   :  { %4785 = vmatmul.mubr.msk.bf16.vlgmr.msra.gmra.mrb[52].mxu0 %vm1300_vm2, %v1276_v63  ;;  %v4227_v63 = vld [vmem:[%s6746_s6 + $0x88] sm:$0xff] }
 0x324   :  { %4789 = vmatpush3.bf16.msra.mxu0 %v5567_v54  ;;  %v2508_v54 = vld [vmem:[%s6746_s6 + $0x30] sm:$0xff] }
 0x325   :  { %4790 = vmatprep.subr.bf16.mxu0 %v5568_v43  ;;  %v5141_v59 = vpack.c.bf16 %v2509_v56, %v2508_v54  ;;  %v4307_v56 = vld [vmem:[%s6746_s6 + $0x2c0] sm:$0xff] }
 0x326   :  { %v1232_v45 = vpop.f32.mrb[120].mxu1 }
 0x327   :  { %v1234_v1 = vpop.f32.mrb[121].mxu1 }
 0x328   :  { %v1235_v2 = vpop.f32.mrb[122].mxu1  ;;  %4791 = vmatpush3.bf16.msra.mxu0 %v5568_v43  ;;  %v4272_v43 = vld [vmem:[%s6746_s6 + $0x1c8] sm:$0xff] }
 0x329   :  { %v1277_v3 = vpack.c.bf16 %v1235_v2, %v1232_v45  ;;  %v1237_v4 = vpop.f32.mrb[123].mxu1  ;;  %5119 = vmatprep.subr.bf16.mxu0 %v5570_v27  ;;  %v5144_v45 = vpack.c.bf16 %v4227_v63, %v4226_v61  ;;  %v5204_v1 = vpack.c.bf16 %v4272_v43, %v4271_v0  ;;  %v4228_v2 = vld [vmem:[%s6746_s6 + $0x90] sm:$0xff]  ;;  %v4265_v63 = vld [vmem:[%s6746_s6 + $0x198] sm:$0xff] }
 0x32a   :  { %v4229_v4 = vld [vmem:[%s6746_s6 + $0x98] sm:$0xff]  ;;  %v4309_v0 = vld [vmem:[%s6746_s6 + $0x2d0] sm:$0xff] }
 0x32b   :  { %4792 = vmatprep.mubr.msk.bf16.mxu0 %vm1300_vm2, %v1277_v3  ;;  %v4310_v43 = vld [vmem:[%s6746_s6 + $0x2d8] sm:$0xff] }
 0x32e   :  { %v1240_v7 = vpop.f32.mrb[124].mxu1 }
 0x32f   :  { %v1242_v8 = vpop.f32.mrb[125].mxu1 }
 0x330   :  { %v1243_v9 = vpop.f32.mrb[126].mxu1  ;;  %v5207_v8 = vpack.c.bf16 %v4274_v6, %v4273_v5  ;;  %v4312_v5 = vld [vmem:[%s6746_s6 + $0x2e8] sm:$0xff] }
 0x331   :  { %v1278_v11 = vpack.c.bf16 %v1243_v9, %v1240_v7  ;;  %v1245_v12 = vpop.f32.mrb[127].mxu1  ;;  %v5147_v7 = vpack.c.bf16 %v4229_v4, %v4228_v2  ;;  %v4230_v9 = vld [vmem:[%s6746_s6 + $0xa0] sm:$0xff] }
 0x332   :  { %v4276_v12 = vld [vmem:[%s6746_s6 + $0x1e8] sm:$0xff]  ;;  %v4266_v2 = vld [vmem:[%s6746_s6 + $0x1a0] sm:$0xff] }
 0x333   :  { %4793 = vmatmul.mubr.msk.bf16.vlgmr.msra.gmra.mrb[52].mxu0 %vm1300_vm2, %v1278_v11  ;;  %v4275_v11 = vld [vmem:[%s6746_s6 + $0x1e0] sm:$0xff] }
 0x334   :  { %5121 = vmatpush3.bf16.msra.mxu0 %v5120_v10  ;;  %4812 = vmatprep.mubr.msk.f32.mxu0 %vm5571_vm3, %v5572_v22  ;;  %v4231_v10 = vld [vmem:[%s6746_s6 + $0xa8] sm:$0xff]  ;;  %v5210_v14 = vpack.c.bf16 %v4276_v12, %v4275_v11  ;;  %v4311_v4 = vld [vmem:[%s6746_s6 + $0x2e0] sm:$0xff]  ;;  %v4314_v11 = vld [vmem:[%s6746_s6 + $0x2f8] sm:$0xff] }
 0x335   :  { %5122 = vmatprep.subr.bf16.mxu0 %v5570_v27  ;;  %v5150_v13 = vpack.c.bf16 %v4231_v10, %v4230_v9  ;;  %v4269_v9 = vld [vmem:[%s6746_s6 + $0x1b8] sm:$0xff]  ;;  %v4313_v10 = vld [vmem:[%s6746_s6 + $0x2f0] sm:$0xff] }
 0x338   :  { %5124 = vmatpush3.bf16.msra.mxu0 %v5123_v15  ;;  %v4232_v15 = vld [vmem:[%s6746_s6 + $0xb0] sm:$0xff] }
 0x339   :  { %5125 = vmatprep.subr.bf16.mxu0 %v5570_v27  ;;  %v5153_v19 = vpack.c.bf16 %v4233_v16, %v4232_v15  ;;  %v4281_v15 = vld [vmem:[%s6746_s6 + $0x208] sm:$0xff]  ;;  %v4325_v16 = vld [vmem:[%s6746_s6 + $0x340] sm:$0xff] }
 0x33c   :  { %5127 = vmatpush3.bf16.msra.mxu0 %v5126_v18  ;;  %v4278_v18 = vld [vmem:[%s6746_s6 + $0x1f8] sm:$0xff] }
 0x33d   :  { %5128 = vmatprep.subr.bf16.mxu0 %v5570_v27  ;;  %v5213_v20 = vpack.c.bf16 %v4278_v18, %v4277_v17  ;;  %v4326_v17 = vld [vmem:[%s6746_s6 + $0x348] sm:$0xff] }
 0x340   :  { %5130 = vmatpush3.bf16.msra.mxu0 %v5129_v21  ;;  %v4244_v21 = vld [vmem:[%s6746_s6 + $0x100] sm:$0xff] }
 0x341   :  { %5131 = vmatprep.subr.bf16.mxu0 %v5570_v27 }
 0x406   :  { %v6227_v24 = vpop.f32.mrb[52].mxu0 }
 0x407   :  { %v2468_v25 = vpop.f32.mrb[53].mxu0  ;;  %v2496_v49 = vadd.f32 %v6227_v24, %v6225_v23  ;;  %v4262_v24 = vld [vmem:[%s6746_s6 + $0x180] sm:$0xff] }
 0x408   :  { %v2494_v28 = vadd.f32 %v6225_v23, %v2468_v25  ;;  %v4795_v29 = vpop.f32.mrb[54].mxu0  ;;  %v4245_v25 = vld [vmem:[%s6746_s6 + $0x108] sm:$0xff] }
 0x409   :  { %v6243_v33 = vadd.f32 %v4795_v29, %v6225_v23  ;;  %v2471_v34 = vpop.f32.mrb[55].mxu0  ;;  %v5168_v29 = vpack.c.bf16 %v4245_v25, %v4244_v21  ;;  %v6431_v54 = vmax.f32 %v2496_v49, 0.0  ;;  %v4343_v49 = vld [vmem:[%s6746_s6 + $0x3c0] sm:$0xff] }
 0x40a   :  { %v6245_v35 = vmax.f32 %v2494_v28, 0.0  ;;  %v2495_v55 = vadd.f32 %v6225_v23, %v2471_v34  ;;  %v4290_v28 = vld [vmem:[%s6746_s6 + $0x248] sm:$0xff] }
 0x40b   :  { %v5228_v30 = vpack.c.bf16 %v4290_v28, %v4289_v26  ;;  %v3256_v61 = vrot.slane %v6431_v54, 2  ;;  %v3422_v21 = vrot.slane %v6431_v54, 6  ;;  %v4283_v26 = vld [vmem:[%s6746_s6 + $0x218] sm:$0xff]  ;;  %v4327_v28 = vld [vmem:[%s6746_s6 + $0x350] sm:$0xff] }
 0x40c   :  { %v2520_v39 = vrot.slane %v6245_v35, 2  ;;  %v2758_v40 = vrot.slane %v6245_v35, 6  ;;  %v6299_v62 = vmax.f32 %v2495_v55, 0.0  ;;  %v2675_v32 = vrot.slane %v6245_v35, 4  ;;  %v4263_v55 = vld [vmem:[%s6746_s6 + $0x188] sm:$0xff] }
 0x40d   :  { %v5192_v58 = vpack.c.bf16 %v4263_v55, %v4262_v24  ;;  %v4345_v24 = vld [vmem:[%s6746_s6 + $0x3d0] sm:$0xff]  ;;  %v4346_v55 = vld [vmem:[%s6746_s6 + $0x3d8] sm:$0xff] }
 0x40e   :  { %4813 = vmatmul.mubr.msk.f32.vlgmr.msra.gmra.mrb[56].mxu0 %vm2521_vm4, %v2520_v39  ;;  %4870 = vmatmul.mubr.msk.f32.vlgmr.msra.gmra.mrb[128].mxu1 %vm2521_vm4, %v2758_v40  ;;  %v2924_v3 = vrot.slane %v6299_v62, 2  ;;  %v3090_v34 = vrot.slane %v6299_v62, 6  ;;  %v4248_v40 = vld [vmem:[%s6746_s6 + $0x120] sm:$0xff]  ;;  %v3007_v25 = vrot.slane %v6299_v62, 4 }
 0x40f   :  { %5133 = vmatpush3.bf16.msra.mxu0 %v5132_v36  ;;  %5181 = vmatpush3.bf16.msra.mxu1 %v5180_v37  ;;  %v4247_v36 = vld [vmem:[%s6746_s6 + $0x118] sm:$0xff]  ;;  %v4291_v37 = vld [vmem:[%s6746_s6 + $0x250] sm:$0xff] }
 0x410   :  { %5134 = vmatprep.subr.bf16.mxu0 %v5570_v27  ;;  %5182 = vmatprep.subr.bf16.mxu1 %v5570_v27  ;;  %v5231_v39 = vpack.c.bf16 %v4292_v38, %v4291_v37 }
 0x411   :  { %4831 = vmatprep.mubr.msk.f32.mxu0 %vm5571_vm3, %v5572_v22  ;;  %4907 = vmatprep.mubr.msk.f32.mxu1 %vm5571_vm3, %v5572_v22 }
 0x413   :  { %5136 = vmatpush3.bf16.msra.mxu0 %v5135_v46  ;;  %5184 = vmatpush3.bf16.msra.mxu1 %v5183_v47  ;;  %v5174_v46 = vpack.c.bf16 %v4249_v41, %v4248_v40  ;;  %v5234_v47 = vpack.c.bf16 %v4294_v44, %v4293_v42  ;;  %v4331_v40 = vld [vmem:[%s6746_s6 + $0x370] sm:$0xff]  ;;  %v4332_v41 = vld [vmem:[%s6746_s6 + $0x378] sm:$0xff] }
 0x414   :  { %5137 = vmatprep.subr.bf16.mxu0 %v5570_v27  ;;  %5185 = vmatprep.subr.bf16.mxu1 %v5570_v27  ;;  %v5285_v44 = vpack.c.bf16 %v4332_v41, %v4331_v40  ;;  %v3842_v41 = vld [vmem:[%s6748_s8 + $0x28] sm:$0xff] }
 0x417   :  { %5139 = vmatpush3.bf16.msra.mxu0 %v5138_v52  ;;  %5187 = vmatpush3.bf16.msra.mxu1 %v5186_v53  ;;  %v4296_v52 = vld [vmem:[%s6746_s6 + $0x278] sm:$0xff]  ;;  %v5177_v53 = vpack.c.bf16 %v4251_v50, %v4250_v48  ;;  %v4299_v48 = vld [vmem:[%s6746_s6 + $0x288] sm:$0xff] }
 0x418   :  { %5140 = vmatprep.subr.bf16.mxu0 %v5570_v27  ;;  %5188 = vmatprep.subr.bf16.mxu1 %v5570_v27  ;;  %v5237_v23 = vpack.c.bf16 %v4296_v52, %v4295_v51  ;;  %v4344_v50 = vld [vmem:[%s6746_s6 + $0x3c8] sm:$0xff]  ;;  %v4300_v52 = vld [vmem:[%s6746_s6 + $0x290] sm:$0xff] }
 0x419   :  { %v5300_v51 = vpack.c.bf16 %v4344_v50, %v4343_v49  ;;  %v3843_v49 = vld [vmem:[%s6748_s8 + $0x30] sm:$0xff]  ;;  %v3844_v50 = vld [vmem:[%s6748_s8 + $0x38] sm:$0xff] }
 0x41b   :  { %5142 = vmatpush3.bf16.msra.mxu0 %v5141_v59  ;;  %5190 = vmatpush3.bf16.msra.mxu1 %v5189_v60  ;;  %v5252_v59 = vpack.c.bf16 %v4308_v57, %v4307_v56  ;;  %v4264_v60 = vld [vmem:[%s6746_s6 + $0x190] sm:$0xff]  ;;  %v5303_v57 = vpack.c.bf16 %v4346_v55, %v4345_v24 }
 0x41c   :  { %5143 = vmatprep.subr.bf16.mxu0 %v5570_v27  ;;  %5203 = vmatprep.subr.bf16.mxu1 %v5570_v27 }
 0x41e   :  { %4832 = vmatmul.mubr.msk.f32.vlgmr.msra.gmra.mrb[58].mxu0 %vm2521_vm4, %v6245_v35  ;;  %4908 = vmatmul.mubr.msk.f32.vlgmr.msra.gmra.mrb[130].mxu1 %vm2521_vm4, %v2924_v3  ;;  %v5171_v35 = vpack.c.bf16 %v4247_v36, %v4246_v31  ;;  %v4267_v3 = vld [vmem:[%s6746_s6 + $0x1a8] sm:$0xff]  ;;  %v4284_v31 = vld [vmem:[%s6746_s6 + $0x220] sm:$0xff] }
 0x41f   :  { %5145 = vmatpush3.bf16.msra.mxu0 %v5144_v45  ;;  %5205 = vmatpush3.bf16.msra.mxu1 %v5204_v1  ;;  %v5195_v45 = vpack.c.bf16 %v4265_v63, %v4264_v60  ;;  %v5255_v1 = vpack.c.bf16 %v4310_v43, %v4309_v0  ;;  %v5198_v6 = vpack.c.bf16 %v4267_v3, %v4266_v2  ;;  %v4330_v36 = vld [vmem:[%s6746_s6 + $0x368] sm:$0xff]  ;;  %v4347_v60 = vld [vmem:[%s6746_s6 + $0x3e0] sm:$0xff]  ;;  %v4304_v43 = vld [vmem:[%s6746_s6 + $0x2b0] sm:$0xff] }
 0x420   :  { %5146 = vmatprep.subr.bf16.mxu0 %v5570_v27  ;;  %5206 = vmatprep.subr.bf16.mxu1 %v5570_v27  ;;  %v4350_v2 = vld [vmem:[%s6746_s6 + $0x3f8] sm:$0xff] }
 0x421   :  { %4850 = vmatprep.mubr.msk.f32.mxu0 %vm5571_vm3, %v5572_v22  ;;  %4945 = vmatprep.mubr.msk.f32.mxu1 %vm5571_vm3, %v5572_v22 }
 0x423   :  { %5148 = vmatpush3.bf16.msra.mxu0 %v5147_v7  ;;  %5208 = vmatpush3.bf16.msra.mxu1 %v5207_v8  ;;  %v5258_v7 = vpack.c.bf16 %v4312_v5, %v4311_v4  ;;  %v4268_v8 = vld [vmem:[%s6746_s6 + $0x1b0] sm:$0xff]  ;;  %v4316_v5 = vld [vmem:[%s6746_s6 + $0x300] sm:$0xff] }
 0x424   :  { %5149 = vmatprep.subr.bf16.mxu0 %v5570_v27  ;;  %5209 = vmatprep.subr.bf16.mxu1 %v5570_v27  ;;  %v5201_v12 = vpack.c.bf16 %v4269_v9, %v4268_v8  ;;  %v3339_v8 = vrot.slane %v6431_v54, 4 }
 0x427   :  { %5151 = vmatpush3.bf16.msra.mxu0 %v5150_v13  ;;  %5211 = vmatpush3.bf16.msra.mxu1 %v5210_v14  ;;  %v5261_v13 = vpack.c.bf16 %v4314_v11, %v4313_v10  ;;  %v4280_v14 = vld [vmem:[%s6746_s6 + $0x200] sm:$0xff]  ;;  %v4318_v10 = vld [vmem:[%s6746_s6 + $0x310] sm:$0xff]  ;;  %v4319_v11 = vld [vmem:[%s6746_s6 + $0x318] sm:$0xff] }
 0x428   :  { %5152 = vmatprep.subr.bf16.mxu0 %v5570_v27  ;;  %5212 = vmatprep.subr.bf16.mxu1 %v5570_v27  ;;  %v5216_v18 = vpack.c.bf16 %v4281_v15, %v4280_v14  ;;  %v4322_v15 = vld [vmem:[%s6746_s6 + $0x330] sm:$0xff] }
 0x42b   :  { %5154 = vmatpush3.bf16.msra.mxu0 %v5153_v19  ;;  %5214 = vmatpush3.bf16.msra.mxu1 %v5213_v20  ;;  %v5276_v19 = vpack.c.bf16 %v4326_v17, %v4325_v16  ;;  %v4282_v20 = vld [vmem:[%s6746_s6 + $0x210] sm:$0xff]  ;;  %v4323_v16 = vld [vmem:[%s6746_s6 + $0x338] sm:$0xff] }
 0x42c   :  { %5167 = vmatprep.subr.bf16.mxu0 %v5570_v27  ;;  %5227 = vmatprep.subr.bf16.mxu1 %v5570_v27  ;;  %v5273_v17 = vpack.c.bf16 %v4323_v16, %v4322_v15 }
 0x42e   :  { %4851 = vmatmul.mubr.msk.f32.vlgmr.msra.gmra.mrb[60].mxu0 %vm2521_vm4, %v2675_v32  ;;  %4946 = vmatmul.mubr.msk.f32.vlgmr.msra.gmra.mrb[132].mxu1 %vm2521_vm4, %v3090_v34  ;;  %v4285_v32 = vld [vmem:[%s6746_s6 + $0x228] sm:$0xff]  ;;  %v4329_v34 = vld [vmem:[%s6746_s6 + $0x360] sm:$0xff] }
 0x42f   :  { %5169 = vmatpush3.bf16.msra.mxu0 %v5168_v29  ;;  %5229 = vmatpush3.bf16.msra.mxu1 %v5228_v30  ;;  %v4328_v29 = vld [vmem:[%s6746_s6 + $0x358] sm:$0xff]  ;;  %v5222_v37 = vpack.c.bf16 %v4285_v32, %v4284_v31  ;;  %v5282_v38 = vpack.c.bf16 %v4330_v36, %v4329_v34  ;;  %v3837_v36 = vld [vmem:[%s6748_s8] sm:$0xff] }
 0x430   :  { %5170 = vmatprep.subr.bf16.mxu0 %v5570_v27  ;;  %5230 = vmatprep.subr.bf16.mxu1 %v5570_v27  ;;  %v5279_v30 = vpack.c.bf16 %v4328_v29, %v4327_v28  ;;  %v4338_v28 = vld [vmem:[%s6746_s6 + $0x3a0] sm:$0xff]  ;;  %v4339_v29 = vld [vmem:[%s6746_s6 + $0x3a8] sm:$0xff]  ;;  %v4341_v31 = vld [vmem:[%s6746_s6 + $0x3b8] sm:$0xff] }
 0x431   :  { %4888 = vmatprep.mubr.msk.f32.mxu0 %vm5571_vm3, %v5572_v22  ;;  %4983 = vmatprep.mubr.msk.f32.mxu1 %vm5571_vm3, %v5572_v22 }
 0x433   :  { %5172 = vmatpush3.bf16.msra.mxu0 %v5171_v35  ;;  %5232 = vmatpush3.bf16.msra.mxu1 %v5231_v39  ;;  %v4286_v35 = vld [vmem:[%s6746_s6 + $0x230] sm:$0xff]  ;;  %v4287_v39 = vld [vmem:[%s6746_s6 + $0x238] sm:$0xff] }
 0x434   :  { %5173 = vmatprep.subr.bf16.mxu0 %v5570_v27  ;;  %5233 = vmatprep.subr.bf16.mxu1 %v5570_v27  ;;  %v5225_v42 = vpack.c.bf16 %v4287_v39, %v4286_v35  ;;  %v3840_v39 = vld [vmem:[%s6748_s8 + $0x18] sm:$0xff] }
 0x437   :  { %5175 = vmatpush3.bf16.msra.mxu0 %v5174_v46  ;;  %5235 = vmatpush3.bf16.msra.mxu1 %v5234_v47  ;;  %v4298_v46 = vld [vmem:[%s6746_s6 + $0x280] sm:$0xff]  ;;  %v6562_v47 = vmax.f32 %v6243_v33, 0.0 }
 0x438   :  { %5176 = vmatprep.subr.bf16.mxu0 %v5570_v27  ;;  %5236 = vmatprep.subr.bf16.mxu1 %v5570_v27  ;;  %v5240_v33 = vpack.c.bf16 %v4299_v48, %v4298_v46 }
 0x439   :  { %v3754_v9 = vrot.slane %v6562_v47, 6  ;;  %v3671_v34 = vrot.slane %v6562_v47, 4 }
 0x43b   :  { %5178 = vmatpush3.bf16.msra.mxu0 %v5177_v53  ;;  %5238 = vmatpush3.bf16.msra.mxu1 %v5237_v23  ;;  %v3588_v53 = vrot.slane %v6562_v47, 2  ;;  %v4301_v23 = vld [vmem:[%s6746_s6 + $0x298] sm:$0xff] }
 0x43c   :  { %5191 = vmatprep.subr.bf16.mxu0 %v5570_v27  ;;  %5251 = vmatprep.subr.bf16.mxu1 %v5570_v27  ;;  %v5243_v56 = vpack.c.bf16 %v4301_v23, %v4300_v52 }
 0x43e   :  { %4889 = vmatmul.mubr.msk.f32.vlgmr.msra.gmra.mrb[62].mxu0 %vm2521_vm4, %v6299_v62  ;;  %4984 = vmatmul.mubr.msk.f32.vlgmr.msra.gmra.mrb[134].mxu1 %vm2521_vm4, %v3256_v61  ;;  %v5219_v62 = vpack.c.bf16 %v4283_v26, %v4282_v20  ;;  %v4348_v61 = vld [vmem:[%s6746_s6 + $0x3e8] sm:$0xff] }
 0x43f   :  { %5193 = vmatpush3.bf16.msra.mxu0 %v5192_v58  ;;  %5253 = vmatpush3.bf16.msra.mxu1 %v5252_v59  ;;  %v4302_v58 = vld [vmem:[%s6746_s6 + $0x2a0] sm:$0xff]  ;;  %v4303_v59 = vld [vmem:[%s6746_s6 + $0x2a8] sm:$0xff]  ;;  %v5306_v0 = vpack.c.bf16 %v4348_v61, %v4347_v60 }
 0x440   :  { %5194 = vmatprep.subr.bf16.mxu0 %v5570_v27  ;;  %5254 = vmatprep.subr.bf16.mxu1 %v5570_v27  ;;  %v5246_v63 = vpack.c.bf16 %v4303_v59, %v4302_v58 }
 0x441   :  { %4926 = vmatprep.mubr.msk.f32.mxu0 %vm5571_vm3, %v5572_v22  ;;  %5021 = vmatprep.mubr.msk.f32.mxu1 %vm5571_vm3, %v5572_v22 }
 0x443   :  { %5196 = vmatpush3.bf16.msra.mxu0 %v5195_v45  ;;  %5256 = vmatpush3.bf16.msra.mxu1 %v5255_v1  ;;  %v4305_v45 = vld [vmem:[%s6746_s6 + $0x2b8] sm:$0xff]  ;;  %v4349_v1 = vld [vmem:[%s6746_s6 + $0x3f0] sm:$0xff] }
 0x444   :  { %5197 = vmatprep.subr.bf16.mxu0 %v5570_v27  ;;  %5257 = vmatprep.subr.bf16.mxu1 %v5570_v27  ;;  %v5249_v3 = vpack.c.bf16 %v4305_v45, %v4304_v43  ;;  %v5309_v4 = vpack.c.bf16 %v4350_v2, %v4349_v1 }
 0x447   :  { %5199 = vmatpush3.bf16.msra.mxu0 %v5198_v6  ;;  %5259 = vmatpush3.bf16.msra.mxu1 %v5258_v7  ;;  %v4317_v6 = vld [vmem:[%s6746_s6 + $0x308] sm:$0xff] }
 0x448   :  { %5200 = vmatprep.subr.bf16.mxu0 %v5570_v27  ;;  %5260 = vmatprep.subr.bf16.mxu1 %v5570_v27  ;;  %v5264_v7 = vpack.c.bf16 %v4317_v6, %v4316_v5 }
 0x44b   :  { %5202 = vmatpush3.bf16.msra.mxu0 %v5201_v12  ;;  %5262 = vmatpush3.bf16.msra.mxu1 %v5261_v13  ;;  %v5267_v12 = vpack.c.bf16 %v4319_v11, %v4318_v10  ;;  %v4321_v13 = vld [vmem:[%s6746_s6 + $0x328] sm:$0xff] }
 0x44c   :  { %5215 = vmatprep.subr.bf16.mxu0 %v5570_v27  ;;  %5275 = vmatprep.subr.bf16.mxu1 %v5570_v27 }
 0x44e   :  { %4927 = vmatmul.mubr.msk.f32.vlgmr.msra.gmra.mrb[64].mxu0 %vm2521_vm4, %v3007_v25  ;;  %5022 = vmatmul.mubr.msk.f32.vlgmr.msra.gmra.mrb[136].mxu1 %vm2521_vm4, %v3422_v21  ;;  %v4336_v21 = vld [vmem:[%s6746_s6 + $0x390] sm:$0xff]  ;;  %v4337_v25 = vld [vmem:[%s6746_s6 + $0x398] sm:$0xff] }
 0x44f   :  { %5217 = vmatpush3.bf16.msra.mxu0 %v5216_v18  ;;  %5277 = vmatpush3.bf16.msra.mxu1 %v5276_v19  ;;  %v4334_v18 = vld [vmem:[%s6746_s6 + $0x380] sm:$0xff]  ;;  %v4335_v19 = vld [vmem:[%s6746_s6 + $0x388] sm:$0xff]  ;;  %v5291_v26 = vpack.c.bf16 %v4337_v25, %v4336_v21 }
 0x450   :  { %5218 = vmatprep.subr.bf16.mxu0 %v5570_v27  ;;  %5278 = vmatprep.subr.bf16.mxu1 %v5570_v27  ;;  %v5288_v20 = vpack.c.bf16 %v4335_v19, %v4334_v18 }
 0x451   :  { %4964 = vmatprep.mubr.msk.f32.mxu0 %vm5571_vm3, %v5572_v22  ;;  %5059 = vmatprep.mubr.msk.f32.mxu1 %vm5571_vm3, %v5572_v22 }
 0x453   :  { %5220 = vmatpush3.bf16.msra.mxu0 %v5219_v62  ;;  %5280 = vmatpush3.bf16.msra.mxu1 %v5279_v30  ;;  %v5294_v62 = vpack.c.bf16 %v4339_v29, %v4338_v28  ;;  %v4340_v30 = vld [vmem:[%s6746_s6 + $0x3b0] sm:$0xff]  ;;  %v4352_v29 = vld [vmem:[%s6749_s7] ss:$0 sm:$0xff] }
 0x454   :  { %5221 = vmatprep.subr.bf16.mxu0 %v5570_v27  ;;  %5281 = vmatprep.subr.bf16.mxu1 %v5570_v27  ;;  %v5297_v32 = vpack.c.bf16 %v4341_v31, %v4340_v30 }
 0x457   :  { %5223 = vmatpush3.bf16.msra.mxu0 %v5222_v37  ;;  %5283 = vmatpush3.bf16.msra.mxu1 %v5282_v38  ;;  %v3838_v37 = vld [vmem:[%s6748_s8 + $0x8] sm:$0xff]  ;;  %v3839_v38 = vld [vmem:[%s6748_s8 + $0x10] sm:$0xff] }
 0x458   :  { %5224 = vmatprep.subr.bf16.mxu0 %v5570_v27  ;;  %5284 = vmatprep.subr.bf16.mxu1 %v5570_v27  ;;  %v5312_v35 = vpack.c.bf16 %v3838_v37, %v3837_v36  ;;  %v5315_v40 = vpack.c.bf16 %v3840_v39, %v3839_v38 }
 0x45b   :  { %5226 = vmatpush3.bf16.msra.mxu0 %v5225_v42  ;;  %5286 = vmatpush3.bf16.msra.mxu1 %v5285_v44 }
 0x45c   :  { %5239 = vmatprep.subr.bf16.mxu0 %v5570_v27  ;;  %5299 = vmatprep.subr.bf16.mxu1 %v5570_v27 }
 0x45e   :  { %4965 = vmatmul.mubr.msk.f32.vlgmr.msra.gmra.mrb[66].mxu0 %vm2521_vm4, %v6431_v54  ;;  %5060 = vmatmul.mubr.msk.f32.vlgmr.msra.gmra.mrb[138].mxu1 %vm2521_vm4, %v3588_v53  ;;  %v4320_v54 = vld [vmem:[%s6746_s6 + $0x320] sm:$0xff] }
 0x45f   :  { %5241 = vmatpush3.bf16.msra.mxu0 %v5240_v33  ;;  %5301 = vmatpush3.bf16.msra.mxu1 %v5300_v51  ;;  %v5270_v14 = vpack.c.bf16 %v4321_v13, %v4320_v54  ;;  %v5321_v33 = vpack.c.bf16 %v3844_v50, %v3843_v49 }
 0x460   :  { %5242 = vmatprep.subr.bf16.mxu0 %v5570_v27  ;;  %5302 = vmatprep.subr.bf16.mxu1 %v5570_v27 }
 0x461   :  { %5002 = vmatprep.mubr.msk.f32.mxu0 %vm5571_vm3, %v5572_v22  ;;  %5097 = vmatprep.mubr.msk.f32.mxu1 %vm5571_vm3, %v5572_v22 }
 0x463   :  { %5244 = vmatpush3.bf16.msra.mxu0 %v5243_v56  ;;  %5304 = vmatpush3.bf16.msra.mxu1 %v5303_v57 }
 0x464   :  { %5245 = vmatprep.subr.bf16.mxu0 %v5570_v27  ;;  %5305 = vmatprep.subr.bf16.mxu1 %v5570_v27 }
 0x467   :  { %5247 = vmatpush3.bf16.msra.mxu0 %v5246_v63  ;;  %5307 = vmatpush3.bf16.msra.mxu1 %v5306_v0 }
 0x468   :  { %5248 = vmatprep.subr.bf16.mxu0 %v5570_v27  ;;  %5308 = vmatprep.subr.bf16.mxu1 %v5570_v27 }
 0x46b   :  { %5250 = vmatpush3.bf16.msra.mxu0 %v5249_v3  ;;  %5310 = vmatpush3.bf16.msra.mxu1 %v5309_v4 }
 0x46c   :  { %5263 = vmatprep.subr.bf16.mxu0 %v5570_v27 }
 0x46e   :  { %5003 = vmatmul.mubr.msk.f32.vlgmr.msra.gmra.mrb[68].mxu0 %vm2521_vm4, %v3339_v8  ;;  %5098 = vmatmul.mubr.msk.f32.vlgmr.msra.gmra.mrb[140].mxu1 %vm2521_vm4, %v3754_v9 }
 0x46f   :  { %5265 = vmatpush3.bf16.msra.mxu0 %v5264_v7  ;;  %5040 = vmatprep.mubr.msk.f32.mxu0 %vm5571_vm3, %v5572_v22 }
 0x470   :  { %5266 = vmatprep.subr.bf16.mxu0 %v5570_v27 }
 0x473   :  { %5268 = vmatpush3.bf16.msra.mxu0 %v5267_v12 }
 0x474   :  { %5269 = vmatprep.subr.bf16.mxu0 %v5570_v27 }
 0x477   :  { %5271 = vmatpush3.bf16.msra.mxu0 %v5270_v14 }
 0x478   :  { %5272 = vmatprep.subr.bf16.mxu0 %v5570_v27 }
 0x47b   :  { %5274 = vmatpush3.bf16.msra.mxu0 %v5273_v17 }
 0x47c   :  { %5287 = vmatprep.subr.bf16.mxu0 %v5570_v27 }
 0x47e   :  { %5041 = vmatmul.mubr.msk.f32.vlgmr.msra.gmra.mrb[70].mxu0 %vm2521_vm4, %v6562_v47 }
 0x47f   :  { %5289 = vmatpush3.bf16.msra.mxu0 %v5288_v20  ;;  %5078 = vmatprep.mubr.msk.f32.mxu0 %vm5571_vm3, %v5572_v22 }
 0x480   :  { %5290 = vmatprep.subr.bf16.mxu0 %v5570_v27 }
 0x483   :  { %5292 = vmatpush3.bf16.msra.mxu0 %v5291_v26 }
 0x484   :  { %5293 = vmatprep.subr.bf16.mxu0 %v5570_v27 }
 0x487   :  { %5295 = vmatpush3.bf16.msra.mxu0 %v5294_v62 }
 0x488   :  { %5296 = vmatprep.subr.bf16.mxu0 %v5570_v27 }
 0x48b   :  { %5298 = vmatpush3.bf16.msra.mxu0 %v5297_v32  ;;  %v17_v32 = vstv %s6750_s11 }
 0x48c   :  { %5311 = vmatprep.subr.bf16.mxu0 %v5570_v27  ;;  %18 = vst [vmem:[#allocation2] sm:$0x1] %v17_v32 }
 0x48e   :  { %5079 = vmatmul.mubr.msk.f32.vlgmr.msra.gmra.mrb[72].mxu0 %vm2521_vm4, %v3671_v34  ;;  %v4353_v34 = vld [vmem:[%s6751_s9] ss:$0 sm:$0xff] }
 0x48f   :  { %5116 = vmatprep.mubr.msk.f32.mxu0 %vm5571_vm3, %v5572_v22  ;;  %5313 = vmatpush3.bf16.msra.mxu0 %v5312_v35  ;;  %v3841_v22 = vld [vmem:[%s6748_s8 + $0x20] sm:$0xff] }
 0x490   :  { %5314 = vmatprep.subr.bf16.mxu0 %v5570_v27  ;;  %v5318_v46 = vpack.c.bf16 %v3842_v41, %v3841_v22  ;;  %v4355_v35 = vld [vmem:[%s6752_s10] ss:$0 sm:$0xff] }
 0x493   :  { %5316 = vmatpush3.bf16.msra.mxu0 %v5315_v40  ;;  %v4356_v41 = vld [vmem:[#allocation2] ss:$0 sm:$0xff] }
 0x494   :  { %5317 = vmatprep.subr.bf16.mxu0 %v5570_v27 }
 0x497   :  { %5319 = vmatpush3.bf16.msra.mxu0 %v5318_v46 }
 0x498   :  { %5320 = vmatprep.subr.bf16.mxu0 %v5570_v27 }
 0x49b   :  { %5322 = vmatpush3.bf16.msra.mxu0 %v5321_v33 }
 0x4e1   :  { %v2590_v42 = vpop.f32.mrb[56].mxu0  ;;  %v2827_v44 = vpop.f32.mrb[128].mxu1 }
 0x4e2   :  { %v4814_v47 = vpop.f32.mrb[57].mxu0  ;;  %v4871_v48 = vpop.f32.mrb[129].mxu1 }
 0x4f1   :  { %v2662_v51 = vpop.f32.mrb[58].mxu0  ;;  %v2993_v52 = vpop.f32.mrb[130].mxu1 }
 0x4f2   :  { %v2663_v53 = vadd.f32 %v2662_v51, %v2590_v42  ;;  %v4833_v23 = vpop.f32.mrb[59].mxu0  ;;  %v4909_v24 = vpop.f32.mrb[131].mxu1 }
 0x501   :  { %v2744_v55 = vpop.f32.mrb[60].mxu0  ;;  %v3159_v56 = vpop.f32.mrb[132].mxu1 }
 0x502   :  { %v2748_v57 = vadd.f32 %v2744_v55, %v2663_v53  ;;  %v4852_v58 = vpop.f32.mrb[61].mxu0  ;;  %v4947_v27 = vpop.f32.mrb[133].mxu1 }
 0x504   :  { %v2831_v59 = vadd.f32 %v2827_v44, %v2748_v57 }
 0x511   :  { %v2910_v60 = vpop.f32.mrb[62].mxu0  ;;  %v3325_v61 = vpop.f32.mrb[134].mxu1 }
 0x512   :  { %v2914_v63 = vadd.f32 %v2910_v60, %v2831_v59  ;;  %v4890_v0 = vpop.f32.mrb[63].mxu0  ;;  %v4985_v43 = vpop.f32.mrb[135].mxu1 }
 0x514   :  { %v2997_v45 = vadd.f32 %v2993_v52, %v2914_v63 }
 0x521   :  { %v3076_v1 = vpop.f32.mrb[64].mxu0  ;;  %v3491_v2 = vpop.f32.mrb[136].mxu1 }
 0x522   :  { %v3080_v3 = vadd.f32 %v3076_v1, %v2997_v45  ;;  %v4928_v4 = vpop.f32.mrb[65].mxu0  ;;  %v5023_v5 = vpop.f32.mrb[137].mxu1 }
 0x524   :  { %v3163_v6 = vadd.f32 %v3159_v56, %v3080_v3 }
 0x531   :  { %v3242_v7 = vpop.f32.mrb[66].mxu0  ;;  %v3657_v8 = vpop.f32.mrb[138].mxu1 }
 0x532   :  { %v3246_v9 = vadd.f32 %v3242_v7, %v3163_v6  ;;  %v4966_v10 = vpop.f32.mrb[67].mxu0  ;;  %v5061_v11 = vpop.f32.mrb[139].mxu1 }
 0x534   :  { %v3329_v12 = vadd.f32 %v3325_v61, %v3246_v9 }
 0x541   :  { %v3408_v54 = vpop.f32.mrb[68].mxu0  ;;  %v3823_v13 = vpop.f32.mrb[140].mxu1 }
 0x542   :  { %v3412_v14 = vadd.f32 %v3408_v54, %v3329_v12  ;;  %v5004_v15 = vpop.f32.mrb[69].mxu0  ;;  %v5099_v16 = vpop.f32.mrb[141].mxu1 }
 0x544   :  { %v3495_v17 = vadd.f32 %v3491_v2, %v3412_v14 }
 0x551   :  { %v3574_v18 = vpop.f32.mrb[70].mxu0 }
 0x552   :  { %v3578_v19 = vadd.f32 %v3574_v18, %v3495_v17  ;;  %v5042_v20 = vpop.f32.mrb[71].mxu0 }
 0x554   :  { %v3661_v21 = vadd.f32 %v3657_v8, %v3578_v19 }
 0x561   :  { %v3740_v25 = vpop.f32.mrb[72].mxu0 }
 0x562   :  { %v3744_v26 = vadd.f32 %v3740_v25, %v3661_v21  ;;  %v5080_v28 = vpop.f32.mrb[73].mxu0 }
 0x564   :  { %v3827_v62 = vadd.f32 %v3823_v13, %v3744_v26 }
 0x566   :  { %v3835_v30 = vadd.f32 %v4352_v29, %v3827_v62 }
 0x568   :  { %v3836_v31 = vmax.f32 %v3835_v30, 0.0 }
 0x56a   :  { %5117 = vmatmul.mubr.msk.f32.vlgmr.msra.gmra.mrb[74].mxu0 %vm2521_vm4, %v3836_v31 }
 0x63d   :  { %v3921_v36 = vpop.f32.mrb[74].mxu0 }
 0x63e   :  { %v3922_v37 = vadd.f32 %v4353_v34, %v3921_v36  ;;  %v5118_v38 = vpop.f32.mrb[75].mxu0 }
 0x640   :  { %v3925_v39 = vmax.f32 %v3922_v37, 0.0 }
 0x642   :  { %v3933_v40 = vmul.f32 %v4355_v35, %v3925_v39 }
 0x644   :  { %v3935_v22 = vsel %vm3934_vm5, %v3933_v40, 0.0 }
 0x645   :  { %3936 = vadd.xlane.f32.xlu0 %v3935_v22 }
 0x6d2   :  { %v3937_v42 = vpop.xlane.xlu0 %3936 }
 0x6d3   :  { %v3945_v44 = vadd.f32 %v4356_v41, %v3937_v42 }
 0x6d5   :  { %3947 = vst.msk [vmem:[%s6753_s12] sm:$0x3] %vm3946_vm6, %v3945_v44 }

</bundles_post_ra>
